<compile_context>
chip_gen: v7x
topology: tpu7x:2x2x1
jax: 0.10.0
libtpu: 0.0.40
codegen_flags: <defaults>
</compile_context>

<pallas_src>
import functools
import math

import jax
import jax.numpy as jnp
from jax.experimental import pallas as pl
from jax.experimental.pallas import tpu as pltpu

_EPS = 1e-5                      # nn.BatchNorm2d default eps


def _default_vmem_limit():
    # Physical VMEM minus 16 MiB headroom: ~112 MB on v5e/v6e, ~48 MB on v7x.
    try:
        cap = int(pltpu.get_tpu_info().vmem_capacity_bytes)
        return max(cap - (16 << 20), 32 << 20)
    except Exception:
        return 48 << 20


_VMEM_LIMIT = _default_vmem_limit()


# ----------------------------- Pallas kernels ------------------------------ #

def _conv_stats_kernel(x_ref, w_ref, acc_ref, stats_ref, *, tn, stride, hps, ho):
    """3x3 conv: three whole-slab MXU matmuls + shifted-window adds + BN stats.

    x_ref:     (tn*stride*hps, K)  bf16  padded rows, grouped (image, H-phase)
    w_ref:     (3, K, cols)        bf16  block-banded weight, one slab per ky
    acc_ref:   (tn*ho, cols)       bf16  conv pre-activations (lane-dense)
    stats_ref: (1, 2, cols)        f32   per-tile [col_sum; col_sumsq]
    """
    x = x_ref[...]
    # Batched M: one matmul per kernel row over the full LHS slab keeps the MXU
    # rows full and the banded RHS staged across every image in the tile.
    p = [jnp.dot(x, w_ref[dy], preferred_element_type=jnp.float32)
         for dy in range(3)]

    cols = acc_ref.shape[1]
    col_sum = jnp.zeros((1, cols), jnp.float32)
    col_sq = jnp.zeros((1, cols), jnp.float32)
    for b in range(tn):                           # static unroll; shifted adds only
        acc = None
        for dy in range(3):
            phase, oy = dy % stride, dy // stride
            r0 = (b * stride + phase) * hps + oy
            part = p[dy][r0:r0 + ho, :]
            acc = part if acc is None else acc + part
        acc_ref[b * ho:(b + 1) * ho, :] = acc.astype(acc_ref.dtype)
        # BN statistics from the f32 pre-downcast values (exact two-pass BN).
        col_sum = col_sum + jnp.sum(acc, axis=0, keepdims=True)
        col_sq = col_sq + jnp.sum(acc * acc, axis=0, keepdims=True)

    stats_ref[...] = jnp.concatenate([col_sum, col_sq], axis=0).reshape(1, 2, cols)


def _bn_act_kernel(acc_ref, scale_ref, bias_ref, o_ref, *, relu):
    y = acc_ref[...].astype(jnp.float32) * scale_ref[...] + bias_ref[...]
    if relu:
        y = jnp.maximum(y, 0.0)
    o_ref[...] = y.astype(o_ref.dtype)


def _bn_act_res_kernel(acc_ref, scale_ref, bias_ref, res_ref, o_ref, *, relu):
    y = (acc_ref[...].astype(jnp.float32) * scale_ref[...] + bias_ref[...]
         + res_ref[...].astype(jnp.float32))
    if relu:
        y = jnp.maximum(y, 0.0)
    o_ref[...] = y.astype(o_ref.dtype)


# ------------------------------ layout helpers ------------------------------ #

def _pick_batch_tile(n, rows_per_img, ho, target=8):
    for tn in range(min(n, target), 0, -1):
        if n % tn:
            continue
        if tn == n or ((tn * rows_per_img) % 8 == 0 and (tn * ho) % 8 == 0):
            return tn
    return n


def _pick_row_tile(rows, max_tile=1024, min_steps=8):
    # >= min_steps grid steps -> double-buffered pipelining + v7x megacore split.
    target = min(max_tile, max(8, rows // min_steps))
    for t in range(target, 0, -1):
        if rows % t == 0 and (t % 8 == 0 or t == rows):
            return t
    return rows


def _rows_layout(x_nhwc, stride):
    """Pad H/W by 1, cast to bf16 and flatten to (N*stride*hps, K) with
    K = Wp*Cin zero-padded up to a multiple of 128.  Rows grouped by
    (image, H-phase) so each 3x3 tap row is a static window of the in-kernel
    matmul products (no im2col is ever materialized in HBM)."""
    n, h, w, c = x_nhwc.shape
    xp = jnp.pad(x_nhwc.astype(jnp.bfloat16), ((0, 0), (1, 1), (1, 1), (0, 0)))
    hp, wp = h + 2, w + 2
    if stride == 1:
        hps = hp
        xr = xp
    else:
        assert hp % stride == 0
        hps = hp // stride
        xr = xp.reshape(n, hps, stride, wp, c).transpose(0, 2, 1, 3, 4)
    xr = xr.reshape(n * stride * hps, wp * c)
    k = wp * c
    k_extra = (-k) % 128
    if k_extra:
        xr = jnp.pad(xr, ((0, 0), (0, k_extra)))
    return xr, hps, wp, k + k_extra


def _banded_weight(w_oihw, stride, wp, wo, k_total):
    """Fold the horizontal taps into a block-banded matrix so one rank-2 matmul
    per (tile, ky) yields lane-dense (rows, Wo*Cout) slabs."""
    cout, cin = w_oihw.shape[0], w_oihw.shape[1]
    w = jnp.transpose(w_oihw, (2, 3, 1, 0))            # (ky, kx, Cin, Cout)
    t = jnp.zeros((3, wp, cin, wo, cout), jnp.float32)
    wo_idx = jnp.arange(wo)
    for dy in range(3):
        for dx in range(3):
            w_in = stride * wo_idx + dx
            blk = jnp.broadcast_to(w[dy, dx][None], (wo, cin, cout))
            t = t.at[dy, w_in, :, wo_idx, :].set(blk)
    t = t.reshape(3, wp * cin, wo * cout)
    k_extra = k_total - wp * cin
    if k_extra:
        t = jnp.pad(t, ((0, 0), (0, k_extra), (0, 0)))
    return t.astype(jnp.bfloat16)


# ------------------------------ conv wrappers ------------------------------- #

def _conv_pre_bn(x_nhwc, w_oihw, stride):
    """Conv3x3 (pad=1, stride s) -> bf16 (N*Ho, Wo*Cout) pre-BN slab + per-tile stats."""
    n, h, w_sp, cin = x_nhwc.shape
    cout = w_oihw.shape[0]
    ho, wo = h // stride, w_sp // stride
    xr, hps, wp, k = _rows_layout(x_nhwc, stride)
    wt = _banded_weight(w_oihw, stride, wp, wo, k)
    rows_per_img = stride * hps
    cols = wo * cout
    tn = _pick_batch_tile(n, rows_per_img, ho)
    n_tiles = n // tn

    acc, stats = pl.pallas_call(
        functools.partial(_conv_stats_kernel, tn=tn, stride=stride, hps=hps, ho=ho),
        grid=(n_tiles,),
        in_specs=[
            pl.BlockSpec((tn * rows_per_img, k), lambda i: (i, 0)),
            pl.BlockSpec((3, k, cols), lambda i: (0, 0, 0)),
        ],
        out_specs=(
            pl.BlockSpec((tn * ho, cols), lambda i: (i, 0)),
            pl.BlockSpec((1, 2, cols), lambda i: (i, 0, 0)),   # per-tile stats
        ),
        out_shape=(
            jax.ShapeDtypeStruct((n * ho, cols), jnp.bfloat16),
            jax.ShapeDtypeStruct((n_tiles, 2, cols), jnp.float32),
        ),
        compiler_params=pltpu.CompilerParams(
            dimension_semantics=("parallel",),     # no resident acc -> megacore OK
            vmem_limit_bytes=_VMEM_LIMIT,
        ),
    )(xr, wt)
    return acc, stats, ho, wo, cout


def _bn_act(acc, scale_cols, bias_cols, residual2d, relu):
    rows, cols = acc.shape
    tb = _pick_row_tile(rows)
    in_specs = [
        pl.BlockSpec((tb, cols), lambda i: (i, 0)),
        pl.BlockSpec((1, cols), lambda i: (0, 0)),
        pl.BlockSpec((1, cols), lambda i: (0, 0)),
    ]
    args = [acc, scale_cols, bias_cols]
    if residual2d is None:
        kernel = functools.partial(_bn_act_kernel, relu=relu)
    else:
        in_specs.append(pl.BlockSpec((tb, cols), lambda i: (i, 0)))
        args.append(residual2d)
        kernel = functools.partial(_bn_act_res_kernel, relu=relu)
    return pl.pallas_call(
        kernel,
        grid=(rows // tb,),
        in_specs=in_specs,
        out_specs=pl.BlockSpec((tb, cols), lambda i: (i, 0)),
        out_shape=jax.ShapeDtypeStruct((rows, cols), jnp.bfloat16),
        compiler_params=pltpu.CompilerParams(
            dimension_semantics=("parallel",),
            vmem_limit_bytes=_VMEM_LIMIT,
        ),
    )(*args)


def conv3x3_bn_act(x, w_oihw, gamma, beta, run_mean, run_var, *, stride,
                   residual=None, relu=True, training=True):
    n = x.shape[0]
    acc, stats, ho, wo, cout = _conv_pre_bn(x, w_oihw, stride)
    if training:                                  # batch stats (biased variance)
        count = n * ho * wo
        folded = stats.reshape(-1, 2, wo, cout).sum(axis=(0, 2))   # tiny XLA glue
        mean = folded[0] / count
        var = jnp.maximum(folded[1] / count - mean * mean, 0.0)
    else:                                         # eval(): running statistics
        mean, var = run_mean, run_var
    inv = jax.lax.rsqrt(var + _EPS)
    scale = gamma * inv
    bias = beta - mean * scale
    scale_cols = jnp.tile(scale, (wo,)).reshape(1, wo * cout)
    bias_cols = jnp.tile(bias, (wo,)).reshape(1, wo * cout)
    res2d = None if residual is None else residual.reshape(n * ho, wo * cout)
    out2d = _bn_act(acc, scale_cols, bias_cols, res2d, relu)
    return out2d.reshape(n, ho, wo, cout)


def basic_block(x, blk, training):
    out = conv3x3_bn_act(x, blk["w1"], blk["g1"], blk["b1"], blk["rm1"], blk["rv1"],
                         stride=blk["stride"], relu=True, training=training)
    in_c, out_c = x.shape[-1], blk["w2"].shape[0]
    if blk["stride"] != 1 or in_c != out_c:
        # LambdaLayer (option-A shortcut): x[:, :, ::2, ::2] + zero-pad channels.
        pad = (out_c - in_c) // 2
        sc = jnp.pad(x[:, ::2, ::2, :], ((0, 0), (0, 0), (0, 0), (pad, pad)))
    else:
        sc = x
    return conv3x3_bn_act(out, blk["w2"], blk["g2"], blk["b2"], blk["rm2"], blk["rv2"],
                          stride=1, residual=sc, relu=True, training=training)


def head(x, w_lin, b_lin):
    # Global avg pool + Linear(64 -> 10): ~0 FLOPs; kept in plain JAX (a 10-lane
    # Pallas output would be all masked stores).
    pooled = jnp.mean(x.astype(jnp.float32), axis=(1, 2))
    return pooled @ w_lin.T + b_lin


def resnet_forward(x_nchw, params, training=True):
    x = jnp.transpose(x_nchw, (0, 2, 3, 1))                         # NCHW -> NHWC
    out = conv3x3_bn_act(x, params["conv1_w"], params["bn1_g"], params["bn1_b"],
                         params["bn1_rm"], params["bn1_rv"],
                         stride=1, relu=True, training=training)
    for layer in ("layer1", "layer2", "layer3"):
        for blk in params[layer]:
            out = basic_block(out, blk, training)
    return head(out, params["lin_w"], params["lin_b"])


# --------------------------- deterministic init ----------------------------- #

def init_params(key, in_channels=3, num_classes=10, num_blocks=(1, 1, 1)):
    keys = iter(jax.random.split(key, 64))

    def kaiming_conv(cout, cin):  # kaiming_normal_, fan_in mode, gain sqrt(2)
        std = math.sqrt(2.0 / (cin * 3 * 3))
        return std * jax.random.normal(next(keys), (cout, cin, 3, 3), jnp.float32)

    params = {
        "conv1_w": kaiming_conv(16, in_channels),
        "bn1_g": jnp.ones((16,), jnp.float32),
        "bn1_b": jnp.zeros((16,), jnp.float32),
        "bn1_rm": jnp.zeros((16,), jnp.float32),
        "bn1_rv": jnp.ones((16,), jnp.float32),
    }
    in_planes = 16

    def make_layer(planes, nblocks, stride):
        nonlocal in_planes
        layer = []
        for s in [stride] + [1] * (nblocks - 1):
            layer.append(dict(
                stride=s,
                w1=kaiming_conv(planes, in_planes),
                g1=jnp.ones((planes,), jnp.float32),
                b1=jnp.zeros((planes,), jnp.float32),
                rm1=jnp.zeros((planes,), jnp.float32),
                rv1=jnp.ones((planes,), jnp.float32),
                w2=kaiming_conv(planes, planes),
                g2=jnp.ones((planes,), jnp.float32),
                b2=jnp.zeros((planes,), jnp.float32),
                rm2=jnp.zeros((planes,), jnp.float32),
                rv2=jnp.ones((planes,), jnp.float32),
            ))
            in_planes = planes
        return layer

    params["layer1"] = make_layer(16, num_blocks[0], 1)
    params["layer2"] = make_layer(32, num_blocks[1], 2)
    params["layer3"] = make_layer(64, num_blocks[2], 2)

    params["lin_w"] = math.sqrt(2.0 / 64) * jax.random.normal(
        next(keys), (num_classes, 64), jnp.float32)
    bound = 1.0 / math.sqrt(64)
    params["lin_b"] = jax.random.uniform(
        next(keys), (num_classes,), jnp.float32, -bound, bound)
    return params


if __name__ == "__main__":
    key = jax.random.PRNGKey(0)
    pkey, xkey = jax.random.split(key)
    params = init_params(pkey, in_channels=3, num_classes=10, num_blocks=(1, 1, 1))
    x = jax.random.normal(xkey, (2, 3, 16, 16), jnp.float32)  # NCHW, like PyTorch
    fwd = jax.jit(lambda xx: resnet_forward(xx, params, training=True))
    out = fwd(x)
    jax.block_until_ready(out)
    assert out.shape == (2, 10) and out.dtype == jnp.float32
    print("KERNEL_OK")
</pallas_src>

<mosaic_0001>
module attributes {stable_mosaic.version = 11 : i64} {
  func.func @_conv_stats_kernel(%arg0: i32, %arg1: memref<36x128xbf16, #tpu.memory_space<vmem>>, %arg2: memref<3x128x256xbf16, #tpu.memory_space<vmem>>, %arg3: memref<32x256xbf16, #tpu.memory_space<vmem>>, %arg4: memref<1x2x256xf32, #tpu.memory_space<vmem>>) attributes {dimension_semantics = [#tpu.dimension_semantics<parallel>], iteration_bounds = array<i64: 1>, scalar_prefetch = 0 : i64, scratch_operands = 0 : i64, tpu.core_type = #tpu.core_type<tc>, window_params = [{transform_indices = @transform_0, window_bounds = array<i64: 36, 128>}, {pipeline_mode = #tpu.pipeline_mode<synchronous>, transform_indices = @transform_1, window_bounds = array<i64: 3, 128, 256>}, {transform_indices = @transform_2, window_bounds = array<i64: 32, 256>}, {transform_indices = @transform_3, window_bounds = array<i64: 1, 2, 256>}]} {
    %c0 = arith.constant 0 : index
    %c0_0 = arith.constant 0 : index
    %0 = vector.load %arg1[%c0, %c0_0] : memref<36x128xbf16, #tpu.memory_space<vmem>>, vector<36x128xbf16>
    %c0_1 = arith.constant 0 : index
    %c0_2 = arith.constant 0 : index
    %c0_3 = arith.constant 0 : index
    %1 = vector.load %arg2[%c0_1, %c0_2, %c0_3] : memref<3x128x256xbf16, #tpu.memory_space<vmem>>, vector<1x128x256xbf16>
    %2 = vector.shape_cast %1 : vector<1x128x256xbf16> to vector<128x256xbf16>
    %cst = arith.constant dense<0.000000e+00> : vector<36x256xf32>
    %3 = tpu.matmul %0, %2, %cst {dimension_numbers = #tpu.dot_dimension_numbers<[1], [0], [0], [1], [0, 0, 1, 1], [], []>} : vector<36x128xbf16>, vector<128x256xbf16>, vector<36x256xf32> -> vector<36x256xf32>
    %c1 = arith.constant 1 : index
    %c0_4 = arith.constant 0 : index
    %c0_5 = arith.constant 0 : index
    %4 = vector.load %arg2[%c1, %c0_4, %c0_5] : memref<3x128x256xbf16, #tpu.memory_space<vmem>>, vector<1x128x256xbf16>
    %5 = vector.shape_cast %4 : vector<1x128x256xbf16> to vector<128x256xbf16>
    %cst_6 = arith.constant dense<0.000000e+00> : vector<36x256xf32>
    %6 = tpu.matmul %0, %5, %cst_6 {dimension_numbers = #tpu.dot_dimension_numbers<[1], [0], [0], [1], [0, 0, 1, 1], [], []>} : vector<36x128xbf16>, vector<128x256xbf16>, vector<36x256xf32> -> vector<36x256xf32>
    %c2 = arith.constant 2 : index
    %c0_7 = arith.constant 0 : index
    %c0_8 = arith.constant 0 : index
    %7 = vector.load %arg2[%c2, %c0_7, %c0_8] : memref<3x128x256xbf16, #tpu.memory_space<vmem>>, vector<1x128x256xbf16>
    %8 = vector.shape_cast %7 : vector<1x128x256xbf16> to vector<128x256xbf16>
    %cst_9 = arith.constant dense<0.000000e+00> : vector<36x256xf32>
    %9 = tpu.matmul %0, %8, %cst_9 {dimension_numbers = #tpu.dot_dimension_numbers<[1], [0], [0], [1], [0, 0, 1, 1], [], []>} : vector<36x128xbf16>, vector<128x256xbf16>, vector<36x256xf32> -> vector<36x256xf32>
    %cst_10 = arith.constant 0.000000e+00 : f32
    %10 = vector.broadcast %cst_10 : f32 to vector<1x256xf32>
    %cst_11 = arith.constant 0.000000e+00 : f32
    %11 = vector.broadcast %cst_11 : f32 to vector<1x256xf32>
    %12 = vector.extract_strided_slice %3 {offsets = [0, 0], sizes = [16, 256], strides = [1, 1]} : vector<36x256xf32> to vector<16x256xf32>
    %13 = vector.extract_strided_slice %6 {offsets = [1, 0], sizes = [16, 256], strides = [1, 1]} : vector<36x256xf32> to vector<16x256xf32>
    %14 = arith.addf %12, %13 : vector<16x256xf32>
    %15 = vector.extract_strided_slice %9 {offsets = [2, 0], sizes = [16, 256], strides = [1, 1]} : vector<36x256xf32> to vector<16x256xf32>
    %16 = arith.addf %14, %15 : vector<16x256xf32>
    %17 = arith.truncf %16 : vector<16x256xf32> to vector<16x256xbf16>
    %c0_12 = arith.constant 0 : index
    %c0_13 = arith.constant 0 : index
    %18 = vector.load %arg3[%c0_12, %c0_13] : memref<32x256xbf16, #tpu.memory_space<vmem>>, vector<16x256xbf16>
    tpu.vector_store %arg3[%c0_12, %c0_13], %17 {strides = array<i32>} : memref<32x256xbf16, #tpu.memory_space<vmem>>, vector<16x256xbf16>,
    %cst_14 = arith.constant dense<0.000000e+00> : vector<256xf32>
    %19 = vector.multi_reduction <add>, %16, %cst_14 [0] : vector<16x256xf32> to vector<256xf32>
    %20 = vector.shape_cast %19 : vector<256xf32> to vector<1x256xf32>
    %21 = arith.addf %10, %20 : vector<1x256xf32>
    %22 = arith.mulf %16, %16 : vector<16x256xf32>
    %cst_15 = arith.constant dense<0.000000e+00> : vector<256xf32>
    %23 = vector.multi_reduction <add>, %22, %cst_15 [0] : vector<16x256xf32> to vector<256xf32>
    %24 = vector.shape_cast %23 : vector<256xf32> to vector<1x256xf32>
    %25 = arith.addf %11, %24 : vector<1x256xf32>
    %26 = vector.extract_strided_slice %3 {offsets = [18, 0], sizes = [16, 256], strides = [1, 1]} : vector<36x256xf32> to vector<16x256xf32>
    %27 = vector.extract_strided_slice %6 {offsets = [19, 0], sizes = [16, 256], strides = [1, 1]} : vector<36x256xf32> to vector<16x256xf32>
    %28 = arith.addf %26, %27 : vector<16x256xf32>
    %29 = vector.extract_strided_slice %9 {offsets = [20, 0], sizes = [16, 256], strides = [1, 1]} : vector<36x256xf32> to vector<16x256xf32>
    %30 = arith.addf %28, %29 : vector<16x256xf32>
    %31 = arith.truncf %30 : vector<16x256xf32> to vector<16x256xbf16>
    %c16 = arith.constant 16 : index
    %c0_16 = arith.constant 0 : index
    %32 = vector.load %arg3[%c16, %c0_16] : memref<32x256xbf16, #tpu.memory_space<vmem>>, vector<16x256xbf16>
    tpu.vector_store %arg3[%c16, %c0_16], %31 {strides = array<i32>} : memref<32x256xbf16, #tpu.memory_space<vmem>>, vector<16x256xbf16>,
    %cst_17 = arith.constant dense<0.000000e+00> : vector<256xf32>
    %33 = vector.multi_reduction <add>, %30, %cst_17 [0] : vector<16x256xf32> to vector<256xf32>
    %34 = vector.shape_cast %33 : vector<256xf32> to vector<1x256xf32>
    %35 = arith.addf %21, %34 : vector<1x256xf32>
    %36 = arith.mulf %30, %30 : vector<16x256xf32>
    %cst_18 = arith.constant dense<0.000000e+00> : vector<256xf32>
    %37 = vector.multi_reduction <add>, %36, %cst_18 [0] : vector<16x256xf32> to vector<256xf32>
    %38 = vector.shape_cast %37 : vector<256xf32> to vector<1x256xf32>
    %39 = arith.addf %25, %38 : vector<1x256xf32>
    %40 = tpu.concatenate %35, %39 in 0 : vector<1x256xf32>, vector<1x256xf32> -> vector<2x256xf32>
    %41 = vector.shape_cast %40 : vector<2x256xf32> to vector<1x2x256xf32>
    %c0_19 = arith.constant 0 : index
    %c0_20 = arith.constant 0 : index
    %c0_21 = arith.constant 0 : index
    %42 = vector.load %arg4[%c0_19, %c0_20, %c0_21] : memref<1x2x256xf32, #tpu.memory_space<vmem>>, vector<1x2x256xf32>
    tpu.vector_store %arg4[%c0_19, %c0_20, %c0_21], %41 {strides = array<i32>} : memref<1x2x256xf32, #tpu.memory_space<vmem>>, vector<1x2x256xf32>,
    return
  }
  func.func @transform_0(%arg0: i32) -> (i32, i32) {
    %c0_i32 = arith.constant 0 : i32
    %c0_i32_0 = arith.constant 0 : i32
    return %arg0, %c0_i32 : i32, i32
  }
  func.func @transform_1(%arg0: i32) -> (i32, i32, i32) {
    %c0_i32 = arith.constant 0 : i32
    %c0_i32_0 = arith.constant 0 : i32
    %c0_i32_1 = arith.constant 0 : i32
    %c0_i32_2 = arith.constant 0 : i32
    return %c0_i32, %c0_i32_0, %c0_i32_1 : i32, i32, i32
  }
  func.func @transform_2(%arg0: i32) -> (i32, i32) {
    %c0_i32 = arith.constant 0 : i32
    %c0_i32_0 = arith.constant 0 : i32
    return %arg0, %c0_i32 : i32, i32
  }
  func.func @transform_3(%arg0: i32) -> (i32, i32, i32) {
    %c0_i32 = arith.constant 0 : i32
    %c0_i32_0 = arith.constant 0 : i32
    %c0_i32_1 = arith.constant 0 : i32
    return %arg0, %c0_i32, %c0_i32_0 : i32, i32, i32
  }
}

module attributes {stable_mosaic.version = 11 : i64} {
  func.func @_bn_act_kernel(%arg0: i32, %arg1: memref<8x256xbf16, #tpu.memory_space<vmem>>, %arg2: memref<1x256xf32, #tpu.memory_space<vmem>>, %arg3: memref<1x256xf32, #tpu.memory_space<vmem>>, %arg4: memref<8x256xbf16, #tpu.memory_space<vmem>>) attributes {dimension_semantics = [#tpu.dimension_semantics<parallel>], iteration_bounds = array<i64: 4>, scalar_prefetch = 0 : i64, scratch_operands = 0 : i64, tpu.core_type = #tpu.core_type<tc>, window_params = [{transform_indices = @transform_0, window_bounds = array<i64: 8, 256>}, {pipeline_mode = #tpu.pipeline_mode<synchronous>, transform_indices = @transform_1, window_bounds = array<i64: 1, 256>}, {pipeline_mode = #tpu.pipeline_mode<synchronous>, transform_indices = @transform_2, window_bounds = array<i64: 1, 256>}, {transform_indices = @transform_3, window_bounds = array<i64: 8, 256>}]} {
    %c0 = arith.constant 0 : index
    %c0_0 = arith.constant 0 : index
    %0 = vector.load %arg1[%c0, %c0_0] : memref<8x256xbf16, #tpu.memory_space<vmem>>, vector<8x256xbf16>
    %1 = arith.extf %0 : vector<8x256xbf16> to vector<8x256xf32>
    %c0_1 = arith.constant 0 : index
    %c0_2 = arith.constant 0 : index
    %2 = vector.load %arg2[%c0_1, %c0_2] : memref<1x256xf32, #tpu.memory_space<vmem>>, vector<1x256xf32>
    %3 = vector.broadcast %2 : vector<1x256xf32> to vector<8x256xf32>
    %4 = arith.mulf %1, %3 : vector<8x256xf32>
    %c0_3 = arith.constant 0 : index
    %c0_4 = arith.constant 0 : index
    %5 = vector.load %arg3[%c0_3, %c0_4] : memref<1x256xf32, #tpu.memory_space<vmem>>, vector<1x256xf32>
    %6 = vector.broadcast %5 : vector<1x256xf32> to vector<8x256xf32>
    %7 = arith.addf %4, %6 : vector<8x256xf32>
    %cst = arith.constant 0.000000e+00 : f32
    %8 = vector.broadcast %cst : f32 to vector<8x256xf32>
    %9 = arith.maximumf %7, %8 : vector<8x256xf32>
    %10 = arith.truncf %9 : vector<8x256xf32> to vector<8x256xbf16>
    %c0_5 = arith.constant 0 : index
    %c0_6 = arith.constant 0 : index
    %11 = vector.load %arg4[%c0_5, %c0_6] : memref<8x256xbf16, #tpu.memory_space<vmem>>, vector<8x256xbf16>
    tpu.vector_store %arg4[%c0_5, %c0_6], %10 {strides = array<i32>} : memref<8x256xbf16, #tpu.memory_space<vmem>>, vector<8x256xbf16>,
    return
  }
  func.func @transform_0(%arg0: i32) -> (i32, i32) {
    %c0_i32 = arith.constant 0 : i32
    %c0_i32_0 = arith.constant 0 : i32
    return %arg0, %c0_i32 : i32, i32
  }
  func.func @transform_1(%arg0: i32) -> (i32, i32) {
    %c0_i32 = arith.constant 0 : i32
    %c0_i32_0 = arith.constant 0 : i32
    %c0_i32_1 = arith.constant 0 : i32
    return %c0_i32, %c0_i32_0 : i32, i32
  }
  func.func @transform_2(%arg0: i32) -> (i32, i32) {
    %c0_i32 = arith.constant 0 : i32
    %c0_i32_0 = arith.constant 0 : i32
    %c0_i32_1 = arith.constant 0 : i32
    return %c0_i32, %c0_i32_0 : i32, i32
  }
  func.func @transform_3(%arg0: i32) -> (i32, i32) {
    %c0_i32 = arith.constant 0 : i32
    %c0_i32_0 = arith.constant 0 : i32
    return %arg0, %c0_i32 : i32, i32
  }
}

module attributes {stable_mosaic.version = 11 : i64} {
  func.func @_conv_stats_kernel(%arg0: i32, %arg1: memref<36x384xbf16, #tpu.memory_space<vmem>>, %arg2: memref<3x384x256xbf16, #tpu.memory_space<vmem>>, %arg3: memref<32x256xbf16, #tpu.memory_space<vmem>>, %arg4: memref<1x2x256xf32, #tpu.memory_space<vmem>>) attributes {dimension_semantics = [#tpu.dimension_semantics<parallel>], iteration_bounds = array<i64: 1>, scalar_prefetch = 0 : i64, scratch_operands = 0 : i64, tpu.core_type = #tpu.core_type<tc>, window_params = [{transform_indices = @transform_0, window_bounds = array<i64: 36, 384>}, {pipeline_mode = #tpu.pipeline_mode<synchronous>, transform_indices = @transform_1, window_bounds = array<i64: 3, 384, 256>}, {transform_indices = @transform_2, window_bounds = array<i64: 32, 256>}, {transform_indices = @transform_3, window_bounds = array<i64: 1, 2, 256>}]} {
    %c0 = arith.constant 0 : index
    %c0_0 = arith.constant 0 : index
    %0 = vector.load %arg1[%c0, %c0_0] : memref<36x384xbf16, #tpu.memory_space<vmem>>, vector<36x384xbf16>
    %c0_1 = arith.constant 0 : index
    %c0_2 = arith.constant 0 : index
    %c0_3 = arith.constant 0 : index
    %1 = vector.load %arg2[%c0_1, %c0_2, %c0_3] : memref<3x384x256xbf16, #tpu.memory_space<vmem>>, vector<1x384x256xbf16>
    %2 = vector.shape_cast %1 : vector<1x384x256xbf16> to vector<384x256xbf16>
    %cst = arith.constant dense<0.000000e+00> : vector<36x256xf32>
    %3 = tpu.matmul %0, %2, %cst {dimension_numbers = #tpu.dot_dimension_numbers<[1], [0], [0], [1], [0, 0, 1, 1], [], []>} : vector<36x384xbf16>, vector<384x256xbf16>, vector<36x256xf32> -> vector<36x256xf32>
    %c1 = arith.constant 1 : index
    %c0_4 = arith.constant 0 : index
    %c0_5 = arith.constant 0 : index
    %4 = vector.load %arg2[%c1, %c0_4, %c0_5] : memref<3x384x256xbf16, #tpu.memory_space<vmem>>, vector<1x384x256xbf16>
    %5 = vector.shape_cast %4 : vector<1x384x256xbf16> to vector<384x256xbf16>
    %cst_6 = arith.constant dense<0.000000e+00> : vector<36x256xf32>
    %6 = tpu.matmul %0, %5, %cst_6 {dimension_numbers = #tpu.dot_dimension_numbers<[1], [0], [0], [1], [0, 0, 1, 1], [], []>} : vector<36x384xbf16>, vector<384x256xbf16>, vector<36x256xf32> -> vector<36x256xf32>
    %c2 = arith.constant 2 : index
    %c0_7 = arith.constant 0 : index
    %c0_8 = arith.constant 0 : index
    %7 = vector.load %arg2[%c2, %c0_7, %c0_8] : memref<3x384x256xbf16, #tpu.memory_space<vmem>>, vector<1x384x256xbf16>
    %8 = vector.shape_cast %7 : vector<1x384x256xbf16> to vector<384x256xbf16>
    %cst_9 = arith.constant dense<0.000000e+00> : vector<36x256xf32>
    %9 = tpu.matmul %0, %8, %cst_9 {dimension_numbers = #tpu.dot_dimension_numbers<[1], [0], [0], [1], [0, 0, 1, 1], [], []>} : vector<36x384xbf16>, vector<384x256xbf16>, vector<36x256xf32> -> vector<36x256xf32>
    %cst_10 = arith.constant 0.000000e+00 : f32
    %10 = vector.broadcast %cst_10 : f32 to vector<1x256xf32>
    %cst_11 = arith.constant 0.000000e+00 : f32
    %11 = vector.broadcast %cst_11 : f32 to vector<1x256xf32>
    %12 = vector.extract_strided_slice %3 {offsets = [0, 0], sizes = [16, 256], strides = [1, 1]} : vector<36x256xf32> to vector<16x256xf32>
    %13 = vector.extract_strided_slice %6 {offsets = [1, 0], sizes = [16, 256], strides = [1, 1]} : vector<36x256xf32> to vector<16x256xf32>
    %14 = arith.addf %12, %13 : vector<16x256xf32>
    %15 = vector.extract_strided_slice %9 {offsets = [2, 0], sizes = [16, 256], strides = [1, 1]} : vector<36x256xf32> to vector<16x256xf32>
    %16 = arith.addf %14, %15 : vector<16x256xf32>
    %17 = arith.truncf %16 : vector<16x256xf32> to vector<16x256xbf16>
    %c0_12 = arith.constant 0 : index
    %c0_13 = arith.constant 0 : index
    %18 = vector.load %arg3[%c0_12, %c0_13] : memref<32x256xbf16, #tpu.memory_space<vmem>>, vector<16x256xbf16>
    tpu.vector_store %arg3[%c0_12, %c0_13], %17 {strides = array<i32>} : memref<32x256xbf16, #tpu.memory_space<vmem>>, vector<16x256xbf16>,
    %cst_14 = arith.constant dense<0.000000e+00> : vector<256xf32>
    %19 = vector.multi_reduction <add>, %16, %cst_14 [0] : vector<16x256xf32> to vector<256xf32>
    %20 = vector.shape_cast %19 : vector<256xf32> to vector<1x256xf32>
    %21 = arith.addf %10, %20 : vector<1x256xf32>
    %22 = arith.mulf %16, %16 : vector<16x256xf32>
    %cst_15 = arith.constant dense<0.000000e+00> : vector<256xf32>
    %23 = vector.multi_reduction <add>, %22, %cst_15 [0] : vector<16x256xf32> to vector<256xf32>
    %24 = vector.shape_cast %23 : vector<256xf32> to vector<1x256xf32>
    %25 = arith.addf %11, %24 : vector<1x256xf32>
    %26 = vector.extract_strided_slice %3 {offsets = [18, 0], sizes = [16, 256], strides = [1, 1]} : vector<36x256xf32> to vector<16x256xf32>
    %27 = vector.extract_strided_slice %6 {offsets = [19, 0], sizes = [16, 256], strides = [1, 1]} : vector<36x256xf32> to vector<16x256xf32>
    %28 = arith.addf %26, %27 : vector<16x256xf32>
    %29 = vector.extract_strided_slice %9 {offsets = [20, 0], sizes = [16, 256], strides = [1, 1]} : vector<36x256xf32> to vector<16x256xf32>
    %30 = arith.addf %28, %29 : vector<16x256xf32>
    %31 = arith.truncf %30 : vector<16x256xf32> to vector<16x256xbf16>
    %c16 = arith.constant 16 : index
    %c0_16 = arith.constant 0 : index
    %32 = vector.load %arg3[%c16, %c0_16] : memref<32x256xbf16, #tpu.memory_space<vmem>>, vector<16x256xbf16>
    tpu.vector_store %arg3[%c16, %c0_16], %31 {strides = array<i32>} : memref<32x256xbf16, #tpu.memory_space<vmem>>, vector<16x256xbf16>,
    %cst_17 = arith.constant dense<0.000000e+00> : vector<256xf32>
    %33 = vector.multi_reduction <add>, %30, %cst_17 [0] : vector<16x256xf32> to vector<256xf32>
    %34 = vector.shape_cast %33 : vector<256xf32> to vector<1x256xf32>
    %35 = arith.addf %21, %34 : vector<1x256xf32>
    %36 = arith.mulf %30, %30 : vector<16x256xf32>
    %cst_18 = arith.constant dense<0.000000e+00> : vector<256xf32>
    %37 = vector.multi_reduction <add>, %36, %cst_18 [0] : vector<16x256xf32> to vector<256xf32>
    %38 = vector.shape_cast %37 : vector<256xf32> to vector<1x256xf32>
    %39 = arith.addf %25, %38 : vector<1x256xf32>
    %40 = tpu.concatenate %35, %39 in 0 : vector<1x256xf32>, vector<1x256xf32> -> vector<2x256xf32>
    %41 = vector.shape_cast %40 : vector<2x256xf32> to vector<1x2x256xf32>
    %c0_19 = arith.constant 0 : index
    %c0_20 = arith.constant 0 : index
    %c0_21 = arith.constant 0 : index
    %42 = vector.load %arg4[%c0_19, %c0_20, %c0_21] : memref<1x2x256xf32, #tpu.memory_space<vmem>>, vector<1x2x256xf32>
    tpu.vector_store %arg4[%c0_19, %c0_20, %c0_21], %41 {strides = array<i32>} : memref<1x2x256xf32, #tpu.memory_space<vmem>>, vector<1x2x256xf32>,
    return
  }
  func.func @transform_0(%arg0: i32) -> (i32, i32) {
    %c0_i32 = arith.constant 0 : i32
    %c0_i32_0 = arith.constant 0 : i32
    return %arg0, %c0_i32 : i32, i32
  }
  func.func @transform_1(%arg0: i32) -> (i32, i32, i32) {
    %c0_i32 = arith.constant 0 : i32
    %c0_i32_0 = arith.constant 0 : i32
    %c0_i32_1 = arith.constant 0 : i32
    %c0_i32_2 = arith.constant 0 : i32
    return %c0_i32, %c0_i32_0, %c0_i32_1 : i32, i32, i32
  }
  func.func @transform_2(%arg0: i32) -> (i32, i32) {
    %c0_i32 = arith.constant 0 : i32
    %c0_i32_0 = arith.constant 0 : i32
    return %arg0, %c0_i32 : i32, i32
  }
  func.func @transform_3(%arg0: i32) -> (i32, i32, i32) {
    %c0_i32 = arith.constant 0 : i32
    %c0_i32_0 = arith.constant 0 : i32
    %c0_i32_1 = arith.constant 0 : i32
    return %arg0, %c0_i32, %c0_i32_0 : i32, i32, i32
  }
}

module attributes {stable_mosaic.version = 11 : i64} {
  func.func @_bn_act_res_kernel(%arg0: i32, %arg1: memref<8x256xbf16, #tpu.memory_space<vmem>>, %arg2: memref<1x256xf32, #tpu.memory_space<vmem>>, %arg3: memref<1x256xf32, #tpu.memory_space<vmem>>, %arg4: memref<8x256xbf16, #tpu.memory_space<vmem>>, %arg5: memref<8x256xbf16, #tpu.memory_space<vmem>>) attributes {dimension_semantics = [#tpu.dimension_semantics<parallel>], iteration_bounds = array<i64: 4>, scalar_prefetch = 0 : i64, scratch_operands = 0 : i64, tpu.core_type = #tpu.core_type<tc>, window_params = [{transform_indices = @transform_0, window_bounds = array<i64: 8, 256>}, {pipeline_mode = #tpu.pipeline_mode<synchronous>, transform_indices = @transform_1, window_bounds = array<i64: 1, 256>}, {pipeline_mode = #tpu.pipeline_mode<synchronous>, transform_indices = @transform_2, window_bounds = array<i64: 1, 256>}, {transform_indices = @transform_3, window_bounds = array<i64: 8, 256>}, {transform_indices = @transform_4, window_bounds = array<i64: 8, 256>}]} {
    %c0 = arith.constant 0 : index
    %c0_0 = arith.constant 0 : index
    %0 = vector.load %arg1[%c0, %c0_0] : memref<8x256xbf16, #tpu.memory_space<vmem>>, vector<8x256xbf16>
    %1 = arith.extf %0 : vector<8x256xbf16> to vector<8x256xf32>
    %c0_1 = arith.constant 0 : index
    %c0_2 = arith.constant 0 : index
    %2 = vector.load %arg2[%c0_1, %c0_2] : memref<1x256xf32, #tpu.memory_space<vmem>>, vector<1x256xf32>
    %3 = vector.broadcast %2 : vector<1x256xf32> to vector<8x256xf32>
    %4 = arith.mulf %1, %3 : vector<8x256xf32>
    %c0_3 = arith.constant 0 : index
    %c0_4 = arith.constant 0 : index
    %5 = vector.load %arg3[%c0_3, %c0_4] : memref<1x256xf32, #tpu.memory_space<vmem>>, vector<1x256xf32>
    %6 = vector.broadcast %5 : vector<1x256xf32> to vector<8x256xf32>
    %7 = arith.addf %4, %6 : vector<8x256xf32>
    %c0_5 = arith.constant 0 : index
    %c0_6 = arith.constant 0 : index
    %8 = vector.load %arg4[%c0_5, %c0_6] : memref<8x256xbf16, #tpu.memory_space<vmem>>, vector<8x256xbf16>
    %9 = arith.extf %8 : vector<8x256xbf16> to vector<8x256xf32>
    %10 = arith.addf %7, %9 : vector<8x256xf32>
    %cst = arith.constant 0.000000e+00 : f32
    %11 = vector.broadcast %cst : f32 to vector<8x256xf32>
    %12 = arith.maximumf %10, %11 : vector<8x256xf32>
    %13 = arith.truncf %12 : vector<8x256xf32> to vector<8x256xbf16>
    %c0_7 = arith.constant 0 : index
    %c0_8 = arith.constant 0 : index
    %14 = vector.load %arg5[%c0_7, %c0_8] : memref<8x256xbf16, #tpu.memory_space<vmem>>, vector<8x256xbf16>
    tpu.vector_store %arg5[%c0_7, %c0_8], %13 {strides = array<i32>} : memref<8x256xbf16, #tpu.memory_space<vmem>>, vector<8x256xbf16>,
    return
  }
  func.func @transform_0(%arg0: i32) -> (i32, i32) {
    %c0_i32 = arith.constant 0 : i32
    %c0_i32_0 = arith.constant 0 : i32
    return %arg0, %c0_i32 : i32, i32
  }
  func.func @transform_1(%arg0: i32) -> (i32, i32) {
    %c0_i32 = arith.constant 0 : i32
    %c0_i32_0 = arith.constant 0 : i32
    %c0_i32_1 = arith.constant 0 : i32
    return %c0_i32, %c0_i32_0 : i32, i32
  }
  func.func @transform_2(%arg0: i32) -> (i32, i32) {
    %c0_i32 = arith.constant 0 : i32
    %c0_i32_0 = arith.constant 0 : i32
    %c0_i32_1 = arith.constant 0 : i32
    return %c0_i32, %c0_i32_0 : i32, i32
  }
  func.func @transform_3(%arg0: i32) -> (i32, i32) {
    %c0_i32 = arith.constant 0 : i32
    %c0_i32_0 = arith.constant 0 : i32
    return %arg0, %c0_i32 : i32, i32
  }
  func.func @transform_4(%arg0: i32) -> (i32, i32) {
    %c0_i32 = arith.constant 0 : i32
    %c0_i32_0 = arith.constant 0 : i32
    return %arg0, %c0_i32 : i32, i32
  }
}

module attributes {stable_mosaic.version = 11 : i64} {
  func.func @_conv_stats_kernel(%arg0: i32, %arg1: memref<36x384xbf16, #tpu.memory_space<vmem>>, %arg2: memref<3x384x256xbf16, #tpu.memory_space<vmem>>, %arg3: memref<16x256xbf16, #tpu.memory_space<vmem>>, %arg4: memref<1x2x256xf32, #tpu.memory_space<vmem>>) attributes {dimension_semantics = [#tpu.dimension_semantics<parallel>], iteration_bounds = array<i64: 1>, scalar_prefetch = 0 : i64, scratch_operands = 0 : i64, tpu.core_type = #tpu.core_type<tc>, window_params = [{transform_indices = @transform_0, window_bounds = array<i64: 36, 384>}, {pipeline_mode = #tpu.pipeline_mode<synchronous>, transform_indices = @transform_1, window_bounds = array<i64: 3, 384, 256>}, {transform_indices = @transform_2, window_bounds = array<i64: 16, 256>}, {transform_indices = @transform_3, window_bounds = array<i64: 1, 2, 256>}]} {
    %c0 = arith.constant 0 : index
    %c0_0 = arith.constant 0 : index
    %0 = vector.load %arg1[%c0, %c0_0] : memref<36x384xbf16, #tpu.memory_space<vmem>>, vector<36x384xbf16>
    %c0_1 = arith.constant 0 : index
    %c0_2 = arith.constant 0 : index
    %c0_3 = arith.constant 0 : index
    %1 = vector.load %arg2[%c0_1, %c0_2, %c0_3] : memref<3x384x256xbf16, #tpu.memory_space<vmem>>, vector<1x384x256xbf16>
    %2 = vector.shape_cast %1 : vector<1x384x256xbf16> to vector<384x256xbf16>
    %cst = arith.constant dense<0.000000e+00> : vector<36x256xf32>
    %3 = tpu.matmul %0, %2, %cst {dimension_numbers = #tpu.dot_dimension_numbers<[1], [0], [0], [1], [0, 0, 1, 1], [], []>} : vector<36x384xbf16>, vector<384x256xbf16>, vector<36x256xf32> -> vector<36x256xf32>
    %c1 = arith.constant 1 : index
    %c0_4 = arith.constant 0 : index
    %c0_5 = arith.constant 0 : index
    %4 = vector.load %arg2[%c1, %c0_4, %c0_5] : memref<3x384x256xbf16, #tpu.memory_space<vmem>>, vector<1x384x256xbf16>
    %5 = vector.shape_cast %4 : vector<1x384x256xbf16> to vector<384x256xbf16>
    %cst_6 = arith.constant dense<0.000000e+00> : vector<36x256xf32>
    %6 = tpu.matmul %0, %5, %cst_6 {dimension_numbers = #tpu.dot_dimension_numbers<[1], [0], [0], [1], [0, 0, 1, 1], [], []>} : vector<36x384xbf16>, vector<384x256xbf16>, vector<36x256xf32> -> vector<36x256xf32>
    %c2 = arith.constant 2 : index
    %c0_7 = arith.constant 0 : index
    %c0_8 = arith.constant 0 : index
    %7 = vector.load %arg2[%c2, %c0_7, %c0_8] : memref<3x384x256xbf16, #tpu.memory_space<vmem>>, vector<1x384x256xbf16>
    %8 = vector.shape_cast %7 : vector<1x384x256xbf16> to vector<384x256xbf16>
    %cst_9 = arith.constant dense<0.000000e+00> : vector<36x256xf32>
    %9 = tpu.matmul %0, %8, %cst_9 {dimension_numbers = #tpu.dot_dimension_numbers<[1], [0], [0], [1], [0, 0, 1, 1], [], []>} : vector<36x384xbf16>, vector<384x256xbf16>, vector<36x256xf32> -> vector<36x256xf32>
    %cst_10 = arith.constant 0.000000e+00 : f32
    %10 = vector.broadcast %cst_10 : f32 to vector<1x256xf32>
    %cst_11 = arith.constant 0.000000e+00 : f32
    %11 = vector.broadcast %cst_11 : f32 to vector<1x256xf32>
    %12 = vector.extract_strided_slice %3 {offsets = [0, 0], sizes = [8, 256], strides = [1, 1]} : vector<36x256xf32> to vector<8x256xf32>
    %13 = vector.extract_strided_slice %6 {offsets = [9, 0], sizes = [8, 256], strides = [1, 1]} : vector<36x256xf32> to vector<8x256xf32>
    %14 = arith.addf %12, %13 : vector<8x256xf32>
    %15 = vector.extract_strided_slice %9 {offsets = [1, 0], sizes = [8, 256], strides = [1, 1]} : vector<36x256xf32> to vector<8x256xf32>
    %16 = arith.addf %14, %15 : vector<8x256xf32>
    %17 = arith.truncf %16 : vector<8x256xf32> to vector<8x256xbf16>
    %c0_12 = arith.constant 0 : index
    %c0_13 = arith.constant 0 : index
    %18 = vector.load %arg3[%c0_12, %c0_13] : memref<16x256xbf16, #tpu.memory_space<vmem>>, vector<8x256xbf16>
    tpu.vector_store %arg3[%c0_12, %c0_13], %17 {strides = array<i32>} : memref<16x256xbf16, #tpu.memory_space<vmem>>, vector<8x256xbf16>,
    %cst_14 = arith.constant dense<0.000000e+00> : vector<256xf32>
    %19 = vector.multi_reduction <add>, %16, %cst_14 [0] : vector<8x256xf32> to vector<256xf32>
    %20 = vector.shape_cast %19 : vector<256xf32> to vector<1x256xf32>
    %21 = arith.addf %10, %20 : vector<1x256xf32>
    %22 = arith.mulf %16, %16 : vector<8x256xf32>
    %cst_15 = arith.constant dense<0.000000e+00> : vector<256xf32>
    %23 = vector.multi_reduction <add>, %22, %cst_15 [0] : vector<8x256xf32> to vector<256xf32>
    %24 = vector.shape_cast %23 : vector<256xf32> to vector<1x256xf32>
    %25 = arith.addf %11, %24 : vector<1x256xf32>
    %26 = vector.extract_strided_slice %3 {offsets = [18, 0], sizes = [8, 256], strides = [1, 1]} : vector<36x256xf32> to vector<8x256xf32>
    %27 = vector.extract_strided_slice %6 {offsets = [27, 0], sizes = [8, 256], strides = [1, 1]} : vector<36x256xf32> to vector<8x256xf32>
    %28 = arith.addf %26, %27 : vector<8x256xf32>
    %29 = vector.extract_strided_slice %9 {offsets = [19, 0], sizes = [8, 256], strides = [1, 1]} : vector<36x256xf32> to vector<8x256xf32>
    %30 = arith.addf %28, %29 : vector<8x256xf32>
    %31 = arith.truncf %30 : vector<8x256xf32> to vector<8x256xbf16>
    %c8 = arith.constant 8 : index
    %c0_16 = arith.constant 0 : index
    %32 = vector.load %arg3[%c8, %c0_16] : memref<16x256xbf16, #tpu.memory_space<vmem>>, vector<8x256xbf16>
    tpu.vector_store %arg3[%c8, %c0_16], %31 {strides = array<i32>} : memref<16x256xbf16, #tpu.memory_space<vmem>>, vector<8x256xbf16>,
    %cst_17 = arith.constant dense<0.000000e+00> : vector<256xf32>
    %33 = vector.multi_reduction <add>, %30, %cst_17 [0] : vector<8x256xf32> to vector<256xf32>
    %34 = vector.shape_cast %33 : vector<256xf32> to vector<1x256xf32>
    %35 = arith.addf %21, %34 : vector<1x256xf32>
    %36 = arith.mulf %30, %30 : vector<8x256xf32>
    %cst_18 = arith.constant dense<0.000000e+00> : vector<256xf32>
    %37 = vector.multi_reduction <add>, %36, %cst_18 [0] : vector<8x256xf32> to vector<256xf32>
    %38 = vector.shape_cast %37 : vector<256xf32> to vector<1x256xf32>
    %39 = arith.addf %25, %38 : vector<1x256xf32>
    %40 = tpu.concatenate %35, %39 in 0 : vector<1x256xf32>, vector<1x256xf32> -> vector<2x256xf32>
    %41 = vector.shape_cast %40 : vector<2x256xf32> to vector<1x2x256xf32>
    %c0_19 = arith.constant 0 : index
    %c0_20 = arith.constant 0 : index
    %c0_21 = arith.constant 0 : index
    %42 = vector.load %arg4[%c0_19, %c0_20, %c0_21] : memref<1x2x256xf32, #tpu.memory_space<vmem>>, vector<1x2x256xf32>
    tpu.vector_store %arg4[%c0_19, %c0_20, %c0_21], %41 {strides = array<i32>} : memref<1x2x256xf32, #tpu.memory_space<vmem>>, vector<1x2x256xf32>,
    return
  }
  func.func @transform_0(%arg0: i32) -> (i32, i32) {
    %c0_i32 = arith.constant 0 : i32
    %c0_i32_0 = arith.constant 0 : i32
    return %arg0, %c0_i32 : i32, i32
  }
  func.func @transform_1(%arg0: i32) -> (i32, i32, i32) {
    %c0_i32 = arith.constant 0 : i32
    %c0_i32_0 = arith.constant 0 : i32
    %c0_i32_1 = arith.constant 0 : i32
    %c0_i32_2 = arith.constant 0 : i32
    return %c0_i32, %c0_i32_0, %c0_i32_1 : i32, i32, i32
  }
  func.func @transform_2(%arg0: i32) -> (i32, i32) {
    %c0_i32 = arith.constant 0 : i32
    %c0_i32_0 = arith.constant 0 : i32
    return %arg0, %c0_i32 : i32, i32
  }
  func.func @transform_3(%arg0: i32) -> (i32, i32, i32) {
    %c0_i32 = arith.constant 0 : i32
    %c0_i32_0 = arith.constant 0 : i32
    %c0_i32_1 = arith.constant 0 : i32
    return %arg0, %c0_i32, %c0_i32_0 : i32, i32, i32
  }
}

module attributes {stable_mosaic.version = 11 : i64} {
  func.func @_bn_act_kernel(%arg0: i32, %arg1: memref<8x256xbf16, #tpu.memory_space<vmem>>, %arg2: memref<1x256xf32, #tpu.memory_space<vmem>>, %arg3: memref<1x256xf32, #tpu.memory_space<vmem>>, %arg4: memref<8x256xbf16, #tpu.memory_space<vmem>>) attributes {dimension_semantics = [#tpu.dimension_semantics<parallel>], iteration_bounds = array<i64: 2>, scalar_prefetch = 0 : i64, scratch_operands = 0 : i64, tpu.core_type = #tpu.core_type<tc>, window_params = [{transform_indices = @transform_0, window_bounds = array<i64: 8, 256>}, {pipeline_mode = #tpu.pipeline_mode<synchronous>, transform_indices = @transform_1, window_bounds = array<i64: 1, 256>}, {pipeline_mode = #tpu.pipeline_mode<synchronous>, transform_indices = @transform_2, window_bounds = array<i64: 1, 256>}, {transform_indices = @transform_3, window_bounds = array<i64: 8, 256>}]} {
    %c0 = arith.constant 0 : index
    %c0_0 = arith.constant 0 : index
    %0 = vector.load %arg1[%c0, %c0_0] : memref<8x256xbf16, #tpu.memory_space<vmem>>, vector<8x256xbf16>
    %1 = arith.extf %0 : vector<8x256xbf16> to vector<8x256xf32>
    %c0_1 = arith.constant 0 : index
    %c0_2 = arith.constant 0 : index
    %2 = vector.load %arg2[%c0_1, %c0_2] : memref<1x256xf32, #tpu.memory_space<vmem>>, vector<1x256xf32>
    %3 = vector.broadcast %2 : vector<1x256xf32> to vector<8x256xf32>
    %4 = arith.mulf %1, %3 : vector<8x256xf32>
    %c0_3 = arith.constant 0 : index
    %c0_4 = arith.constant 0 : index
    %5 = vector.load %arg3[%c0_3, %c0_4] : memref<1x256xf32, #tpu.memory_space<vmem>>, vector<1x256xf32>
    %6 = vector.broadcast %5 : vector<1x256xf32> to vector<8x256xf32>
    %7 = arith.addf %4, %6 : vector<8x256xf32>
    %cst = arith.constant 0.000000e+00 : f32
    %8 = vector.broadcast %cst : f32 to vector<8x256xf32>
    %9 = arith.maximumf %7, %8 : vector<8x256xf32>
    %10 = arith.truncf %9 : vector<8x256xf32> to vector<8x256xbf16>
    %c0_5 = arith.constant 0 : index
    %c0_6 = arith.constant 0 : index
    %11 = vector.load %arg4[%c0_5, %c0_6] : memref<8x256xbf16, #tpu.memory_space<vmem>>, vector<8x256xbf16>
    tpu.vector_store %arg4[%c0_5, %c0_6], %10 {strides = array<i32>} : memref<8x256xbf16, #tpu.memory_space<vmem>>, vector<8x256xbf16>,
    return
  }
  func.func @transform_0(%arg0: i32) -> (i32, i32) {
    %c0_i32 = arith.constant 0 : i32
    %c0_i32_0 = arith.constant 0 : i32
    return %arg0, %c0_i32 : i32, i32
  }
  func.func @transform_1(%arg0: i32) -> (i32, i32) {
    %c0_i32 = arith.constant 0 : i32
    %c0_i32_0 = arith.constant 0 : i32
    %c0_i32_1 = arith.constant 0 : i32
    return %c0_i32, %c0_i32_0 : i32, i32
  }
  func.func @transform_2(%arg0: i32) -> (i32, i32) {
    %c0_i32 = arith.constant 0 : i32
    %c0_i32_0 = arith.constant 0 : i32
    %c0_i32_1 = arith.constant 0 : i32
    return %c0_i32, %c0_i32_0 : i32, i32
  }
  func.func @transform_3(%arg0: i32) -> (i32, i32) {
    %c0_i32 = arith.constant 0 : i32
    %c0_i32_0 = arith.constant 0 : i32
    return %arg0, %c0_i32 : i32, i32
  }
}

module attributes {stable_mosaic.version = 11 : i64} {
  func.func @_conv_stats_kernel(%arg0: i32, %arg1: memref<20x384xbf16, #tpu.memory_space<vmem>>, %arg2: memref<3x384x256xbf16, #tpu.memory_space<vmem>>, %arg3: memref<16x256xbf16, #tpu.memory_space<vmem>>, %arg4: memref<1x2x256xf32, #tpu.memory_space<vmem>>) attributes {dimension_semantics = [#tpu.dimension_semantics<parallel>], iteration_bounds = array<i64: 1>, scalar_prefetch = 0 : i64, scratch_operands = 0 : i64, tpu.core_type = #tpu.core_type<tc>, window_params = [{transform_indices = @transform_0, window_bounds = array<i64: 20, 384>}, {pipeline_mode = #tpu.pipeline_mode<synchronous>, transform_indices = @transform_1, window_bounds = array<i64: 3, 384, 256>}, {transform_indices = @transform_2, window_bounds = array<i64: 16, 256>}, {transform_indices = @transform_3, window_bounds = array<i64: 1, 2, 256>}]} {
    %c0 = arith.constant 0 : index
    %c0_0 = arith.constant 0 : index
    %0 = vector.load %arg1[%c0, %c0_0] : memref<20x384xbf16, #tpu.memory_space<vmem>>, vector<20x384xbf16>
    %c0_1 = arith.constant 0 : index
    %c0_2 = arith.constant 0 : index
    %c0_3 = arith.constant 0 : index
    %1 = vector.load %arg2[%c0_1, %c0_2, %c0_3] : memref<3x384x256xbf16, #tpu.memory_space<vmem>>, vector<1x384x256xbf16>
    %2 = vector.shape_cast %1 : vector<1x384x256xbf16> to vector<384x256xbf16>
    %cst = arith.constant dense<0.000000e+00> : vector<20x256xf32>
    %3 = tpu.matmul %0, %2, %cst {dimension_numbers = #tpu.dot_dimension_numbers<[1], [0], [0], [1], [0, 0, 1, 1], [], []>} : vector<20x384xbf16>, vector<384x256xbf16>, vector<20x256xf32> -> vector<20x256xf32>
    %c1 = arith.constant 1 : index
    %c0_4 = arith.constant 0 : index
    %c0_5 = arith.constant 0 : index
    %4 = vector.load %arg2[%c1, %c0_4, %c0_5] : memref<3x384x256xbf16, #tpu.memory_space<vmem>>, vector<1x384x256xbf16>
    %5 = vector.shape_cast %4 : vector<1x384x256xbf16> to vector<384x256xbf16>
    %cst_6 = arith.constant dense<0.000000e+00> : vector<20x256xf32>
    %6 = tpu.matmul %0, %5, %cst_6 {dimension_numbers = #tpu.dot_dimension_numbers<[1], [0], [0], [1], [0, 0, 1, 1], [], []>} : vector<20x384xbf16>, vector<384x256xbf16>, vector<20x256xf32> -> vector<20x256xf32>
    %c2 = arith.constant 2 : index
    %c0_7 = arith.constant 0 : index
    %c0_8 = arith.constant 0 : index
    %7 = vector.load %arg2[%c2, %c0_7, %c0_8] : memref<3x384x256xbf16, #tpu.memory_space<vmem>>, vector<1x384x256xbf16>
    %8 = vector.shape_cast %7 : vector<1x384x256xbf16> to vector<384x256xbf16>
    %cst_9 = arith.constant dense<0.000000e+00> : vector<20x256xf32>
    %9 = tpu.matmul %0, %8, %cst_9 {dimension_numbers = #tpu.dot_dimension_numbers<[1], [0], [0], [1], [0, 0, 1, 1], [], []>} : vector<20x384xbf16>, vector<384x256xbf16>, vector<20x256xf32> -> vector<20x256xf32>
    %cst_10 = arith.constant 0.000000e+00 : f32
    %10 = vector.broadcast %cst_10 : f32 to vector<1x256xf32>
    %cst_11 = arith.constant 0.000000e+00 : f32
    %11 = vector.broadcast %cst_11 : f32 to vector<1x256xf32>
    %12 = vector.extract_strided_slice %3 {offsets = [0, 0], sizes = [8, 256], strides = [1, 1]} : vector<20x256xf32> to vector<8x256xf32>
    %13 = vector.extract_strided_slice %6 {offsets = [1, 0], sizes = [8, 256], strides = [1, 1]} : vector<20x256xf32> to vector<8x256xf32>
    %14 = arith.addf %12, %13 : vector<8x256xf32>
    %15 = vector.extract_strided_slice %9 {offsets = [2, 0], sizes = [8, 256], strides = [1, 1]} : vector<20x256xf32> to vector<8x256xf32>
    %16 = arith.addf %14, %15 : vector<8x256xf32>
    %17 = arith.truncf %16 : vector<8x256xf32> to vector<8x256xbf16>
    %c0_12 = arith.constant 0 : index
    %c0_13 = arith.constant 0 : index
    %18 = vector.load %arg3[%c0_12, %c0_13] : memref<16x256xbf16, #tpu.memory_space<vmem>>, vector<8x256xbf16>
    tpu.vector_store %arg3[%c0_12, %c0_13], %17 {strides = array<i32>} : memref<16x256xbf16, #tpu.memory_space<vmem>>, vector<8x256xbf16>,
    %cst_14 = arith.constant dense<0.000000e+00> : vector<256xf32>
    %19 = vector.multi_reduction <add>, %16, %cst_14 [0] : vector<8x256xf32> to vector<256xf32>
    %20 = vector.shape_cast %19 : vector<256xf32> to vector<1x256xf32>
    %21 = arith.addf %10, %20 : vector<1x256xf32>
    %22 = arith.mulf %16, %16 : vector<8x256xf32>
    %cst_15 = arith.constant dense<0.000000e+00> : vector<256xf32>
    %23 = vector.multi_reduction <add>, %22, %cst_15 [0] : vector<8x256xf32> to vector<256xf32>
    %24 = vector.shape_cast %23 : vector<256xf32> to vector<1x256xf32>
    %25 = arith.addf %11, %24 : vector<1x256xf32>
    %26 = vector.extract_strided_slice %3 {offsets = [10, 0], sizes = [8, 256], strides = [1, 1]} : vector<20x256xf32> to vector<8x256xf32>
    %27 = vector.extract_strided_slice %6 {offsets = [11, 0], sizes = [8, 256], strides = [1, 1]} : vector<20x256xf32> to vector<8x256xf32>
    %28 = arith.addf %26, %27 : vector<8x256xf32>
    %29 = vector.extract_strided_slice %9 {offsets = [12, 0], sizes = [8, 256], strides = [1, 1]} : vector<20x256xf32> to vector<8x256xf32>
    %30 = arith.addf %28, %29 : vector<8x256xf32>
    %31 = arith.truncf %30 : vector<8x256xf32> to vector<8x256xbf16>
    %c8 = arith.constant 8 : index
    %c0_16 = arith.constant 0 : index
    %32 = vector.load %arg3[%c8, %c0_16] : memref<16x256xbf16, #tpu.memory_space<vmem>>, vector<8x256xbf16>
    tpu.vector_store %arg3[%c8, %c0_16], %31 {strides = array<i32>} : memref<16x256xbf16, #tpu.memory_space<vmem>>, vector<8x256xbf16>,
    %cst_17 = arith.constant dense<0.000000e+00> : vector<256xf32>
    %33 = vector.multi_reduction <add>, %30, %cst_17 [0] : vector<8x256xf32> to vector<256xf32>
    %34 = vector.shape_cast %33 : vector<256xf32> to vector<1x256xf32>
    %35 = arith.addf %21, %34 : vector<1x256xf32>
    %36 = arith.mulf %30, %30 : vector<8x256xf32>
    %cst_18 = arith.constant dense<0.000000e+00> : vector<256xf32>
    %37 = vector.multi_reduction <add>, %36, %cst_18 [0] : vector<8x256xf32> to vector<256xf32>
    %38 = vector.shape_cast %37 : vector<256xf32> to vector<1x256xf32>
    %39 = arith.addf %25, %38 : vector<1x256xf32>
    %40 = tpu.concatenate %35, %39 in 0 : vector<1x256xf32>, vector<1x256xf32> -> vector<2x256xf32>
    %41 = vector.shape_cast %40 : vector<2x256xf32> to vector<1x2x256xf32>
    %c0_19 = arith.constant 0 : index
    %c0_20 = arith.constant 0 : index
    %c0_21 = arith.constant 0 : index
    %42 = vector.load %arg4[%c0_19, %c0_20, %c0_21] : memref<1x2x256xf32, #tpu.memory_space<vmem>>, vector<1x2x256xf32>
    tpu.vector_store %arg4[%c0_19, %c0_20, %c0_21], %41 {strides = array<i32>} : memref<1x2x256xf32, #tpu.memory_space<vmem>>, vector<1x2x256xf32>,
    return
  }
  func.func @transform_0(%arg0: i32) -> (i32, i32) {
    %c0_i32 = arith.constant 0 : i32
    %c0_i32_0 = arith.constant 0 : i32
    return %arg0, %c0_i32 : i32, i32
  }
  func.func @transform_1(%arg0: i32) -> (i32, i32, i32) {
    %c0_i32 = arith.constant 0 : i32
    %c0_i32_0 = arith.constant 0 : i32
    %c0_i32_1 = arith.constant 0 : i32
    %c0_i32_2 = arith.constant 0 : i32
    return %c0_i32, %c0_i32_0, %c0_i32_1 : i32, i32, i32
  }
  func.func @transform_2(%arg0: i32) -> (i32, i32) {
    %c0_i32 = arith.constant 0 : i32
    %c0_i32_0 = arith.constant 0 : i32
    return %arg0, %c0_i32 : i32, i32
  }
  func.func @transform_3(%arg0: i32) -> (i32, i32, i32) {
    %c0_i32 = arith.constant 0 : i32
    %c0_i32_0 = arith.constant 0 : i32
    %c0_i32_1 = arith.constant 0 : i32
    return %arg0, %c0_i32, %c0_i32_0 : i32, i32, i32
  }
}

module attributes {stable_mosaic.version = 11 : i64} {
  func.func @_bn_act_res_kernel(%arg0: i32, %arg1: memref<8x256xbf16, #tpu.memory_space<vmem>>, %arg2: memref<1x256xf32, #tpu.memory_space<vmem>>, %arg3: memref<1x256xf32, #tpu.memory_space<vmem>>, %arg4: memref<8x256xbf16, #tpu.memory_space<vmem>>, %arg5: memref<8x256xbf16, #tpu.memory_space<vmem>>) attributes {dimension_semantics = [#tpu.dimension_semantics<parallel>], iteration_bounds = array<i64: 2>, scalar_prefetch = 0 : i64, scratch_operands = 0 : i64, tpu.core_type = #tpu.core_type<tc>, window_params = [{transform_indices = @transform_0, window_bounds = array<i64: 8, 256>}, {pipeline_mode = #tpu.pipeline_mode<synchronous>, transform_indices = @transform_1, window_bounds = array<i64: 1, 256>}, {pipeline_mode = #tpu.pipeline_mode<synchronous>, transform_indices = @transform_2, window_bounds = array<i64: 1, 256>}, {transform_indices = @transform_3, window_bounds = array<i64: 8, 256>}, {transform_indices = @transform_4, window_bounds = array<i64: 8, 256>}]} {
    %c0 = arith.constant 0 : index
    %c0_0 = arith.constant 0 : index
    %0 = vector.load %arg1[%c0, %c0_0] : memref<8x256xbf16, #tpu.memory_space<vmem>>, vector<8x256xbf16>
    %1 = arith.extf %0 : vector<8x256xbf16> to vector<8x256xf32>
    %c0_1 = arith.constant 0 : index
    %c0_2 = arith.constant 0 : index
    %2 = vector.load %arg2[%c0_1, %c0_2] : memref<1x256xf32, #tpu.memory_space<vmem>>, vector<1x256xf32>
    %3 = vector.broadcast %2 : vector<1x256xf32> to vector<8x256xf32>
    %4 = arith.mulf %1, %3 : vector<8x256xf32>
    %c0_3 = arith.constant 0 : index
    %c0_4 = arith.constant 0 : index
    %5 = vector.load %arg3[%c0_3, %c0_4] : memref<1x256xf32, #tpu.memory_space<vmem>>, vector<1x256xf32>
    %6 = vector.broadcast %5 : vector<1x256xf32> to vector<8x256xf32>
    %7 = arith.addf %4, %6 : vector<8x256xf32>
    %c0_5 = arith.constant 0 : index
    %c0_6 = arith.constant 0 : index
    %8 = vector.load %arg4[%c0_5, %c0_6] : memref<8x256xbf16, #tpu.memory_space<vmem>>, vector<8x256xbf16>
    %9 = arith.extf %8 : vector<8x256xbf16> to vector<8x256xf32>
    %10 = arith.addf %7, %9 : vector<8x256xf32>
    %cst = arith.constant 0.000000e+00 : f32
    %11 = vector.broadcast %cst : f32 to vector<8x256xf32>
    %12 = arith.maximumf %10, %11 : vector<8x256xf32>
    %13 = arith.truncf %12 : vector<8x256xf32> to vector<8x256xbf16>
    %c0_7 = arith.constant 0 : index
    %c0_8 = arith.constant 0 : index
    %14 = vector.load %arg5[%c0_7, %c0_8] : memref<8x256xbf16, #tpu.memory_space<vmem>>, vector<8x256xbf16>
    tpu.vector_store %arg5[%c0_7, %c0_8], %13 {strides = array<i32>} : memref<8x256xbf16, #tpu.memory_space<vmem>>, vector<8x256xbf16>,
    return
  }
  func.func @transform_0(%arg0: i32) -> (i32, i32) {
    %c0_i32 = arith.constant 0 : i32
    %c0_i32_0 = arith.constant 0 : i32
    return %arg0, %c0_i32 : i32, i32
  }
  func.func @transform_1(%arg0: i32) -> (i32, i32) {
    %c0_i32 = arith.constant 0 : i32
    %c0_i32_0 = arith.constant 0 : i32
    %c0_i32_1 = arith.constant 0 : i32
    return %c0_i32, %c0_i32_0 : i32, i32
  }
  func.func @transform_2(%arg0: i32) -> (i32, i32) {
    %c0_i32 = arith.constant 0 : i32
    %c0_i32_0 = arith.constant 0 : i32
    %c0_i32_1 = arith.constant 0 : i32
    return %c0_i32, %c0_i32_0 : i32, i32
  }
  func.func @transform_3(%arg0: i32) -> (i32, i32) {
    %c0_i32 = arith.constant 0 : i32
    %c0_i32_0 = arith.constant 0 : i32
    return %arg0, %c0_i32 : i32, i32
  }
  func.func @transform_4(%arg0: i32) -> (i32, i32) {
    %c0_i32 = arith.constant 0 : i32
    %c0_i32_0 = arith.constant 0 : i32
    return %arg0, %c0_i32 : i32, i32
  }
}

module attributes {stable_mosaic.version = 11 : i64} {
  func.func @_conv_stats_kernel(%arg0: i32, %arg1: memref<20x384xbf16, #tpu.memory_space<vmem>>, %arg2: memref<3x384x256xbf16, #tpu.memory_space<vmem>>, %arg3: memref<8x256xbf16, #tpu.memory_space<vmem>>, %arg4: memref<1x2x256xf32, #tpu.memory_space<vmem>>) attributes {dimension_semantics = [#tpu.dimension_semantics<parallel>], iteration_bounds = array<i64: 1>, scalar_prefetch = 0 : i64, scratch_operands = 0 : i64, tpu.core_type = #tpu.core_type<tc>, window_params = [{transform_indices = @transform_0, window_bounds = array<i64: 20, 384>}, {pipeline_mode = #tpu.pipeline_mode<synchronous>, transform_indices = @transform_1, window_bounds = array<i64: 3, 384, 256>}, {transform_indices = @transform_2, window_bounds = array<i64: 8, 256>}, {transform_indices = @transform_3, window_bounds = array<i64: 1, 2, 256>}]} {
    %c0 = arith.constant 0 : index
    %c0_0 = arith.constant 0 : index
    %0 = vector.load %arg1[%c0, %c0_0] : memref<20x384xbf16, #tpu.memory_space<vmem>>, vector<20x384xbf16>
    %c0_1 = arith.constant 0 : index
    %c0_2 = arith.constant 0 : index
    %c0_3 = arith.constant 0 : index
    %1 = vector.load %arg2[%c0_1, %c0_2, %c0_3] : memref<3x384x256xbf16, #tpu.memory_space<vmem>>, vector<1x384x256xbf16>
    %2 = vector.shape_cast %1 : vector<1x384x256xbf16> to vector<384x256xbf16>
    %cst = arith.constant dense<0.000000e+00> : vector<20x256xf32>
    %3 = tpu.matmul %0, %2, %cst {dimension_numbers = #tpu.dot_dimension_numbers<[1], [0], [0], [1], [0, 0, 1, 1], [], []>} : vector<20x384xbf16>, vector<384x256xbf16>, vector<20x256xf32> -> vector<20x256xf32>
    %c1 = arith.constant 1 : index
    %c0_4 = arith.constant 0 : index
    %c0_5 = arith.constant 0 : index
    %4 = vector.load %arg2[%c1, %c0_4, %c0_5] : memref<3x384x256xbf16, #tpu.memory_space<vmem>>, vector<1x384x256xbf16>
    %5 = vector.shape_cast %4 : vector<1x384x256xbf16> to vector<384x256xbf16>
    %cst_6 = arith.constant dense<0.000000e+00> : vector<20x256xf32>
    %6 = tpu.matmul %0, %5, %cst_6 {dimension_numbers = #tpu.dot_dimension_numbers<[1], [0], [0], [1], [0, 0, 1, 1], [], []>} : vector<20x384xbf16>, vector<384x256xbf16>, vector<20x256xf32> -> vector<20x256xf32>
    %c2 = arith.constant 2 : index
    %c0_7 = arith.constant 0 : index
    %c0_8 = arith.constant 0 : index
    %7 = vector.load %arg2[%c2, %c0_7, %c0_8] : memref<3x384x256xbf16, #tpu.memory_space<vmem>>, vector<1x384x256xbf16>
    %8 = vector.shape_cast %7 : vector<1x384x256xbf16> to vector<384x256xbf16>
    %cst_9 = arith.constant dense<0.000000e+00> : vector<20x256xf32>
    %9 = tpu.matmul %0, %8, %cst_9 {dimension_numbers = #tpu.dot_dimension_numbers<[1], [0], [0], [1], [0, 0, 1, 1], [], []>} : vector<20x384xbf16>, vector<384x256xbf16>, vector<20x256xf32> -> vector<20x256xf32>
    %cst_10 = arith.constant 0.000000e+00 : f32
    %10 = vector.broadcast %cst_10 : f32 to vector<1x256xf32>
    %cst_11 = arith.constant 0.000000e+00 : f32
    %11 = vector.broadcast %cst_11 : f32 to vector<1x256xf32>
    %12 = vector.extract_strided_slice %3 {offsets = [0, 0], sizes = [4, 256], strides = [1, 1]} : vector<20x256xf32> to vector<4x256xf32>
    %13 = vector.extract_strided_slice %6 {offsets = [5, 0], sizes = [4, 256], strides = [1, 1]} : vector<20x256xf32> to vector<4x256xf32>
    %14 = arith.addf %12, %13 : vector<4x256xf32>
    %15 = vector.extract_strided_slice %9 {offsets = [1, 0], sizes = [4, 256], strides = [1, 1]} : vector<20x256xf32> to vector<4x256xf32>
    %16 = arith.addf %14, %15 : vector<4x256xf32>
    %17 = arith.truncf %16 : vector<4x256xf32> to vector<4x256xbf16>
    %c0_12 = arith.constant 0 : index
    %c0_13 = arith.constant 0 : index
    %18 = vector.load %arg3[%c0_12, %c0_13] : memref<8x256xbf16, #tpu.memory_space<vmem>>, vector<4x256xbf16>
    tpu.vector_store %arg3[%c0_12, %c0_13], %17 {strides = array<i32>} : memref<8x256xbf16, #tpu.memory_space<vmem>>, vector<4x256xbf16>,
    %cst_14 = arith.constant dense<0.000000e+00> : vector<256xf32>
    %19 = vector.multi_reduction <add>, %16, %cst_14 [0] : vector<4x256xf32> to vector<256xf32>
    %20 = vector.shape_cast %19 : vector<256xf32> to vector<1x256xf32>
    %21 = arith.addf %10, %20 : vector<1x256xf32>
    %22 = arith.mulf %16, %16 : vector<4x256xf32>
    %cst_15 = arith.constant dense<0.000000e+00> : vector<256xf32>
    %23 = vector.multi_reduction <add>, %22, %cst_15 [0] : vector<4x256xf32> to vector<256xf32>
    %24 = vector.shape_cast %23 : vector<256xf32> to vector<1x256xf32>
    %25 = arith.addf %11, %24 : vector<1x256xf32>
    %26 = vector.extract_strided_slice %3 {offsets = [10, 0], sizes = [4, 256], strides = [1, 1]} : vector<20x256xf32> to vector<4x256xf32>
    %27 = vector.extract_strided_slice %6 {offsets = [15, 0], sizes = [4, 256], strides = [1, 1]} : vector<20x256xf32> to vector<4x256xf32>
    %28 = arith.addf %26, %27 : vector<4x256xf32>
    %29 = vector.extract_strided_slice %9 {offsets = [11, 0], sizes = [4, 256], strides = [1, 1]} : vector<20x256xf32> to vector<4x256xf32>
    %30 = arith.addf %28, %29 : vector<4x256xf32>
    %31 = arith.truncf %30 : vector<4x256xf32> to vector<4x256xbf16>
    %c4 = arith.constant 4 : index
    %c0_16 = arith.constant 0 : index
    %32 = vector.load %arg3[%c4, %c0_16] : memref<8x256xbf16, #tpu.memory_space<vmem>>, vector<4x256xbf16>
    tpu.vector_store %arg3[%c4, %c0_16], %31 {strides = array<i32>} : memref<8x256xbf16, #tpu.memory_space<vmem>>, vector<4x256xbf16>,
    %cst_17 = arith.constant dense<0.000000e+00> : vector<256xf32>
    %33 = vector.multi_reduction <add>, %30, %cst_17 [0] : vector<4x256xf32> to vector<256xf32>
    %34 = vector.shape_cast %33 : vector<256xf32> to vector<1x256xf32>
    %35 = arith.addf %21, %34 : vector<1x256xf32>
    %36 = arith.mulf %30, %30 : vector<4x256xf32>
    %cst_18 = arith.constant dense<0.000000e+00> : vector<256xf32>
    %37 = vector.multi_reduction <add>, %36, %cst_18 [0] : vector<4x256xf32> to vector<256xf32>
    %38 = vector.shape_cast %37 : vector<256xf32> to vector<1x256xf32>
    %39 = arith.addf %25, %38 : vector<1x256xf32>
    %40 = tpu.concatenate %35, %39 in 0 : vector<1x256xf32>, vector<1x256xf32> -> vector<2x256xf32>
    %41 = vector.shape_cast %40 : vector<2x256xf32> to vector<1x2x256xf32>
    %c0_19 = arith.constant 0 : index
    %c0_20 = arith.constant 0 : index
    %c0_21 = arith.constant 0 : index
    %42 = vector.load %arg4[%c0_19, %c0_20, %c0_21] : memref<1x2x256xf32, #tpu.memory_space<vmem>>, vector<1x2x256xf32>
    tpu.vector_store %arg4[%c0_19, %c0_20, %c0_21], %41 {strides = array<i32>} : memref<1x2x256xf32, #tpu.memory_space<vmem>>, vector<1x2x256xf32>,
    return
  }
  func.func @transform_0(%arg0: i32) -> (i32, i32) {
    %c0_i32 = arith.constant 0 : i32
    %c0_i32_0 = arith.constant 0 : i32
    return %arg0, %c0_i32 : i32, i32
  }
  func.func @transform_1(%arg0: i32) -> (i32, i32, i32) {
    %c0_i32 = arith.constant 0 : i32
    %c0_i32_0 = arith.constant 0 : i32
    %c0_i32_1 = arith.constant 0 : i32
    %c0_i32_2 = arith.constant 0 : i32
    return %c0_i32, %c0_i32_0, %c0_i32_1 : i32, i32, i32
  }
  func.func @transform_2(%arg0: i32) -> (i32, i32) {
    %c0_i32 = arith.constant 0 : i32
    %c0_i32_0 = arith.constant 0 : i32
    return %arg0, %c0_i32 : i32, i32
  }
  func.func @transform_3(%arg0: i32) -> (i32, i32, i32) {
    %c0_i32 = arith.constant 0 : i32
    %c0_i32_0 = arith.constant 0 : i32
    %c0_i32_1 = arith.constant 0 : i32
    return %arg0, %c0_i32, %c0_i32_0 : i32, i32, i32
  }
}

module attributes {stable_mosaic.version = 11 : i64} {
  func.func @_bn_act_kernel(%arg0: i32, %arg1: memref<8x256xbf16, #tpu.memory_space<vmem>>, %arg2: memref<1x256xf32, #tpu.memory_space<vmem>>, %arg3: memref<1x256xf32, #tpu.memory_space<vmem>>, %arg4: memref<8x256xbf16, #tpu.memory_space<vmem>>) attributes {dimension_semantics = [#tpu.dimension_semantics<parallel>], iteration_bounds = array<i64: 1>, scalar_prefetch = 0 : i64, scratch_operands = 0 : i64, tpu.core_type = #tpu.core_type<tc>, window_params = [{transform_indices = @transform_0, window_bounds = array<i64: 8, 256>}, {pipeline_mode = #tpu.pipeline_mode<synchronous>, transform_indices = @transform_1, window_bounds = array<i64: 1, 256>}, {pipeline_mode = #tpu.pipeline_mode<synchronous>, transform_indices = @transform_2, window_bounds = array<i64: 1, 256>}, {transform_indices = @transform_3, window_bounds = array<i64: 8, 256>}]} {
    %c0 = arith.constant 0 : index
    %c0_0 = arith.constant 0 : index
    %0 = vector.load %arg1[%c0, %c0_0] : memref<8x256xbf16, #tpu.memory_space<vmem>>, vector<8x256xbf16>
    %1 = arith.extf %0 : vector<8x256xbf16> to vector<8x256xf32>
    %c0_1 = arith.constant 0 : index
    %c0_2 = arith.constant 0 : index
    %2 = vector.load %arg2[%c0_1, %c0_2] : memref<1x256xf32, #tpu.memory_space<vmem>>, vector<1x256xf32>
    %3 = vector.broadcast %2 : vector<1x256xf32> to vector<8x256xf32>
    %4 = arith.mulf %1, %3 : vector<8x256xf32>
    %c0_3 = arith.constant 0 : index
    %c0_4 = arith.constant 0 : index
    %5 = vector.load %arg3[%c0_3, %c0_4] : memref<1x256xf32, #tpu.memory_space<vmem>>, vector<1x256xf32>
    %6 = vector.broadcast %5 : vector<1x256xf32> to vector<8x256xf32>
    %7 = arith.addf %4, %6 : vector<8x256xf32>
    %cst = arith.constant 0.000000e+00 : f32
    %8 = vector.broadcast %cst : f32 to vector<8x256xf32>
    %9 = arith.maximumf %7, %8 : vector<8x256xf32>
    %10 = arith.truncf %9 : vector<8x256xf32> to vector<8x256xbf16>
    %c0_5 = arith.constant 0 : index
    %c0_6 = arith.constant 0 : index
    %11 = vector.load %arg4[%c0_5, %c0_6] : memref<8x256xbf16, #tpu.memory_space<vmem>>, vector<8x256xbf16>
    tpu.vector_store %arg4[%c0_5, %c0_6], %10 {strides = array<i32>} : memref<8x256xbf16, #tpu.memory_space<vmem>>, vector<8x256xbf16>,
    return
  }
  func.func @transform_0(%arg0: i32) -> (i32, i32) {
    %c0_i32 = arith.constant 0 : i32
    %c0_i32_0 = arith.constant 0 : i32
    return %arg0, %c0_i32 : i32, i32
  }
  func.func @transform_1(%arg0: i32) -> (i32, i32) {
    %c0_i32 = arith.constant 0 : i32
    %c0_i32_0 = arith.constant 0 : i32
    %c0_i32_1 = arith.constant 0 : i32
    return %c0_i32, %c0_i32_0 : i32, i32
  }
  func.func @transform_2(%arg0: i32) -> (i32, i32) {
    %c0_i32 = arith.constant 0 : i32
    %c0_i32_0 = arith.constant 0 : i32
    %c0_i32_1 = arith.constant 0 : i32
    return %c0_i32, %c0_i32_0 : i32, i32
  }
  func.func @transform_3(%arg0: i32) -> (i32, i32) {
    %c0_i32 = arith.constant 0 : i32
    %c0_i32_0 = arith.constant 0 : i32
    return %arg0, %c0_i32 : i32, i32
  }
}

module attributes {stable_mosaic.version = 11 : i64} {
  func.func @_conv_stats_kernel(%arg0: i32, %arg1: memref<12x384xbf16, #tpu.memory_space<vmem>>, %arg2: memref<3x384x256xbf16, #tpu.memory_space<vmem>>, %arg3: memref<8x256xbf16, #tpu.memory_space<vmem>>, %arg4: memref<1x2x256xf32, #tpu.memory_space<vmem>>) attributes {dimension_semantics = [#tpu.dimension_semantics<parallel>], iteration_bounds = array<i64: 1>, scalar_prefetch = 0 : i64, scratch_operands = 0 : i64, tpu.core_type = #tpu.core_type<tc>, window_params = [{transform_indices = @transform_0, window_bounds = array<i64: 12, 384>}, {pipeline_mode = #tpu.pipeline_mode<synchronous>, transform_indices = @transform_1, window_bounds = array<i64: 3, 384, 256>}, {transform_indices = @transform_2, window_bounds = array<i64: 8, 256>}, {transform_indices = @transform_3, window_bounds = array<i64: 1, 2, 256>}]} {
    %c0 = arith.constant 0 : index
    %c0_0 = arith.constant 0 : index
    %0 = vector.load %arg1[%c0, %c0_0] : memref<12x384xbf16, #tpu.memory_space<vmem>>, vector<12x384xbf16>
    %c0_1 = arith.constant 0 : index
    %c0_2 = arith.constant 0 : index
    %c0_3 = arith.constant 0 : index
    %1 = vector.load %arg2[%c0_1, %c0_2, %c0_3] : memref<3x384x256xbf16, #tpu.memory_space<vmem>>, vector<1x384x256xbf16>
    %2 = vector.shape_cast %1 : vector<1x384x256xbf16> to vector<384x256xbf16>
    %cst = arith.constant dense<0.000000e+00> : vector<12x256xf32>
    %3 = tpu.matmul %0, %2, %cst {dimension_numbers = #tpu.dot_dimension_numbers<[1], [0], [0], [1], [0, 0, 1, 1], [], []>} : vector<12x384xbf16>, vector<384x256xbf16>, vector<12x256xf32> -> vector<12x256xf32>
    %c1 = arith.constant 1 : index
    %c0_4 = arith.constant 0 : index
    %c0_5 = arith.constant 0 : index
    %4 = vector.load %arg2[%c1, %c0_4, %c0_5] : memref<3x384x256xbf16, #tpu.memory_space<vmem>>, vector<1x384x256xbf16>
    %5 = vector.shape_cast %4 : vector<1x384x256xbf16> to vector<384x256xbf16>
    %cst_6 = arith.constant dense<0.000000e+00> : vector<12x256xf32>
    %6 = tpu.matmul %0, %5, %cst_6 {dimension_numbers = #tpu.dot_dimension_numbers<[1], [0], [0], [1], [0, 0, 1, 1], [], []>} : vector<12x384xbf16>, vector<384x256xbf16>, vector<12x256xf32> -> vector<12x256xf32>
    %c2 = arith.constant 2 : index
    %c0_7 = arith.constant 0 : index
    %c0_8 = arith.constant 0 : index
    %7 = vector.load %arg2[%c2, %c0_7, %c0_8] : memref<3x384x256xbf16, #tpu.memory_space<vmem>>, vector<1x384x256xbf16>
    %8 = vector.shape_cast %7 : vector<1x384x256xbf16> to vector<384x256xbf16>
    %cst_9 = arith.constant dense<0.000000e+00> : vector<12x256xf32>
    %9 = tpu.matmul %0, %8, %cst_9 {dimension_numbers = #tpu.dot_dimension_numbers<[1], [0], [0], [1], [0, 0, 1, 1], [], []>} : vector<12x384xbf16>, vector<384x256xbf16>, vector<12x256xf32> -> vector<12x256xf32>
    %cst_10 = arith.constant 0.000000e+00 : f32
    %10 = vector.broadcast %cst_10 : f32 to vector<1x256xf32>
    %cst_11 = arith.constant 0.000000e+00 : f32
    %11 = vector.broadcast %cst_11 : f32 to vector<1x256xf32>
    %12 = vector.extract_strided_slice %3 {offsets = [0, 0], sizes = [4, 256], strides = [1, 1]} : vector<12x256xf32> to vector<4x256xf32>
    %13 = vector.extract_strided_slice %6 {offsets = [1, 0], sizes = [4, 256], strides = [1, 1]} : vector<12x256xf32> to vector<4x256xf32>
    %14 = arith.addf %12, %13 : vector<4x256xf32>
    %15 = vector.extract_strided_slice %9 {offsets = [2, 0], sizes = [4, 256], strides = [1, 1]} : vector<12x256xf32> to vector<4x256xf32>
    %16 = arith.addf %14, %15 : vector<4x256xf32>
    %17 = arith.truncf %16 : vector<4x256xf32> to vector<4x256xbf16>
    %c0_12 = arith.constant 0 : index
    %c0_13 = arith.constant 0 : index
    %18 = vector.load %arg3[%c0_12, %c0_13] : memref<8x256xbf16, #tpu.memory_space<vmem>>, vector<4x256xbf16>
    tpu.vector_store %arg3[%c0_12, %c0_13], %17 {strides = array<i32>} : memref<8x256xbf16, #tpu.memory_space<vmem>>, vector<4x256xbf16>,
    %cst_14 = arith.constant dense<0.000000e+00> : vector<256xf32>
    %19 = vector.multi_reduction <add>, %16, %cst_14 [0] : vector<4x256xf32> to vector<256xf32>
    %20 = vector.shape_cast %19 : vector<256xf32> to vector<1x256xf32>
    %21 = arith.addf %10, %20 : vector<1x256xf32>
    %22 = arith.mulf %16, %16 : vector<4x256xf32>
    %cst_15 = arith.constant dense<0.000000e+00> : vector<256xf32>
    %23 = vector.multi_reduction <add>, %22, %cst_15 [0] : vector<4x256xf32> to vector<256xf32>
    %24 = vector.shape_cast %23 : vector<256xf32> to vector<1x256xf32>
    %25 = arith.addf %11, %24 : vector<1x256xf32>
    %26 = vector.extract_strided_slice %3 {offsets = [6, 0], sizes = [4, 256], strides = [1, 1]} : vector<12x256xf32> to vector<4x256xf32>
    %27 = vector.extract_strided_slice %6 {offsets = [7, 0], sizes = [4, 256], strides = [1, 1]} : vector<12x256xf32> to vector<4x256xf32>
    %28 = arith.addf %26, %27 : vector<4x256xf32>
    %29 = vector.extract_strided_slice %9 {offsets = [8, 0], sizes = [4, 256], strides = [1, 1]} : vector<12x256xf32> to vector<4x256xf32>
    %30 = arith.addf %28, %29 : vector<4x256xf32>
    %31 = arith.truncf %30 : vector<4x256xf32> to vector<4x256xbf16>
    %c4 = arith.constant 4 : index
    %c0_16 = arith.constant 0 : index
    %32 = vector.load %arg3[%c4, %c0_16] : memref<8x256xbf16, #tpu.memory_space<vmem>>, vector<4x256xbf16>
    tpu.vector_store %arg3[%c4, %c0_16], %31 {strides = array<i32>} : memref<8x256xbf16, #tpu.memory_space<vmem>>, vector<4x256xbf16>,
    %cst_17 = arith.constant dense<0.000000e+00> : vector<256xf32>
    %33 = vector.multi_reduction <add>, %30, %cst_17 [0] : vector<4x256xf32> to vector<256xf32>
    %34 = vector.shape_cast %33 : vector<256xf32> to vector<1x256xf32>
    %35 = arith.addf %21, %34 : vector<1x256xf32>
    %36 = arith.mulf %30, %30 : vector<4x256xf32>
    %cst_18 = arith.constant dense<0.000000e+00> : vector<256xf32>
    %37 = vector.multi_reduction <add>, %36, %cst_18 [0] : vector<4x256xf32> to vector<256xf32>
    %38 = vector.shape_cast %37 : vector<256xf32> to vector<1x256xf32>
    %39 = arith.addf %25, %38 : vector<1x256xf32>
    %40 = tpu.concatenate %35, %39 in 0 : vector<1x256xf32>, vector<1x256xf32> -> vector<2x256xf32>
    %41 = vector.shape_cast %40 : vector<2x256xf32> to vector<1x2x256xf32>
    %c0_19 = arith.constant 0 : index
    %c0_20 = arith.constant 0 : index
    %c0_21 = arith.constant 0 : index
    %42 = vector.load %arg4[%c0_19, %c0_20, %c0_21] : memref<1x2x256xf32, #tpu.memory_space<vmem>>, vector<1x2x256xf32>
    tpu.vector_store %arg4[%c0_19, %c0_20, %c0_21], %41 {strides = array<i32>} : memref<1x2x256xf32, #tpu.memory_space<vmem>>, vector<1x2x256xf32>,
    return
  }
  func.func @transform_0(%arg0: i32) -> (i32, i32) {
    %c0_i32 = arith.constant 0 : i32
    %c0_i32_0 = arith.constant 0 : i32
    return %arg0, %c0_i32 : i32, i32
  }
  func.func @transform_1(%arg0: i32) -> (i32, i32, i32) {
    %c0_i32 = arith.constant 0 : i32
    %c0_i32_0 = arith.constant 0 : i32
    %c0_i32_1 = arith.constant 0 : i32
    %c0_i32_2 = arith.constant 0 : i32
    return %c0_i32, %c0_i32_0, %c0_i32_1 : i32, i32, i32
  }
  func.func @transform_2(%arg0: i32) -> (i32, i32) {
    %c0_i32 = arith.constant 0 : i32
    %c0_i32_0 = arith.constant 0 : i32
    return %arg0, %c0_i32 : i32, i32
  }
  func.func @transform_3(%arg0: i32) -> (i32, i32, i32) {
    %c0_i32 = arith.constant 0 : i32
    %c0_i32_0 = arith.constant 0 : i32
    %c0_i32_1 = arith.constant 0 : i32
    return %arg0, %c0_i32, %c0_i32_0 : i32, i32, i32
  }
}

module attributes {stable_mosaic.version = 11 : i64} {
  func.func @_bn_act_res_kernel(%arg0: i32, %arg1: memref<8x256xbf16, #tpu.memory_space<vmem>>, %arg2: memref<1x256xf32, #tpu.memory_space<vmem>>, %arg3: memref<1x256xf32, #tpu.memory_space<vmem>>, %arg4: memref<8x256xbf16, #tpu.memory_space<vmem>>, %arg5: memref<8x256xbf16, #tpu.memory_space<vmem>>) attributes {dimension_semantics = [#tpu.dimension_semantics<parallel>], iteration_bounds = array<i64: 1>, scalar_prefetch = 0 : i64, scratch_operands = 0 : i64, tpu.core_type = #tpu.core_type<tc>, window_params = [{transform_indices = @transform_0, window_bounds = array<i64: 8, 256>}, {pipeline_mode = #tpu.pipeline_mode<synchronous>, transform_indices = @transform_1, window_bounds = array<i64: 1, 256>}, {pipeline_mode = #tpu.pipeline_mode<synchronous>, transform_indices = @transform_2, window_bounds = array<i64: 1, 256>}, {transform_indices = @transform_3, window_bounds = array<i64: 8, 256>}, {transform_indices = @transform_4, window_bounds = array<i64: 8, 256>}]} {
    %c0 = arith.constant 0 : index
    %c0_0 = arith.constant 0 : index
    %0 = vector.load %arg1[%c0, %c0_0] : memref<8x256xbf16, #tpu.memory_space<vmem>>, vector<8x256xbf16>
    %1 = arith.extf %0 : vector<8x256xbf16> to vector<8x256xf32>
    %c0_1 = arith.constant 0 : index
    %c0_2 = arith.constant 0 : index
    %2 = vector.load %arg2[%c0_1, %c0_2] : memref<1x256xf32, #tpu.memory_space<vmem>>, vector<1x256xf32>
    %3 = vector.broadcast %2 : vector<1x256xf32> to vector<8x256xf32>
    %4 = arith.mulf %1, %3 : vector<8x256xf32>
    %c0_3 = arith.constant 0 : index
    %c0_4 = arith.constant 0 : index
    %5 = vector.load %arg3[%c0_3, %c0_4] : memref<1x256xf32, #tpu.memory_space<vmem>>, vector<1x256xf32>
    %6 = vector.broadcast %5 : vector<1x256xf32> to vector<8x256xf32>
    %7 = arith.addf %4, %6 : vector<8x256xf32>
    %c0_5 = arith.constant 0 : index
    %c0_6 = arith.constant 0 : index
    %8 = vector.load %arg4[%c0_5, %c0_6] : memref<8x256xbf16, #tpu.memory_space<vmem>>, vector<8x256xbf16>
    %9 = arith.extf %8 : vector<8x256xbf16> to vector<8x256xf32>
    %10 = arith.addf %7, %9 : vector<8x256xf32>
    %cst = arith.constant 0.000000e+00 : f32
    %11 = vector.broadcast %cst : f32 to vector<8x256xf32>
    %12 = arith.maximumf %10, %11 : vector<8x256xf32>
    %13 = arith.truncf %12 : vector<8x256xf32> to vector<8x256xbf16>
    %c0_7 = arith.constant 0 : index
    %c0_8 = arith.constant 0 : index
    %14 = vector.load %arg5[%c0_7, %c0_8] : memref<8x256xbf16, #tpu.memory_space<vmem>>, vector<8x256xbf16>
    tpu.vector_store %arg5[%c0_7, %c0_8], %13 {strides = array<i32>} : memref<8x256xbf16, #tpu.memory_space<vmem>>, vector<8x256xbf16>,
    return
  }
  func.func @transform_0(%arg0: i32) -> (i32, i32) {
    %c0_i32 = arith.constant 0 : i32
    %c0_i32_0 = arith.constant 0 : i32
    return %arg0, %c0_i32 : i32, i32
  }
  func.func @transform_1(%arg0: i32) -> (i32, i32) {
    %c0_i32 = arith.constant 0 : i32
    %c0_i32_0 = arith.constant 0 : i32
    %c0_i32_1 = arith.constant 0 : i32
    return %c0_i32, %c0_i32_0 : i32, i32
  }
  func.func @transform_2(%arg0: i32) -> (i32, i32) {
    %c0_i32 = arith.constant 0 : i32
    %c0_i32_0 = arith.constant 0 : i32
    %c0_i32_1 = arith.constant 0 : i32
    return %c0_i32, %c0_i32_0 : i32, i32
  }
  func.func @transform_3(%arg0: i32) -> (i32, i32) {
    %c0_i32 = arith.constant 0 : i32
    %c0_i32_0 = arith.constant 0 : i32
    return %arg0, %c0_i32 : i32, i32
  }
  func.func @transform_4(%arg0: i32) -> (i32, i32) {
    %c0_i32 = arith.constant 0 : i32
    %c0_i32_0 = arith.constant 0 : i32
    return %arg0, %c0_i32 : i32, i32
  }
}

</mosaic_0001>

<bundles_post_ra>
// kernel: _lambda_.14
= control target key start
LH: loop header
LB: loop body
LE: loop exit
PB: predicated region body
PF: predicated region fallthrough
CT: control target
= control target key end

     0   :  { %v975_v1 = vmov 0   ;;  %vm514_vm0 = vcmask 1046528   ;;  %vm539_vm1 = vcmask 1045504   ;;  %vm673_vm2 = vcmask 1042432   ;;  %s1236_s1 = inlined_call_operand.vmem [shape: bf16[3,128,256], index: 1, kind: input, shape index: {}]   ;;  %s1237_s0 = inlined_call_operand.vmem [shape: bf16[36,128], index: 0, kind: input, shape index: {}]   ;;  %s1238_s2 = inlined_call_operand.vmem [shape: bf16[32,256], index: 2, kind: output, shape index: {0}]   ;;  %s1239_s3 = inlined_call_operand.vmem [shape: f32[1,2,256], index: 3, kind: output, shape index: {1}]  }
   0x1   :  { %v900_v0 = vld [vmem:[%s1236_s1 + $0x4] ss:$8 sps:$4 sm:$0xff]   ;;  %321 = vmatprep.mubr.bf16.mxu1 %v975_v1  ;;  %163 = vmatprep.mubr.bf16.mxu0 %v975_v1  ;;  %v904_v3 = vld [vmem:[%s1236_s1] ss:$8 sps:$4 sm:$0xff]   ;;  %v906_v5 = vld [vmem:[%s1236_s1 + $0x14] ss:$8 sps:$4 sm:$0xff]  }
   0x2   :  { %v902_v2 = vld [vmem:[%s1236_s1 + $0x84] ss:$8 sps:$4 sm:$0xff]   ;;  %131 = vmatprep.subr.bf16.mxu0 %v900_v0  ;;  %v905_v4 = vld [vmem:[%s1236_s1 + $0x80] ss:$8 sps:$4 sm:$0xff]   ;;  %v908_v6 = vld [vmem:[%s1236_s1 + $0x94] ss:$8 sps:$4 sm:$0xff]  }
   0x3   :  { %289 = vmatprep.subr.bf16.mxu1 %v902_v2  ;;  %132 = vmatpush1.bf16.msra.mxu0 %v904_v3  ;;  %v910_v7 = vld [vmem:[%s1236_s1 + $0x10] ss:$8 sps:$4 sm:$0xff]   ;;  %v912_v9 = vld [vmem:[%s1236_s1 + $0x24] ss:$8 sps:$4 sm:$0xff]   ;;  %v916_v11 = vld [vmem:[%s1236_s1 + $0x20] ss:$8 sps:$4 sm:$0xff]  }
   0x4   :  { %290 = vmatpush1.bf16.msra.mxu1 %v905_v4  ;;  %133 = vmatprep.subr.bf16.mxu0 %v906_v5  ;;  %v911_v8 = vld [vmem:[%s1236_s1 + $0x90] ss:$8 sps:$4 sm:$0xff]   ;;  %v914_v10 = vld [vmem:[%s1236_s1 + $0xa4] ss:$8 sps:$4 sm:$0xff]   ;;  %v917_v12 = vld [vmem:[%s1236_s1 + $0xa0] ss:$8 sps:$4 sm:$0xff]  }
   0x5   :  { %291 = vmatprep.subr.bf16.mxu1 %v908_v6  ;;  %v918_v13 = vld [vmem:[%s1236_s1 + $0x34] ss:$8 sps:$4 sm:$0xff]   ;;  %v922_v15 = vld [vmem:[%s1236_s1 + $0x30] ss:$8 sps:$4 sm:$0xff]   ;;  %v924_v17 = vld [vmem:[%s1236_s1 + $0x44] ss:$8 sps:$4 sm:$0xff]  }
   0x6   :  { %v920_v14 = vld [vmem:[%s1236_s1 + $0xb4] ss:$8 sps:$4 sm:$0xff]   ;;  %v923_v16 = vld [vmem:[%s1236_s1 + $0xb0] ss:$8 sps:$4 sm:$0xff]   ;;  %v926_v18 = vld [vmem:[%s1236_s1 + $0xc4] ss:$8 sps:$4 sm:$0xff]  }
   0x7   :  { %134 = vmatpush1.bf16.msra.mxu0 %v910_v7  ;;  %v928_v19 = vld [vmem:[%s1236_s1 + $0x40] ss:$8 sps:$4 sm:$0xff]   ;;  %v930_v21 = vld [vmem:[%s1236_s1 + $0x54] ss:$8 sps:$4 sm:$0xff]   ;;  %v934_v23 = vld [vmem:[%s1236_s1 + $0x50] ss:$8 sps:$4 sm:$0xff]  }
   0x8   :  { %292 = vmatpush1.bf16.msra.mxu1 %v911_v8  ;;  %135 = vmatprep.subr.bf16.mxu0 %v912_v9  ;;  %v929_v20 = vld [vmem:[%s1236_s1 + $0xc0] ss:$8 sps:$4 sm:$0xff]   ;;  %v932_v22 = vld [vmem:[%s1236_s1 + $0xd4] ss:$8 sps:$4 sm:$0xff]   ;;  %v935_v24 = vld [vmem:[%s1236_s1 + $0xd0] ss:$8 sps:$4 sm:$0xff]  }
   0x9   :  { %293 = vmatprep.subr.bf16.mxu1 %v914_v10  ;;  %v936_v25 = vld [vmem:[%s1236_s1 + $0x64] ss:$8 sps:$4 sm:$0xff]   ;;  %v940_v27 = vld [vmem:[%s1236_s1 + $0x60] ss:$8 sps:$4 sm:$0xff]   ;;  %v942_v29 = vld [vmem:[%s1236_s1 + $0x74] ss:$8 sps:$4 sm:$0xff]  }
   0xa   :  { %v938_v26 = vld [vmem:[%s1236_s1 + $0xe4] ss:$8 sps:$4 sm:$0xff]   ;;  %v941_v28 = vld [vmem:[%s1236_s1 + $0xe0] ss:$8 sps:$4 sm:$0xff]   ;;  %v944_v30 = vld [vmem:[%s1236_s1 + $0xf4] ss:$8 sps:$4 sm:$0xff]  }
   0xb   :  { %136 = vmatpush1.bf16.msra.mxu0 %v916_v11  ;;  %v946_v31 = vld [vmem:[%s1236_s1 + $0x70] ss:$8 sps:$4 sm:$0xff]   ;;  %v951_v33 = vld [vmem:[%s1236_s1 + $0x104] ss:$8 sps:$4 sm:$0xff]   ;;  %v949_v35 = vld [vmem:[%s1236_s1 + $0x100] ss:$8 sps:$4 sm:$0xff]  }
   0xc   :  { %294 = vmatpush1.bf16.msra.mxu1 %v917_v12  ;;  %137 = vmatprep.subr.bf16.mxu0 %v918_v13  ;;  %v947_v32 = vld [vmem:[%s1236_s1 + $0xf0] ss:$8 sps:$4 sm:$0xff]   ;;  %v1100_v34 = vld [vmem:[%s1237_s0] sm:$0xff]   ;;  %v954_v36 = vld [vmem:[%s1236_s1 + $0x114] ss:$8 sps:$4 sm:$0xff]   ;;  %vm674_vm3 = vcmask 1046532  }
   0xd   :  { %295 = vmatprep.subr.bf16.mxu1 %v920_v14  ;;  %v952_v37 = vld [vmem:[%s1236_s1 + $0x110] ss:$8 sps:$4 sm:$0xff]   ;;  %v958_v38 = vld [vmem:[%s1236_s1 + $0x124] ss:$8 sps:$4 sm:$0xff]   ;;  %v956_v40 = vld [vmem:[%s1236_s1 + $0x120] ss:$8 sps:$4 sm:$0xff]  }
   0xe   :  { %v955_v39 = vld [vmem:[%s1237_s0 + $0x8] sm:$0xff]   ;;  %v961_v41 = vld [vmem:[%s1236_s1 + $0x134] ss:$8 sps:$4 sm:$0xff]   ;;  %v959_v42 = vld [vmem:[%s1236_s1 + $0x130] ss:$8 sps:$4 sm:$0xff]   ;;  %vm765_vm5 = vcmask 1040384  }
   0xf   :  { %138 = vmatpush1.bf16.msra.mxu0 %v922_v15  ;;  %v965_v43 = vld [vmem:[%s1236_s1 + $0x144] ss:$8 sps:$4 sm:$0xff]   ;;  %v962_v44 = vld [vmem:[%s1237_s0 + $0x10] ss:$0 sps:$4 sm:$0x33]   ;;  %vm1213_vm4 = vmor %vm673_vm2, %vm674_vm3 }
  0x10   :  { %296 = vmatpush1.bf16.msra.mxu1 %v923_v16  ;;  %139 = vmatprep.subr.bf16.mxu0 %v924_v17  ;;  %v963_v45 = vld [vmem:[%s1236_s1 + $0x140] ss:$8 sps:$4 sm:$0xff]   ;;  %v968_v46 = vld [vmem:[%s1236_s1 + $0x154] ss:$8 sps:$4 sm:$0xff]   ;;  %v966_v47 = vld [vmem:[%s1236_s1 + $0x150] ss:$8 sps:$4 sm:$0xff]  }
  0x11   :  { %297 = vmatprep.subr.bf16.mxu1 %v926_v18  ;;  %v971_v48 = vld [vmem:[%s1236_s1 + $0x164] ss:$8 sps:$4 sm:$0xff]   ;;  %v969_v49 = vld [vmem:[%s1236_s1 + $0x160] ss:$8 sps:$4 sm:$0xff]   ;;  %v974_v50 = vld [vmem:[%s1236_s1 + $0x174] ss:$8 sps:$4 sm:$0xff]  }
  0x12   :  { %v972_v51 = vld [vmem:[%s1236_s1 + $0x170] ss:$8 sps:$4 sm:$0xff]  }
  0x13   :  { %140 = vmatpush1.bf16.msra.mxu0 %v928_v19 }
  0x14   :  { %298 = vmatpush1.bf16.msra.mxu1 %v929_v20  ;;  %141 = vmatprep.subr.bf16.mxu0 %v930_v21 }
  0x15   :  { %299 = vmatprep.subr.bf16.mxu1 %v932_v22 }
  0x17   :  { %142 = vmatpush1.bf16.msra.mxu0 %v934_v23 }
  0x18   :  { %300 = vmatpush1.bf16.msra.mxu1 %v935_v24  ;;  %143 = vmatprep.subr.bf16.mxu0 %v936_v25 }
  0x19   :  { %301 = vmatprep.subr.bf16.mxu1 %v938_v26 }
  0x1b   :  { %144 = vmatpush1.bf16.msra.mxu0 %v940_v27 }
  0x1c   :  { %302 = vmatpush1.bf16.msra.mxu1 %v941_v28  ;;  %145 = vmatprep.subr.bf16.mxu0 %v942_v29 }
  0x1d   :  { %303 = vmatprep.subr.bf16.mxu1 %v944_v30 }
  0x1f   :  { %146 = vmatpush1.bf16.msra.mxu0 %v946_v31 }
  0x20   :  { %304 = vmatpush1.bf16.msra.mxu1 %v947_v32  ;;  %447 = vmatprep.subr.bf16.mxu0 %v951_v33 }
  0x21   :  { %883 = vmatprep.subr.bf16.mxu1 %v951_v33 }
  0x22   :  { %164 = vmatmul.mubr.bf16.vlgmr.msra.gmra.mrb[0].mxu0 %v1100_v34 }
  0x23   :  { %322 = vmatmul.mubr.bf16.vlgmr.msra.gmra.mrb[0].mxu1 %v1100_v34  ;;  %448 = vmatpush1.bf16.msra.mxu0 %v949_v35 }
  0x24   :  { %891 = vmatpush1.bf16.msra.mxu1 %v949_v35  ;;  %449 = vmatprep.subr.bf16.mxu0 %v954_v36 }
  0x25   :  { %884 = vmatprep.subr.bf16.mxu1 %v954_v36  ;;  %331 = vmatprep.mubr.bf16.mxu1 %v975_v1 }
  0x26   :  { %173 = vmatprep.mubr.bf16.mxu0 %v975_v1 }
  0x27   :  { %450 = vmatpush1.bf16.msra.mxu0 %v952_v37 }
  0x28   :  { %892 = vmatpush1.bf16.msra.mxu1 %v952_v37  ;;  %451 = vmatprep.subr.bf16.mxu0 %v958_v38 }
  0x29   :  { %885 = vmatprep.subr.bf16.mxu1 %v958_v38 }
  0x2a   :  { %174 = vmatmul.mubr.bf16.gmra.mrb[4].mxu0 %v955_v39 }
  0x2b   :  { %332 = vmatmul.mubr.bf16.gmra.mrb[4].mxu1 %v955_v39  ;;  %452 = vmatpush1.bf16.msra.mxu0 %v956_v40 }
  0x2c   :  { %893 = vmatpush1.bf16.msra.mxu1 %v956_v40  ;;  %453 = vmatprep.subr.bf16.mxu0 %v961_v41 }
  0x2d   :  { %886 = vmatprep.subr.bf16.mxu1 %v961_v41  ;;  %341 = vmatprep.mubr.bf16.mxu1 %v975_v1 }
  0x2e   :  { %183 = vmatprep.mubr.bf16.mxu0 %v975_v1 }
  0x2f   :  { %454 = vmatpush1.bf16.msra.mxu0 %v959_v42 }
  0x30   :  { %894 = vmatpush1.bf16.msra.mxu1 %v959_v42  ;;  %455 = vmatprep.subr.bf16.mxu0 %v965_v43 }
  0x31   :  { %887 = vmatprep.subr.bf16.mxu1 %v965_v43 }
  0x32   :  { %184 = vmatmul.mubr.bf16.gmra.mrb[8].mxu0 %v962_v44 }
  0x33   :  { %342 = vmatmul.mubr.bf16.gmra.mrb[8].mxu1 %v962_v44  ;;  %456 = vmatpush1.bf16.msra.mxu0 %v963_v45 }
  0x34   :  { %895 = vmatpush1.bf16.msra.mxu1 %v963_v45  ;;  %457 = vmatprep.subr.bf16.mxu0 %v968_v46 }
  0x35   :  { %888 = vmatprep.subr.bf16.mxu1 %v968_v46  ;;  %479 = vmatprep.mubr.bf16.mxu0 %v975_v1 }
  0x36   :  { %489 = vmatprep.mubr.bf16.mxu1 %v975_v1 }
  0x37   :  { %458 = vmatpush1.bf16.msra.mxu0 %v966_v47 }
  0x38   :  { %896 = vmatpush1.bf16.msra.mxu1 %v966_v47  ;;  %459 = vmatprep.subr.bf16.mxu0 %v971_v48 }
  0x39   :  { %889 = vmatprep.subr.bf16.mxu1 %v971_v48 }
  0x3b   :  { %460 = vmatpush1.bf16.msra.mxu0 %v969_v49 }
  0x3c   :  { %897 = vmatpush1.bf16.msra.mxu1 %v969_v49  ;;  %461 = vmatprep.subr.bf16.mxu0 %v974_v50 }
  0x3d   :  { %890 = vmatprep.subr.bf16.mxu1 %v974_v50 }
  0x3f   :  { %462 = vmatpush1.bf16.msra.mxu0 %v972_v51 }
  0x40   :  { %898 = vmatpush1.bf16.msra.mxu1 %v972_v51 }
  0x42   :  { %480 = vmatmul.mubr.bf16.vlgmr.msra.gmra.mrb[12].mxu0 %v1100_v34 }
  0x43   :  { %490 = vmatmul.mubr.bf16.vlgmr.msra.gmra.mrb[12].mxu1 %v955_v39 }
  0x44   :  { %499 = vmatprep.mubr.bf16.mxu1 %v975_v1 }
  0x4b   :  { %500 = vmatmul.mubr.bf16.gmra.mrb[16].mxu1 %v962_v44 }
  0xf5   :  { %v165_v53 = vpop.f32.mrb[0].mxu0 }
  0xf6   :  { %v323_v52 = vpop.f32.mrb[0].mxu1  ;;  %v167_v56 = vpop.f32.mrb[1].mxu0 }
  0xf7   :  { %v515_v54 = vrot.slane %v323_v52, 1  ;;  %v325_v55 = vpop.f32.mrb[1].mxu1  ;;  %v169_v58 = vpop.f32.mrb[2].mxu0 }
  0xf8   :  { %v327_v57 = vpop.f32.mrb[2].mxu1  ;;  %v171_v61 = vpop.f32.mrb[3].mxu0  ;;  %v518_v62 = vrot.slane %v325_v55, 1 }
  0xf9   :  { %v516_v59 = vrot.slane %v327_v57, 1  ;;  %v329_v60 = vpop.f32.mrb[3].mxu1 }
  0xfa   :  { %v519_v63 = vrot.slane %v329_v60, 1 }
  0xfb   :  { %v517_v0 = vsel %vm514_vm0, %v515_v54, %v516_v59 }
  0xfc   :  { %v529_v2 = vadd.f32 %v517_v0, %v165_v53  ;;  %v520_v3 = vsel %vm514_vm0, %v518_v62, %v519_v63 }
  0xfd   :  { %v1165_v1 = vadd.f32 %v520_v3, %v167_v56  ;;  %v175_v5 = vpop.f32.mrb[4].mxu0 }
  0xfe   :  { %v333_v4 = vpop.f32.mrb[4].mxu1  ;;  %v177_v8 = vpop.f32.mrb[5].mxu0 }
  0xff   :  { %v521_v6 = vrot.slane %v333_v4, 1  ;;  %v335_v7 = vpop.f32.mrb[5].mxu1  ;;  %v179_v11 = vpop.f32.mrb[6].mxu0 }
 0x100   :  { %v523_v9 = vrot.slane %v335_v7, 1  ;;  %v337_v10 = vpop.f32.mrb[6].mxu1  ;;  %v181_v15 = vpop.f32.mrb[7].mxu0 }
 0x101   :  { %v522_v12 = vsel %vm514_vm0, %v516_v59, %v521_v6  ;;  %v612_v13 = vrot.slane %v337_v10, 1  ;;  %v339_v14 = vpop.f32.mrb[7].mxu1 }
 0x102   :  { %v531_v16 = vadd.f32 %v522_v12, %v169_v58  ;;  %v524_v17 = vsel %vm514_vm0, %v519_v63, %v523_v9  ;;  %v614_v18 = vrot.slane %v339_v14, 1 }
 0x103   :  { %v532_v19 = vadd.f32 %v524_v17, %v171_v61  ;;  %v613_v20 = vsel %vm514_vm0, %v521_v6, %v612_v13 }
 0x104   :  { %v626_v21 = vadd.f32 %v613_v20, %v175_v5  ;;  %v615_v22 = vsel %vm514_vm0, %v523_v9, %v614_v18 }
 0x105   :  { %v627_v23 = vadd.f32 %v615_v22, %v177_v8  ;;  %v185_v25 = vpop.f32.mrb[8].mxu0 }
 0x106   :  { %v343_v24 = vpop.f32.mrb[8].mxu1  ;;  %v187_v28 = vpop.f32.mrb[9].mxu0 }
 0x107   :  { %v616_v26 = vrot.slane %v343_v24, 1  ;;  %v345_v27 = vpop.f32.mrb[9].mxu1  ;;  %v189_v31 = vpop.f32.mrb[10].mxu0 }
 0x108   :  { %v618_v29 = vrot.slane %v345_v27, 1  ;;  %v347_v30 = vpop.f32.mrb[10].mxu1  ;;  %v190_v35 = vpop.f32.mrb[11].mxu0 }
 0x109   :  { %v617_v32 = vsel %vm514_vm0, %v612_v13, %v616_v26  ;;  %v348_v33 = vpop.f32.mrb[11].mxu1  ;;  %v630_v34 = vadd.f32 %v616_v26, %v185_v25 }
 0x10a   :  { %v628_v36 = vadd.f32 %v617_v32, %v179_v11  ;;  %v619_v37 = vsel %vm514_vm0, %v614_v18, %v618_v29  ;;  %v1173_v38 = vadd.f32 %v618_v29, %v187_v28 }
 0x10b   :  { %v1175_v39 = vadd.f32 %v619_v37, %v181_v15 }
 0x115   :  { %v481_v40 = vpop.f32.mrb[12].mxu0 }
 0x116   :  { %v491_v41 = vpop.f32.mrb[12].mxu1  ;;  %v540_v42 = vrot.slane %v481_v40, 2  ;;  %v483_v43 = vpop.f32.mrb[13].mxu0 }
 0x117   :  { %v493_v44 = vpop.f32.mrb[13].mxu1  ;;  %v543_v45 = vrot.slane %v483_v43, 2  ;;  %v485_v46 = vpop.f32.mrb[14].mxu0  ;;  %v546_v48 = vrot.slane %v491_v41, 2 }
 0x118   :  { %v495_v47 = vpop.f32.mrb[14].mxu1  ;;  %v541_v49 = vrot.slane %v485_v46, 2  ;;  %v487_v51 = vpop.f32.mrb[15].mxu0  ;;  %v548_v55 = vrot.slane %v493_v44, 2 }
 0x119   :  { %v636_v50 = vrot.slane %v495_v47, 2  ;;  %v1177_v52 = vpop.f32.mrb[15].mxu1  ;;  %v544_v53 = vrot.slane %v487_v51, 2 }
 0x11a   :  { %v638_v54 = vrot.slane %v1177_v52, 2  ;;  %v542_v56 = vsel %vm539_vm1, %v540_v42, %v541_v49  ;;  %v547_v57 = vsel %vm539_vm1, %v541_v49, %v546_v48 }
 0x11b   :  { %v637_v58 = vsel %vm539_vm1, %v546_v48, %v636_v50  ;;  %v554_v59 = vadd.f32 %v542_v56, %v529_v2  ;;  %v556_v60 = vadd.f32 %v547_v57, %v531_v16  ;;  %v545_v62 = vsel %vm539_vm1, %v543_v45, %v544_v53 }
 0x11c   :  { %v650_v61 = vadd.f32 %v637_v58, %v626_v21  ;;  %v549_v63 = vsel %vm539_vm1, %v544_v53, %v548_v55  ;;  %v555_v0 = vadd.f32 %v545_v62, %v1165_v1  ;;  %v639_v3 = vsel %vm539_vm1, %v548_v55, %v638_v54 }
 0x11d   :  { %v572_v4 = vadd.f32 %v556_v60, %v554_v59  ;;  %v588_v5 = vmul.f32 %v554_v59, %v554_v59  ;;  %v590_v6 = vmul.f32 %v556_v60, %v556_v60  ;;  %v557_v8 = vadd.f32 %v549_v63, %v532_v19 }
 0x11e   :  { %v501_v7 = vpop.f32.mrb[16].mxu1  ;;  %v878_v9 = vpack.c.bf16 %v555_v0, %v554_v59  ;;  %v589_v10 = vmul.f32 %v555_v0, %v555_v0  ;;  %v1189_v12 = vadd.f32 %v639_v3, %v627_v23  ;;  %v723_v23 = vmul.f32 %v650_v61, %v650_v61 }
 0x11f   :  { %v503_v2 = vpop.f32.mrb[17].mxu1  ;;  %v592_v11 = vadd.f32 %v590_v6, %v588_v5  ;;  %v640_v13 = vrot.slane %v501_v7, 2  ;;  %v573_v15 = vrot.slane %v572_v4, 4  ;;  %v879_v16 = vpack.c.bf16 %v557_v8, %v556_v60 }
 0x120   :  { %v505_v14 = vpop.f32.mrb[18].mxu1  ;;  %570 = vst [vmem:[%s1238_s2] sm:$0xff] %v878_v9  ;;  %v579_v1 = vadd.f32 %v557_v8, %v555_v0  ;;  %v591_v17 = vmul.f32 %v557_v8, %v557_v8  ;;  %v880_v20 = vpack.c.bf16 %v1189_v12, %v650_v61  ;;  %v693_v27 = vrot.slane %v650_v61, 2 }
 0x121   :  { %v506_v18 = vpop.f32.mrb[19].mxu1  ;;  %v593_v19 = vrot.slane %v592_v11, 4  ;;  %571 = vst [vmem:[%s1238_s2 + $0x8] sm:$0xff] %v879_v16  ;;  %v641_v22 = vsel %vm539_vm1, %v636_v50, %v640_v13  ;;  %v574_v25 = vadd.f32 %v573_v15, %v572_v4  ;;  %v654_v26 = vadd.f32 %v640_v13, %v630_v34 }
 0x122   :  { %v599_v21 = vadd.f32 %v591_v17, %v589_v10  ;;  %v652_v24 = vadd.f32 %v641_v22, %v628_v36  ;;  %v580_v28 = vrot.slane %v579_v1, 4  ;;  %v735_v35 = vrot.slane %v723_v23, 2 }
 0x123   :  { %v594_v31 = vadd.f32 %v593_v19, %v592_v11  ;;  %v699_v32 = vrot.slane %v654_v26, 2  ;;  %v727_v33 = vmul.f32 %v654_v26, %v654_v26  ;;  %v724_v37 = vmul.f32 %v1189_v12, %v1189_v12 }
 0x124   :  { %v694_v29 = vrot.slane %v652_v24, 2  ;;  %v725_v30 = vmul.f32 %v652_v24, %v652_v24  ;;  %v575_v42 = vrot.slane %v574_v25, 2  ;;  %v600_v43 = vrot.slane %v599_v21, 4 }
 0x125   :  { %v741_v34 = vrot.slane %v727_v33, 2  ;;  %v581_v44 = vadd.f32 %v580_v28, %v579_v1  ;;  %v595_v47 = vrot.slane %v594_v31, 2  ;;  %v696_v48 = vrot.slane %v1189_v12, 2 }
 0x126   :  { %v695_v40 = vsel %vm539_vm1, %v693_v27, %v694_v29  ;;  %v736_v41 = vrot.slane %v725_v30, 2  ;;  %v700_v36 = vsel %vm539_vm1, %v694_v29, %v699_v32  ;;  %v642_v50 = vrot.slane %v503_v2, 2 }
 0x127   :  { %v707_v45 = vadd.f32 %v700_v36, %v695_v40  ;;  %v876_v51 = vrot.slane %v880_v20, 9  ;;  %v738_v53 = vrot.slane %v724_v37, 2  ;;  %v576_v57 = vadd.f32 %v575_v42, %v574_v25 }
 0x128   :  { %v737_v46 = vsel %vm539_vm1, %v735_v35, %v736_v41  ;;  %v742_v49 = vsel %vm539_vm1, %v736_v41, %v741_v34  ;;  %v601_v58 = vadd.f32 %v600_v43, %v599_v21  ;;  %v643_v59 = vsel %vm539_vm1, %v638_v54, %v642_v50 }
 0x129   :  { %v708_v55 = vrot.slane %v707_v45, 4  ;;  %v749_v56 = vadd.f32 %v742_v49, %v737_v46  ;;  %v655_v60 = vadd.f32 %v642_v50, %v1173_v38  ;;  %v582_v61 = vrot.slane %v581_v44, 2 }
 0x12a   :  { %v653_v0 = vadd.f32 %v643_v59, %v1175_v39  ;;  %v596_v3 = vadd.f32 %v595_v47, %v594_v31  ;;  %v577_v2 = vrot.slane %v576_v57, 1  ;;  %v602_v11 = vrot.slane %v601_v58, 2 }
 0x12b   :  { %v709_v62 = vadd.f32 %v708_v55, %v707_v45  ;;  %v750_v63 = vrot.slane %v749_v56, 4  ;;  %v882_v4 = vpack.c.bf16 %v655_v60, %v654_v26  ;;  %v701_v5 = vrot.slane %v655_v60, 2 }
 0x12c   :  { %v728_v6 = vmul.f32 %v655_v60, %v655_v60  ;;  %v881_v9 = vpack.c.bf16 %v653_v0, %v652_v24  ;;  %v697_v10 = vrot.slane %v653_v0, 2  ;;  %v726_v38 = vmul.f32 %v653_v0, %v653_v0 }
 0x12d   :  { %v710_v7 = vrot.slane %v709_v62, 2  ;;  %v751_v8 = vadd.f32 %v750_v63, %v749_v56  ;;  %v597_v15 = vrot.slane %v596_v3, 1  ;;  %v681_v16 = vrot.slane %v882_v4, 5 }
 0x12e   :  { %v743_v54 = vrot.slane %v728_v6, 2  ;;  %v678_v13 = vrot.slane %v881_v9, 5  ;;  %v698_v14 = vsel %vm539_vm1, %v696_v48, %v697_v10  ;;  %v702_v1 = vsel %vm539_vm1, %v697_v10, %v701_v5 }
 0x12f   :  { %v711_v12 = vadd.f32 %v710_v7, %v709_v62  ;;  %v752_v39 = vrot.slane %v751_v8, 2  ;;  %v739_v17 = vrot.slane %v726_v38, 2  ;;  %v578_v22 = vadd.f32 %v577_v2, %v576_v57 }
 0x130   :  { %v679_v19 = vsel %vm1213_vm4, %v876_v51, %v678_v13  ;;  %v680_v21 = vrot.slane %v678_v13, 4  ;;  %v714_v23 = vadd.f32 %v702_v1, %v698_v14  ;;  %v598_v31 = vadd.f32 %v597_v15, %v596_v3 }
 0x131   :  { %v712_v18 = vrot.slane %v711_v12, 1  ;;  %v753_v20 = vadd.f32 %v752_v39, %v751_v8  ;;  %685 = vst [vmem:[%s1238_s2 + $0x10] sm:$0xff] %v679_v19  ;;  %v740_v24 = vsel %vm539_vm1, %v738_v53, %v739_v17  ;;  %v744_v25 = vsel %vm539_vm1, %v739_v17, %v743_v54 }
 0x132   :  { %v682_v28 = vsel %vm1213_vm4, %v680_v21, %v681_v16  ;;  %v756_v29 = vadd.f32 %v744_v25, %v740_v24  ;;  %v715_v30 = vrot.slane %v714_v23, 4  ;;  %v583_v37 = vadd.f32 %v582_v61, %v581_v44 }
 0x133   :  { %v713_v26 = vadd.f32 %v712_v18, %v711_v12  ;;  %v754_v27 = vrot.slane %v753_v20, 1  ;;  %686 = vst [vmem:[%s1238_s2 + $0x18] sm:$0xff] %v682_v28  ;;  %v603_v41 = vadd.f32 %v602_v11, %v601_v58 }
 0x134   :  { %v757_v35 = vrot.slane %v756_v29, 4  ;;  %v716_v40 = vadd.f32 %v715_v30, %v714_v23  ;;  %v584_v46 = vrot.slane %v583_v37, 1 }
 0x135   :  { %v721_v32 = vadd.f32 %v713_v26, %v578_v22  ;;  %v755_v33 = vadd.f32 %v754_v27, %v753_v20  ;;  %v604_v48 = vrot.slane %v603_v41, 1 }
 0x136   :  { %v758_v43 = vadd.f32 %v757_v35, %v756_v29  ;;  %v717_v36 = vrot.slane %v716_v40, 2  ;;  %v585_v53 = vadd.f32 %v584_v46, %v583_v37 }
 0x137   :  { %v763_v42 = vadd.f32 %v755_v33, %v598_v31  ;;  %v605_v56 = vadd.f32 %v604_v48, %v603_v41 }
 0x138   :  { %v759_v45 = vrot.slane %v758_v43, 2  ;;  %v718_v47 = vadd.f32 %v717_v36, %v716_v40 }
 0x139   :  { %v766_v34 = vsel %vm765_vm5, %v721_v32, %v763_v42 }
 0x13a   :  { %v760_v49 = vadd.f32 %v759_v45, %v758_v43  ;;  %v719_v50 = vrot.slane %v718_v47, 1 }
 0x13c   :  { %v761_v51 = vrot.slane %v760_v49, 1  ;;  %v720_v55 = vadd.f32 %v719_v50, %v718_v47 }
 0x13e   :  { %v762_v57 = vadd.f32 %v761_v51, %v760_v49  ;;  %v722_v44 = vadd.f32 %v720_v55, %v585_v53 }
 0x140   :  { %v764_v59 = vadd.f32 %v762_v57, %v605_v56 }
 0x142   :  { %v767_v58 = vsel %vm765_vm5, %v722_v44, %v764_v59 }
 0x143   :  { %v770_v60 = vcombine.low %v766_v34, %v767_v58 }
 0x145   :  { %877 = vst.sshfl [vmem:[%s1239_s3] sm:$0x33 pattern:$0x76325410] %v770_v60 }

// kernel: tile.73
= control target key start
LH: loop header
LB: loop body
LE: loop exit
PB: predicated region body
PF: predicated region fallthrough
CT: control target
= control target key end

     0   :  { %s28_s0 = inlined_call_operand.vmem [shape: f32[16], index: 0, kind: input, shape index: {}]   ;;  %s29_s1 = inlined_call_operand.vmem [shape: f32[16,16], index: 1, kind: output, shape index: {}]  }
   0x1   :  { %v4_v0 = vld [vmem:[%s28_s0] ss:$0 sm:$0xff] }
   0x2   :  { %5 = vst [vmem:[%s29_s1] sm:$0xff] %v4_v0  ;;  %8 = vst [vmem:[%s29_s1 + $0x8] sm:$0xff] %v4_v0 }

// kernel: tile.74
= control target key start
LH: loop header
LB: loop body
LE: loop exit
PB: predicated region body
PF: predicated region fallthrough
CT: control target
= control target key end

     0   :  { %s7_s6 = smov 3  ;;  %s21_s9 = smov 3  ;;  %vm4_vm0 = vcmask 130048   ;;  %vm11_vm1 = vcmask 1048448   ;;  %vm18_vm2 = vcmask 917248   ;;  %vm25_vm3 = vcmask 786048   ;;  %s128_s0 = inlined_call_operand.vmem [shape: f32[16,16], index: 0, kind: input, shape index: {}]   ;;  %s129_s1 = inlined_call_operand.vmem [shape: f32[1,256], index: 1, kind: output, shape index: {}]  }
   0x1   :  { %v66_v0 = vld [vmem:[%s128_s0 + $0x7] ss:$8 sm:%s7_s6]   ;;  %s81_s10 = smov 112   ;;  %v68_v1 = vld [vmem:[%s128_s0 + $0x5] ss:$8 sm:%s21_s9]   ;;  %s14_s13 = smov 3 }
   0x2   :  { %9 = vrot.lane.b32.xlu0 %v66_v0, %s81_s10  ;;  %s82_s14 = smov 80   ;;  %v67_v2 = vld [vmem:[%s128_s0 + $0x6] ss:$8 sm:%s14_s13]   ;;  %s28_s17 = smov 3  ;;  %vm32_vm4 = vcmask 654848   ;;  %vm39_vm5 = vcmask 523648  }
   0x3   :  { %23 = vrot.lane.b32.xlu1 %v68_v1, %s82_s14  ;;  %v69_v3 = vld [vmem:[%s128_s0 + $0x4] ss:$8 sm:%s28_s17]   ;;  %s35_s20 = smov 3  ;;  %s42_s21 = smov 3  ;;  %vm46_vm6 = vcmask 392448   ;;  %vm53_vm7 = vcmask 261248  }
   0x4   :  { %s83_s22 = smov 96   ;;  %s84_s23 = smov 64   ;;  %v70_v4 = vld [vmem:[%s128_s0 + $0x3] ss:$8 sm:%s35_s20]   ;;  %v71_v5 = vld [vmem:[%s128_s0 + $0x2] ss:$8 sm:%s42_s21]  }
   0x5   :  { %s2_s26 = smov 3  ;;  %s49_s29 = smov 3 }
   0x6   :  { %16 = vrot.lane.b32.xlu0 %v67_v2, %s83_s22  ;;  %v3_v6 = vld [vmem:[%s128_s0] ss:$8 sm:%s2_s26]   ;;  %s85_s3 = smov 48   ;;  %s86_s4 = smov 32  }
   0x7   :  { %30 = vrot.lane.b32.xlu1 %v69_v3, %s84_s23  ;;  %5 = vst.msk [vmem:[#allocation0] ss:$8 sm:$0x3] %vm4_vm0, %v3_v6   ;;  %v72_v7 = vld [vmem:[%s128_s0 + $0x1] ss:$8 sm:%s49_s29]   ;;  %s87_s0 = smov 16  }
   0xa   :  { %37 = vrot.lane.b32.xlu0 %v70_v4, %s85_s3 }
   0xb   :  { %44 = vrot.lane.b32.xlu1 %v71_v5, %s86_s4 }
   0xe   :  { %51 = vrot.lane.b32.xlu0 %v72_v7, %s87_s0 }
  0x74   :  { %v10_v8 = vpop.permute.xlu0 %9  }
  0x75   :  { %12 = vst.msk [vmem:[#allocation0] ss:$8 sm:$0x3] %vm11_vm1, %v10_v8   ;;  %v24_v9 = vpop.permute.xlu1 %23  }
  0x78   :  { %v17_v10 = vpop.permute.xlu0 %16  }
  0x79   :  { %19 = vst.msk [vmem:[#allocation0] ss:$8 sm:$0x3] %vm18_vm2, %v17_v10   ;;  %v31_v11 = vpop.permute.xlu1 %30  }
  0x7a   :  { %26 = vst.msk [vmem:[#allocation0] ss:$8 sm:$0x3] %vm25_vm3, %v24_v9  }
  0x7b   :  { %33 = vst.msk [vmem:[#allocation0] ss:$8 sm:$0x3] %vm32_vm4, %v31_v11  }
  0x7c   :  { %v38_v12 = vpop.permute.xlu0 %37  }
  0x7d   :  { %40 = vst.msk [vmem:[#allocation0] ss:$8 sm:$0x3] %vm39_vm5, %v38_v12   ;;  %v45_v13 = vpop.permute.xlu1 %44  }
  0x7e   :  { %47 = vst.msk [vmem:[#allocation0] ss:$8 sm:$0x3] %vm46_vm6, %v45_v13  }
  0x80   :  { %v52_v14 = vpop.permute.xlu0 %51  }
  0x81   :  { %54 = vst.msk [vmem:[#allocation0] ss:$8 sm:$0x3] %vm53_vm7, %v52_v14  }
  0x88   :  { %v58_v15 = vld [vmem:[#allocation0] sm:$0x1]  ;;  %v62_v16 = vld [vmem:[#allocation0 + $0x8] sm:$0x1] }
  0x89   :  { %60 = vst [vmem:[%s129_s1] sm:$0x1] %v58_v15  ;;  %73 = vst [vmem:[%s129_s1 + $0x1] sm:$0x1] %v62_v16 }

// kernel: _lambda_.15
= control target key start
LH: loop header
LB: loop body
LE: loop exit
PB: predicated region body
PF: predicated region fallthrough
CT: control target
= control target key end

     0   :  { %s319_s12 = smov 0   ;;  %s342_s0 = inlined_call_operand.vmem [shape: bf16[32,256], index: 0, kind: input, shape index: {}]   ;;  %s343_s1 = inlined_call_operand.vmem [shape: f32[1,256], index: 1, kind: input, shape index: {}]   ;;  %s344_s2 = inlined_call_operand.vmem [shape: f32[1,256], index: 2, kind: input, shape index: {}]   ;;  %s345_s3 = inlined_call_operand.vmem [shape: bf16[32,256], index: 3, kind: output, shape index: {}]  }
   0x1 LB: > { %s268_s13 = sadd.s32 4294967295, %s297_s12   ;;  %p272_p0 = scmp.ge.s32.totalorder %s297_s12, 1  ;;  %s297_s12 = sphi %s319_s12, %s13_s12  }
   0x2   : > { %p137_p1 = scmp.lt.s32.totalorder %s297_s12, 5 }
   0x4   : > { %p138_p2 = pnand %p272_p0, %p137_p1 }
   0x5   : > { %p161_p3 = scmp.lt.s32.totalorder (!%p138_p2), %s268_s13, 3  ;;  %v176_v0 = vlaneseq (!%p138_p2)  ;;  %v174_v2 = vld [vmem:[%s343_s1] sm:$0x3] (!%p138_p2) }
   0x6   : > { %141 = sbr.rel (%p138_p2) target bundleno = 28 (0x1c), region = 32  ;;  %v188_v5 = vld [vmem:[%s344_s2] sm:$0x3] (!%p138_p2) }
   0x7   : > { %v177_v1 = vshrl.u32 (!%p138_p2), %v176_v0, 7 }
   0x9   : > { %v178_v3 = vsub.s32 (!%p138_p2), 0, %v177_v1  ;;  %v182_v4 = vsub.s32 (!%p138_p2), 1, %v177_v1 }
   0xb   : > { %v179_v7 = vrot.slane (!%p138_p2), %v174_v2, %v178_v3  ;;  %v183_v8 = vrot.slane (!%p138_p2), %v174_v2, %v182_v4  ;;  %v193_v11 = vrot.slane (!%p138_p2), %v188_v5, %v178_v3  ;;  %v197_v12 = vrot.slane (!%p138_p2), %v188_v5, %v182_v4 }
   0xd   : > { %s347_s13 = smov (!%p161_p3, %s268_s13), 3 }
   0xe   : > { %s280_s16 = sshll.u32 %s347_s13, 3 }
   0xf   : > { %s165_s21 = scalar_lea.vmem %s342_s0, %s280_s16  ;;  %s170_s24 = scalar_lea.vmem %s345_s3, %s280_s16 }
  0x10   : > { %v171_v6 = vld [vmem:[%s165_s21] sm:$0xff] }
  0x11   : > { %v172_v9 = vunpack.c.l.bf16 %v171_v6  ;;  %v173_v10 = vunpack.c.h.bf16 %v171_v6 }
  0x13   : > { %v186_v13 = vmul.f32 %v179_v7, %v172_v9  ;;  %v187_v14 = vmul.f32 %v183_v8, %v173_v10 }
  0x15   : > { %v200_v15 = vadd.f32 %v193_v11, %v186_v13  ;;  %v201_v16 = vadd.f32 %v197_v12, %v187_v14 }
  0x17   : > { %v202_v17 = vmax.f32 %v200_v15, 0.0  ;;  %v203_v18 = vmax.f32 %v201_v16, 0.0 }
  0x19   : > { %v282_v19 = vpack.c.bf16 %v203_v18, %v202_v17 }
  0x1b   : > { %212 = vst [vmem:[%s170_s24] sm:$0xff] %v282_v19 }
  0x1c PF: > { %s13_s12 = sadd.s32 1, %s297_s12  }
  0x1d   : > { %p10_p4 = scmp.ge.s32.totalorder %s13_s12, 6  }
  0x1f   :  { %12 = sbr.rel (!%p10_p4) target bundleno = 1 (0x1), region = 62 }

// kernel: _lambda_.16
= control target key start
LH: loop header
LB: loop body
LE: loop exit
PB: predicated region body
PF: predicated region fallthrough
CT: control target
= control target key end

     0   :  { %v2100_v1 = vmov 0   ;;  %vm1330_vm0 = vcmask 1045504   ;;  %vm1305_vm1 = vcmask 1046528   ;;  %vm1464_vm2 = vcmask 1042432   ;;  %s2740_s1 = inlined_call_operand.vmem [shape: bf16[3,384,256], index: 1, kind: input, shape index: {}]   ;;  %s2741_s0 = inlined_call_operand.vmem [shape: bf16[36,384], index: 0, kind: input, shape index: {}]   ;;  %s2742_s2 = inlined_call_operand.vmem [shape: bf16[32,256], index: 2, kind: output, shape index: {0}]   ;;  %s2743_s3 = inlined_call_operand.vmem [shape: f32[1,2,256], index: 3, kind: output, shape index: {1}]  }
   0x1   :  { %v1873_v0 = vld [vmem:[%s2740_s1 + $0x4] ss:$8 sps:$4 sm:$0xff]   ;;  %448 = vmatprep.mubr.bf16.mxu0 %v2100_v1  ;;  %v1877_v3 = vld [vmem:[%s2740_s1] ss:$8 sps:$4 sm:$0xff]   ;;  %v1879_v5 = vld [vmem:[%s2740_s1 + $0x14] ss:$8 sps:$4 sm:$0xff]  }
   0x2   :  { %v1875_v2 = vld [vmem:[%s2740_s1 + $0x104] ss:$8 sps:$4 sm:$0xff]   ;;  %355 = vmatprep.subr.bf16.mxu1 %v1873_v0  ;;  %v1878_v4 = vld [vmem:[%s2740_s1 + $0x100] ss:$8 sps:$4 sm:$0xff]   ;;  %v1881_v6 = vld [vmem:[%s2740_s1 + $0x114] ss:$8 sps:$4 sm:$0xff]  }
   0x3   :  { %416 = vmatprep.subr.bf16.mxu0 %v1875_v2  ;;  %356 = vmatpush1.bf16.msra.mxu1 %v1877_v3  ;;  %v1883_v7 = vld [vmem:[%s2740_s1 + $0x10] ss:$8 sps:$4 sm:$0xff]   ;;  %v1885_v9 = vld [vmem:[%s2740_s1 + $0x24] ss:$8 sps:$4 sm:$0xff]   ;;  %v1889_v11 = vld [vmem:[%s2740_s1 + $0x20] ss:$8 sps:$4 sm:$0xff]  }
   0x4   :  { %417 = vmatpush1.bf16.msra.mxu0 %v1878_v4  ;;  %357 = vmatprep.subr.bf16.mxu1 %v1879_v5  ;;  %v1884_v8 = vld [vmem:[%s2740_s1 + $0x110] ss:$8 sps:$4 sm:$0xff]   ;;  %v1887_v10 = vld [vmem:[%s2740_s1 + $0x124] ss:$8 sps:$4 sm:$0xff]   ;;  %v1890_v12 = vld [vmem:[%s2740_s1 + $0x120] ss:$8 sps:$4 sm:$0xff]  }
   0x5   :  { %418 = vmatprep.subr.bf16.mxu0 %v1881_v6  ;;  %v1891_v13 = vld [vmem:[%s2740_s1 + $0x34] ss:$8 sps:$4 sm:$0xff]   ;;  %v1895_v15 = vld [vmem:[%s2740_s1 + $0x30] ss:$8 sps:$4 sm:$0xff]   ;;  %v1897_v17 = vld [vmem:[%s2740_s1 + $0x44] ss:$8 sps:$4 sm:$0xff]  }
   0x6   :  { %v1893_v14 = vld [vmem:[%s2740_s1 + $0x134] ss:$8 sps:$4 sm:$0xff]   ;;  %v1896_v16 = vld [vmem:[%s2740_s1 + $0x130] ss:$8 sps:$4 sm:$0xff]   ;;  %v1899_v18 = vld [vmem:[%s2740_s1 + $0x144] ss:$8 sps:$4 sm:$0xff]  }
   0x7   :  { %358 = vmatpush1.bf16.msra.mxu1 %v1883_v7  ;;  %v1901_v19 = vld [vmem:[%s2740_s1 + $0x40] ss:$8 sps:$4 sm:$0xff]   ;;  %v1903_v21 = vld [vmem:[%s2740_s1 + $0x54] ss:$8 sps:$4 sm:$0xff]   ;;  %v1907_v23 = vld [vmem:[%s2740_s1 + $0x50] ss:$8 sps:$4 sm:$0xff]  }
   0x8   :  { %419 = vmatpush1.bf16.msra.mxu0 %v1884_v8  ;;  %359 = vmatprep.subr.bf16.mxu1 %v1885_v9  ;;  %v1902_v20 = vld [vmem:[%s2740_s1 + $0x140] ss:$8 sps:$4 sm:$0xff]   ;;  %v1905_v22 = vld [vmem:[%s2740_s1 + $0x154] ss:$8 sps:$4 sm:$0xff]   ;;  %v1908_v24 = vld [vmem:[%s2740_s1 + $0x150] ss:$8 sps:$4 sm:$0xff]  }
   0x9   :  { %420 = vmatprep.subr.bf16.mxu0 %v1887_v10  ;;  %v1909_v25 = vld [vmem:[%s2740_s1 + $0x64] ss:$8 sps:$4 sm:$0xff]   ;;  %v1913_v27 = vld [vmem:[%s2740_s1 + $0x60] ss:$8 sps:$4 sm:$0xff]   ;;  %v1915_v29 = vld [vmem:[%s2740_s1 + $0x74] ss:$8 sps:$4 sm:$0xff]  }
   0xa   :  { %v1911_v26 = vld [vmem:[%s2740_s1 + $0x164] ss:$8 sps:$4 sm:$0xff]   ;;  %v1914_v28 = vld [vmem:[%s2740_s1 + $0x160] ss:$8 sps:$4 sm:$0xff]   ;;  %v1917_v30 = vld [vmem:[%s2740_s1 + $0x174] ss:$8 sps:$4 sm:$0xff]  }
   0xb   :  { %360 = vmatpush1.bf16.msra.mxu1 %v1889_v11  ;;  %v1919_v31 = vld [vmem:[%s2740_s1 + $0x70] ss:$8 sps:$4 sm:$0xff]   ;;  %v1921_v33 = vld [vmem:[%s2740_s1 + $0x84] ss:$8 sps:$4 sm:$0xff]   ;;  %v2227_v35 = vld [vmem:[%s2741_s0 + $0x8] ss:$12 sps:$4 sm:$0xff]  }
   0xc   :  { %421 = vmatpush1.bf16.msra.mxu0 %v1890_v12  ;;  %361 = vmatprep.subr.bf16.mxu1 %v1891_v13  ;;  %v1920_v32 = vld [vmem:[%s2740_s1 + $0x170] ss:$8 sps:$4 sm:$0xff]   ;;  %v1925_v34 = vld [vmem:[%s2740_s1 + $0x304] ss:$8 sps:$4 sm:$0xff]   ;;  %v1923_v36 = vld [vmem:[%s2740_s1 + $0x300] ss:$8 sps:$4 sm:$0xff]  }
   0xd   :  { %422 = vmatprep.subr.bf16.mxu0 %v1893_v14  ;;  %v1926_v37 = vld [vmem:[%s2740_s1 + $0x80] ss:$8 sps:$4 sm:$0xff]   ;;  %v1928_v38 = vld [vmem:[%s2740_s1 + $0x94] ss:$8 sps:$4 sm:$0xff]   ;;  %v1930_v40 = vld [vmem:[%s2740_s1 + $0x310] ss:$8 sps:$4 sm:$0xff]  }
   0xe   :  { %v1932_v39 = vld [vmem:[%s2740_s1 + $0x314] ss:$8 sps:$4 sm:$0xff]   ;;  %v1933_v41 = vld [vmem:[%s2740_s1 + $0x90] ss:$8 sps:$4 sm:$0xff]   ;;  %v1934_v42 = vld [vmem:[%s2740_s1 + $0xa4] ss:$8 sps:$4 sm:$0xff]  }
   0xf   :  { %362 = vmatpush1.bf16.msra.mxu1 %v1895_v15  ;;  %v1938_v43 = vld [vmem:[%s2740_s1 + $0x324] ss:$8 sps:$4 sm:$0xff]   ;;  %v1936_v44 = vld [vmem:[%s2740_s1 + $0x320] ss:$8 sps:$4 sm:$0xff]   ;;  %v1940_v46 = vld [vmem:[%s2740_s1 + $0xb4] ss:$8 sps:$4 sm:$0xff]  }
  0x10   :  { %423 = vmatpush1.bf16.msra.mxu0 %v1896_v16  ;;  %363 = vmatprep.subr.bf16.mxu1 %v1897_v17  ;;  %v1939_v45 = vld [vmem:[%s2740_s1 + $0xa0] ss:$8 sps:$4 sm:$0xff]   ;;  %v1944_v47 = vld [vmem:[%s2740_s1 + $0x334] ss:$8 sps:$4 sm:$0xff]   ;;  %v1942_v48 = vld [vmem:[%s2740_s1 + $0x330] ss:$8 sps:$4 sm:$0xff]  }
  0x11   :  { %424 = vmatprep.subr.bf16.mxu0 %v1899_v18  ;;  %v1945_v49 = vld [vmem:[%s2740_s1 + $0xb0] ss:$8 sps:$4 sm:$0xff]   ;;  %v1946_v50 = vld [vmem:[%s2740_s1 + $0xc4] ss:$8 sps:$4 sm:$0xff]   ;;  %v1948_v53 = vld [vmem:[%s2740_s1 + $0x340] ss:$8 sps:$4 sm:$0xff]  }
  0x12   :  { %v2279_v51 = vld [vmem:[%s2741_s0 + $0x4] ss:$12 sps:$4 sm:$0xff]   ;;  %v1951_v54 = vld [vmem:[%s2740_s1 + $0xc0] ss:$8 sps:$4 sm:$0xff]   ;;  %v1952_v55 = vld [vmem:[%s2740_s1 + $0xd4] ss:$8 sps:$4 sm:$0xff]  }
  0x13   :  { %364 = vmatpush1.bf16.msra.mxu1 %v1901_v19  ;;  %v1950_v52 = vld [vmem:[%s2740_s1 + $0x344] ss:$8 sps:$4 sm:$0xff]   ;;  %387 = vmatprep.mubr.bf16.mxu1 %v2279_v51  ;;  %v1956_v56 = vld [vmem:[%s2740_s1 + $0x354] ss:$8 sps:$4 sm:$0xff]   ;;  %v1954_v57 = vld [vmem:[%s2740_s1 + $0x350] ss:$8 sps:$4 sm:$0xff]  }
  0x14   :  { %425 = vmatpush1.bf16.msra.mxu0 %v1902_v20  ;;  %365 = vmatprep.subr.bf16.mxu1 %v1903_v21  ;;  %v1957_v58 = vld [vmem:[%s2740_s1 + $0xd0] ss:$8 sps:$4 sm:$0xff]   ;;  %v1958_v59 = vld [vmem:[%s2740_s1 + $0xe4] ss:$8 sps:$4 sm:$0xff]   ;;  %v1960_v61 = vld [vmem:[%s2740_s1 + $0x360] ss:$8 sps:$4 sm:$0xff]  }
  0x15   :  { %426 = vmatprep.subr.bf16.mxu0 %v1905_v22  ;;  %v1962_v60 = vld [vmem:[%s2740_s1 + $0x364] ss:$8 sps:$4 sm:$0xff]   ;;  %v1963_v62 = vld [vmem:[%s2740_s1 + $0xe0] ss:$8 sps:$4 sm:$0xff]   ;;  %v1964_v63 = vld [vmem:[%s2740_s1 + $0xf4] ss:$8 sps:$4 sm:$0xff]  }
  0x16   :  { %v1968_v0 = vld [vmem:[%s2740_s1 + $0x374] ss:$8 sps:$4 sm:$0xff]   ;;  %v2324_v2 = vld [vmem:[%s2741_s0 + $0x20] ss:$12 sps:$4 sm:$0xff]   ;;  %v1966_v3 = vld [vmem:[%s2740_s1 + $0x370] ss:$8 sps:$4 sm:$0xff]  }
  0x17   :  { %366 = vmatpush1.bf16.msra.mxu1 %v1907_v23  ;;  %v1969_v4 = vld [vmem:[%s2740_s1 + $0xf0] ss:$8 sps:$4 sm:$0xff]   ;;  %v1975_v5 = vld [vmem:[%s2740_s1 + $0x184] ss:$8 sps:$4 sm:$0xff]   ;;  %v1973_v8 = vld [vmem:[%s2740_s1 + $0x180] ss:$8 sps:$4 sm:$0xff]  }
  0x18   :  { %427 = vmatpush1.bf16.msra.mxu0 %v1908_v24  ;;  %367 = vmatprep.subr.bf16.mxu1 %v1909_v25  ;;  %v1978_v6 = vld [vmem:[%s2740_s1 + $0x384] ss:$8 sps:$4 sm:$0xff]   ;;  %v1976_v9 = vld [vmem:[%s2740_s1 + $0x380] ss:$8 sps:$4 sm:$0xff]   ;;  %v1981_v10 = vld [vmem:[%s2740_s1 + $0x194] ss:$8 sps:$4 sm:$0xff]  }
  0x19   :  { %428 = vmatprep.subr.bf16.mxu0 %v1911_v26  ;;  %v2341_v7 = vld [vmem:[%s2741_s0] ss:$12 sps:$4 sm:$0xff]   ;;  %v1984_v11 = vld [vmem:[%s2740_s1 + $0x394] ss:$8 sps:$4 sm:$0xff]   ;;  %v1979_v13 = vld [vmem:[%s2740_s1 + $0x190] ss:$8 sps:$4 sm:$0xff]  }
  0x1a   :  { %v2360_v12 = vld [vmem:[%s2741_s0 + $0x38] ss:$0 sps:$4 sm:$0x33]   ;;  %v1987_v15 = vld [vmem:[%s2740_s1 + $0x1a4] ss:$8 sps:$4 sm:$0xff]   ;;  %vm1465_vm3 = vcmask 1046532  }
  0x1b   :  { %368 = vmatpush1.bf16.msra.mxu1 %v1913_v27  ;;  %v1982_v14 = vld [vmem:[%s2740_s1 + $0x390] ss:$8 sps:$4 sm:$0xff]   ;;  %v1990_v16 = vld [vmem:[%s2740_s1 + $0x3a4] ss:$8 sps:$4 sm:$0xff]   ;;  %v1985_v17 = vld [vmem:[%s2740_s1 + $0x1a0] ss:$8 sps:$4 sm:$0xff]  }
  0x1c   :  { %429 = vmatpush1.bf16.msra.mxu0 %v1914_v28  ;;  %369 = vmatprep.subr.bf16.mxu1 %v1915_v29  ;;  %v1988_v18 = vld [vmem:[%s2740_s1 + $0x3a0] ss:$8 sps:$4 sm:$0xff]   ;;  %v1993_v19 = vld [vmem:[%s2740_s1 + $0x1b4] ss:$8 sps:$4 sm:$0xff]   ;;  %v1991_v21 = vld [vmem:[%s2740_s1 + $0x1b0] ss:$8 sps:$4 sm:$0xff]  }
  0x1d   :  { %430 = vmatprep.subr.bf16.mxu0 %v1917_v30  ;;  %v1996_v20 = vld [vmem:[%s2740_s1 + $0x3b4] ss:$8 sps:$4 sm:$0xff]   ;;  %v1994_v22 = vld [vmem:[%s2740_s1 + $0x3b0] ss:$8 sps:$4 sm:$0xff]   ;;  %v1999_v23 = vld [vmem:[%s2740_s1 + $0x1c4] ss:$8 sps:$4 sm:$0xff]  }
  0x1e   :  { %v2002_v24 = vld [vmem:[%s2740_s1 + $0x3c4] ss:$8 sps:$4 sm:$0xff]   ;;  %v1997_v25 = vld [vmem:[%s2740_s1 + $0x1c0] ss:$8 sps:$4 sm:$0xff]   ;;  %v2006_v29 = vld [vmem:[%s2740_s1 + $0x1d4] ss:$8 sps:$4 sm:$0xff]  }
  0x1f   :  { %370 = vmatpush1.bf16.msra.mxu1 %v1919_v31  ;;  %v2000_v26 = vld [vmem:[%s2740_s1 + $0x3c0] ss:$8 sps:$4 sm:$0xff]   ;;  %v2415_v28 = vld [vmem:[%s2741_s0 + $0x18] ss:$12 sps:$4 sm:$0xff]   ;;  %v2009_v30 = vld [vmem:[%s2740_s1 + $0x3d4] ss:$8 sps:$4 sm:$0xff]  }
  0x20   :  { %431 = vmatpush1.bf16.msra.mxu0 %v1920_v32  ;;  %371 = vmatprep.subr.bf16.mxu1 %v1921_v33  ;;  %v2410_v27 = vld [vmem:[%s2741_s0 + $0x1c] ss:$12 sps:$4 sm:$0xff]   ;;  %v2004_v31 = vld [vmem:[%s2740_s1 + $0x1d0] ss:$8 sps:$4 sm:$0xff]   ;;  %v2012_v33 = vld [vmem:[%s2740_s1 + $0x1e4] ss:$8 sps:$4 sm:$0xff]  }
  0x21   :  { %1177 = vmatprep.subr.bf16.mxu0 %v1925_v34  ;;  %v2007_v32 = vld [vmem:[%s2740_s1 + $0x3d0] ss:$8 sps:$4 sm:$0xff]   ;;  %v2015_v34 = vld [vmem:[%s2740_s1 + $0x3e4] ss:$8 sps:$4 sm:$0xff]   ;;  %vm2718_vm4 = vmor %vm1464_vm2, %vm1465_vm3  ;;  %vm1556_vm5 = vcmask 1040384  }
  0x23   :  { %449 = vmatmul.mubr.bf16.vlgmr.msra.gmra.mrb[0].mxu0 %v2227_v35  ;;  %372 = vmatpush1.bf16.msra.mxu1 %v1926_v37 }
  0x24   :  { %1178 = vmatpush1.bf16.msra.mxu0 %v1923_v36  ;;  %373 = vmatprep.subr.bf16.mxu1 %v1928_v38  ;;  %v22_v36 = vld [vmem:[%s2741_s0 + $0x30] sm:$0x33]  ;;  %v2010_v38 = vld [vmem:[%s2740_s1 + $0x1e0] ss:$8 sps:$4 sm:$0xff]  }
  0x25   :  { %1179 = vmatprep.subr.bf16.mxu0 %v1932_v39  ;;  %458 = vmatprep.mubr.bf16.mxu0 %v2100_v1  ;;  %v2440_v37 = vcombine.high %v22_v36, %v22_v36  ;;  %v2445_v39 = vcombine.low %v22_v36, %v22_v36 }
  0x27   :  { %374 = vmatpush1.bf16.msra.mxu1 %v1933_v41  ;;  %v2019_v41 = vld [vmem:[%s2740_s1 + $0x1f4] ss:$8 sps:$4 sm:$0xff]  }
  0x28   :  { %1180 = vmatpush1.bf16.msra.mxu0 %v1930_v40  ;;  %375 = vmatprep.subr.bf16.mxu1 %v1934_v42  ;;  %v2013_v40 = vld [vmem:[%s2740_s1 + $0x3e0] ss:$8 sps:$4 sm:$0xff]   ;;  %v2022_v42 = vld [vmem:[%s2740_s1 + $0x3f4] ss:$8 sps:$4 sm:$0xff]  }
  0x29   :  { %1181 = vmatprep.subr.bf16.mxu0 %v1938_v43  ;;  %v2017_v43 = vld [vmem:[%s2740_s1 + $0x1f0] ss:$8 sps:$4 sm:$0xff]  }
  0x2b   :  { %376 = vmatpush1.bf16.msra.mxu1 %v1939_v45  ;;  %459 = vmatmul.mubr.bf16.gmra.mrb[4].mxu0 %v2324_v2  ;;  %v2025_v45 = vld [vmem:[%s2740_s1 + $0x204] ss:$8 sps:$4 sm:$0xff]  }
  0x2c   :  { %1182 = vmatpush1.bf16.msra.mxu0 %v1936_v44  ;;  %377 = vmatprep.subr.bf16.mxu1 %v1940_v46  ;;  %v2020_v44 = vld [vmem:[%s2740_s1 + $0x3f0] ss:$8 sps:$4 sm:$0xff]   ;;  %v2028_v46 = vld [vmem:[%s2740_s1 + $0x404] ss:$8 sps:$4 sm:$0xff]  }
  0x2d   :  { %1183 = vmatprep.subr.bf16.mxu0 %v1944_v47  ;;  %468 = vmatprep.mubr.bf16.mxu0 %v2100_v1  ;;  %v2023_v47 = vld [vmem:[%s2740_s1 + $0x200] ss:$8 sps:$4 sm:$0xff]  }
  0x2f   :  { %378 = vmatpush1.bf16.msra.mxu1 %v1945_v49  ;;  %v2031_v49 = vld [vmem:[%s2740_s1 + $0x214] ss:$8 sps:$4 sm:$0xff]  }
  0x30   :  { %1184 = vmatpush1.bf16.msra.mxu0 %v1942_v48  ;;  %379 = vmatprep.subr.bf16.mxu1 %v1946_v50  ;;  %v2026_v48 = vld [vmem:[%s2740_s1 + $0x400] ss:$8 sps:$4 sm:$0xff]   ;;  %v2034_v50 = vld [vmem:[%s2740_s1 + $0x414] ss:$8 sps:$4 sm:$0xff]  }
  0x31   :  { %1185 = vmatprep.subr.bf16.mxu0 %v1950_v52  ;;  %v2032_v52 = vld [vmem:[%s2740_s1 + $0x410] ss:$8 sps:$4 sm:$0xff]  }
  0x33   :  { %380 = vmatpush1.bf16.msra.mxu1 %v1951_v54  ;;  %469 = vmatmul.mubr.bf16.gmra.mrb[8].mxu0 %v2360_v12  ;;  %v2040_v54 = vld [vmem:[%s2740_s1 + $0x424] ss:$8 sps:$4 sm:$0xff]  }
  0x34   :  { %1186 = vmatpush1.bf16.msra.mxu0 %v1948_v53  ;;  %381 = vmatprep.subr.bf16.mxu1 %v1952_v55  ;;  %v2037_v53 = vld [vmem:[%s2740_s1 + $0x224] ss:$8 sps:$4 sm:$0xff]   ;;  %v2035_v55 = vld [vmem:[%s2740_s1 + $0x220] ss:$8 sps:$4 sm:$0xff]  }
  0x35   :  { %1187 = vmatprep.subr.bf16.mxu0 %v1956_v56  ;;  %1209 = vmatprep.mubr.bf16.mxu0 %v2279_v51  ;;  %v2038_v56 = vld [vmem:[%s2740_s1 + $0x420] ss:$8 sps:$4 sm:$0xff]  }
  0x37   :  { %382 = vmatpush1.bf16.msra.mxu1 %v1957_v58  ;;  %v2046_v58 = vld [vmem:[%s2740_s1 + $0x434] ss:$8 sps:$4 sm:$0xff]  }
  0x38   :  { %1188 = vmatpush1.bf16.msra.mxu0 %v1954_v57  ;;  %383 = vmatprep.subr.bf16.mxu1 %v1958_v59  ;;  %v2043_v57 = vld [vmem:[%s2740_s1 + $0x234] ss:$8 sps:$4 sm:$0xff]   ;;  %v2041_v59 = vld [vmem:[%s2740_s1 + $0x230] ss:$8 sps:$4 sm:$0xff]  }
  0x39   :  { %1189 = vmatprep.subr.bf16.mxu0 %v1962_v60  ;;  %v2044_v60 = vld [vmem:[%s2740_s1 + $0x430] ss:$8 sps:$4 sm:$0xff]  }
  0x3b   :  { %384 = vmatpush1.bf16.msra.mxu1 %v1963_v62  ;;  %v2055_v62 = vld [vmem:[%s2740_s1 + $0x444] ss:$8 sps:$4 sm:$0xff]  }
  0x3c   :  { %1190 = vmatpush1.bf16.msra.mxu0 %v1960_v61  ;;  %385 = vmatprep.subr.bf16.mxu1 %v1964_v63  ;;  %v2052_v61 = vld [vmem:[%s2740_s1 + $0x244] ss:$8 sps:$4 sm:$0xff]   ;;  %v2050_v63 = vld [vmem:[%s2740_s1 + $0x240] ss:$8 sps:$4 sm:$0xff]  }
  0x3d   :  { %1191 = vmatprep.subr.bf16.mxu0 %v1968_v0  ;;  %v2053_v0 = vld [vmem:[%s2740_s1 + $0x440] ss:$8 sps:$4 sm:$0xff]  }
  0x3f   :  { %386 = vmatpush1.bf16.msra.mxu1 %v1969_v4  ;;  %v2061_v4 = vld [vmem:[%s2740_s1 + $0x454] ss:$8 sps:$4 sm:$0xff]  }
  0x40   :  { %1192 = vmatpush1.bf16.msra.mxu0 %v1966_v3  ;;  %766 = vmatprep.subr.bf16.mxu1 %v1975_v5  ;;  %v2058_v3 = vld [vmem:[%s2740_s1 + $0x254] ss:$8 sps:$4 sm:$0xff]   ;;  %v2056_v5 = vld [vmem:[%s2740_s1 + $0x250] ss:$8 sps:$4 sm:$0xff]  }
  0x41   :  { %1193 = vmatprep.subr.bf16.mxu0 %v1978_v6  ;;  %v2059_v6 = vld [vmem:[%s2740_s1 + $0x450] ss:$8 sps:$4 sm:$0xff]  }
  0x42   :  { %388 = vmatmul.mubr.bf16.vlgmr.msra.gmra.mrb[0].mxu1 %v2341_v7 }
  0x43   :  { %767 = vmatpush1.bf16.msra.mxu1 %v1973_v8  ;;  %397 = vmatprep.mubr.bf16.mxu1 %v2410_v27  ;;  %v2066_v8 = vld [vmem:[%s2740_s1 + $0x264] ss:$8 sps:$4 sm:$0xff]  }
  0x44   :  { %1194 = vmatpush1.bf16.msra.mxu0 %v1976_v9  ;;  %768 = vmatprep.subr.bf16.mxu1 %v1981_v10  ;;  %v2069_v9 = vld [vmem:[%s2740_s1 + $0x464] ss:$8 sps:$4 sm:$0xff]   ;;  %v2064_v10 = vld [vmem:[%s2740_s1 + $0x260] ss:$8 sps:$4 sm:$0xff]  }
  0x45   :  { %1195 = vmatprep.subr.bf16.mxu0 %v1984_v11  ;;  %v2067_v11 = vld [vmem:[%s2740_s1 + $0x460] ss:$8 sps:$4 sm:$0xff]  }
  0x47   :  { %769 = vmatpush1.bf16.msra.mxu1 %v1979_v13  ;;  %v2072_v13 = vld [vmem:[%s2740_s1 + $0x274] ss:$8 sps:$4 sm:$0xff]  }
  0x48   :  { %1196 = vmatpush1.bf16.msra.mxu0 %v1982_v14  ;;  %770 = vmatprep.subr.bf16.mxu1 %v1987_v15  ;;  %v2075_v14 = vld [vmem:[%s2740_s1 + $0x474] ss:$8 sps:$4 sm:$0xff]   ;;  %v2070_v15 = vld [vmem:[%s2740_s1 + $0x270] ss:$8 sps:$4 sm:$0xff]  }
  0x49   :  { %1197 = vmatprep.subr.bf16.mxu0 %v1990_v16  ;;  %v2073_v16 = vld [vmem:[%s2740_s1 + $0x470] ss:$8 sps:$4 sm:$0xff]  }
  0x4a   :  { %398 = vmatmul.mubr.bf16.gmra.mrb[4].mxu1 %v2415_v28 }
  0x4b   :  { %771 = vmatpush1.bf16.msra.mxu1 %v1985_v17  ;;  %407 = vmatprep.mubr.bf16.mxu1 %v2440_v37  ;;  %v2078_v17 = vld [vmem:[%s2740_s1 + $0x284] ss:$8 sps:$4 sm:$0xff]  }
  0x4c   :  { %1198 = vmatpush1.bf16.msra.mxu0 %v1988_v18  ;;  %772 = vmatprep.subr.bf16.mxu1 %v1993_v19  ;;  %v2076_v18 = vld [vmem:[%s2740_s1 + $0x280] ss:$8 sps:$4 sm:$0xff]   ;;  %v2081_v19 = vld [vmem:[%s2740_s1 + $0x294] ss:$8 sps:$4 sm:$0xff]  }
  0x4d   :  { %1199 = vmatprep.subr.bf16.mxu0 %v1996_v20  ;;  %v2079_v20 = vld [vmem:[%s2740_s1 + $0x290] ss:$8 sps:$4 sm:$0xff]  }
  0x4f   :  { %773 = vmatpush1.bf16.msra.mxu1 %v1991_v21  ;;  %v2084_v21 = vld [vmem:[%s2740_s1 + $0x2a4] ss:$8 sps:$4 sm:$0xff]  }
  0x50   :  { %1200 = vmatpush1.bf16.msra.mxu0 %v1994_v22  ;;  %774 = vmatprep.subr.bf16.mxu1 %v1999_v23  ;;  %v2082_v22 = vld [vmem:[%s2740_s1 + $0x2a0] ss:$8 sps:$4 sm:$0xff]   ;;  %v2085_v23 = vld [vmem:[%s2740_s1 + $0x2b0] ss:$8 sps:$4 sm:$0xff]  }
  0x51   :  { %1201 = vmatprep.subr.bf16.mxu0 %v2002_v24  ;;  %v2090_v24 = vld [vmem:[%s2740_s1 + $0x2c4] ss:$8 sps:$4 sm:$0xff]  }
  0x52   :  { %408 = vmatmul.mubr.bf16.gmra.mrb[8].mxu1 %v2445_v39 }
  0x53   :  { %775 = vmatpush1.bf16.msra.mxu1 %v1997_v25  ;;  %798 = vmatprep.mubr.bf16.mxu1 %v2279_v51  ;;  %v2029_v51 = vld [vmem:[%s2740_s1 + $0x210] ss:$8 sps:$4 sm:$0xff]   ;;  %v2088_v25 = vld [vmem:[%s2740_s1 + $0x2c0] ss:$8 sps:$4 sm:$0xff]  }
  0x54   :  { %1202 = vmatpush1.bf16.msra.mxu0 %v2000_v26  ;;  %776 = vmatprep.subr.bf16.mxu1 %v2006_v29  ;;  %v2093_v26 = vld [vmem:[%s2740_s1 + $0x2d4] ss:$8 sps:$4 sm:$0xff]   ;;  %v2094_v29 = vld [vmem:[%s2740_s1 + $0x2e0] ss:$8 sps:$4 sm:$0xff]  }
  0x55   :  { %1203 = vmatprep.subr.bf16.mxu0 %v2009_v30  ;;  %v2099_v30 = vld [vmem:[%s2740_s1 + $0x2f4] ss:$8 sps:$4 sm:$0xff]  }
  0x57   :  { %777 = vmatpush1.bf16.msra.mxu1 %v2004_v31  ;;  %v2097_v31 = vld [vmem:[%s2740_s1 + $0x2f0] ss:$8 sps:$4 sm:$0xff]  }
  0x58   :  { %1204 = vmatpush1.bf16.msra.mxu0 %v2007_v32  ;;  %778 = vmatprep.subr.bf16.mxu1 %v2012_v33 }
  0x59   :  { %1205 = vmatprep.subr.bf16.mxu0 %v2015_v34 }
  0x5b   :  { %779 = vmatpush1.bf16.msra.mxu1 %v2010_v38 }
  0x5c   :  { %1206 = vmatpush1.bf16.msra.mxu0 %v2013_v40  ;;  %780 = vmatprep.subr.bf16.mxu1 %v2019_v41 }
  0x5d   :  { %1207 = vmatprep.subr.bf16.mxu0 %v2022_v42 }
  0x5f   :  { %781 = vmatpush1.bf16.msra.mxu1 %v2017_v43 }
  0x60   :  { %1208 = vmatpush1.bf16.msra.mxu0 %v2020_v44  ;;  %782 = vmatprep.subr.bf16.mxu1 %v2025_v45 }
  0x61   :  { %1238 = vmatprep.subr.bf16.mxu0 %v2028_v46 }
  0x63   :  { %1210 = vmatmul.mubr.bf16.vlgmr.msra.gmra.mrb[12].mxu0 %v2341_v7  ;;  %783 = vmatpush1.bf16.msra.mxu1 %v2023_v47 }
  0x64   :  { %1239 = vmatpush1.bf16.msra.mxu0 %v2026_v48  ;;  %784 = vmatprep.subr.bf16.mxu1 %v2031_v49 }
  0x65   :  { %1240 = vmatprep.subr.bf16.mxu0 %v2034_v50  ;;  %1219 = vmatprep.mubr.bf16.mxu0 %v2410_v27 }
  0x67   :  { %785 = vmatpush1.bf16.msra.mxu1 %v2029_v51 }
  0x68   :  { %1241 = vmatpush1.bf16.msra.mxu0 %v2032_v52  ;;  %786 = vmatprep.subr.bf16.mxu1 %v2037_v53 }
  0x69   :  { %1242 = vmatprep.subr.bf16.mxu0 %v2040_v54 }
  0x6b   :  { %1220 = vmatmul.mubr.bf16.gmra.mrb[16].mxu0 %v2415_v28  ;;  %787 = vmatpush1.bf16.msra.mxu1 %v2035_v55 }
  0x6c   :  { %1243 = vmatpush1.bf16.msra.mxu0 %v2038_v56  ;;  %788 = vmatprep.subr.bf16.mxu1 %v2043_v57 }
  0x6d   :  { %1244 = vmatprep.subr.bf16.mxu0 %v2046_v58  ;;  %1229 = vmatprep.mubr.bf16.mxu0 %v2440_v37 }
  0x6f   :  { %789 = vmatpush1.bf16.msra.mxu1 %v2041_v59 }
  0x70   :  { %1245 = vmatpush1.bf16.msra.mxu0 %v2044_v60  ;;  %790 = vmatprep.subr.bf16.mxu1 %v2052_v61 }
  0x71   :  { %1246 = vmatprep.subr.bf16.mxu0 %v2055_v62 }
  0x73   :  { %1230 = vmatmul.mubr.bf16.gmra.mrb[20].mxu0 %v2445_v39  ;;  %791 = vmatpush1.bf16.msra.mxu1 %v2050_v63 }
  0x74   :  { %1247 = vmatpush1.bf16.msra.mxu0 %v2053_v0  ;;  %792 = vmatprep.subr.bf16.mxu1 %v2058_v3 }
  0x75   :  { %1248 = vmatprep.subr.bf16.mxu0 %v2061_v4  ;;  %1270 = vmatprep.mubr.bf16.mxu0 %v2100_v1 }
  0x77   :  { %793 = vmatpush1.bf16.msra.mxu1 %v2056_v5 }
  0x78   :  { %1249 = vmatpush1.bf16.msra.mxu0 %v2059_v6  ;;  %794 = vmatprep.subr.bf16.mxu1 %v2066_v8 }
  0x79   :  { %1250 = vmatprep.subr.bf16.mxu0 %v2069_v9 }
  0x7b   :  { %795 = vmatpush1.bf16.msra.mxu1 %v2064_v10 }
  0x7c   :  { %1251 = vmatpush1.bf16.msra.mxu0 %v2067_v11  ;;  %796 = vmatprep.subr.bf16.mxu1 %v2072_v13 }
  0x7d   :  { %1252 = vmatprep.subr.bf16.mxu0 %v2075_v14 }
  0x7f   :  { %797 = vmatpush1.bf16.msra.mxu1 %v2070_v15 }
  0x80   :  { %1253 = vmatpush1.bf16.msra.mxu0 %v2073_v16  ;;  %827 = vmatprep.subr.bf16.mxu1 %v2078_v17 }
  0x82   :  { %799 = vmatmul.mubr.bf16.vlgmr.msra.gmra.mrb[12].mxu1 %v2341_v7  ;;  %v2087_v7 = vld [vmem:[%s2740_s1 + $0x2b4] ss:$8 sps:$4 sm:$0xff]  }
  0x83   :  { %1271 = vmatmul.mubr.bf16.vlgmr.msra.gmra.mrb[12].mxu0 %v2227_v35  ;;  %828 = vmatpush1.bf16.msra.mxu1 %v2076_v18 }
  0x84   :  { %1280 = vmatprep.mubr.bf16.mxu0 %v2100_v1  ;;  %829 = vmatprep.subr.bf16.mxu1 %v2081_v19 }
  0x85   :  { %808 = vmatprep.mubr.bf16.mxu1 %v2410_v27  ;;  %v2091_v27 = vld [vmem:[%s2740_s1 + $0x2d0] ss:$8 sps:$4 sm:$0xff]  }
  0x87   :  { %830 = vmatpush1.bf16.msra.mxu1 %v2079_v20 }
  0x88   :  { %831 = vmatprep.subr.bf16.mxu1 %v2084_v21 }
  0x8a   :  { %809 = vmatmul.mubr.bf16.gmra.mrb[16].mxu1 %v2415_v28  ;;  %v2096_v28 = vld [vmem:[%s2740_s1 + $0x2e4] ss:$8 sps:$4 sm:$0xff]  }
  0x8b   :  { %1281 = vmatmul.mubr.bf16.gmra.mrb[16].mxu0 %v2324_v2  ;;  %832 = vmatpush1.bf16.msra.mxu1 %v2082_v22 }
  0x8c   :  { %1290 = vmatprep.mubr.bf16.mxu0 %v2100_v1  ;;  %833 = vmatprep.subr.bf16.mxu1 %v2087_v7 }
  0x8d   :  { %818 = vmatprep.mubr.bf16.mxu1 %v2440_v37 }
  0x8f   :  { %834 = vmatpush1.bf16.msra.mxu1 %v2085_v23 }
  0x90   :  { %835 = vmatprep.subr.bf16.mxu1 %v2090_v24 }
  0x92   :  { %819 = vmatmul.mubr.bf16.gmra.mrb[20].mxu1 %v2445_v39 }
  0x93   :  { %1291 = vmatmul.mubr.bf16.gmra.mrb[20].mxu0 %v2360_v12  ;;  %836 = vmatpush1.bf16.msra.mxu1 %v2088_v25 }
  0x94   :  { %859 = vmatprep.mubr.bf16.mxu1 %v2100_v1  ;;  %837 = vmatprep.subr.bf16.mxu1 %v2093_v26 }
  0x97   :  { %838 = vmatpush1.bf16.msra.mxu1 %v2091_v27 }
  0x98   :  { %839 = vmatprep.subr.bf16.mxu1 %v2096_v28 }
  0x9b   :  { %840 = vmatpush1.bf16.msra.mxu1 %v2094_v29 }
  0x9c   :  { %841 = vmatprep.subr.bf16.mxu1 %v2099_v30 }
  0x9f   :  { %842 = vmatpush1.bf16.msra.mxu1 %v2097_v31 }
  0xa2   :  { %860 = vmatmul.mubr.bf16.vlgmr.msra.gmra.mrb[12].mxu1 %v2227_v35 }
  0xa3   :  { %869 = vmatprep.mubr.bf16.mxu1 %v2100_v1 }
  0xaa   :  { %870 = vmatmul.mubr.bf16.gmra.mrb[16].mxu1 %v2324_v2 }
  0xab   :  { %879 = vmatprep.mubr.bf16.mxu1 %v2100_v1 }
  0xb2   :  { %880 = vmatmul.mubr.bf16.gmra.mrb[20].mxu1 %v2360_v12 }
  0xf6   :  { %v450_v32 = vpop.f32.mrb[0].mxu0 }
  0xf7   :  { %v452_v33 = vpop.f32.mrb[1].mxu0 }
  0xf8   :  { %v454_v34 = vpop.f32.mrb[2].mxu0 }
  0xf9   :  { %v456_v36 = vpop.f32.mrb[3].mxu0 }
  0xfe   :  { %v460_v37 = vpop.f32.mrb[4].mxu0 }
  0xff   :  { %v462_v38 = vpop.f32.mrb[5].mxu0 }
 0x100   :  { %v464_v39 = vpop.f32.mrb[6].mxu0 }
 0x101   :  { %v466_v40 = vpop.f32.mrb[7].mxu0 }
 0x106   :  { %v470_v45 = vpop.f32.mrb[8].mxu0 }
 0x107   :  { %v472_v46 = vpop.f32.mrb[9].mxu0 }
 0x108   :  { %v474_v47 = vpop.f32.mrb[10].mxu0 }
 0x109   :  { %v475_v48 = vpop.f32.mrb[11].mxu0 }
 0x115   :  { %v389_v41 = vpop.f32.mrb[0].mxu1 }
 0x116   :  { %v2631_v42 = vadd.f32 %v450_v32, %v389_v41  ;;  %v391_v35 = vpop.f32.mrb[1].mxu1 }
 0x117   :  { %v2633_v43 = vadd.f32 %v452_v33, %v391_v35  ;;  %v393_v44 = vpop.f32.mrb[2].mxu1 }
 0x118   :  { %v2635_v2 = vadd.f32 %v454_v34, %v393_v44  ;;  %v395_v1 = vpop.f32.mrb[3].mxu1 }
 0x119   :  { %v2637_v12 = vadd.f32 %v456_v36, %v395_v1 }
 0x11d   :  { %v399_v49 = vpop.f32.mrb[4].mxu1 }
 0x11e   :  { %v2639_v50 = vadd.f32 %v460_v37, %v399_v49  ;;  %v401_v51 = vpop.f32.mrb[5].mxu1 }
 0x11f   :  { %v2641_v52 = vadd.f32 %v462_v38, %v401_v51  ;;  %v403_v53 = vpop.f32.mrb[6].mxu1 }
 0x120   :  { %v2643_v54 = vadd.f32 %v464_v39, %v403_v53  ;;  %v405_v55 = vpop.f32.mrb[7].mxu1 }
 0x121   :  { %v2645_v56 = vadd.f32 %v466_v40, %v405_v55 }
 0x125   :  { %v409_v57 = vpop.f32.mrb[8].mxu1 }
 0x126   :  { %v411_v58 = vpop.f32.mrb[9].mxu1  ;;  %v2647_v59 = vadd.f32 %v470_v45, %v409_v57 }
 0x127   :  { %v413_v60 = vpop.f32.mrb[10].mxu1  ;;  %v2649_v61 = vadd.f32 %v472_v46, %v411_v58 }
 0x128   :  { %v414_v62 = vpop.f32.mrb[11].mxu1 }
 0x156   :  { %v1272_v63 = vpop.f32.mrb[12].mxu0 }
 0x157   :  { %v1331_v0 = vrot.slane %v1272_v63, 2  ;;  %v1274_v3 = vpop.f32.mrb[13].mxu0 }
 0x158   :  { %v1334_v4 = vrot.slane %v1274_v3, 2  ;;  %v1276_v5 = vpop.f32.mrb[14].mxu0 }
 0x159   :  { %v1332_v6 = vrot.slane %v1276_v5, 2  ;;  %v1278_v8 = vpop.f32.mrb[15].mxu0 }
 0x15a   :  { %v1335_v9 = vrot.slane %v1278_v8, 2 }
 0x15b   :  { %v1333_v10 = vsel %vm1330_vm0, %v1331_v0, %v1332_v6 }
 0x15c   :  { %v1336_v11 = vsel %vm1330_vm0, %v1334_v4, %v1335_v9 }
 0x15e   :  { %v1282_v13 = vpop.f32.mrb[16].mxu0 }
 0x15f   :  { %v1337_v14 = vrot.slane %v1282_v13, 2  ;;  %v1284_v15 = vpop.f32.mrb[17].mxu0 }
 0x160   :  { %v1339_v16 = vrot.slane %v1284_v15, 2  ;;  %v1286_v17 = vpop.f32.mrb[18].mxu0 }
 0x161   :  { %v1338_v18 = vsel %vm1330_vm0, %v1332_v6, %v1337_v14  ;;  %v1427_v19 = vrot.slane %v1286_v17, 2  ;;  %v1288_v20 = vpop.f32.mrb[19].mxu0 }
 0x162   :  { %v1340_v21 = vsel %vm1330_vm0, %v1335_v9, %v1339_v16  ;;  %v1429_v22 = vrot.slane %v1288_v20, 2 }
 0x163   :  { %v1428_v7 = vsel %vm1330_vm0, %v1337_v14, %v1427_v19 }
 0x164   :  { %v1430_v23 = vsel %vm1330_vm0, %v1339_v16, %v1429_v22 }
 0x166   :  { %v2657_v24 = vpop.f32.mrb[20].mxu0 }
 0x167   :  { %v1431_v25 = vrot.slane %v2657_v24, 2  ;;  %v2660_v26 = vpop.f32.mrb[21].mxu0 }
 0x168   :  { %v1433_v27 = vrot.slane %v2660_v26, 2  ;;  %v1296_v28 = vpop.f32.mrb[22].mxu0 }
 0x169   :  { %v2666_v29 = vsel %vm1330_vm0, %v1427_v19, %v1431_v25  ;;  %v1297_v30 = vpop.f32.mrb[23].mxu0 }
 0x16a   :  { %v2671_v31 = vsel %vm1330_vm0, %v1429_v22, %v1433_v27 }
 0x175   :  { %v861_v32 = vpop.f32.mrb[12].mxu1 }
 0x176   :  { %v863_v33 = vpop.f32.mrb[13].mxu1  ;;  %v1306_v36 = vrot.slane %v861_v32, 1 }
 0x177   :  { %v865_v34 = vpop.f32.mrb[14].mxu1  ;;  %v1309_v39 = vrot.slane %v863_v33, 1 }
 0x178   :  { %v1307_v37 = vrot.slane %v865_v34, 1  ;;  %v867_v38 = vpop.f32.mrb[15].mxu1 }
 0x179   :  { %v1310_v40 = vrot.slane %v867_v38, 1 }
 0x17a   :  { %v1308_v41 = vsel %vm1305_vm1, %v1306_v36, %v1307_v37 }
 0x17b   :  { %v1320_v35 = vadd.f32 %v1308_v41, %v2631_v42  ;;  %v1311_v44 = vsel %vm1305_vm1, %v1309_v39, %v1310_v40 }
 0x17c   :  { %v1321_v1 = vadd.f32 %v1311_v44, %v2633_v43 }
 0x17d   :  { %v1345_v45 = vadd.f32 %v1333_v10, %v1320_v35  ;;  %v871_v46 = vpop.f32.mrb[16].mxu1 }
 0x17e   :  { %v1346_v47 = vadd.f32 %v1336_v11, %v1321_v1  ;;  %v1312_v48 = vrot.slane %v871_v46, 1  ;;  %v873_v49 = vpop.f32.mrb[17].mxu1 }
 0x17f   :  { %v1314_v51 = vrot.slane %v873_v49, 1  ;;  %v875_v53 = vpop.f32.mrb[18].mxu1  ;;  %v1379_v6 = vmul.f32 %v1345_v45, %v1345_v45 }
 0x180   :  { %v1835_v55 = vpack.c.bf16 %v1346_v47, %v1345_v45  ;;  %v1313_v57 = vsel %vm1305_vm1, %v1307_v37, %v1312_v48  ;;  %v1403_v58 = vrot.slane %v875_v53, 1  ;;  %v877_v60 = vpop.f32.mrb[19].mxu1  ;;  %v1380_v9 = vmul.f32 %v1346_v47, %v1346_v47 }
 0x181   :  { %v1322_v62 = vadd.f32 %v1313_v57, %v2635_v2  ;;  %v1315_v42 = vsel %vm1305_vm1, %v1310_v40, %v1314_v51  ;;  %v1405_v63 = vrot.slane %v877_v60, 1 }
 0x182   :  { %1361 = vst [vmem:[%s2742_s2] sm:$0xff] %v1835_v55  ;;  %v1323_v43 = vadd.f32 %v1315_v42, %v2637_v12  ;;  %v1404_v0 = vsel %vm1305_vm1, %v1312_v48, %v1403_v58 }
 0x183   :  { %v1347_v3 = vadd.f32 %v1338_v18, %v1322_v62  ;;  %v1417_v4 = vadd.f32 %v1404_v0, %v2639_v50  ;;  %v1406_v5 = vsel %vm1305_vm1, %v1314_v51, %v1405_v63 }
 0x184   :  { %v1348_v8 = vadd.f32 %v1340_v21, %v1323_v43  ;;  %v1418_v2 = vadd.f32 %v1406_v5, %v2641_v52 }
 0x185   :  { %v1363_v10 = vadd.f32 %v1347_v3, %v1345_v45  ;;  %v1381_v11 = vmul.f32 %v1347_v3, %v1347_v3  ;;  %v1441_v13 = vadd.f32 %v1428_v7, %v1417_v4  ;;  %v881_v14 = vpop.f32.mrb[20].mxu1 }
 0x186   :  { %v1836_v15 = vpack.c.bf16 %v1348_v8, %v1347_v3  ;;  %v1370_v16 = vadd.f32 %v1348_v8, %v1346_v47  ;;  %v1382_v17 = vmul.f32 %v1348_v8, %v1348_v8  ;;  %v2688_v12 = vadd.f32 %v1430_v23, %v1418_v2  ;;  %v883_v19 = vpop.f32.mrb[21].mxu1 }
 0x187   :  { %v1364_v18 = vrot.slane %v1363_v10, 4  ;;  %v1383_v20 = vadd.f32 %v1381_v11, %v1379_v6  ;;  %v885_v50 = vpop.f32.mrb[22].mxu1  ;;  %v1407_v30 = vrot.slane %v881_v14, 1  ;;  %v1409_v33 = vrot.slane %v883_v19, 1 }
 0x188   :  { %1362 = vst [vmem:[%s2742_s2 + $0x8] sm:$0xff] %v1836_v15  ;;  %v1390_v21 = vadd.f32 %v1382_v17, %v1380_v9  ;;  %v1837_v52 = vpack.c.bf16 %v2688_v12, %v1441_v13  ;;  %v886_v22 = vpop.f32.mrb[23].mxu1  ;;  %v1371_v7 = vrot.slane %v1370_v16, 4  ;;  %v1514_v34 = vmul.f32 %v1441_v13, %v1441_v13 }
 0x189   :  { %v1384_v28 = vrot.slane %v1383_v20, 4  ;;  %v1365_v32 = vadd.f32 %v1364_v18, %v1363_v10  ;;  %v1408_v36 = vsel %vm1305_vm1, %v1403_v58, %v1407_v30  ;;  %v1421_v37 = vadd.f32 %v1407_v30, %v2647_v59 }
 0x18a   :  { %v1484_v38 = vrot.slane %v1441_v13, 2  ;;  %v1515_v39 = vmul.f32 %v2688_v12, %v2688_v12  ;;  %v1419_v40 = vadd.f32 %v1408_v36, %v2643_v54  ;;  %v1410_v41 = vsel %vm1305_vm1, %v1405_v63, %v1409_v33 }
 0x18b   :  { %v1385_v23 = vadd.f32 %v1384_v28, %v1383_v20  ;;  %v2700_v35 = vadd.f32 %v1371_v7, %v1370_v16  ;;  %v1391_v44 = vrot.slane %v1390_v21, 4  ;;  %v1445_v1 = vadd.f32 %v1431_v25, %v1421_v37 }
 0x18c   :  { %v1420_v45 = vadd.f32 %v1410_v41, %v2645_v56  ;;  %v1366_v46 = vrot.slane %v1365_v32, 2  ;;  %v1487_v47 = vrot.slane %v2688_v12, 2  ;;  %v1443_v59 = vadd.f32 %v2666_v29, %v1419_v40 }
 0x18d   :  { %v1422_v48 = vadd.f32 %v1409_v33, %v2649_v61  ;;  %v1386_v49 = vrot.slane %v1385_v23, 2  ;;  %v1526_v51 = vrot.slane %v1514_v34, 2  ;;  %v1490_v54 = vrot.slane %v1445_v1, 2 }
 0x18e   :  { %v1518_v53 = vmul.f32 %v1445_v1, %v1445_v1  ;;  %v1833_v55 = vrot.slane %v1837_v52, 9  ;;  %v1529_v57 = vrot.slane %v1515_v39, 2  ;;  %v1485_v58 = vrot.slane %v1443_v59, 2 }
 0x18f   :  { %v1516_v60 = vmul.f32 %v1443_v59, %v1443_v59  ;;  %v1373_v24 = vrot.slane %v2700_v35, 2  ;;  %v1392_v25 = vadd.f32 %v1391_v44, %v1390_v21  ;;  %v1444_v56 = vadd.f32 %v2671_v31, %v1420_v45 }
 0x190   :  { %v1532_v62 = vrot.slane %v1518_v53, 2  ;;  %v1367_v42 = vadd.f32 %v1366_v46, %v1365_v32  ;;  %v1486_v63 = vsel %vm1330_vm0, %v1484_v38, %v1485_v58  ;;  %v1491_v29 = vsel %vm1330_vm0, %v1485_v58, %v1490_v54 }
 0x191   :  { %v1527_v61 = vrot.slane %v1516_v60, 2  ;;  %v1387_v43 = vadd.f32 %v1386_v49, %v1385_v23  ;;  %v1498_v0 = vadd.f32 %v1491_v29, %v1486_v63  ;;  %v1446_v3 = vadd.f32 %v1433_v27, %v1422_v48 }
 0x192   :  { %v1838_v4 = vpack.c.bf16 %v1444_v56, %v1443_v59  ;;  %v1488_v8 = vrot.slane %v1444_v56, 2  ;;  %v1517_v2 = vmul.f32 %v1444_v56, %v1444_v56  ;;  %v1368_v7 = vrot.slane %v1367_v42, 1 }
 0x193   :  { %v1528_v5 = vsel %vm1330_vm0, %v1526_v51, %v1527_v61  ;;  %v1533_v6 = vsel %vm1330_vm0, %v1527_v61, %v1532_v62  ;;  %v1499_v9 = vrot.slane %v1498_v0, 4  ;;  %v1839_v11 = vpack.c.bf16 %v1446_v3, %v1445_v1 }
 0x194   :  { %v1540_v10 = vadd.f32 %v1533_v6, %v1528_v5  ;;  %v1469_v13 = vrot.slane %v1838_v4, 5  ;;  %v1489_v26 = vsel %vm1330_vm0, %v1487_v47, %v1488_v8  ;;  %v1492_v27 = vrot.slane %v1446_v3, 2 }
 0x195   :  { %v1519_v14 = vmul.f32 %v1446_v3, %v1446_v3  ;;  %v1530_v15 = vrot.slane %v1517_v2, 2  ;;  %v1500_v16 = vadd.f32 %v1499_v9, %v1498_v0  ;;  %v1472_v18 = vrot.slane %v1839_v11, 5 }
 0x196   :  { %v1541_v17 = vrot.slane %v1540_v10, 4  ;;  %v1470_v12 = vsel %vm2718_vm4, %v1833_v55, %v1469_v13  ;;  %v1471_v19 = vrot.slane %v1469_v13, 4  ;;  %v1493_v20 = vsel %vm1330_vm0, %v1488_v8, %v1492_v27 }
 0x197   :  { %1476 = vst [vmem:[%s2742_s2 + $0x10] sm:$0xff] %v1470_v12  ;;  %v1531_v50 = vsel %vm1330_vm0, %v1529_v57, %v1530_v15  ;;  %v1534_v21 = vrot.slane %v1519_v14, 2  ;;  %v1501_v52 = vrot.slane %v1500_v16, 2  ;;  %v1505_v28 = vadd.f32 %v1493_v20, %v1489_v26 }
 0x198   :  { %v1542_v22 = vadd.f32 %v1541_v17, %v1540_v10  ;;  %v1393_v30 = vrot.slane %v1392_v25, 2  ;;  %v1473_v32 = vsel %vm2718_vm4, %v1471_v19, %v1472_v18  ;;  %v1388_v38 = vrot.slane %v1387_v43, 1 }
 0x199   :  { %v1535_v33 = vsel %vm1330_vm0, %v1530_v15, %v1534_v21  ;;  %v1502_v23 = vadd.f32 %v1501_v52, %v1500_v16  ;;  %1477 = vst [vmem:[%s2742_s2 + $0x18] sm:$0xff] %v1473_v32  ;;  %v1506_v36 = vrot.slane %v1505_v28, 4  ;;  %v1374_v39 = vadd.f32 %v1373_v24, %v2700_v35 }
 0x19a   :  { %v1543_v34 = vrot.slane %v1542_v22, 2  ;;  %v1547_v37 = vadd.f32 %v1535_v33, %v1531_v50  ;;  %v1369_v45 = vadd.f32 %v1368_v7, %v1367_v42  ;;  %v1394_v46 = vadd.f32 %v1393_v30, %v1392_v25 }
 0x19b   :  { %v1503_v40 = vrot.slane %v1502_v23, 1  ;;  %v1507_v44 = vadd.f32 %v1506_v36, %v1505_v28  ;;  %v1389_v51 = vadd.f32 %v1388_v38, %v1387_v43  ;;  %v1375_v54 = vrot.slane %v1374_v39, 1 }
 0x19c   :  { %v1544_v41 = vadd.f32 %v1543_v34, %v1542_v22  ;;  %v1548_v1 = vrot.slane %v1547_v37, 4  ;;  %v1395_v60 = vrot.slane %v1394_v46, 1 }
 0x19d   :  { %v1504_v47 = vadd.f32 %v1503_v40, %v1502_v23  ;;  %v1508_v48 = vrot.slane %v1507_v44, 2  ;;  %v1376_v56 = vadd.f32 %v1375_v54, %v1374_v39 }
 0x19e   :  { %v1545_v59 = vrot.slane %v1544_v41, 1  ;;  %v1549_v49 = vadd.f32 %v1548_v1, %v1547_v37  ;;  %v1396_v25 = vadd.f32 %v1395_v60, %v1394_v46 }
 0x19f   :  { %v1512_v53 = vadd.f32 %v1504_v47, %v1369_v45  ;;  %v1509_v57 = vadd.f32 %v1508_v48, %v1507_v44 }
 0x1a0   :  { %v1546_v55 = vadd.f32 %v1545_v59, %v1544_v41  ;;  %v1550_v58 = vrot.slane %v1549_v49, 2 }
 0x1a1   :  { %v1510_v35 = vrot.slane %v1509_v57, 1 }
 0x1a2   :  { %v1554_v62 = vadd.f32 %v1546_v55, %v1389_v51  ;;  %v1551_v24 = vadd.f32 %v1550_v58, %v1549_v49 }
 0x1a3   :  { %v1511_v29 = vadd.f32 %v1510_v35, %v1509_v57 }
 0x1a4   :  { %v1557_v63 = vsel %vm1556_vm5, %v1512_v53, %v1554_v62  ;;  %v1552_v42 = vrot.slane %v1551_v24, 1 }
 0x1a5   :  { %v1513_v61 = vadd.f32 %v1511_v29, %v1376_v56 }
 0x1a6   :  { %v1553_v0 = vadd.f32 %v1552_v42, %v1551_v24 }
 0x1a8   :  { %v1555_v3 = vadd.f32 %v1553_v0, %v1396_v25 }
 0x1aa   :  { %v1558_v4 = vsel %vm1556_vm5, %v1513_v61, %v1555_v3 }
 0x1ab   :  { %v1561_v43 = vcombine.low %v1557_v63, %v1558_v4 }
 0x1ad   :  { %1834 = vst.sshfl [vmem:[%s2743_s3] sm:$0x33 pattern:$0x76325410] %v1561_v43 }

// kernel: _lambda_.19
= control target key start
LH: loop header
LB: loop body
LE: loop exit
PB: predicated region body
PF: predicated region fallthrough
CT: control target
= control target key end

     0   :  { %s391_s15 = smov 0   ;;  %s417_s0 = inlined_call_operand.vmem [shape: bf16[32,256], index: 0, kind: input, shape index: {}]   ;;  %s418_s1 = inlined_call_operand.vmem [shape: f32[1,256], index: 1, kind: input, shape index: {}]   ;;  %s419_s2 = inlined_call_operand.vmem [shape: f32[1,256], index: 2, kind: input, shape index: {}]   ;;  %s420_s3 = inlined_call_operand.vmem [shape: bf16[32,256], index: 3, kind: input, shape index: {}]   ;;  %s421_s4 = inlined_call_operand.vmem [shape: bf16[32,256], index: 4, kind: output, shape index: {}]  }
   0x1 LB: > { %s332_s16 = sadd.s32 4294967295, %s364_s15   ;;  %p336_p0 = scmp.ge.s32.totalorder %s364_s15, 1  ;;  %s364_s15 = sphi %s391_s15, %s14_s15  }
   0x2   : > { %p172_p1 = scmp.lt.s32.totalorder %s364_s15, 5 }
   0x4   : > { %p173_p2 = pnand %p336_p0, %p172_p1 }
   0x5   : > { %p203_p3 = scmp.lt.s32.totalorder (!%p173_p2), %s332_s16, 3  ;;  %v223_v0 = vlaneseq (!%p173_p2)  ;;  %v221_v2 = vld [vmem:[%s418_s1] sm:$0x3] (!%p173_p2) }
   0x6   : > { %176 = sbr.rel (%p173_p2) target bundleno = 30 (0x1e), region = 36  ;;  %v235_v5 = vld [vmem:[%s419_s2] sm:$0x3] (!%p173_p2) }
   0x7   : > { %v224_v1 = vshrl.u32 (!%p173_p2), %v223_v0, 7 }
   0x9   : > { %v225_v3 = vsub.s32 (!%p173_p2), 0, %v224_v1  ;;  %v229_v4 = vsub.s32 (!%p173_p2), 1, %v224_v1 }
   0xb   : > { %v226_v7 = vrot.slane (!%p173_p2), %v221_v2, %v225_v3  ;;  %v230_v8 = vrot.slane (!%p173_p2), %v221_v2, %v229_v4  ;;  %v240_v12 = vrot.slane (!%p173_p2), %v235_v5, %v225_v3  ;;  %v244_v13 = vrot.slane (!%p173_p2), %v235_v5, %v229_v4 }
   0xd   : > { %s423_s16 = smov (!%p203_p3, %s332_s16), 3 }
   0xe   : > { %s346_s19 = sshll.u32 %s423_s16, 3 }
   0xf   : > { %s207_s24 = scalar_lea.vmem %s417_s0, %s346_s19  ;;  %s212_s27 = scalar_lea.vmem %s420_s3, %s346_s19 }
  0x10   : > { %v218_v6 = vld [vmem:[%s207_s24] sm:$0xff]  ;;  %s217_s30 = scalar_lea.vmem %s421_s4, %s346_s19 }
  0x11   : > { %v249_v9 = vld [vmem:[%s212_s27] sm:$0xff]  ;;  %v219_v10 = vunpack.c.l.bf16 %v218_v6  ;;  %v220_v11 = vunpack.c.h.bf16 %v218_v6 }
  0x12   : > { %v250_v16 = vunpack.c.l.bf16 %v249_v9  ;;  %v251_v17 = vunpack.c.h.bf16 %v249_v9 }
  0x13   : > { %v233_v14 = vmul.f32 %v226_v7, %v219_v10  ;;  %v234_v15 = vmul.f32 %v230_v8, %v220_v11 }
  0x15   : > { %v247_v18 = vadd.f32 %v240_v12, %v233_v14  ;;  %v248_v19 = vadd.f32 %v244_v13, %v234_v15 }
  0x17   : > { %v252_v20 = vadd.f32 %v250_v16, %v247_v18  ;;  %v253_v21 = vadd.f32 %v251_v17, %v248_v19 }
  0x19   : > { %v254_v22 = vmax.f32 %v252_v20, 0.0  ;;  %v255_v23 = vmax.f32 %v253_v21, 0.0 }
  0x1b   : > { %v349_v24 = vpack.c.bf16 %v255_v23, %v254_v22 }
  0x1d   : > { %264 = vst [vmem:[%s217_s30] sm:$0xff] %v349_v24 }
  0x1e PF: > { %s14_s15 = sadd.s32 1, %s364_s15  }
  0x1f   : > { %p11_p4 = scmp.ge.s32.totalorder %s14_s15, 6  }
  0x21   :  { %13 = sbr.rel (!%p11_p4) target bundleno = 1 (0x1), region = 69 }

// kernel: _lambda_.20
= control target key start
LH: loop header
LB: loop body
LE: loop exit
PB: predicated region body
PF: predicated region fallthrough
CT: control target
= control target key end

     0   :  { %v1995_v1 = vmov 0   ;;  %vm1287_vm0 = vcmask 1046528   ;;  %vm1410_vm1 = vcmask 1045504   ;;  %vm1397_vm2 = vcmask 1042432   ;;  %s2578_s1 = inlined_call_operand.vmem [shape: bf16[3,384,256], index: 1, kind: input, shape index: {}]   ;;  %s2579_s0 = inlined_call_operand.vmem [shape: bf16[36,384], index: 0, kind: input, shape index: {}]   ;;  %s2580_s2 = inlined_call_operand.vmem [shape: bf16[16,256], index: 2, kind: output, shape index: {0}]   ;;  %s2581_s3 = inlined_call_operand.vmem [shape: f32[1,2,256], index: 3, kind: output, shape index: {1}]  }
   0x1   :  { %v1768_v0 = vld [vmem:[%s2578_s1 + $0x4] ss:$8 sps:$4 sm:$0xff]   ;;  %444 = vmatprep.mubr.bf16.mxu0 %v1995_v1  ;;  %v1770_v2 = vld [vmem:[%s2578_s1] ss:$8 sps:$4 sm:$0xff]   ;;  %v1771_v3 = vld [vmem:[%s2578_s1 + $0x14] ss:$8 sps:$4 sm:$0xff]  }
   0x2   :  { %355 = vmatprep.subr.bf16.mxu1 %v1768_v0  ;;  %v1773_v4 = vld [vmem:[%s2578_s1 + $0x10] ss:$8 sps:$4 sm:$0xff]   ;;  %v1774_v5 = vld [vmem:[%s2578_s1 + $0x104] ss:$8 sps:$4 sm:$0xff]   ;;  %v1776_v6 = vld [vmem:[%s2578_s1 + $0x100] ss:$8 sps:$4 sm:$0xff]  }
   0x3   :  { %356 = vmatpush1.bf16.msra.mxu1 %v1770_v2  ;;  %v1777_v7 = vld [vmem:[%s2578_s1 + $0x24] ss:$8 sps:$4 sm:$0xff]   ;;  %412 = vmatprep.subr.bf16.mxu0 %v1774_v5  ;;  %v1780_v8 = vld [vmem:[%s2578_s1 + $0x114] ss:$8 sps:$4 sm:$0xff]   ;;  %v1782_v9 = vld [vmem:[%s2578_s1 + $0x110] ss:$8 sps:$4 sm:$0xff]  }
   0x4   :  { %357 = vmatprep.subr.bf16.mxu1 %v1771_v3  ;;  %413 = vmatpush1.bf16.msra.mxu0 %v1776_v6  ;;  %v1779_v10 = vld [vmem:[%s2578_s1 + $0x20] ss:$8 sps:$4 sm:$0xff]   ;;  %v1783_v11 = vld [vmem:[%s2578_s1 + $0x34] ss:$8 sps:$4 sm:$0xff]   ;;  %v1786_v12 = vld [vmem:[%s2578_s1 + $0x124] ss:$8 sps:$4 sm:$0xff]  }
   0x5   :  { %414 = vmatprep.subr.bf16.mxu0 %v1780_v8  ;;  %v1788_v13 = vld [vmem:[%s2578_s1 + $0x120] ss:$8 sps:$4 sm:$0xff]   ;;  %v1785_v14 = vld [vmem:[%s2578_s1 + $0x30] ss:$8 sps:$4 sm:$0xff]   ;;  %v1792_v15 = vld [vmem:[%s2578_s1 + $0x134] ss:$8 sps:$4 sm:$0xff]  }
   0x6   :  { %v1789_v16 = vld [vmem:[%s2578_s1 + $0x44] ss:$8 sps:$4 sm:$0xff]   ;;  %v1794_v17 = vld [vmem:[%s2578_s1 + $0x130] ss:$8 sps:$4 sm:$0xff]   ;;  %v1791_v18 = vld [vmem:[%s2578_s1 + $0x40] ss:$8 sps:$4 sm:$0xff]  }
   0x7   :  { %358 = vmatpush1.bf16.msra.mxu1 %v1773_v4  ;;  %v1798_v19 = vld [vmem:[%s2578_s1 + $0x144] ss:$8 sps:$4 sm:$0xff]   ;;  %v1795_v20 = vld [vmem:[%s2578_s1 + $0x54] ss:$8 sps:$4 sm:$0xff]   ;;  %v1800_v21 = vld [vmem:[%s2578_s1 + $0x140] ss:$8 sps:$4 sm:$0xff]  }
   0x8   :  { %359 = vmatprep.subr.bf16.mxu1 %v1777_v7  ;;  %415 = vmatpush1.bf16.msra.mxu0 %v1782_v9  ;;  %v1797_v22 = vld [vmem:[%s2578_s1 + $0x50] ss:$8 sps:$4 sm:$0xff]   ;;  %v1804_v23 = vld [vmem:[%s2578_s1 + $0x154] ss:$8 sps:$4 sm:$0xff]   ;;  %v1801_v24 = vld [vmem:[%s2578_s1 + $0x64] ss:$8 sps:$4 sm:$0xff]  }
   0x9   :  { %416 = vmatprep.subr.bf16.mxu0 %v1786_v12  ;;  %v1806_v25 = vld [vmem:[%s2578_s1 + $0x150] ss:$8 sps:$4 sm:$0xff]   ;;  %v1803_v26 = vld [vmem:[%s2578_s1 + $0x60] ss:$8 sps:$4 sm:$0xff]   ;;  %v1810_v27 = vld [vmem:[%s2578_s1 + $0x164] ss:$8 sps:$4 sm:$0xff]  }
   0xa   :  { %v1807_v28 = vld [vmem:[%s2578_s1 + $0x74] ss:$8 sps:$4 sm:$0xff]   ;;  %v1812_v29 = vld [vmem:[%s2578_s1 + $0x160] ss:$8 sps:$4 sm:$0xff]   ;;  %v1809_v30 = vld [vmem:[%s2578_s1 + $0x70] ss:$8 sps:$4 sm:$0xff]  }
   0xb   :  { %360 = vmatpush1.bf16.msra.mxu1 %v1779_v10  ;;  %v1816_v31 = vld [vmem:[%s2578_s1 + $0x174] ss:$8 sps:$4 sm:$0xff]   ;;  %v1813_v32 = vld [vmem:[%s2578_s1 + $0x84] ss:$8 sps:$4 sm:$0xff]   ;;  %v1818_v33 = vld [vmem:[%s2578_s1 + $0x170] ss:$8 sps:$4 sm:$0xff]  }
   0xc   :  { %361 = vmatprep.subr.bf16.mxu1 %v1783_v11  ;;  %417 = vmatpush1.bf16.msra.mxu0 %v1788_v13  ;;  %v1815_v34 = vld [vmem:[%s2578_s1 + $0x80] ss:$8 sps:$4 sm:$0xff]   ;;  %v1824_v35 = vld [vmem:[%s2578_s1 + $0x304] ss:$8 sps:$4 sm:$0xff]   ;;  %v1819_v36 = vld [vmem:[%s2578_s1 + $0x94] ss:$8 sps:$4 sm:$0xff]  }
   0xd   :  { %418 = vmatprep.subr.bf16.mxu0 %v1792_v15  ;;  %v2128_v37 = vld [vmem:[%s2579_s0 + $0x8] ss:$12 sps:$4 sm:$0xff]   ;;  %v1821_v39 = vld [vmem:[%s2578_s1 + $0x90] ss:$8 sps:$4 sm:$0xff]   ;;  %v1826_v41 = vld [vmem:[%s2578_s1 + $0xa4] ss:$8 sps:$4 sm:$0xff]  }
   0xe   :  { %v1822_v38 = vld [vmem:[%s2578_s1 + $0x300] ss:$8 sps:$4 sm:$0xff]   ;;  %v1831_v40 = vld [vmem:[%s2578_s1 + $0x314] ss:$8 sps:$4 sm:$0xff]   ;;  %v1829_v42 = vld [vmem:[%s2578_s1 + $0x310] ss:$8 sps:$4 sm:$0xff]  }
   0xf   :  { %362 = vmatpush1.bf16.msra.mxu1 %v1785_v14  ;;  %v1828_v43 = vld [vmem:[%s2578_s1 + $0xa0] ss:$8 sps:$4 sm:$0xff]   ;;  %v1837_v44 = vld [vmem:[%s2578_s1 + $0x324] ss:$8 sps:$4 sm:$0xff]   ;;  %v1832_v45 = vld [vmem:[%s2578_s1 + $0xb4] ss:$8 sps:$4 sm:$0xff]  }
  0x10   :  { %363 = vmatprep.subr.bf16.mxu1 %v1789_v16  ;;  %419 = vmatpush1.bf16.msra.mxu0 %v1794_v17  ;;  %v1834_v46 = vld [vmem:[%s2578_s1 + $0xb0] ss:$8 sps:$4 sm:$0xff]   ;;  %v1835_v47 = vld [vmem:[%s2578_s1 + $0x320] ss:$8 sps:$4 sm:$0xff]   ;;  %v1843_v48 = vld [vmem:[%s2578_s1 + $0x334] ss:$8 sps:$4 sm:$0xff]  }
  0x11   :  { %420 = vmatprep.subr.bf16.mxu0 %v1798_v19  ;;  %v2168_v49 = vld [vmem:[%s2579_s0 + $0x4] ss:$12 sps:$4 sm:$0xff]   ;;  %v1840_v52 = vld [vmem:[%s2578_s1 + $0xc0] ss:$8 sps:$4 sm:$0xff]   ;;  %v1844_v54 = vld [vmem:[%s2578_s1 + $0xd4] ss:$8 sps:$4 sm:$0xff]  }
  0x12   :  { %v1838_v50 = vld [vmem:[%s2578_s1 + $0xc4] ss:$8 sps:$4 sm:$0xff]   ;;  %387 = vmatprep.mubr.bf16.mxu1 %v2168_v49  ;;  %v1841_v51 = vld [vmem:[%s2578_s1 + $0x330] ss:$8 sps:$4 sm:$0xff]   ;;  %v1847_v55 = vld [vmem:[%s2578_s1 + $0x340] ss:$8 sps:$4 sm:$0xff]  }
  0x13   :  { %364 = vmatpush1.bf16.msra.mxu1 %v1791_v18  ;;  %v1849_v53 = vld [vmem:[%s2578_s1 + $0x344] ss:$8 sps:$4 sm:$0xff]   ;;  %v1846_v56 = vld [vmem:[%s2578_s1 + $0xd0] ss:$8 sps:$4 sm:$0xff]   ;;  %v1855_v57 = vld [vmem:[%s2578_s1 + $0x354] ss:$8 sps:$4 sm:$0xff]  }
  0x14   :  { %365 = vmatprep.subr.bf16.mxu1 %v1795_v20  ;;  %421 = vmatpush1.bf16.msra.mxu0 %v1800_v21  ;;  %v1850_v58 = vld [vmem:[%s2578_s1 + $0xe4] ss:$8 sps:$4 sm:$0xff]   ;;  %v1853_v59 = vld [vmem:[%s2578_s1 + $0x350] ss:$8 sps:$4 sm:$0xff]   ;;  %v1852_v60 = vld [vmem:[%s2578_s1 + $0xe0] ss:$8 sps:$4 sm:$0xff]  }
  0x15   :  { %422 = vmatprep.subr.bf16.mxu0 %v1804_v23  ;;  %v1861_v61 = vld [vmem:[%s2578_s1 + $0x364] ss:$8 sps:$4 sm:$0xff]   ;;  %v1856_v62 = vld [vmem:[%s2578_s1 + $0xf4] ss:$8 sps:$4 sm:$0xff]   ;;  %v1858_v63 = vld [vmem:[%s2578_s1 + $0xf0] ss:$8 sps:$4 sm:$0xff]  }
  0x16   :  { %v1859_v0 = vld [vmem:[%s2578_s1 + $0x360] ss:$8 sps:$4 sm:$0xff]   ;;  %v1867_v2 = vld [vmem:[%s2578_s1 + $0x184] ss:$8 sps:$4 sm:$0xff]   ;;  %v1870_v3 = vld [vmem:[%s2578_s1 + $0x374] ss:$8 sps:$4 sm:$0xff]  }
  0x17   :  { %366 = vmatpush1.bf16.msra.mxu1 %v1797_v22  ;;  %v2225_v4 = vld [vmem:[%s2579_s0 + $0x20] ss:$12 sps:$4 sm:$0xff]   ;;  %v1868_v7 = vld [vmem:[%s2578_s1 + $0x370] ss:$8 sps:$4 sm:$0xff]   ;;  %v1873_v9 = vld [vmem:[%s2578_s1 + $0x194] ss:$8 sps:$4 sm:$0xff]  }
  0x18   :  { %367 = vmatprep.subr.bf16.mxu1 %v1801_v24  ;;  %423 = vmatpush1.bf16.msra.mxu0 %v1806_v25  ;;  %v2230_v5 = vld [vmem:[%s2579_s0] ss:$12 sps:$4 sm:$0xff]   ;;  %v1871_v10 = vld [vmem:[%s2578_s1 + $0x190] ss:$8 sps:$4 sm:$0xff]   ;;  %v1882_v13 = vld [vmem:[%s2578_s1 + $0x394] ss:$8 sps:$4 sm:$0xff]  }
  0x19   :  { %424 = vmatprep.subr.bf16.mxu0 %v1810_v27  ;;  %v1865_v6 = vld [vmem:[%s2578_s1 + $0x180] ss:$8 sps:$4 sm:$0xff]   ;;  %v1876_v8 = vld [vmem:[%s2578_s1 + $0x384] ss:$8 sps:$4 sm:$0xff]   ;;  %v1880_v15 = vld [vmem:[%s2578_s1 + $0x390] ss:$8 sps:$4 sm:$0xff]  }
  0x1a   :  { %v1874_v11 = vld [vmem:[%s2578_s1 + $0x380] ss:$8 sps:$4 sm:$0xff]   ;;  %v1879_v12 = vld [vmem:[%s2578_s1 + $0x1a4] ss:$8 sps:$4 sm:$0xff]   ;;  %v1885_v18 = vld [vmem:[%s2578_s1 + $0x1b4] ss:$8 sps:$4 sm:$0xff]  }
  0x1b   :  { %368 = vmatpush1.bf16.msra.mxu1 %v1803_v26  ;;  %v2262_v14 = vld [vmem:[%s2579_s0 + $0x38] ss:$0 sps:$4 sm:$0x33]   ;;  %v1877_v16 = vld [vmem:[%s2578_s1 + $0x1a0] ss:$8 sps:$4 sm:$0xff]   ;;  %vm1398_vm3 = vcmask 1046532  }
  0x1c   :  { %369 = vmatprep.subr.bf16.mxu1 %v1807_v28  ;;  %425 = vmatpush1.bf16.msra.mxu0 %v1812_v29  ;;  %v1888_v17 = vld [vmem:[%s2578_s1 + $0x3a4] ss:$8 sps:$4 sm:$0xff]   ;;  %v1883_v19 = vld [vmem:[%s2578_s1 + $0x1b0] ss:$8 sps:$4 sm:$0xff]   ;;  %v1886_v20 = vld [vmem:[%s2578_s1 + $0x3a0] ss:$8 sps:$4 sm:$0xff]  }
  0x1d   :  { %426 = vmatprep.subr.bf16.mxu0 %v1816_v31  ;;  %v1891_v21 = vld [vmem:[%s2578_s1 + $0x1c4] ss:$8 sps:$4 sm:$0xff]   ;;  %v1894_v22 = vld [vmem:[%s2578_s1 + $0x3b4] ss:$8 sps:$4 sm:$0xff]   ;;  %v1892_v25 = vld [vmem:[%s2578_s1 + $0x3b0] ss:$8 sps:$4 sm:$0xff]  }
  0x1e   :  { %v2293_v23 = vld [vmem:[%s2579_s0 + $0x1c] ss:$12 sps:$4 sm:$0xff]   ;;  %v2298_v24 = vld [vmem:[%s2579_s0 + $0x18] ss:$12 sps:$4 sm:$0xff]   ;;  %v22_v31 = vld [vmem:[%s2579_s0 + $0x30] sm:$0x33] }
  0x1f   :  { %370 = vmatpush1.bf16.msra.mxu1 %v1809_v30  ;;  %v1889_v26 = vld [vmem:[%s2578_s1 + $0x1c0] ss:$8 sps:$4 sm:$0xff]   ;;  %v1900_v27 = vld [vmem:[%s2578_s1 + $0x3c4] ss:$8 sps:$4 sm:$0xff]   ;;  %v1897_v28 = vld [vmem:[%s2578_s1 + $0x1d4] ss:$8 sps:$4 sm:$0xff]  }
  0x20   :  { %371 = vmatprep.subr.bf16.mxu1 %v1813_v32  ;;  %427 = vmatpush1.bf16.msra.mxu0 %v1818_v33  ;;  %v1895_v29 = vld [vmem:[%s2578_s1 + $0x1d0] ss:$8 sps:$4 sm:$0xff]   ;;  %v1898_v30 = vld [vmem:[%s2578_s1 + $0x3c0] ss:$8 sps:$4 sm:$0xff]   ;;  %v1907_v32 = vld [vmem:[%s2578_s1 + $0x3d4] ss:$8 sps:$4 sm:$0xff]   ;;  %v2326_v33 = vcombine.high %v22_v31, %v22_v31 }
  0x21   :  { %1165 = vmatprep.subr.bf16.mxu0 %v1824_v35  ;;  %v2331_v35 = vcombine.low %v22_v31, %v22_v31  ;;  %v1992_v31 = vld [vmem:[%s2578_s1 + $0x2f0] ss:$8 sps:$4 sm:$0xff]   ;;  %vm2564_vm4 = vmor %vm1397_vm2, %vm1398_vm3  ;;  %vm1463_vm5 = vcmask 1040384  }
  0x23   :  { %372 = vmatpush1.bf16.msra.mxu1 %v1815_v34  ;;  %445 = vmatmul.mubr.bf16.vlgmr.msra.gmra.mrb[0].mxu0 %v2128_v37  ;;  %v1904_v34 = vld [vmem:[%s2578_s1 + $0x1e4] ss:$8 sps:$4 sm:$0xff]  }
  0x24   :  { %373 = vmatprep.subr.bf16.mxu1 %v1819_v36  ;;  %1166 = vmatpush1.bf16.msra.mxu0 %v1822_v38  ;;  %v1902_v36 = vld [vmem:[%s2578_s1 + $0x1e0] ss:$8 sps:$4 sm:$0xff]   ;;  %v1905_v38 = vld [vmem:[%s2578_s1 + $0x3d0] ss:$8 sps:$4 sm:$0xff]  }
  0x25   :  { %452 = vmatprep.mubr.bf16.mxu0 %v1995_v1  ;;  %1167 = vmatprep.subr.bf16.mxu0 %v1831_v40  ;;  %v1910_v40 = vld [vmem:[%s2578_s1 + $0x1f4] ss:$8 sps:$4 sm:$0xff]  }
  0x27   :  { %374 = vmatpush1.bf16.msra.mxu1 %v1821_v39  ;;  %v1913_v39 = vld [vmem:[%s2578_s1 + $0x3e4] ss:$8 sps:$4 sm:$0xff]  }
  0x28   :  { %375 = vmatprep.subr.bf16.mxu1 %v1826_v41  ;;  %1168 = vmatpush1.bf16.msra.mxu0 %v1829_v42  ;;  %v1908_v41 = vld [vmem:[%s2578_s1 + $0x1f0] ss:$8 sps:$4 sm:$0xff]   ;;  %v1911_v42 = vld [vmem:[%s2578_s1 + $0x3e0] ss:$8 sps:$4 sm:$0xff]  }
  0x29   :  { %1169 = vmatprep.subr.bf16.mxu0 %v1837_v44  ;;  %v1917_v44 = vld [vmem:[%s2578_s1 + $0x204] ss:$8 sps:$4 sm:$0xff]  }
  0x2b   :  { %376 = vmatpush1.bf16.msra.mxu1 %v1828_v43  ;;  %453 = vmatmul.mubr.bf16.gmra.mrb[4].mxu0 %v2225_v4  ;;  %v1920_v43 = vld [vmem:[%s2578_s1 + $0x3f4] ss:$8 sps:$4 sm:$0xff]  }
  0x2c   :  { %377 = vmatprep.subr.bf16.mxu1 %v1832_v45  ;;  %1170 = vmatpush1.bf16.msra.mxu0 %v1835_v47  ;;  %v1915_v45 = vld [vmem:[%s2578_s1 + $0x200] ss:$8 sps:$4 sm:$0xff]   ;;  %v1926_v47 = vld [vmem:[%s2578_s1 + $0x404] ss:$8 sps:$4 sm:$0xff]  }
  0x2d   :  { %1171 = vmatprep.subr.bf16.mxu0 %v1843_v48  ;;  %462 = vmatprep.mubr.bf16.mxu0 %v1995_v1  ;;  %v1923_v48 = vld [vmem:[%s2578_s1 + $0x214] ss:$8 sps:$4 sm:$0xff]  }
  0x2f   :  { %378 = vmatpush1.bf16.msra.mxu1 %v1834_v46  ;;  %v1918_v46 = vld [vmem:[%s2578_s1 + $0x3f0] ss:$8 sps:$4 sm:$0xff]  }
  0x30   :  { %379 = vmatprep.subr.bf16.mxu1 %v1838_v50  ;;  %1172 = vmatpush1.bf16.msra.mxu0 %v1841_v51  ;;  %v1924_v50 = vld [vmem:[%s2578_s1 + $0x400] ss:$8 sps:$4 sm:$0xff]   ;;  %v1932_v51 = vld [vmem:[%s2578_s1 + $0x414] ss:$8 sps:$4 sm:$0xff]  }
  0x31   :  { %1173 = vmatprep.subr.bf16.mxu0 %v1849_v53  ;;  %v1930_v53 = vld [vmem:[%s2578_s1 + $0x410] ss:$8 sps:$4 sm:$0xff]  }
  0x33   :  { %380 = vmatpush1.bf16.msra.mxu1 %v1840_v52  ;;  %463 = vmatmul.mubr.bf16.gmra.mrb[8].mxu0 %v2262_v14  ;;  %v1929_v52 = vld [vmem:[%s2578_s1 + $0x224] ss:$8 sps:$4 sm:$0xff]  }
  0x34   :  { %381 = vmatprep.subr.bf16.mxu1 %v1844_v54  ;;  %1174 = vmatpush1.bf16.msra.mxu0 %v1847_v55  ;;  %v1927_v54 = vld [vmem:[%s2578_s1 + $0x220] ss:$8 sps:$4 sm:$0xff]   ;;  %v1941_v55 = vld [vmem:[%s2578_s1 + $0x424] ss:$8 sps:$4 sm:$0xff]  }
  0x35   :  { %1175 = vmatprep.subr.bf16.mxu0 %v1855_v57  ;;  %1197 = vmatprep.mubr.bf16.mxu0 %v2168_v49  ;;  %v1939_v57 = vld [vmem:[%s2578_s1 + $0x420] ss:$8 sps:$4 sm:$0xff]  }
  0x37   :  { %382 = vmatpush1.bf16.msra.mxu1 %v1846_v56  ;;  %v1935_v56 = vld [vmem:[%s2578_s1 + $0x234] ss:$8 sps:$4 sm:$0xff]  }
  0x38   :  { %383 = vmatprep.subr.bf16.mxu1 %v1850_v58  ;;  %1176 = vmatpush1.bf16.msra.mxu0 %v1853_v59  ;;  %v1933_v58 = vld [vmem:[%s2578_s1 + $0x230] ss:$8 sps:$4 sm:$0xff]   ;;  %v1947_v59 = vld [vmem:[%s2578_s1 + $0x434] ss:$8 sps:$4 sm:$0xff]  }
  0x39   :  { %1177 = vmatprep.subr.bf16.mxu0 %v1861_v61  ;;  %v1945_v61 = vld [vmem:[%s2578_s1 + $0x430] ss:$8 sps:$4 sm:$0xff]  }
  0x3b   :  { %384 = vmatpush1.bf16.msra.mxu1 %v1852_v60  ;;  %v1944_v60 = vld [vmem:[%s2578_s1 + $0x244] ss:$8 sps:$4 sm:$0xff]  }
  0x3c   :  { %385 = vmatprep.subr.bf16.mxu1 %v1856_v62  ;;  %1178 = vmatpush1.bf16.msra.mxu0 %v1859_v0  ;;  %v1942_v62 = vld [vmem:[%s2578_s1 + $0x240] ss:$8 sps:$4 sm:$0xff]   ;;  %v1950_v0 = vld [vmem:[%s2578_s1 + $0x254] ss:$8 sps:$4 sm:$0xff]  }
  0x3d   :  { %1179 = vmatprep.subr.bf16.mxu0 %v1870_v3  ;;  %v1948_v3 = vld [vmem:[%s2578_s1 + $0x250] ss:$8 sps:$4 sm:$0xff]  }
  0x3f   :  { %386 = vmatpush1.bf16.msra.mxu1 %v1858_v63  ;;  %v1955_v63 = vld [vmem:[%s2578_s1 + $0x444] ss:$8 sps:$4 sm:$0xff]  }
  0x40   :  { %758 = vmatprep.subr.bf16.mxu1 %v1867_v2  ;;  %1180 = vmatpush1.bf16.msra.mxu0 %v1868_v7  ;;  %v1953_v2 = vld [vmem:[%s2578_s1 + $0x440] ss:$8 sps:$4 sm:$0xff]   ;;  %v1958_v7 = vld [vmem:[%s2578_s1 + $0x264] ss:$8 sps:$4 sm:$0xff]  }
  0x41   :  { %1181 = vmatprep.subr.bf16.mxu0 %v1876_v8  ;;  %v1959_v8 = vld [vmem:[%s2578_s1 + $0x450] ss:$8 sps:$4 sm:$0xff]  }
  0x42   :  { %388 = vmatmul.mubr.bf16.vlgmr.msra.gmra.mrb[0].mxu1 %v2230_v5 }
  0x43   :  { %759 = vmatpush1.bf16.msra.mxu1 %v1865_v6  ;;  %395 = vmatprep.mubr.bf16.mxu1 %v2293_v23  ;;  %v1961_v6 = vld [vmem:[%s2578_s1 + $0x454] ss:$8 sps:$4 sm:$0xff]  }
  0x44   :  { %760 = vmatprep.subr.bf16.mxu1 %v1873_v9  ;;  %1182 = vmatpush1.bf16.msra.mxu0 %v1874_v11  ;;  %v1956_v9 = vld [vmem:[%s2578_s1 + $0x260] ss:$8 sps:$4 sm:$0xff]   ;;  %v1964_v11 = vld [vmem:[%s2578_s1 + $0x274] ss:$8 sps:$4 sm:$0xff]  }
  0x45   :  { %1183 = vmatprep.subr.bf16.mxu0 %v1882_v13  ;;  %v1962_v13 = vld [vmem:[%s2578_s1 + $0x270] ss:$8 sps:$4 sm:$0xff]  }
  0x47   :  { %761 = vmatpush1.bf16.msra.mxu1 %v1871_v10  ;;  %v1967_v10 = vld [vmem:[%s2578_s1 + $0x464] ss:$8 sps:$4 sm:$0xff]  }
  0x48   :  { %762 = vmatprep.subr.bf16.mxu1 %v1879_v12  ;;  %1184 = vmatpush1.bf16.msra.mxu0 %v1880_v15  ;;  %v1965_v12 = vld [vmem:[%s2578_s1 + $0x460] ss:$8 sps:$4 sm:$0xff]   ;;  %v1973_v15 = vld [vmem:[%s2578_s1 + $0x474] ss:$8 sps:$4 sm:$0xff]  }
  0x49   :  { %1185 = vmatprep.subr.bf16.mxu0 %v1888_v17  ;;  %v1971_v17 = vld [vmem:[%s2578_s1 + $0x470] ss:$8 sps:$4 sm:$0xff]  }
  0x4a   :  { %396 = vmatmul.mubr.bf16.gmra.mrb[4].mxu1 %v2298_v24 }
  0x4b   :  { %763 = vmatpush1.bf16.msra.mxu1 %v1877_v16  ;;  %405 = vmatprep.mubr.bf16.mxu1 %v2326_v33  ;;  %v1970_v16 = vld [vmem:[%s2578_s1 + $0x284] ss:$8 sps:$4 sm:$0xff]  }
  0x4c   :  { %764 = vmatprep.subr.bf16.mxu1 %v1885_v18  ;;  %1186 = vmatpush1.bf16.msra.mxu0 %v1886_v20  ;;  %v1968_v18 = vld [vmem:[%s2578_s1 + $0x280] ss:$8 sps:$4 sm:$0xff]   ;;  %v1974_v20 = vld [vmem:[%s2578_s1 + $0x290] ss:$8 sps:$4 sm:$0xff]  }
  0x4d   :  { %1187 = vmatprep.subr.bf16.mxu0 %v1894_v22  ;;  %v1982_v22 = vld [vmem:[%s2578_s1 + $0x2b4] ss:$8 sps:$4 sm:$0xff]  }
  0x4f   :  { %765 = vmatpush1.bf16.msra.mxu1 %v1883_v19  ;;  %v1976_v19 = vld [vmem:[%s2578_s1 + $0x294] ss:$8 sps:$4 sm:$0xff]  }
  0x50   :  { %766 = vmatprep.subr.bf16.mxu1 %v1891_v21  ;;  %1188 = vmatpush1.bf16.msra.mxu0 %v1892_v25  ;;  %v1979_v21 = vld [vmem:[%s2578_s1 + $0x2a4] ss:$8 sps:$4 sm:$0xff]  }
  0x51   :  { %1189 = vmatprep.subr.bf16.mxu0 %v1900_v27  ;;  %v1985_v25 = vld [vmem:[%s2578_s1 + $0x2c4] ss:$8 sps:$4 sm:$0xff]   ;;  %v1986_v27 = vld [vmem:[%s2578_s1 + $0x2d0] ss:$8 sps:$4 sm:$0xff]  }
  0x52   :  { %406 = vmatmul.mubr.bf16.gmra.mrb[8].mxu1 %v2331_v35 }
  0x53   :  { %767 = vmatpush1.bf16.msra.mxu1 %v1889_v26  ;;  %790 = vmatprep.mubr.bf16.mxu1 %v2168_v49  ;;  %v1921_v49 = vld [vmem:[%s2578_s1 + $0x210] ss:$8 sps:$4 sm:$0xff]   ;;  %v1988_v26 = vld [vmem:[%s2578_s1 + $0x2d4] ss:$8 sps:$4 sm:$0xff]  }
  0x54   :  { %768 = vmatprep.subr.bf16.mxu1 %v1897_v28  ;;  %1190 = vmatpush1.bf16.msra.mxu0 %v1898_v30  ;;  %v1991_v28 = vld [vmem:[%s2578_s1 + $0x2e4] ss:$8 sps:$4 sm:$0xff]   ;;  %v1994_v30 = vld [vmem:[%s2578_s1 + $0x2f4] ss:$8 sps:$4 sm:$0xff]  }
  0x55   :  { %1191 = vmatprep.subr.bf16.mxu0 %v1907_v32 }
  0x57   :  { %769 = vmatpush1.bf16.msra.mxu1 %v1895_v29  ;;  %v1989_v29 = vld [vmem:[%s2578_s1 + $0x2e0] ss:$8 sps:$4 sm:$0xff]  }
  0x58   :  { %770 = vmatprep.subr.bf16.mxu1 %v1904_v34  ;;  %1192 = vmatpush1.bf16.msra.mxu0 %v1905_v38 }
  0x59   :  { %1193 = vmatprep.subr.bf16.mxu0 %v1913_v39 }
  0x5b   :  { %771 = vmatpush1.bf16.msra.mxu1 %v1902_v36 }
  0x5c   :  { %772 = vmatprep.subr.bf16.mxu1 %v1910_v40  ;;  %1194 = vmatpush1.bf16.msra.mxu0 %v1911_v42 }
  0x5d   :  { %1195 = vmatprep.subr.bf16.mxu0 %v1920_v43 }
  0x5f   :  { %773 = vmatpush1.bf16.msra.mxu1 %v1908_v41 }
  0x60   :  { %774 = vmatprep.subr.bf16.mxu1 %v1917_v44  ;;  %1196 = vmatpush1.bf16.msra.mxu0 %v1918_v46 }
  0x61   :  { %1224 = vmatprep.subr.bf16.mxu0 %v1926_v47 }
  0x63   :  { %775 = vmatpush1.bf16.msra.mxu1 %v1915_v45  ;;  %1198 = vmatmul.mubr.bf16.vlgmr.msra.gmra.mrb[12].mxu0 %v2230_v5 }
  0x64   :  { %776 = vmatprep.subr.bf16.mxu1 %v1923_v48  ;;  %1225 = vmatpush1.bf16.msra.mxu0 %v1924_v50 }
  0x65   :  { %1207 = vmatprep.mubr.bf16.mxu0 %v2293_v23  ;;  %1226 = vmatprep.subr.bf16.mxu0 %v1932_v51 }
  0x67   :  { %777 = vmatpush1.bf16.msra.mxu1 %v1921_v49 }
  0x68   :  { %778 = vmatprep.subr.bf16.mxu1 %v1929_v52  ;;  %1227 = vmatpush1.bf16.msra.mxu0 %v1930_v53 }
  0x69   :  { %1228 = vmatprep.subr.bf16.mxu0 %v1941_v55 }
  0x6b   :  { %779 = vmatpush1.bf16.msra.mxu1 %v1927_v54  ;;  %1208 = vmatmul.mubr.bf16.gmra.mrb[16].mxu0 %v2298_v24 }
  0x6c   :  { %780 = vmatprep.subr.bf16.mxu1 %v1935_v56  ;;  %1229 = vmatpush1.bf16.msra.mxu0 %v1939_v57 }
  0x6d   :  { %1217 = vmatprep.mubr.bf16.mxu0 %v2326_v33  ;;  %1230 = vmatprep.subr.bf16.mxu0 %v1947_v59 }
  0x6f   :  { %781 = vmatpush1.bf16.msra.mxu1 %v1933_v58 }
  0x70   :  { %782 = vmatprep.subr.bf16.mxu1 %v1944_v60  ;;  %1231 = vmatpush1.bf16.msra.mxu0 %v1945_v61 }
  0x71   :  { %1232 = vmatprep.subr.bf16.mxu0 %v1955_v63 }
  0x73   :  { %783 = vmatpush1.bf16.msra.mxu1 %v1942_v62  ;;  %1218 = vmatmul.mubr.bf16.gmra.mrb[20].mxu0 %v2331_v35 }
  0x74   :  { %784 = vmatprep.subr.bf16.mxu1 %v1950_v0  ;;  %1233 = vmatpush1.bf16.msra.mxu0 %v1953_v2 }
  0x75   :  { %1256 = vmatprep.mubr.bf16.mxu0 %v1995_v1  ;;  %1234 = vmatprep.subr.bf16.mxu0 %v1961_v6 }
  0x77   :  { %785 = vmatpush1.bf16.msra.mxu1 %v1948_v3 }
  0x78   :  { %786 = vmatprep.subr.bf16.mxu1 %v1958_v7  ;;  %1235 = vmatpush1.bf16.msra.mxu0 %v1959_v8 }
  0x79   :  { %1236 = vmatprep.subr.bf16.mxu0 %v1967_v10 }
  0x7b   :  { %787 = vmatpush1.bf16.msra.mxu1 %v1956_v9 }
  0x7c   :  { %788 = vmatprep.subr.bf16.mxu1 %v1964_v11  ;;  %1237 = vmatpush1.bf16.msra.mxu0 %v1965_v12 }
  0x7d   :  { %1238 = vmatprep.subr.bf16.mxu0 %v1973_v15 }
  0x7f   :  { %789 = vmatpush1.bf16.msra.mxu1 %v1962_v13 }
  0x80   :  { %817 = vmatprep.subr.bf16.mxu1 %v1970_v16  ;;  %1239 = vmatpush1.bf16.msra.mxu0 %v1971_v17 }
  0x82   :  { %791 = vmatmul.mubr.bf16.vlgmr.msra.gmra.mrb[12].mxu1 %v2230_v5  ;;  %v1977_v5 = vld [vmem:[%s2578_s1 + $0x2a0] ss:$8 sps:$4 sm:$0xff]  }
  0x83   :  { %818 = vmatpush1.bf16.msra.mxu1 %v1968_v18  ;;  %798 = vmatprep.mubr.bf16.mxu1 %v2293_v23  ;;  %v1980_v23 = vld [vmem:[%s2578_s1 + $0x2b0] ss:$8 sps:$4 sm:$0xff]  }
  0x84   :  { %819 = vmatprep.subr.bf16.mxu1 %v1976_v19  ;;  %1257 = vmatmul.mubr.bf16.vlgmr.msra.gmra.mrb[12].mxu0 %v2128_v37 }
  0x85   :  { %1266 = vmatprep.mubr.bf16.mxu0 %v1995_v1 }
  0x87   :  { %820 = vmatpush1.bf16.msra.mxu1 %v1974_v20 }
  0x88   :  { %821 = vmatprep.subr.bf16.mxu1 %v1979_v21 }
  0x8a   :  { %799 = vmatmul.mubr.bf16.gmra.mrb[16].mxu1 %v2298_v24  ;;  %v1983_v24 = vld [vmem:[%s2578_s1 + $0x2c0] ss:$8 sps:$4 sm:$0xff]  }
  0x8b   :  { %822 = vmatpush1.bf16.msra.mxu1 %v1977_v5  ;;  %808 = vmatprep.mubr.bf16.mxu1 %v2326_v33 }
  0x8c   :  { %823 = vmatprep.subr.bf16.mxu1 %v1982_v22  ;;  %1267 = vmatmul.mubr.bf16.gmra.mrb[16].mxu0 %v2225_v4 }
  0x8d   :  { %1276 = vmatprep.mubr.bf16.mxu0 %v1995_v1 }
  0x8f   :  { %824 = vmatpush1.bf16.msra.mxu1 %v1980_v23 }
  0x90   :  { %825 = vmatprep.subr.bf16.mxu1 %v1985_v25 }
  0x92   :  { %809 = vmatmul.mubr.bf16.gmra.mrb[20].mxu1 %v2331_v35 }
  0x93   :  { %826 = vmatpush1.bf16.msra.mxu1 %v1983_v24  ;;  %849 = vmatprep.mubr.bf16.mxu1 %v1995_v1 }
  0x94   :  { %827 = vmatprep.subr.bf16.mxu1 %v1988_v26  ;;  %1277 = vmatmul.mubr.bf16.gmra.mrb[24].mxu0 %v2262_v14 }
  0x97   :  { %828 = vmatpush1.bf16.msra.mxu1 %v1986_v27 }
  0x98   :  { %829 = vmatprep.subr.bf16.mxu1 %v1991_v28 }
  0x9b   :  { %830 = vmatpush1.bf16.msra.mxu1 %v1989_v29 }
  0x9c   :  { %831 = vmatprep.subr.bf16.mxu1 %v1994_v30 }
  0x9f   :  { %832 = vmatpush1.bf16.msra.mxu1 %v1992_v31 }
  0xa2   :  { %850 = vmatmul.mubr.bf16.vlgmr.msra.gmra.mrb[12].mxu1 %v2128_v37 }
  0xa3   :  { %857 = vmatprep.mubr.bf16.mxu1 %v1995_v1 }
  0xaa   :  { %858 = vmatmul.mubr.bf16.gmra.mrb[16].mxu1 %v2225_v4 }
  0xab   :  { %867 = vmatprep.mubr.bf16.mxu1 %v1995_v1 }
  0xb2   :  { %868 = vmatmul.mubr.bf16.gmra.mrb[20].mxu1 %v2262_v14 }
  0xf6   :  { %v446_v32 = vpop.f32.mrb[0].mxu0 }
  0xf7   :  { %v448_v33 = vpop.f32.mrb[1].mxu0 }
  0xf8   :  { %v450_v34 = vpop.f32.mrb[2].mxu0 }
  0xf9   :  { %v451_v35 = vpop.f32.mrb[3].mxu0 }
  0xfe   :  { %v454_v36 = vpop.f32.mrb[4].mxu0 }
  0xff   :  { %v456_v38 = vpop.f32.mrb[5].mxu0 }
 0x100   :  { %v458_v40 = vpop.f32.mrb[6].mxu0 }
 0x101   :  { %v460_v37 = vpop.f32.mrb[7].mxu0 }
 0x106   :  { %v464_v45 = vpop.f32.mrb[8].mxu0 }
 0x107   :  { %v465_v1 = vpop.f32.mrb[9].mxu0 }
 0x108   :  { %v466_v46 = vpop.f32.mrb[10].mxu0 }
 0x109   :  { %v467_v14 = vpop.f32.mrb[11].mxu0 }
 0x115   :  { %v389_v39 = vpop.f32.mrb[0].mxu1 }
 0x116   :  { %v2526_v41 = vadd.f32 %v446_v32, %v389_v39  ;;  %v391_v42 = vpop.f32.mrb[1].mxu1 }
 0x117   :  { %v2528_v43 = vadd.f32 %v448_v33, %v391_v42  ;;  %v393_v44 = vpop.f32.mrb[2].mxu1 }
 0x118   :  { %v394_v4 = vpop.f32.mrb[3].mxu1 }
 0x11d   :  { %v397_v47 = vpop.f32.mrb[4].mxu1 }
 0x11e   :  { %v2530_v48 = vadd.f32 %v454_v36, %v397_v47  ;;  %v399_v49 = vpop.f32.mrb[5].mxu1 }
 0x11f   :  { %v2532_v50 = vadd.f32 %v456_v38, %v399_v49  ;;  %v401_v51 = vpop.f32.mrb[6].mxu1 }
 0x120   :  { %v2534_v52 = vadd.f32 %v458_v40, %v401_v51  ;;  %v403_v53 = vpop.f32.mrb[7].mxu1 }
 0x121   :  { %v2536_v54 = vadd.f32 %v460_v37, %v403_v53 }
 0x125   :  { %v407_v55 = vpop.f32.mrb[8].mxu1 }
 0x126   :  { %v408_v56 = vpop.f32.mrb[9].mxu1 }
 0x127   :  { %v409_v57 = vpop.f32.mrb[10].mxu1 }
 0x128   :  { %v410_v58 = vpop.f32.mrb[11].mxu1 }
 0x146   :  { %v1219_v59 = vpop.f32.mrb[20].mxu0 }
 0x147   :  { %v1220_v60 = vpop.f32.mrb[21].mxu0 }
 0x148   :  { %v1221_v61 = vpop.f32.mrb[22].mxu0 }
 0x149   :  { %v1222_v62 = vpop.f32.mrb[23].mxu0 }
 0x157   :  { %v1258_v63 = vpop.f32.mrb[12].mxu0 }
 0x158   :  { %v1302_v0 = vrot.slane %v1258_v63, 1  ;;  %v1260_v2 = vpop.f32.mrb[13].mxu0 }
 0x159   :  { %v1305_v3 = vrot.slane %v1260_v2, 1  ;;  %v1262_v6 = vpop.f32.mrb[14].mxu0 }
 0x15a   :  { %v1303_v7 = vrot.slane %v1262_v6, 1  ;;  %v1264_v8 = vpop.f32.mrb[15].mxu0 }
 0x15b   :  { %v1306_v9 = vrot.slane %v1264_v8, 1 }
 0x15c   :  { %v1304_v10 = vsel %vm1287_vm0, %v1302_v0, %v1303_v7 }
 0x15d   :  { %v1307_v11 = vsel %vm1287_vm0, %v1305_v3, %v1306_v9 }
 0x15f   :  { %v1268_v12 = vpop.f32.mrb[16].mxu0 }
 0x160   :  { %v1373_v13 = vrot.slane %v1268_v12, 1  ;;  %v1270_v15 = vpop.f32.mrb[17].mxu0 }
 0x161   :  { %v1376_v16 = vrot.slane %v1270_v15, 1  ;;  %v1272_v17 = vpop.f32.mrb[18].mxu0 }
 0x162   :  { %v1374_v18 = vrot.slane %v1272_v17, 1  ;;  %v2540_v19 = vpop.f32.mrb[19].mxu0 }
 0x163   :  { %v1377_v20 = vrot.slane %v2540_v19, 1 }
 0x164   :  { %v1375_v21 = vsel %vm1287_vm0, %v1373_v13, %v1374_v18 }
 0x165   :  { %v1378_v5 = vsel %vm1287_vm0, %v1376_v16, %v1377_v20 }
 0x167   :  { %v1278_v22 = vpop.f32.mrb[24].mxu0 }
 0x168   :  { %v1279_v23 = vpop.f32.mrb[25].mxu0 }
 0x169   :  { %v1280_v25 = vpop.f32.mrb[26].mxu0 }
 0x16a   :  { %v1281_v24 = vpop.f32.mrb[27].mxu0 }
 0x175   :  { %v851_v26 = vpop.f32.mrb[12].mxu1 }
 0x176   :  { %v852_v27 = vpop.f32.mrb[13].mxu1 }
 0x177   :  { %v853_v28 = vpop.f32.mrb[14].mxu1 }
 0x178   :  { %v855_v29 = vpop.f32.mrb[15].mxu1  ;;  %v1288_v31 = vrot.slane %v853_v28, 1 }
 0x179   :  { %v1291_v34 = vrot.slane %v855_v29, 1 }
 0x17d   :  { %v859_v30 = vpop.f32.mrb[16].mxu1 }
 0x17e   :  { %v1289_v32 = vrot.slane %v859_v30, 1  ;;  %v861_v33 = vpop.f32.mrb[17].mxu1 }
 0x17f   :  { %v1292_v35 = vrot.slane %v861_v33, 1  ;;  %v863_v36 = vpop.f32.mrb[18].mxu1 }
 0x180   :  { %v1290_v38 = vsel %vm1287_vm0, %v1288_v31, %v1289_v32  ;;  %v865_v39 = vpop.f32.mrb[19].mxu1  ;;  %v1355_v47 = vrot.slane %v863_v36, 1 }
 0x181   :  { %v1296_v40 = vadd.f32 %v1290_v38, %v2526_v41  ;;  %v1293_v42 = vsel %vm1287_vm0, %v1291_v34, %v1292_v35  ;;  %v1358_v55 = vrot.slane %v865_v39, 1 }
 0x182   :  { %v1297_v37 = vadd.f32 %v1293_v42, %v2528_v43 }
 0x183   :  { %v1310_v44 = vadd.f32 %v1304_v10, %v1296_v40 }
 0x184   :  { %v1311_v4 = vadd.f32 %v1307_v11, %v1297_v37 }
 0x185   :  { %v1321_v45 = vrot.slane %v1310_v44, 4  ;;  %v1335_v1 = vmul.f32 %v1310_v44, %v1310_v44  ;;  %v869_v46 = vpop.f32.mrb[20].mxu1 }
 0x186   :  { %v1740_v14 = vpack.c.bf16 %v1311_v4, %v1310_v44  ;;  %v1356_v49 = vrot.slane %v869_v46, 1  ;;  %v871_v51 = vpop.f32.mrb[21].mxu1  ;;  %v1327_v58 = vrot.slane %v1311_v4, 4  ;;  %v1336_v59 = vmul.f32 %v1311_v4, %v1311_v4 }
 0x187   :  { %v1337_v53 = vrot.slane %v1335_v1, 4  ;;  %v1359_v56 = vrot.slane %v871_v51, 1  ;;  %v873_v57 = vpop.f32.mrb[22].mxu1  ;;  %v1322_v61 = vadd.f32 %v1321_v45, %v1310_v44 }
 0x188   :  { %v1357_v41 = vsel %vm1287_vm0, %v1355_v47, %v1356_v49  ;;  %v1367_v60 = vadd.f32 %v1356_v49, %v2534_v52  ;;  %1320 = vst [vmem:[%s2580_s2] sm:$0xff] %v1740_v14  ;;  %v874_v43 = vpop.f32.mrb[23].mxu1  ;;  %v1328_v8 = vadd.f32 %v1327_v58, %v1311_v4  ;;  %v1343_v52 = vrot.slane %v1336_v59, 4 }
 0x189   :  { %v1365_v62 = vadd.f32 %v1357_v41, %v2530_v48  ;;  %v1360_v63 = vsel %vm1287_vm0, %v1358_v55, %v1359_v56  ;;  %v1338_v0 = vadd.f32 %v1337_v53, %v1335_v1  ;;  %v1368_v7 = vadd.f32 %v1359_v56, %v2536_v54 }
 0x18a   :  { %v1385_v2 = vadd.f32 %v1374_v18, %v1367_v60  ;;  %v1366_v3 = vadd.f32 %v1360_v63, %v2532_v50  ;;  %v1323_v11 = vrot.slane %v1322_v61, 2  ;;  %v1329_v50 = vrot.slane %v1328_v8, 2 }
 0x18b   :  { %v1383_v6 = vadd.f32 %v1375_v21, %v1365_v62  ;;  %v1339_v15 = vrot.slane %v1338_v0, 2  ;;  %v1344_v18 = vadd.f32 %v1343_v52, %v1336_v59  ;;  %v1386_v54 = vadd.f32 %v1377_v20, %v1368_v7 }
 0x18c   :  { %v1412_v9 = vrot.slane %v1385_v2, 2  ;;  %v1435_v10 = vmul.f32 %v1385_v2, %v1385_v2  ;;  %v1384_v48 = vadd.f32 %v1378_v5, %v1366_v3  ;;  %v1324_v23 = vadd.f32 %v1323_v11, %v1322_v61 }
 0x18d   :  { %v1411_v12 = vrot.slane %v1383_v6, 2  ;;  %v1433_v13 = vmul.f32 %v1383_v6, %v1383_v6  ;;  %v1340_v27 = vadd.f32 %v1339_v15, %v1338_v0  ;;  %v1742_v5 = vpack.c.bf16 %v1386_v54, %v1385_v2 }
 0x18e   :  { %v1442_v16 = vrot.slane %v1435_v10, 2  ;;  %v1741_v24 = vpack.c.bf16 %v1384_v48, %v1383_v6  ;;  %v1414_v26 = vrot.slane %v1384_v48, 2  ;;  %v1415_v32 = vrot.slane %v1386_v54, 2 }
 0x18f   :  { %v1413_v17 = vsel %vm1410_vm1, %v1411_v12, %v1412_v9  ;;  %v1441_v22 = vrot.slane %v1433_v13, 2  ;;  %v1434_v33 = vmul.f32 %v1384_v48, %v1384_v48  ;;  %v1436_v34 = vmul.f32 %v1386_v54, %v1386_v54 }
 0x190   :  { %v1419_v21 = vrot.slane %v1413_v17, 4  ;;  %v1738_v31 = vrot.slane %v1741_v24, 9  ;;  %v1345_v35 = vrot.slane %v1344_v18, 2  ;;  %v1402_v36 = vrot.slane %v1742_v5, 5 }
 0x191   :  { %v1443_v25 = vsel %vm1410_vm1, %v1441_v22, %v1442_v16  ;;  %v1325_v38 = vrot.slane %v1324_v23, 1  ;;  %v1416_v39 = vsel %vm1410_vm1, %v1414_v26, %v1415_v32  ;;  %v1444_v40 = vrot.slane %v1434_v33, 2 }
 0x192   :  { %v1420_v28 = vadd.f32 %v1419_v21, %v1413_v17  ;;  %v1449_v29 = vrot.slane %v1443_v25, 4  ;;  %v1445_v42 = vrot.slane %v1436_v34, 2  ;;  %v1403_v4 = vsel %vm2564_vm4, %v1738_v31, %v1402_v36 }
 0x193   :  { %v1425_v45 = vrot.slane %v1416_v39, 4  ;;  %v1341_v1 = vrot.slane %v1340_v27, 1  ;;  %v1330_v46 = vadd.f32 %v1329_v50, %v1328_v8  ;;  %1405 = vst [vmem:[%s2580_s2 + $0x8] sm:$0xff] %v1403_v4  ;;  %v1326_v55 = vadd.f32 %v1325_v38, %v1324_v23 }
 0x194   :  { %v1421_v19 = vrot.slane %v1420_v28, 2  ;;  %v1450_v20 = vadd.f32 %v1449_v29, %v1443_v25  ;;  %v1446_v14 = vsel %vm1410_vm1, %v1444_v40, %v1445_v42  ;;  %v1346_v56 = vadd.f32 %v1345_v35, %v1344_v18 }
 0x195   :  { %v1426_v51 = vadd.f32 %v1425_v45, %v1416_v39  ;;  %v1455_v53 = vrot.slane %v1446_v14, 4  ;;  %v1342_v60 = vadd.f32 %v1341_v1, %v1340_v27  ;;  %v1331_v43 = vrot.slane %v1330_v46, 1 }
 0x196   :  { %v1422_v37 = vadd.f32 %v1421_v19, %v1420_v28  ;;  %v1451_v44 = vrot.slane %v1450_v20, 2  ;;  %v1347_v2 = vrot.slane %v1346_v56, 1 }
 0x197   :  { %v1427_v59 = vrot.slane %v1426_v51, 2  ;;  %v1456_v41 = vadd.f32 %v1455_v53, %v1446_v14  ;;  %v1332_v8 = vadd.f32 %v1331_v43, %v1330_v46 }
 0x198   :  { %v1423_v47 = vrot.slane %v1422_v37, 1  ;;  %v1452_v49 = vadd.f32 %v1451_v44, %v1450_v20  ;;  %v1348_v11 = vadd.f32 %v1347_v2, %v1346_v56 }
 0x199   :  { %v1428_v63 = vadd.f32 %v1427_v59, %v1426_v51  ;;  %v1457_v0 = vrot.slane %v1456_v41, 2 }
 0x19a   :  { %v1424_v57 = vadd.f32 %v1423_v47, %v1422_v37  ;;  %v1453_v58 = vrot.slane %v1452_v49, 1 }
 0x19b   :  { %v1429_v6 = vrot.slane %v1428_v63, 1  ;;  %v1458_v7 = vadd.f32 %v1457_v0, %v1456_v41 }
 0x19c   :  { %v1431_v61 = vadd.f32 %v1424_v57, %v1326_v55  ;;  %v1454_v62 = vadd.f32 %v1453_v58, %v1452_v49 }
 0x19d   :  { %v1430_v9 = vadd.f32 %v1429_v6, %v1428_v63  ;;  %v1459_v10 = vrot.slane %v1458_v7, 1 }
 0x19e   :  { %v1461_v3 = vadd.f32 %v1454_v62, %v1342_v60 }
 0x19f   :  { %v1432_v12 = vadd.f32 %v1430_v9, %v1332_v8  ;;  %v1460_v13 = vadd.f32 %v1459_v10, %v1458_v7 }
 0x1a0   :  { %v1464_v52 = vsel %vm1463_vm5, %v1431_v61, %v1461_v3 }
 0x1a1   :  { %v1462_v15 = vadd.f32 %v1460_v13, %v1348_v11 }
 0x1a3   :  { %v1465_v16 = vsel %vm1463_vm5, %v1432_v12, %v1462_v15 }
 0x1a4   :  { %v1468_v48 = vcombine.low %v1464_v52, %v1465_v16 }
 0x1a6   :  { %1739 = vst.sshfl [vmem:[%s2581_s3] sm:$0x33 pattern:$0x76325410] %v1468_v48 }

// kernel: tile.103
= control target key start
LH: loop header
LB: loop body
LE: loop exit
PB: predicated region body
PF: predicated region fallthrough
CT: control target
= control target key end

     0   :  { %s22_s0 = inlined_call_operand.vmem [shape: f32[32], index: 0, kind: input, shape index: {}]   ;;  %s23_s1 = inlined_call_operand.vmem [shape: f32[8,32], index: 1, kind: output, shape index: {}]  }
   0x1   :  { %v4_v0 = vld [vmem:[%s22_s0] ss:$0 sm:$0xff] }
   0x2   :  { %5 = vst [vmem:[%s23_s1] sm:$0xff] %v4_v0 }

// kernel: tile.104
= control target key start
LH: loop header
LB: loop body
LE: loop exit
PB: predicated region body
PF: predicated region fallthrough
CT: control target
= control target key end

     0   :  { %s7_s6 = smov 3  ;;  %s14_s9 = smov 3  ;;  %vm4_vm0 = vcmask 261120   ;;  %vm11_vm1 = vcmask 1048320   ;;  %vm18_vm2 = vcmask 785920   ;;  %vm25_vm3 = vcmask 523520   ;;  %s76_s0 = inlined_call_operand.vmem [shape: f32[8,32], index: 0, kind: input, shape index: {}]   ;;  %s77_s1 = inlined_call_operand.vmem [shape: f32[1,256], index: 1, kind: output, shape index: {}]  }
   0x1   :  { %v38_v0 = vld [vmem:[%s76_s0 + $0x3] ss:$4 sm:%s7_s6]   ;;  %s45_s10 = smov 96   ;;  %s21_s11 = smov 3  ;;  %v39_v1 = vld [vmem:[%s76_s0 + $0x2] ss:$4 sm:%s14_s9]  }
   0x2   :  { %9 = vrot.lane.b32.xlu0 %v38_v0, %s45_s10  ;;  %v40_v2 = vld [vmem:[%s76_s0 + $0x1] ss:$4 sm:%s21_s11]   ;;  %s2_s16 = smov 3  ;;  %s46_s17 = smov 32  }
   0x3   :  { %23 = vrot.lane.b32.xlu1 %v40_v2, %s46_s17  ;;  %v3_v3 = vld [vmem:[%s76_s0] ss:$4 sm:%s2_s16]   ;;  %s47_s0 = smov 64  }
   0x4   :  { %5 = vst.msk [vmem:[#allocation0] ss:$8 sm:$0x3] %vm4_vm0, %v3_v3  }
   0x6   :  { %16 = vrot.lane.b32.xlu0 %v39_v1, %s47_s0 }
  0x74   :  { %v10_v4 = vpop.permute.xlu0 %9  }
  0x75   :  { %12 = vst.msk [vmem:[#allocation0] ss:$8 sm:$0x3] %vm11_vm1, %v10_v4   ;;  %v24_v5 = vpop.permute.xlu1 %23  }
  0x78   :  { %v17_v6 = vpop.permute.xlu0 %16  }
  0x79   :  { %19 = vst.msk [vmem:[#allocation0] ss:$8 sm:$0x3] %vm18_vm2, %v17_v6  }
  0x7a   :  { %26 = vst.msk [vmem:[#allocation0] ss:$8 sm:$0x3] %vm25_vm3, %v24_v5  }
  0x81   :  { %v30_v7 = vld [vmem:[#allocation0] sm:$0x1]  ;;  %v34_v8 = vld [vmem:[#allocation0 + $0x8] sm:$0x1] }
  0x82   :  { %32 = vst [vmem:[%s77_s1] sm:$0x1] %v30_v7  ;;  %41 = vst [vmem:[%s77_s1 + $0x1] sm:$0x1] %v34_v8 }

// kernel: _lambda_.21
= control target key start
LH: loop header
LB: loop body
LE: loop exit
PB: predicated region body
PF: predicated region fallthrough
CT: control target
= control target key end

     0   :  { %s319_s12 = smov 0   ;;  %s342_s0 = inlined_call_operand.vmem [shape: bf16[16,256], index: 0, kind: input, shape index: {}]   ;;  %s343_s1 = inlined_call_operand.vmem [shape: f32[1,256], index: 1, kind: input, shape index: {}]   ;;  %s344_s2 = inlined_call_operand.vmem [shape: f32[1,256], index: 2, kind: input, shape index: {}]   ;;  %s345_s3 = inlined_call_operand.vmem [shape: bf16[16,256], index: 3, kind: output, shape index: {}]  }
   0x1 LB: > { %s268_s13 = sadd.s32 4294967295, %s297_s12   ;;  %p272_p0 = scmp.ge.s32.totalorder %s297_s12, 1  ;;  %s297_s12 = sphi %s319_s12, %s13_s12  }
   0x2   : > { %p137_p1 = scmp.lt.s32.totalorder %s297_s12, 3 }
   0x4   : > { %p138_p2 = pnand %p272_p0, %p137_p1 }
   0x5   : > { %p161_p3 = scmp.lt.s32.totalorder (!%p138_p2), %s268_s13, 1  ;;  %v176_v0 = vlaneseq (!%p138_p2)  ;;  %v174_v2 = vld [vmem:[%s343_s1] sm:$0x3] (!%p138_p2) }
   0x6   : > { %141 = sbr.rel (%p138_p2) target bundleno = 28 (0x1c), region = 32  ;;  %v188_v5 = vld [vmem:[%s344_s2] sm:$0x3] (!%p138_p2) }
   0x7   : > { %v177_v1 = vshrl.u32 (!%p138_p2), %v176_v0, 7 }
   0x9   : > { %v178_v3 = vsub.s32 (!%p138_p2), 0, %v177_v1  ;;  %v182_v4 = vsub.s32 (!%p138_p2), 1, %v177_v1 }
   0xb   : > { %v179_v7 = vrot.slane (!%p138_p2), %v174_v2, %v178_v3  ;;  %v183_v8 = vrot.slane (!%p138_p2), %v174_v2, %v182_v4  ;;  %v193_v11 = vrot.slane (!%p138_p2), %v188_v5, %v178_v3  ;;  %v197_v12 = vrot.slane (!%p138_p2), %v188_v5, %v182_v4 }
   0xd   : > { %s347_s13 = smov (!%p161_p3, %s268_s13), 1 }
   0xe   : > { %s280_s16 = sshll.u32 %s347_s13, 3 }
   0xf   : > { %s165_s21 = scalar_lea.vmem %s342_s0, %s280_s16  ;;  %s170_s24 = scalar_lea.vmem %s345_s3, %s280_s16 }
  0x10   : > { %v171_v6 = vld [vmem:[%s165_s21] sm:$0xff] }
  0x11   : > { %v172_v9 = vunpack.c.l.bf16 %v171_v6  ;;  %v173_v10 = vunpack.c.h.bf16 %v171_v6 }
  0x13   : > { %v186_v13 = vmul.f32 %v179_v7, %v172_v9  ;;  %v187_v14 = vmul.f32 %v183_v8, %v173_v10 }
  0x15   : > { %v200_v15 = vadd.f32 %v193_v11, %v186_v13  ;;  %v201_v16 = vadd.f32 %v197_v12, %v187_v14 }
  0x17   : > { %v202_v17 = vmax.f32 %v200_v15, 0.0  ;;  %v203_v18 = vmax.f32 %v201_v16, 0.0 }
  0x19   : > { %v282_v19 = vpack.c.bf16 %v203_v18, %v202_v17 }
  0x1b   : > { %212 = vst [vmem:[%s170_s24] sm:$0xff] %v282_v19 }
  0x1c PF: > { %s13_s12 = sadd.s32 1, %s297_s12  }
  0x1d   : > { %p10_p4 = scmp.ge.s32.totalorder %s13_s12, 4  }
  0x1f   :  { %12 = sbr.rel (!%p10_p4) target bundleno = 1 (0x1), region = 62 }

// kernel: _lambda_.22
= control target key start
LH: loop header
LB: loop body
LE: loop exit
PB: predicated region body
PF: predicated region fallthrough
CT: control target
= control target key end

     0   :  { %v1912_v1 = vmov 0   ;;  %vm1238_vm0 = vcmask 1045504   ;;  %vm1223_vm1 = vcmask 1046528   ;;  %vm1326_vm2 = vcmask 1042432   ;;  %s2440_s1 = inlined_call_operand.vmem [shape: bf16[3,384,256], index: 1, kind: input, shape index: {}]   ;;  %s2441_s0 = inlined_call_operand.vmem [shape: bf16[20,384], index: 0, kind: input, shape index: {}]   ;;  %s2442_s2 = inlined_call_operand.vmem [shape: bf16[16,256], index: 2, kind: output, shape index: {0}]   ;;  %s2443_s3 = inlined_call_operand.vmem [shape: f32[1,2,256], index: 3, kind: output, shape index: {1}]  }
   0x1   :  { %v1689_v0 = vld [vmem:[%s2440_s1 + $0x4] ss:$8 sps:$4 sm:$0xff]   ;;  %418 = vmatprep.mubr.bf16.mxu0 %v1912_v1  ;;  %v1693_v3 = vld [vmem:[%s2440_s1] ss:$8 sps:$4 sm:$0xff]   ;;  %v1695_v5 = vld [vmem:[%s2440_s1 + $0x14] ss:$8 sps:$4 sm:$0xff]  }
   0x2   :  { %v1691_v2 = vld [vmem:[%s2440_s1 + $0x104] ss:$8 sps:$4 sm:$0xff]   ;;  %335 = vmatprep.subr.bf16.mxu1 %v1689_v0  ;;  %v1694_v4 = vld [vmem:[%s2440_s1 + $0x100] ss:$8 sps:$4 sm:$0xff]   ;;  %v1697_v6 = vld [vmem:[%s2440_s1 + $0x114] ss:$8 sps:$4 sm:$0xff]  }
   0x3   :  { %386 = vmatprep.subr.bf16.mxu0 %v1691_v2  ;;  %336 = vmatpush1.bf16.msra.mxu1 %v1693_v3  ;;  %v1699_v7 = vld [vmem:[%s2440_s1 + $0x10] ss:$8 sps:$4 sm:$0xff]   ;;  %v1701_v9 = vld [vmem:[%s2440_s1 + $0x24] ss:$8 sps:$4 sm:$0xff]   ;;  %v1705_v11 = vld [vmem:[%s2440_s1 + $0x20] ss:$8 sps:$4 sm:$0xff]  }
   0x4   :  { %387 = vmatpush1.bf16.msra.mxu0 %v1694_v4  ;;  %337 = vmatprep.subr.bf16.mxu1 %v1695_v5  ;;  %v1700_v8 = vld [vmem:[%s2440_s1 + $0x110] ss:$8 sps:$4 sm:$0xff]   ;;  %v1703_v10 = vld [vmem:[%s2440_s1 + $0x124] ss:$8 sps:$4 sm:$0xff]   ;;  %v1706_v12 = vld [vmem:[%s2440_s1 + $0x120] ss:$8 sps:$4 sm:$0xff]  }
   0x5   :  { %388 = vmatprep.subr.bf16.mxu0 %v1697_v6  ;;  %v1707_v13 = vld [vmem:[%s2440_s1 + $0x34] ss:$8 sps:$4 sm:$0xff]   ;;  %v1711_v15 = vld [vmem:[%s2440_s1 + $0x30] ss:$8 sps:$4 sm:$0xff]   ;;  %v1713_v17 = vld [vmem:[%s2440_s1 + $0x44] ss:$8 sps:$4 sm:$0xff]  }
   0x6   :  { %v1709_v14 = vld [vmem:[%s2440_s1 + $0x134] ss:$8 sps:$4 sm:$0xff]   ;;  %v1712_v16 = vld [vmem:[%s2440_s1 + $0x130] ss:$8 sps:$4 sm:$0xff]   ;;  %v1715_v18 = vld [vmem:[%s2440_s1 + $0x144] ss:$8 sps:$4 sm:$0xff]  }
   0x7   :  { %338 = vmatpush1.bf16.msra.mxu1 %v1699_v7  ;;  %v1717_v19 = vld [vmem:[%s2440_s1 + $0x40] ss:$8 sps:$4 sm:$0xff]   ;;  %v1719_v21 = vld [vmem:[%s2440_s1 + $0x54] ss:$8 sps:$4 sm:$0xff]   ;;  %v1723_v23 = vld [vmem:[%s2440_s1 + $0x50] ss:$8 sps:$4 sm:$0xff]  }
   0x8   :  { %389 = vmatpush1.bf16.msra.mxu0 %v1700_v8  ;;  %339 = vmatprep.subr.bf16.mxu1 %v1701_v9  ;;  %v1718_v20 = vld [vmem:[%s2440_s1 + $0x140] ss:$8 sps:$4 sm:$0xff]   ;;  %v1721_v22 = vld [vmem:[%s2440_s1 + $0x154] ss:$8 sps:$4 sm:$0xff]   ;;  %v1724_v24 = vld [vmem:[%s2440_s1 + $0x150] ss:$8 sps:$4 sm:$0xff]  }
   0x9   :  { %390 = vmatprep.subr.bf16.mxu0 %v1703_v10  ;;  %v1725_v25 = vld [vmem:[%s2440_s1 + $0x64] ss:$8 sps:$4 sm:$0xff]   ;;  %v1729_v27 = vld [vmem:[%s2440_s1 + $0x60] ss:$8 sps:$4 sm:$0xff]   ;;  %v1731_v29 = vld [vmem:[%s2440_s1 + $0x74] ss:$8 sps:$4 sm:$0xff]  }
   0xa   :  { %v1727_v26 = vld [vmem:[%s2440_s1 + $0x164] ss:$8 sps:$4 sm:$0xff]   ;;  %v1730_v28 = vld [vmem:[%s2440_s1 + $0x160] ss:$8 sps:$4 sm:$0xff]   ;;  %v1733_v30 = vld [vmem:[%s2440_s1 + $0x174] ss:$8 sps:$4 sm:$0xff]  }
   0xb   :  { %340 = vmatpush1.bf16.msra.mxu1 %v1705_v11  ;;  %v1735_v31 = vld [vmem:[%s2440_s1 + $0x70] ss:$8 sps:$4 sm:$0xff]   ;;  %v1737_v33 = vld [vmem:[%s2440_s1 + $0x84] ss:$8 sps:$4 sm:$0xff]   ;;  %v2039_v35 = vld [vmem:[%s2441_s0 + $0x8] ss:$12 sps:$4 sm:$0xff]  }
   0xc   :  { %391 = vmatpush1.bf16.msra.mxu0 %v1706_v12  ;;  %341 = vmatprep.subr.bf16.mxu1 %v1707_v13  ;;  %v1736_v32 = vld [vmem:[%s2440_s1 + $0x170] ss:$8 sps:$4 sm:$0xff]   ;;  %v1741_v34 = vld [vmem:[%s2440_s1 + $0x304] ss:$8 sps:$4 sm:$0xff]   ;;  %v1739_v36 = vld [vmem:[%s2440_s1 + $0x300] ss:$8 sps:$4 sm:$0xff]  }
   0xd   :  { %392 = vmatprep.subr.bf16.mxu0 %v1709_v14  ;;  %v1742_v37 = vld [vmem:[%s2440_s1 + $0x80] ss:$8 sps:$4 sm:$0xff]   ;;  %v1744_v38 = vld [vmem:[%s2440_s1 + $0x94] ss:$8 sps:$4 sm:$0xff]   ;;  %v1746_v40 = vld [vmem:[%s2440_s1 + $0x310] ss:$8 sps:$4 sm:$0xff]  }
   0xe   :  { %v1748_v39 = vld [vmem:[%s2440_s1 + $0x314] ss:$8 sps:$4 sm:$0xff]   ;;  %v1749_v41 = vld [vmem:[%s2440_s1 + $0x90] ss:$8 sps:$4 sm:$0xff]   ;;  %v1750_v42 = vld [vmem:[%s2440_s1 + $0xa4] ss:$8 sps:$4 sm:$0xff]  }
   0xf   :  { %342 = vmatpush1.bf16.msra.mxu1 %v1711_v15  ;;  %v1754_v43 = vld [vmem:[%s2440_s1 + $0x324] ss:$8 sps:$4 sm:$0xff]   ;;  %v1752_v44 = vld [vmem:[%s2440_s1 + $0x320] ss:$8 sps:$4 sm:$0xff]   ;;  %v1756_v46 = vld [vmem:[%s2440_s1 + $0xb4] ss:$8 sps:$4 sm:$0xff]  }
  0x10   :  { %393 = vmatpush1.bf16.msra.mxu0 %v1712_v16  ;;  %343 = vmatprep.subr.bf16.mxu1 %v1713_v17  ;;  %v1755_v45 = vld [vmem:[%s2440_s1 + $0xa0] ss:$8 sps:$4 sm:$0xff]   ;;  %v1760_v47 = vld [vmem:[%s2440_s1 + $0x334] ss:$8 sps:$4 sm:$0xff]   ;;  %v1758_v48 = vld [vmem:[%s2440_s1 + $0x330] ss:$8 sps:$4 sm:$0xff]  }
  0x11   :  { %394 = vmatprep.subr.bf16.mxu0 %v1715_v18  ;;  %v1761_v49 = vld [vmem:[%s2440_s1 + $0xb0] ss:$8 sps:$4 sm:$0xff]   ;;  %v1762_v50 = vld [vmem:[%s2440_s1 + $0xc4] ss:$8 sps:$4 sm:$0xff]   ;;  %v1764_v53 = vld [vmem:[%s2440_s1 + $0x340] ss:$8 sps:$4 sm:$0xff]  }
  0x12   :  { %v2091_v51 = vld [vmem:[%s2441_s0 + $0x4] ss:$12 sps:$4 sm:$0xff]   ;;  %v1767_v54 = vld [vmem:[%s2440_s1 + $0xc0] ss:$8 sps:$4 sm:$0xff]   ;;  %v1768_v55 = vld [vmem:[%s2440_s1 + $0xd4] ss:$8 sps:$4 sm:$0xff]  }
  0x13   :  { %344 = vmatpush1.bf16.msra.mxu1 %v1717_v19  ;;  %v1766_v52 = vld [vmem:[%s2440_s1 + $0x344] ss:$8 sps:$4 sm:$0xff]   ;;  %367 = vmatprep.mubr.bf16.mxu1 %v2091_v51  ;;  %v1772_v56 = vld [vmem:[%s2440_s1 + $0x354] ss:$8 sps:$4 sm:$0xff]   ;;  %v1770_v57 = vld [vmem:[%s2440_s1 + $0x350] ss:$8 sps:$4 sm:$0xff]  }
  0x14   :  { %395 = vmatpush1.bf16.msra.mxu0 %v1718_v20  ;;  %345 = vmatprep.subr.bf16.mxu1 %v1719_v21  ;;  %v1773_v58 = vld [vmem:[%s2440_s1 + $0xd0] ss:$8 sps:$4 sm:$0xff]   ;;  %v1774_v59 = vld [vmem:[%s2440_s1 + $0xe4] ss:$8 sps:$4 sm:$0xff]   ;;  %v1776_v61 = vld [vmem:[%s2440_s1 + $0x360] ss:$8 sps:$4 sm:$0xff]  }
  0x15   :  { %396 = vmatprep.subr.bf16.mxu0 %v1721_v22  ;;  %v1778_v60 = vld [vmem:[%s2440_s1 + $0x364] ss:$8 sps:$4 sm:$0xff]   ;;  %v1779_v62 = vld [vmem:[%s2440_s1 + $0xe0] ss:$8 sps:$4 sm:$0xff]   ;;  %v1780_v63 = vld [vmem:[%s2440_s1 + $0xf4] ss:$8 sps:$4 sm:$0xff]  }
  0x16   :  { %v1784_v0 = vld [vmem:[%s2440_s1 + $0x374] ss:$8 sps:$4 sm:$0xff]   ;;  %v1782_v2 = vld [vmem:[%s2440_s1 + $0x370] ss:$8 sps:$4 sm:$0xff]   ;;  %v1791_v4 = vld [vmem:[%s2440_s1 + $0x184] ss:$8 sps:$4 sm:$0xff]  }
  0x17   :  { %346 = vmatpush1.bf16.msra.mxu1 %v1723_v23  ;;  %v1785_v3 = vld [vmem:[%s2440_s1 + $0xf0] ss:$8 sps:$4 sm:$0xff]   ;;  %v1794_v5 = vld [vmem:[%s2440_s1 + $0x384] ss:$8 sps:$4 sm:$0xff]   ;;  %v1789_v7 = vld [vmem:[%s2440_s1 + $0x180] ss:$8 sps:$4 sm:$0xff]  }
  0x18   :  { %397 = vmatpush1.bf16.msra.mxu0 %v1724_v24  ;;  %347 = vmatprep.subr.bf16.mxu1 %v1725_v25  ;;  %v2148_v6 = vld [vmem:[%s2441_s0] ss:$12 sps:$4 sm:$0xff]   ;;  %v1797_v10 = vld [vmem:[%s2440_s1 + $0x194] ss:$8 sps:$4 sm:$0xff]   ;;  %v1795_v12 = vld [vmem:[%s2440_s1 + $0x190] ss:$8 sps:$4 sm:$0xff]  }
  0x19   :  { %398 = vmatprep.subr.bf16.mxu0 %v1727_v26  ;;  %v1792_v8 = vld [vmem:[%s2440_s1 + $0x380] ss:$8 sps:$4 sm:$0xff]   ;;  %v1800_v11 = vld [vmem:[%s2440_s1 + $0x394] ss:$8 sps:$4 sm:$0xff]   ;;  %v1798_v13 = vld [vmem:[%s2440_s1 + $0x390] ss:$8 sps:$4 sm:$0xff]  }
  0x1a   :  { %v2159_v9 = vld [vmem:[%s2441_s0 + $0x20] ss:$0 sps:$4 sm:$0x33]   ;;  %v1803_v14 = vld [vmem:[%s2440_s1 + $0x1a4] ss:$8 sps:$4 sm:$0xff]   ;;  %vm1327_vm3 = vcmask 1046532  }
  0x1b   :  { %348 = vmatpush1.bf16.msra.mxu1 %v1729_v27  ;;  %v1806_v15 = vld [vmem:[%s2440_s1 + $0x3a4] ss:$8 sps:$4 sm:$0xff]   ;;  %v1801_v16 = vld [vmem:[%s2440_s1 + $0x1a0] ss:$8 sps:$4 sm:$0xff]   ;;  %v1809_v18 = vld [vmem:[%s2440_s1 + $0x1b4] ss:$8 sps:$4 sm:$0xff]  }
  0x1c   :  { %399 = vmatpush1.bf16.msra.mxu0 %v1730_v28  ;;  %349 = vmatprep.subr.bf16.mxu1 %v1731_v29  ;;  %v1804_v17 = vld [vmem:[%s2440_s1 + $0x3a0] ss:$8 sps:$4 sm:$0xff]   ;;  %v1812_v19 = vld [vmem:[%s2440_s1 + $0x3b4] ss:$8 sps:$4 sm:$0xff]   ;;  %v1807_v20 = vld [vmem:[%s2440_s1 + $0x1b0] ss:$8 sps:$4 sm:$0xff]  }
  0x1d   :  { %400 = vmatprep.subr.bf16.mxu0 %v1733_v30  ;;  %v1810_v21 = vld [vmem:[%s2440_s1 + $0x3b0] ss:$8 sps:$4 sm:$0xff]   ;;  %v1815_v22 = vld [vmem:[%s2440_s1 + $0x1c4] ss:$8 sps:$4 sm:$0xff]   ;;  %v1813_v24 = vld [vmem:[%s2440_s1 + $0x1c0] ss:$8 sps:$4 sm:$0xff]  }
  0x1e   :  { %v1818_v23 = vld [vmem:[%s2440_s1 + $0x3c4] ss:$8 sps:$4 sm:$0xff]   ;;  %v1816_v25 = vld [vmem:[%s2440_s1 + $0x3c0] ss:$8 sps:$4 sm:$0xff]   ;;  %v1821_v26 = vld [vmem:[%s2440_s1 + $0x1d4] ss:$8 sps:$4 sm:$0xff]  }
  0x1f   :  { %350 = vmatpush1.bf16.msra.mxu1 %v1735_v31  ;;  %v1824_v27 = vld [vmem:[%s2440_s1 + $0x3d4] ss:$8 sps:$4 sm:$0xff]   ;;  %v1819_v29 = vld [vmem:[%s2440_s1 + $0x1d0] ss:$8 sps:$4 sm:$0xff]   ;;  %vm1328_vm4 = vmor %vm1326_vm2, %vm1327_vm3  ;;  %vm1391_vm5 = vcmask 1040384  }
  0x20   :  { %401 = vmatpush1.bf16.msra.mxu0 %v1736_v32  ;;  %351 = vmatprep.subr.bf16.mxu1 %v1737_v33  ;;  %v18_v28 = vld [vmem:[%s2441_s0 + $0x18] sm:$0x33]  ;;  %v1827_v33 = vld [vmem:[%s2440_s1 + $0x1e4] ss:$8 sps:$4 sm:$0xff]  }
  0x21   :  { %1117 = vmatprep.subr.bf16.mxu0 %v1741_v34  ;;  %v1822_v30 = vld [vmem:[%s2440_s1 + $0x3d0] ss:$8 sps:$4 sm:$0xff]   ;;  %v2227_v31 = vcombine.high %v18_v28, %v18_v28  ;;  %v2229_v32 = vcombine.low %v18_v28, %v18_v28  ;;  %v1830_v34 = vld [vmem:[%s2440_s1 + $0x3e4] ss:$8 sps:$4 sm:$0xff]  }
  0x23   :  { %419 = vmatmul.mubr.bf16.vlgmr.msra.gmra.mrb[0].mxu0 %v2039_v35  ;;  %352 = vmatpush1.bf16.msra.mxu1 %v1742_v37  ;;  %v1828_v37 = vld [vmem:[%s2440_s1 + $0x3e0] ss:$8 sps:$4 sm:$0xff]  }
  0x24   :  { %1118 = vmatpush1.bf16.msra.mxu0 %v1739_v36  ;;  %353 = vmatprep.subr.bf16.mxu1 %v1744_v38  ;;  %v1825_v36 = vld [vmem:[%s2440_s1 + $0x1e0] ss:$8 sps:$4 sm:$0xff]   ;;  %v1834_v38 = vld [vmem:[%s2440_s1 + $0x1f4] ss:$8 sps:$4 sm:$0xff]  }
  0x25   :  { %1119 = vmatprep.subr.bf16.mxu0 %v1748_v39  ;;  %428 = vmatprep.mubr.bf16.mxu0 %v1912_v1  ;;  %v1837_v39 = vld [vmem:[%s2440_s1 + $0x3f4] ss:$8 sps:$4 sm:$0xff]  }
  0x27   :  { %354 = vmatpush1.bf16.msra.mxu1 %v1749_v41  ;;  %v1835_v41 = vld [vmem:[%s2440_s1 + $0x3f0] ss:$8 sps:$4 sm:$0xff]  }
  0x28   :  { %1120 = vmatpush1.bf16.msra.mxu0 %v1746_v40  ;;  %355 = vmatprep.subr.bf16.mxu1 %v1750_v42  ;;  %v1832_v40 = vld [vmem:[%s2440_s1 + $0x1f0] ss:$8 sps:$4 sm:$0xff]   ;;  %v1840_v42 = vld [vmem:[%s2440_s1 + $0x204] ss:$8 sps:$4 sm:$0xff]  }
  0x29   :  { %1121 = vmatprep.subr.bf16.mxu0 %v1754_v43  ;;  %v1843_v43 = vld [vmem:[%s2440_s1 + $0x404] ss:$8 sps:$4 sm:$0xff]  }
  0x2b   :  { %356 = vmatpush1.bf16.msra.mxu1 %v1755_v45  ;;  %429 = vmatmul.mubr.bf16.gmra.mrb[4].mxu0 %v2159_v9  ;;  %v1841_v45 = vld [vmem:[%s2440_s1 + $0x400] ss:$8 sps:$4 sm:$0xff]  }
  0x2c   :  { %1122 = vmatpush1.bf16.msra.mxu0 %v1752_v44  ;;  %357 = vmatprep.subr.bf16.mxu1 %v1756_v46  ;;  %v1838_v44 = vld [vmem:[%s2440_s1 + $0x200] ss:$8 sps:$4 sm:$0xff]   ;;  %v1846_v46 = vld [vmem:[%s2440_s1 + $0x214] ss:$8 sps:$4 sm:$0xff]  }
  0x2d   :  { %1123 = vmatprep.subr.bf16.mxu0 %v1760_v47  ;;  %1149 = vmatprep.mubr.bf16.mxu0 %v2091_v51  ;;  %v1849_v47 = vld [vmem:[%s2440_s1 + $0x414] ss:$8 sps:$4 sm:$0xff]  }
  0x2f   :  { %358 = vmatpush1.bf16.msra.mxu1 %v1761_v49  ;;  %v1847_v49 = vld [vmem:[%s2440_s1 + $0x410] ss:$8 sps:$4 sm:$0xff]  }
  0x30   :  { %1124 = vmatpush1.bf16.msra.mxu0 %v1758_v48  ;;  %359 = vmatprep.subr.bf16.mxu1 %v1762_v50  ;;  %v1844_v48 = vld [vmem:[%s2440_s1 + $0x210] ss:$8 sps:$4 sm:$0xff]   ;;  %v1852_v50 = vld [vmem:[%s2440_s1 + $0x224] ss:$8 sps:$4 sm:$0xff]  }
  0x31   :  { %1125 = vmatprep.subr.bf16.mxu0 %v1766_v52  ;;  %v1850_v52 = vld [vmem:[%s2440_s1 + $0x220] ss:$8 sps:$4 sm:$0xff]  }
  0x33   :  { %360 = vmatpush1.bf16.msra.mxu1 %v1767_v54  ;;  %v1858_v54 = vld [vmem:[%s2440_s1 + $0x234] ss:$8 sps:$4 sm:$0xff]  }
  0x34   :  { %1126 = vmatpush1.bf16.msra.mxu0 %v1764_v53  ;;  %361 = vmatprep.subr.bf16.mxu1 %v1768_v55  ;;  %v1853_v53 = vld [vmem:[%s2440_s1 + $0x420] ss:$8 sps:$4 sm:$0xff]   ;;  %v1861_v55 = vld [vmem:[%s2440_s1 + $0x434] ss:$8 sps:$4 sm:$0xff]  }
  0x35   :  { %1127 = vmatprep.subr.bf16.mxu0 %v1772_v56  ;;  %v1856_v56 = vld [vmem:[%s2440_s1 + $0x230] ss:$8 sps:$4 sm:$0xff]  }
  0x37   :  { %362 = vmatpush1.bf16.msra.mxu1 %v1773_v58  ;;  %v1864_v58 = vld [vmem:[%s2440_s1 + $0x244] ss:$8 sps:$4 sm:$0xff]  }
  0x38   :  { %1128 = vmatpush1.bf16.msra.mxu0 %v1770_v57  ;;  %363 = vmatprep.subr.bf16.mxu1 %v1774_v59  ;;  %v1859_v57 = vld [vmem:[%s2440_s1 + $0x430] ss:$8 sps:$4 sm:$0xff]   ;;  %v1867_v59 = vld [vmem:[%s2440_s1 + $0x444] ss:$8 sps:$4 sm:$0xff]  }
  0x39   :  { %1129 = vmatprep.subr.bf16.mxu0 %v1778_v60  ;;  %v1862_v60 = vld [vmem:[%s2440_s1 + $0x240] ss:$8 sps:$4 sm:$0xff]  }
  0x3b   :  { %364 = vmatpush1.bf16.msra.mxu1 %v1779_v62  ;;  %v1870_v62 = vld [vmem:[%s2440_s1 + $0x254] ss:$8 sps:$4 sm:$0xff]  }
  0x3c   :  { %1130 = vmatpush1.bf16.msra.mxu0 %v1776_v61  ;;  %365 = vmatprep.subr.bf16.mxu1 %v1780_v63  ;;  %v1865_v61 = vld [vmem:[%s2440_s1 + $0x440] ss:$8 sps:$4 sm:$0xff]   ;;  %v1873_v63 = vld [vmem:[%s2440_s1 + $0x454] ss:$8 sps:$4 sm:$0xff]  }
  0x3d   :  { %1131 = vmatprep.subr.bf16.mxu0 %v1784_v0  ;;  %v1868_v0 = vld [vmem:[%s2440_s1 + $0x250] ss:$8 sps:$4 sm:$0xff]  }
  0x3f   :  { %366 = vmatpush1.bf16.msra.mxu1 %v1785_v3  ;;  %v1878_v3 = vld [vmem:[%s2440_s1 + $0x264] ss:$8 sps:$4 sm:$0xff]  }
  0x40   :  { %1132 = vmatpush1.bf16.msra.mxu0 %v1782_v2  ;;  %726 = vmatprep.subr.bf16.mxu1 %v1791_v4  ;;  %v1871_v2 = vld [vmem:[%s2440_s1 + $0x450] ss:$8 sps:$4 sm:$0xff]   ;;  %v1881_v4 = vld [vmem:[%s2440_s1 + $0x464] ss:$8 sps:$4 sm:$0xff]  }
  0x41   :  { %1133 = vmatprep.subr.bf16.mxu0 %v1794_v5  ;;  %v1876_v5 = vld [vmem:[%s2440_s1 + $0x260] ss:$8 sps:$4 sm:$0xff]  }
  0x42   :  { %368 = vmatmul.mubr.bf16.vlgmr.msra.gmra.mrb[0].mxu1 %v2148_v6 }
  0x43   :  { %727 = vmatpush1.bf16.msra.mxu1 %v1789_v7  ;;  %377 = vmatprep.mubr.bf16.mxu1 %v2227_v31  ;;  %v1879_v7 = vld [vmem:[%s2440_s1 + $0x460] ss:$8 sps:$4 sm:$0xff]  }
  0x44   :  { %1134 = vmatpush1.bf16.msra.mxu0 %v1792_v8  ;;  %728 = vmatprep.subr.bf16.mxu1 %v1797_v10  ;;  %v1884_v8 = vld [vmem:[%s2440_s1 + $0x274] ss:$8 sps:$4 sm:$0xff]  }
  0x45   :  { %1135 = vmatprep.subr.bf16.mxu0 %v1800_v11  ;;  %v1887_v10 = vld [vmem:[%s2440_s1 + $0x474] ss:$8 sps:$4 sm:$0xff]   ;;  %v1882_v11 = vld [vmem:[%s2440_s1 + $0x270] ss:$8 sps:$4 sm:$0xff]  }
  0x47   :  { %729 = vmatpush1.bf16.msra.mxu1 %v1795_v12  ;;  %v1885_v12 = vld [vmem:[%s2440_s1 + $0x470] ss:$8 sps:$4 sm:$0xff]  }
  0x48   :  { %1136 = vmatpush1.bf16.msra.mxu0 %v1798_v13  ;;  %730 = vmatprep.subr.bf16.mxu1 %v1803_v14  ;;  %v1890_v13 = vld [vmem:[%s2440_s1 + $0x284] ss:$8 sps:$4 sm:$0xff]   ;;  %v1888_v14 = vld [vmem:[%s2440_s1 + $0x280] ss:$8 sps:$4 sm:$0xff]  }
  0x49   :  { %1137 = vmatprep.subr.bf16.mxu0 %v1806_v15  ;;  %v1893_v15 = vld [vmem:[%s2440_s1 + $0x294] ss:$8 sps:$4 sm:$0xff]  }
  0x4a   :  { %378 = vmatmul.mubr.bf16.gmra.mrb[4].mxu1 %v2229_v32 }
  0x4b   :  { %731 = vmatpush1.bf16.msra.mxu1 %v1801_v16  ;;  %758 = vmatprep.mubr.bf16.mxu1 %v2091_v51  ;;  %v1855_v51 = vld [vmem:[%s2440_s1 + $0x424] ss:$8 sps:$4 sm:$0xff]   ;;  %v1891_v16 = vld [vmem:[%s2440_s1 + $0x290] ss:$8 sps:$4 sm:$0xff]  }
  0x4c   :  { %1138 = vmatpush1.bf16.msra.mxu0 %v1804_v17  ;;  %732 = vmatprep.subr.bf16.mxu1 %v1809_v18  ;;  %v1896_v17 = vld [vmem:[%s2440_s1 + $0x2a4] ss:$8 sps:$4 sm:$0xff]   ;;  %v1894_v18 = vld [vmem:[%s2440_s1 + $0x2a0] ss:$8 sps:$4 sm:$0xff]  }
  0x4d   :  { %1139 = vmatprep.subr.bf16.mxu0 %v1812_v19  ;;  %v1897_v19 = vld [vmem:[%s2440_s1 + $0x2b0] ss:$8 sps:$4 sm:$0xff]  }
  0x4f   :  { %733 = vmatpush1.bf16.msra.mxu1 %v1807_v20  ;;  %v1902_v20 = vld [vmem:[%s2440_s1 + $0x2c4] ss:$8 sps:$4 sm:$0xff]  }
  0x50   :  { %1140 = vmatpush1.bf16.msra.mxu0 %v1810_v21  ;;  %734 = vmatprep.subr.bf16.mxu1 %v1815_v22  ;;  %v1900_v21 = vld [vmem:[%s2440_s1 + $0x2c0] ss:$8 sps:$4 sm:$0xff]   ;;  %v1905_v22 = vld [vmem:[%s2440_s1 + $0x2d4] ss:$8 sps:$4 sm:$0xff]  }
  0x51   :  { %1141 = vmatprep.subr.bf16.mxu0 %v1818_v23  ;;  %v1903_v23 = vld [vmem:[%s2440_s1 + $0x2d0] ss:$8 sps:$4 sm:$0xff]  }
  0x53   :  { %735 = vmatpush1.bf16.msra.mxu1 %v1813_v24  ;;  %v1908_v24 = vld [vmem:[%s2440_s1 + $0x2e4] ss:$8 sps:$4 sm:$0xff]  }
  0x54   :  { %1142 = vmatpush1.bf16.msra.mxu0 %v1816_v25  ;;  %736 = vmatprep.subr.bf16.mxu1 %v1821_v26  ;;  %v1906_v25 = vld [vmem:[%s2440_s1 + $0x2e0] ss:$8 sps:$4 sm:$0xff]   ;;  %v1911_v26 = vld [vmem:[%s2440_s1 + $0x2f4] ss:$8 sps:$4 sm:$0xff]  }
  0x55   :  { %1143 = vmatprep.subr.bf16.mxu0 %v1824_v27  ;;  %v1909_v27 = vld [vmem:[%s2440_s1 + $0x2f0] ss:$8 sps:$4 sm:$0xff]  }
  0x57   :  { %737 = vmatpush1.bf16.msra.mxu1 %v1819_v29 }
  0x58   :  { %1144 = vmatpush1.bf16.msra.mxu0 %v1822_v30  ;;  %738 = vmatprep.subr.bf16.mxu1 %v1827_v33 }
  0x59   :  { %1145 = vmatprep.subr.bf16.mxu0 %v1830_v34 }
  0x5b   :  { %739 = vmatpush1.bf16.msra.mxu1 %v1825_v36 }
  0x5c   :  { %1146 = vmatpush1.bf16.msra.mxu0 %v1828_v37  ;;  %740 = vmatprep.subr.bf16.mxu1 %v1834_v38 }
  0x5d   :  { %1147 = vmatprep.subr.bf16.mxu0 %v1837_v39 }
  0x5f   :  { %741 = vmatpush1.bf16.msra.mxu1 %v1832_v40 }
  0x60   :  { %1148 = vmatpush1.bf16.msra.mxu0 %v1835_v41  ;;  %742 = vmatprep.subr.bf16.mxu1 %v1840_v42 }
  0x61   :  { %1168 = vmatprep.subr.bf16.mxu0 %v1843_v43 }
  0x63   :  { %1150 = vmatmul.mubr.bf16.vlgmr.msra.gmra.mrb[8].mxu0 %v2148_v6  ;;  %743 = vmatpush1.bf16.msra.mxu1 %v1838_v44 }
  0x64   :  { %1169 = vmatpush1.bf16.msra.mxu0 %v1841_v45  ;;  %744 = vmatprep.subr.bf16.mxu1 %v1846_v46 }
  0x65   :  { %1170 = vmatprep.subr.bf16.mxu0 %v1849_v47  ;;  %1159 = vmatprep.mubr.bf16.mxu0 %v2227_v31 }
  0x67   :  { %745 = vmatpush1.bf16.msra.mxu1 %v1844_v48 }
  0x68   :  { %1171 = vmatpush1.bf16.msra.mxu0 %v1847_v49  ;;  %746 = vmatprep.subr.bf16.mxu1 %v1852_v50 }
  0x69   :  { %1172 = vmatprep.subr.bf16.mxu0 %v1855_v51 }
  0x6b   :  { %1160 = vmatmul.mubr.bf16.gmra.mrb[12].mxu0 %v2229_v32  ;;  %747 = vmatpush1.bf16.msra.mxu1 %v1850_v52 }
  0x6c   :  { %1173 = vmatpush1.bf16.msra.mxu0 %v1853_v53  ;;  %748 = vmatprep.subr.bf16.mxu1 %v1858_v54 }
  0x6d   :  { %1174 = vmatprep.subr.bf16.mxu0 %v1861_v55  ;;  %1200 = vmatprep.mubr.bf16.mxu0 %v1912_v1 }
  0x6f   :  { %749 = vmatpush1.bf16.msra.mxu1 %v1856_v56 }
  0x70   :  { %1175 = vmatpush1.bf16.msra.mxu0 %v1859_v57  ;;  %750 = vmatprep.subr.bf16.mxu1 %v1864_v58 }
  0x71   :  { %1176 = vmatprep.subr.bf16.mxu0 %v1867_v59 }
  0x73   :  { %751 = vmatpush1.bf16.msra.mxu1 %v1862_v60 }
  0x74   :  { %1177 = vmatpush1.bf16.msra.mxu0 %v1865_v61  ;;  %752 = vmatprep.subr.bf16.mxu1 %v1870_v62 }
  0x75   :  { %1178 = vmatprep.subr.bf16.mxu0 %v1873_v63 }
  0x77   :  { %753 = vmatpush1.bf16.msra.mxu1 %v1868_v0 }
  0x78   :  { %1179 = vmatpush1.bf16.msra.mxu0 %v1871_v2  ;;  %754 = vmatprep.subr.bf16.mxu1 %v1878_v3 }
  0x79   :  { %1180 = vmatprep.subr.bf16.mxu0 %v1881_v4 }
  0x7b   :  { %755 = vmatpush1.bf16.msra.mxu1 %v1876_v5 }
  0x7c   :  { %1181 = vmatpush1.bf16.msra.mxu0 %v1879_v7  ;;  %756 = vmatprep.subr.bf16.mxu1 %v1884_v8 }
  0x7d   :  { %1182 = vmatprep.subr.bf16.mxu0 %v1887_v10 }
  0x7f   :  { %757 = vmatpush1.bf16.msra.mxu1 %v1882_v11 }
  0x80   :  { %1183 = vmatpush1.bf16.msra.mxu0 %v1885_v12  ;;  %777 = vmatprep.subr.bf16.mxu1 %v1890_v13 }
  0x82   :  { %759 = vmatmul.mubr.bf16.vlgmr.msra.gmra.mrb[8].mxu1 %v2148_v6  ;;  %v1899_v6 = vld [vmem:[%s2440_s1 + $0x2b4] ss:$8 sps:$4 sm:$0xff]  }
  0x83   :  { %1201 = vmatmul.mubr.bf16.vlgmr.msra.gmra.mrb[8].mxu0 %v2039_v35  ;;  %778 = vmatpush1.bf16.msra.mxu1 %v1888_v14 }
  0x84   :  { %1210 = vmatprep.mubr.bf16.mxu0 %v1912_v1  ;;  %779 = vmatprep.subr.bf16.mxu1 %v1893_v15 }
  0x85   :  { %768 = vmatprep.mubr.bf16.mxu1 %v2227_v31 }
  0x87   :  { %780 = vmatpush1.bf16.msra.mxu1 %v1891_v16 }
  0x88   :  { %781 = vmatprep.subr.bf16.mxu1 %v1896_v17 }
  0x8a   :  { %769 = vmatmul.mubr.bf16.gmra.mrb[12].mxu1 %v2229_v32 }
  0x8b   :  { %1211 = vmatmul.mubr.bf16.gmra.mrb[12].mxu0 %v2159_v9  ;;  %782 = vmatpush1.bf16.msra.mxu1 %v1894_v18 }
  0x8c   :  { %809 = vmatprep.mubr.bf16.mxu1 %v1912_v1  ;;  %783 = vmatprep.subr.bf16.mxu1 %v1899_v6 }
  0x8f   :  { %784 = vmatpush1.bf16.msra.mxu1 %v1897_v19 }
  0x90   :  { %785 = vmatprep.subr.bf16.mxu1 %v1902_v20 }
  0x93   :  { %786 = vmatpush1.bf16.msra.mxu1 %v1900_v21 }
  0x94   :  { %787 = vmatprep.subr.bf16.mxu1 %v1905_v22 }
  0x97   :  { %788 = vmatpush1.bf16.msra.mxu1 %v1903_v23 }
  0x98   :  { %789 = vmatprep.subr.bf16.mxu1 %v1908_v24 }
  0x9b   :  { %790 = vmatpush1.bf16.msra.mxu1 %v1906_v25 }
  0x9c   :  { %791 = vmatprep.subr.bf16.mxu1 %v1911_v26 }
  0x9f   :  { %792 = vmatpush1.bf16.msra.mxu1 %v1909_v27 }
  0xa2   :  { %810 = vmatmul.mubr.bf16.vlgmr.msra.gmra.mrb[8].mxu1 %v2039_v35 }
  0xa3   :  { %819 = vmatprep.mubr.bf16.mxu1 %v1912_v1 }
  0xaa   :  { %820 = vmatmul.mubr.bf16.gmra.mrb[12].mxu1 %v2159_v9 }
  0xf6   :  { %v420_v28 = vpop.f32.mrb[0].mxu0 }
  0xf7   :  { %v422_v29 = vpop.f32.mrb[1].mxu0 }
  0xf8   :  { %v424_v30 = vpop.f32.mrb[2].mxu0 }
  0xf9   :  { %v426_v31 = vpop.f32.mrb[3].mxu0 }
  0xfe   :  { %v430_v32 = vpop.f32.mrb[4].mxu0 }
  0xff   :  { %v432_v34 = vpop.f32.mrb[5].mxu0 }
 0x100   :  { %v434_v38 = vpop.f32.mrb[6].mxu0 }
 0x101   :  { %v435_v41 = vpop.f32.mrb[7].mxu0 }
 0x115   :  { %v369_v33 = vpop.f32.mrb[0].mxu1 }
 0x116   :  { %v421_v36 = vadd.f32 %v420_v28, %v369_v33  ;;  %v371_v37 = vpop.f32.mrb[1].mxu1 }
 0x117   :  { %v423_v39 = vadd.f32 %v422_v29, %v371_v37  ;;  %v373_v40 = vpop.f32.mrb[2].mxu1 }
 0x118   :  { %v425_v42 = vadd.f32 %v424_v30, %v373_v40  ;;  %v375_v43 = vpop.f32.mrb[3].mxu1 }
 0x119   :  { %v2416_v35 = vadd.f32 %v426_v31, %v375_v43 }
 0x11d   :  { %v379_v1 = vpop.f32.mrb[4].mxu1 }
 0x11e   :  { %v381_v44 = vpop.f32.mrb[5].mxu1  ;;  %v431_v9 = vadd.f32 %v430_v32, %v379_v1 }
 0x11f   :  { %v383_v45 = vpop.f32.mrb[6].mxu1  ;;  %v433_v46 = vadd.f32 %v432_v34, %v381_v44 }
 0x120   :  { %v384_v47 = vpop.f32.mrb[7].mxu1 }
 0x156   :  { %v1202_v48 = vpop.f32.mrb[8].mxu0 }
 0x157   :  { %v1239_v49 = vrot.slane %v1202_v48, 2  ;;  %v1204_v50 = vpop.f32.mrb[9].mxu0 }
 0x158   :  { %v1242_v51 = vrot.slane %v1204_v50, 2  ;;  %v1206_v52 = vpop.f32.mrb[10].mxu0 }
 0x159   :  { %v1240_v53 = vrot.slane %v1206_v52, 2  ;;  %v1208_v54 = vpop.f32.mrb[11].mxu0 }
 0x15a   :  { %v1243_v55 = vrot.slane %v1208_v54, 2 }
 0x15b   :  { %v1241_v56 = vsel %vm1238_vm0, %v1239_v49, %v1240_v53 }
 0x15c   :  { %v1244_v57 = vsel %vm1238_vm0, %v1242_v51, %v1243_v55 }
 0x15e   :  { %v1212_v58 = vpop.f32.mrb[12].mxu0 }
 0x15f   :  { %v1304_v59 = vrot.slane %v1212_v58, 2  ;;  %v1214_v60 = vpop.f32.mrb[13].mxu0 }
 0x160   :  { %v1306_v61 = vrot.slane %v1214_v60, 2  ;;  %v1216_v62 = vpop.f32.mrb[14].mxu0 }
 0x161   :  { %v1305_v63 = vsel %vm1238_vm0, %v1240_v53, %v1304_v59  ;;  %v1217_v0 = vpop.f32.mrb[15].mxu0 }
 0x162   :  { %v1307_v2 = vsel %vm1238_vm0, %v1243_v55, %v1306_v61 }
 0x175   :  { %v811_v3 = vpop.f32.mrb[8].mxu1 }
 0x176   :  { %v813_v4 = vpop.f32.mrb[9].mxu1  ;;  %v1224_v7 = vrot.slane %v811_v3, 1 }
 0x177   :  { %v815_v5 = vpop.f32.mrb[10].mxu1  ;;  %v1227_v11 = vrot.slane %v813_v4, 1 }
 0x178   :  { %v1225_v8 = vrot.slane %v815_v5, 1  ;;  %v817_v10 = vpop.f32.mrb[11].mxu1 }
 0x179   :  { %v1228_v12 = vrot.slane %v817_v10, 1 }
 0x17a   :  { %v1226_v13 = vsel %vm1223_vm1, %v1224_v7, %v1225_v8 }
 0x17b   :  { %v1232_v14 = vadd.f32 %v1226_v13, %v421_v36  ;;  %v1229_v15 = vsel %vm1223_vm1, %v1227_v11, %v1228_v12 }
 0x17c   :  { %v1233_v16 = vadd.f32 %v1229_v15, %v423_v39 }
 0x17d   :  { %v1247_v17 = vadd.f32 %v1241_v56, %v1232_v14  ;;  %v821_v18 = vpop.f32.mrb[12].mxu1 }
 0x17e   :  { %v1248_v6 = vadd.f32 %v1244_v57, %v1233_v16  ;;  %v1290_v19 = vrot.slane %v821_v18, 1  ;;  %v823_v20 = vpop.f32.mrb[13].mxu1 }
 0x17f   :  { %v1258_v21 = vrot.slane %v1247_v17, 4  ;;  %v1272_v22 = vmul.f32 %v1247_v17, %v1247_v17  ;;  %v1292_v23 = vrot.slane %v823_v20, 1  ;;  %v825_v24 = vpop.f32.mrb[14].mxu1 }
 0x180   :  { %v1665_v25 = vpack.c.bf16 %v1248_v6, %v1247_v17  ;;  %v1291_v26 = vsel %vm1223_vm1, %v1225_v8, %v1290_v19  ;;  %v826_v27 = vpop.f32.mrb[15].mxu1  ;;  %v1300_v31 = vadd.f32 %v1290_v19, %v431_v9  ;;  %v1264_v32 = vrot.slane %v1248_v6, 4 }
 0x181   :  { %v1259_v28 = vadd.f32 %v1258_v21, %v1247_v17  ;;  %v1274_v29 = vrot.slane %v1272_v22, 4  ;;  %v1298_v30 = vadd.f32 %v1291_v26, %v425_v42  ;;  %v1293_v33 = vsel %vm1223_vm1, %v1228_v12, %v1292_v23 }
 0x182   :  { %1257 = vst [vmem:[%s2442_s2] sm:$0xff] %v1665_v25  ;;  %v1301_v34 = vadd.f32 %v1292_v23, %v433_v46  ;;  %v1273_v36 = vmul.f32 %v1248_v6, %v1248_v6  ;;  %v1314_v38 = vadd.f32 %v1304_v59, %v1300_v31  ;;  %v1299_v40 = vadd.f32 %v1293_v33, %v2416_v35 }
 0x183   :  { %v1312_v37 = vadd.f32 %v1305_v63, %v1298_v30  ;;  %v1260_v39 = vrot.slane %v1259_v28, 2  ;;  %v1275_v43 = vadd.f32 %v1274_v29, %v1272_v22  ;;  %v1265_v42 = vadd.f32 %v1264_v32, %v1248_v6 }
 0x184   :  { %v1315_v41 = vadd.f32 %v1306_v61, %v1301_v34  ;;  %v1340_v44 = vrot.slane %v1314_v38, 2  ;;  %v1363_v45 = vmul.f32 %v1314_v38, %v1314_v38  ;;  %v1280_v47 = vrot.slane %v1273_v36, 4 }
 0x185   :  { %v1339_v1 = vrot.slane %v1312_v37, 2  ;;  %v1361_v9 = vmul.f32 %v1312_v37, %v1312_v37  ;;  %v1313_v49 = vadd.f32 %v1307_v2, %v1299_v40  ;;  %v1261_v50 = vadd.f32 %v1260_v39, %v1259_v28 }
 0x186   :  { %v1276_v52 = vrot.slane %v1275_v43, 2  ;;  %v1370_v53 = vrot.slane %v1363_v45, 2  ;;  %v1266_v35 = vrot.slane %v1265_v42, 2  ;;  %v1667_v56 = vpack.c.bf16 %v1315_v41, %v1314_v38 }
 0x187   :  { %v1341_v48 = vsel %vm1238_vm0, %v1339_v1, %v1340_v44  ;;  %v1369_v51 = vrot.slane %v1361_v9, 2  ;;  %v1666_v54 = vpack.c.bf16 %v1313_v49, %v1312_v37  ;;  %v1281_v57 = vadd.f32 %v1280_v47, %v1273_v36 }
 0x188   :  { %v1347_v46 = vrot.slane %v1341_v48, 4  ;;  %v1342_v60 = vrot.slane %v1313_v49, 2  ;;  %v1262_v61 = vrot.slane %v1261_v50, 1  ;;  %v1331_v0 = vrot.slane %v1667_v56, 5 }
 0x189   :  { %v1371_v58 = vsel %vm1238_vm0, %v1369_v51, %v1370_v53  ;;  %v1663_v59 = vrot.slane %v1666_v54, 9  ;;  %v1277_v2 = vadd.f32 %v1276_v52, %v1275_v43  ;;  %v1343_v3 = vrot.slane %v1315_v41, 2 }
 0x18a   :  { %v1348_v55 = vadd.f32 %v1347_v46, %v1341_v48  ;;  %v1377_v63 = vrot.slane %v1371_v58, 4  ;;  %v1362_v4 = vmul.f32 %v1313_v49, %v1313_v49  ;;  %v1364_v5 = vmul.f32 %v1315_v41, %v1315_v41 }
 0x18b   :  { %v1332_v10 = vsel %vm1328_vm4, %v1663_v59, %v1331_v0  ;;  %v1282_v11 = vrot.slane %v1281_v57, 2  ;;  %v1344_v12 = vsel %vm1238_vm0, %v1342_v60, %v1343_v3  ;;  %v1263_v18 = vadd.f32 %v1262_v61, %v1261_v50 }
 0x18c   :  { %v1349_v62 = vrot.slane %v1348_v55, 2  ;;  %v1378_v8 = vadd.f32 %v1377_v63, %v1371_v58  ;;  %1334 = vst [vmem:[%s2442_s2 + $0x8] sm:$0xff] %v1332_v10  ;;  %v1372_v13 = vrot.slane %v1362_v4, 2  ;;  %v1373_v14 = vrot.slane %v1364_v5, 2 }
 0x18d   :  { %v1353_v17 = vrot.slane %v1344_v12, 4  ;;  %v1278_v6 = vrot.slane %v1277_v2, 1  ;;  %v1267_v19 = vadd.f32 %v1266_v35, %v1265_v42  ;;  %v1283_v25 = vadd.f32 %v1282_v11, %v1281_v57 }
 0x18e   :  { %v1350_v7 = vadd.f32 %v1349_v62, %v1348_v55  ;;  %v1379_v16 = vrot.slane %v1378_v8, 2  ;;  %v1374_v20 = vsel %vm1238_vm0, %v1372_v13, %v1373_v14 }
 0x18f   :  { %v1354_v23 = vadd.f32 %v1353_v17, %v1344_v12  ;;  %v1383_v24 = vrot.slane %v1374_v20, 4  ;;  %v1268_v30 = vrot.slane %v1267_v19, 1  ;;  %v1279_v31 = vadd.f32 %v1278_v6, %v1277_v2 }
 0x190   :  { %v1351_v15 = vrot.slane %v1350_v7, 1  ;;  %v1380_v22 = vadd.f32 %v1379_v16, %v1378_v8  ;;  %v1284_v36 = vrot.slane %v1283_v25, 1 }
 0x191   :  { %v1355_v28 = vrot.slane %v1354_v23, 2  ;;  %v1384_v29 = vadd.f32 %v1383_v24, %v1374_v20  ;;  %v1269_v40 = vadd.f32 %v1268_v30, %v1267_v19 }
 0x192   :  { %v1352_v21 = vadd.f32 %v1351_v15, %v1350_v7  ;;  %v1381_v27 = vrot.slane %v1380_v22, 1  ;;  %v1285_v44 = vadd.f32 %v1284_v36, %v1283_v25 }
 0x193   :  { %v1356_v33 = vadd.f32 %v1355_v28, %v1354_v23  ;;  %v1385_v34 = vrot.slane %v1384_v29, 2 }
 0x194   :  { %v1359_v26 = vadd.f32 %v1352_v21, %v1263_v18  ;;  %v1382_v32 = vadd.f32 %v1381_v27, %v1380_v22 }
 0x195   :  { %v1357_v38 = vrot.slane %v1356_v33, 1  ;;  %v1386_v39 = vadd.f32 %v1385_v34, %v1384_v29 }
 0x196   :  { %v1389_v37 = vadd.f32 %v1382_v32, %v1279_v31 }
 0x197   :  { %v1358_v43 = vadd.f32 %v1357_v38, %v1356_v33  ;;  %v1387_v1 = vrot.slane %v1386_v39, 1 }
 0x198   :  { %v1392_v41 = vsel %vm1391_vm5, %v1359_v26, %v1389_v37 }
 0x199   :  { %v1360_v42 = vadd.f32 %v1358_v43, %v1269_v40  ;;  %v1388_v9 = vadd.f32 %v1387_v1, %v1386_v39 }
 0x19b   :  { %v1390_v45 = vadd.f32 %v1388_v9, %v1285_v44 }
 0x19d   :  { %v1393_v47 = vsel %vm1391_vm5, %v1360_v42, %v1390_v45 }
 0x19e   :  { %v1396_v48 = vcombine.low %v1392_v41, %v1393_v47 }
 0x1a0   :  { %1664 = vst.sshfl [vmem:[%s2443_s3] sm:$0x33 pattern:$0x76325410] %v1396_v48 }

// kernel: _lambda_.23
= control target key start
LH: loop header
LB: loop body
LE: loop exit
PB: predicated region body
PF: predicated region fallthrough
CT: control target
= control target key end

     0   :  { %s391_s15 = smov 0   ;;  %s417_s0 = inlined_call_operand.vmem [shape: bf16[16,256], index: 0, kind: input, shape index: {}]   ;;  %s418_s1 = inlined_call_operand.vmem [shape: f32[1,256], index: 1, kind: input, shape index: {}]   ;;  %s419_s2 = inlined_call_operand.vmem [shape: f32[1,256], index: 2, kind: input, shape index: {}]   ;;  %s420_s3 = inlined_call_operand.vmem [shape: bf16[16,256], index: 3, kind: input, shape index: {}]   ;;  %s421_s4 = inlined_call_operand.vmem [shape: bf16[16,256], index: 4, kind: output, shape index: {}]  }
   0x1 LB: > { %s332_s16 = sadd.s32 4294967295, %s364_s15   ;;  %p336_p0 = scmp.ge.s32.totalorder %s364_s15, 1  ;;  %s364_s15 = sphi %s391_s15, %s14_s15  }
   0x2   : > { %p172_p1 = scmp.lt.s32.totalorder %s364_s15, 3 }
   0x4   : > { %p173_p2 = pnand %p336_p0, %p172_p1 }
   0x5   : > { %p203_p3 = scmp.lt.s32.totalorder (!%p173_p2), %s332_s16, 1  ;;  %v223_v0 = vlaneseq (!%p173_p2)  ;;  %v221_v2 = vld [vmem:[%s418_s1] sm:$0x3] (!%p173_p2) }
   0x6   : > { %176 = sbr.rel (%p173_p2) target bundleno = 30 (0x1e), region = 36  ;;  %v235_v5 = vld [vmem:[%s419_s2] sm:$0x3] (!%p173_p2) }
   0x7   : > { %v224_v1 = vshrl.u32 (!%p173_p2), %v223_v0, 7 }
   0x9   : > { %v225_v3 = vsub.s32 (!%p173_p2), 0, %v224_v1  ;;  %v229_v4 = vsub.s32 (!%p173_p2), 1, %v224_v1 }
   0xb   : > { %v226_v7 = vrot.slane (!%p173_p2), %v221_v2, %v225_v3  ;;  %v230_v8 = vrot.slane (!%p173_p2), %v221_v2, %v229_v4  ;;  %v240_v12 = vrot.slane (!%p173_p2), %v235_v5, %v225_v3  ;;  %v244_v13 = vrot.slane (!%p173_p2), %v235_v5, %v229_v4 }
   0xd   : > { %s423_s16 = smov (!%p203_p3, %s332_s16), 1 }
   0xe   : > { %s346_s19 = sshll.u32 %s423_s16, 3 }
   0xf   : > { %s207_s24 = scalar_lea.vmem %s417_s0, %s346_s19  ;;  %s212_s27 = scalar_lea.vmem %s420_s3, %s346_s19 }
  0x10   : > { %v218_v6 = vld [vmem:[%s207_s24] sm:$0xff]  ;;  %s217_s30 = scalar_lea.vmem %s421_s4, %s346_s19 }
  0x11   : > { %v249_v9 = vld [vmem:[%s212_s27] sm:$0xff]  ;;  %v219_v10 = vunpack.c.l.bf16 %v218_v6  ;;  %v220_v11 = vunpack.c.h.bf16 %v218_v6 }
  0x12   : > { %v250_v16 = vunpack.c.l.bf16 %v249_v9  ;;  %v251_v17 = vunpack.c.h.bf16 %v249_v9 }
  0x13   : > { %v233_v14 = vmul.f32 %v226_v7, %v219_v10  ;;  %v234_v15 = vmul.f32 %v230_v8, %v220_v11 }
  0x15   : > { %v247_v18 = vadd.f32 %v240_v12, %v233_v14  ;;  %v248_v19 = vadd.f32 %v244_v13, %v234_v15 }
  0x17   : > { %v252_v20 = vadd.f32 %v250_v16, %v247_v18  ;;  %v253_v21 = vadd.f32 %v251_v17, %v248_v19 }
  0x19   : > { %v254_v22 = vmax.f32 %v252_v20, 0.0  ;;  %v255_v23 = vmax.f32 %v253_v21, 0.0 }
  0x1b   : > { %v349_v24 = vpack.c.bf16 %v255_v23, %v254_v22 }
  0x1d   : > { %264 = vst [vmem:[%s217_s30] sm:$0xff] %v349_v24 }
  0x1e PF: > { %s14_s15 = sadd.s32 1, %s364_s15  }
  0x1f   : > { %p11_p4 = scmp.ge.s32.totalorder %s14_s15, 4  }
  0x21   :  { %13 = sbr.rel (!%p11_p4) target bundleno = 1 (0x1), region = 69 }

// kernel: _lambda_.24
= control target key start
LH: loop header
LB: loop body
LE: loop exit
PB: predicated region body
PF: predicated region fallthrough
CT: control target
= control target key end

     0   :  { %v1866_v1 = vmov 0   ;;  %vm1215_vm0 = vcmask 1042432   ;;  %vm1243_vm1 = vcmask 1043456   ;;  %vm1352_vm2 = vcmask 1040384   ;;  %s2391_s1 = inlined_call_operand.vmem [shape: bf16[3,384,256], index: 1, kind: input, shape index: {}]   ;;  %s2392_s0 = inlined_call_operand.vmem [shape: bf16[20,384], index: 0, kind: input, shape index: {}]   ;;  %s2393_s2 = inlined_call_operand.vmem [shape: bf16[8,256], index: 2, kind: output, shape index: {0}]   ;;  %s2394_s3 = inlined_call_operand.vmem [shape: f32[1,2,256], index: 3, kind: output, shape index: {1}]  }
   0x1   :  { %v1643_v0 = vld [vmem:[%s2391_s1 + $0x4] ss:$8 sps:$4 sm:$0xff]   ;;  %416 = vmatprep.mubr.bf16.mxu0 %v1866_v1  ;;  %v1645_v2 = vld [vmem:[%s2391_s1] ss:$8 sps:$4 sm:$0xff]   ;;  %v1646_v3 = vld [vmem:[%s2391_s1 + $0x14] ss:$8 sps:$4 sm:$0xff]  }
   0x2   :  { %335 = vmatprep.subr.bf16.mxu1 %v1643_v0  ;;  %v1648_v4 = vld [vmem:[%s2391_s1 + $0x10] ss:$8 sps:$4 sm:$0xff]   ;;  %v1649_v5 = vld [vmem:[%s2391_s1 + $0x104] ss:$8 sps:$4 sm:$0xff]   ;;  %v1653_v7 = vld [vmem:[%s2391_s1 + $0x100] ss:$8 sps:$4 sm:$0xff]  }
   0x3   :  { %336 = vmatpush1.bf16.msra.mxu1 %v1645_v2  ;;  %v1651_v6 = vld [vmem:[%s2391_s1 + $0x24] ss:$8 sps:$4 sm:$0xff]   ;;  %384 = vmatprep.subr.bf16.mxu0 %v1649_v5  ;;  %v1655_v8 = vld [vmem:[%s2391_s1 + $0x114] ss:$8 sps:$4 sm:$0xff]   ;;  %v1654_v9 = vld [vmem:[%s2391_s1 + $0x20] ss:$8 sps:$4 sm:$0xff]  }
   0x4   :  { %337 = vmatprep.subr.bf16.mxu1 %v1646_v3  ;;  %385 = vmatpush1.bf16.msra.mxu0 %v1653_v7  ;;  %v1657_v10 = vld [vmem:[%s2391_s1 + $0x34] ss:$8 sps:$4 sm:$0xff]   ;;  %v1659_v11 = vld [vmem:[%s2391_s1 + $0x110] ss:$8 sps:$4 sm:$0xff]   ;;  %v1661_v12 = vld [vmem:[%s2391_s1 + $0x124] ss:$8 sps:$4 sm:$0xff]  }
   0x5   :  { %386 = vmatprep.subr.bf16.mxu0 %v1655_v8  ;;  %v1660_v13 = vld [vmem:[%s2391_s1 + $0x30] ss:$8 sps:$4 sm:$0xff]   ;;  %v1665_v14 = vld [vmem:[%s2391_s1 + $0x120] ss:$8 sps:$4 sm:$0xff]   ;;  %v1667_v15 = vld [vmem:[%s2391_s1 + $0x134] ss:$8 sps:$4 sm:$0xff]  }
   0x6   :  { %v1663_v16 = vld [vmem:[%s2391_s1 + $0x44] ss:$8 sps:$4 sm:$0xff]   ;;  %v1671_v17 = vld [vmem:[%s2391_s1 + $0x130] ss:$8 sps:$4 sm:$0xff]   ;;  %v1666_v18 = vld [vmem:[%s2391_s1 + $0x40] ss:$8 sps:$4 sm:$0xff]  }
   0x7   :  { %338 = vmatpush1.bf16.msra.mxu1 %v1648_v4  ;;  %v1673_v19 = vld [vmem:[%s2391_s1 + $0x144] ss:$8 sps:$4 sm:$0xff]   ;;  %v1669_v20 = vld [vmem:[%s2391_s1 + $0x54] ss:$8 sps:$4 sm:$0xff]   ;;  %v1672_v21 = vld [vmem:[%s2391_s1 + $0x50] ss:$8 sps:$4 sm:$0xff]  }
   0x8   :  { %339 = vmatprep.subr.bf16.mxu1 %v1651_v6  ;;  %387 = vmatpush1.bf16.msra.mxu0 %v1659_v11  ;;  %v1677_v22 = vld [vmem:[%s2391_s1 + $0x140] ss:$8 sps:$4 sm:$0xff]   ;;  %v1679_v23 = vld [vmem:[%s2391_s1 + $0x154] ss:$8 sps:$4 sm:$0xff]   ;;  %v1675_v24 = vld [vmem:[%s2391_s1 + $0x64] ss:$8 sps:$4 sm:$0xff]  }
   0x9   :  { %388 = vmatprep.subr.bf16.mxu0 %v1661_v12  ;;  %v1683_v25 = vld [vmem:[%s2391_s1 + $0x150] ss:$8 sps:$4 sm:$0xff]   ;;  %v1678_v26 = vld [vmem:[%s2391_s1 + $0x60] ss:$8 sps:$4 sm:$0xff]   ;;  %v1685_v27 = vld [vmem:[%s2391_s1 + $0x164] ss:$8 sps:$4 sm:$0xff]  }
   0xa   :  { %v1681_v28 = vld [vmem:[%s2391_s1 + $0x74] ss:$8 sps:$4 sm:$0xff]   ;;  %v1689_v29 = vld [vmem:[%s2391_s1 + $0x160] ss:$8 sps:$4 sm:$0xff]   ;;  %v1684_v30 = vld [vmem:[%s2391_s1 + $0x70] ss:$8 sps:$4 sm:$0xff]  }
   0xb   :  { %340 = vmatpush1.bf16.msra.mxu1 %v1654_v9  ;;  %v1691_v31 = vld [vmem:[%s2391_s1 + $0x174] ss:$8 sps:$4 sm:$0xff]   ;;  %v1687_v32 = vld [vmem:[%s2391_s1 + $0x84] ss:$8 sps:$4 sm:$0xff]   ;;  %v1695_v33 = vld [vmem:[%s2391_s1 + $0x170] ss:$8 sps:$4 sm:$0xff]  }
   0xc   :  { %341 = vmatprep.subr.bf16.mxu1 %v1657_v10  ;;  %389 = vmatpush1.bf16.msra.mxu0 %v1665_v14  ;;  %v1690_v34 = vld [vmem:[%s2391_s1 + $0x80] ss:$8 sps:$4 sm:$0xff]   ;;  %v1699_v35 = vld [vmem:[%s2391_s1 + $0x304] ss:$8 sps:$4 sm:$0xff]   ;;  %v1693_v36 = vld [vmem:[%s2391_s1 + $0x94] ss:$8 sps:$4 sm:$0xff]  }
   0xd   :  { %390 = vmatprep.subr.bf16.mxu0 %v1667_v15  ;;  %v1999_v37 = vld [vmem:[%s2392_s0 + $0x8] ss:$12 sps:$4 sm:$0xff]   ;;  %v1696_v39 = vld [vmem:[%s2391_s1 + $0x90] ss:$8 sps:$4 sm:$0xff]   ;;  %v1700_v41 = vld [vmem:[%s2391_s1 + $0xa4] ss:$8 sps:$4 sm:$0xff]  }
   0xe   :  { %v1697_v38 = vld [vmem:[%s2391_s1 + $0x300] ss:$8 sps:$4 sm:$0xff]   ;;  %v1706_v40 = vld [vmem:[%s2391_s1 + $0x314] ss:$8 sps:$4 sm:$0xff]   ;;  %v1704_v42 = vld [vmem:[%s2391_s1 + $0x310] ss:$8 sps:$4 sm:$0xff]  }
   0xf   :  { %342 = vmatpush1.bf16.msra.mxu1 %v1660_v13  ;;  %v1703_v43 = vld [vmem:[%s2391_s1 + $0xa0] ss:$8 sps:$4 sm:$0xff]   ;;  %v1712_v44 = vld [vmem:[%s2391_s1 + $0x324] ss:$8 sps:$4 sm:$0xff]   ;;  %v1707_v45 = vld [vmem:[%s2391_s1 + $0xb4] ss:$8 sps:$4 sm:$0xff]  }
  0x10   :  { %343 = vmatprep.subr.bf16.mxu1 %v1663_v16  ;;  %391 = vmatpush1.bf16.msra.mxu0 %v1671_v17  ;;  %v2030_v46 = vld [vmem:[%s2392_s0 + $0x4] ss:$12 sps:$4 sm:$0xff]   ;;  %v1710_v47 = vld [vmem:[%s2391_s1 + $0x320] ss:$8 sps:$4 sm:$0xff]   ;;  %v1718_v49 = vld [vmem:[%s2391_s1 + $0x334] ss:$8 sps:$4 sm:$0xff]  }
  0x11   :  { %392 = vmatprep.subr.bf16.mxu0 %v1673_v19  ;;  %v1709_v48 = vld [vmem:[%s2391_s1 + $0xb0] ss:$8 sps:$4 sm:$0xff]   ;;  %v1713_v50 = vld [vmem:[%s2391_s1 + $0xc4] ss:$8 sps:$4 sm:$0xff]   ;;  %367 = vmatprep.mubr.bf16.mxu1 %v2030_v46  ;;  %v1715_v52 = vld [vmem:[%s2391_s1 + $0xc0] ss:$8 sps:$4 sm:$0xff]  }
  0x12   :  { %v1716_v51 = vld [vmem:[%s2391_s1 + $0x330] ss:$8 sps:$4 sm:$0xff]   ;;  %v1724_v53 = vld [vmem:[%s2391_s1 + $0x344] ss:$8 sps:$4 sm:$0xff]   ;;  %v1719_v54 = vld [vmem:[%s2391_s1 + $0xd4] ss:$8 sps:$4 sm:$0xff]  }
  0x13   :  { %344 = vmatpush1.bf16.msra.mxu1 %v1666_v18  ;;  %v1722_v55 = vld [vmem:[%s2391_s1 + $0x340] ss:$8 sps:$4 sm:$0xff]   ;;  %v1721_v56 = vld [vmem:[%s2391_s1 + $0xd0] ss:$8 sps:$4 sm:$0xff]   ;;  %v1730_v57 = vld [vmem:[%s2391_s1 + $0x354] ss:$8 sps:$4 sm:$0xff]  }
  0x14   :  { %345 = vmatprep.subr.bf16.mxu1 %v1669_v20  ;;  %393 = vmatpush1.bf16.msra.mxu0 %v1677_v22  ;;  %v1725_v58 = vld [vmem:[%s2391_s1 + $0xe4] ss:$8 sps:$4 sm:$0xff]   ;;  %v1728_v59 = vld [vmem:[%s2391_s1 + $0x350] ss:$8 sps:$4 sm:$0xff]   ;;  %v1727_v60 = vld [vmem:[%s2391_s1 + $0xe0] ss:$8 sps:$4 sm:$0xff]  }
  0x15   :  { %394 = vmatprep.subr.bf16.mxu0 %v1679_v23  ;;  %v1738_v61 = vld [vmem:[%s2391_s1 + $0x364] ss:$8 sps:$4 sm:$0xff]   ;;  %v1731_v62 = vld [vmem:[%s2391_s1 + $0xf4] ss:$8 sps:$4 sm:$0xff]   ;;  %v1736_v63 = vld [vmem:[%s2391_s1 + $0x360] ss:$8 sps:$4 sm:$0xff]  }
  0x16   :  { %v1733_v0 = vld [vmem:[%s2391_s1 + $0xf0] ss:$8 sps:$4 sm:$0xff]   ;;  %v1745_v2 = vld [vmem:[%s2391_s1 + $0x374] ss:$8 sps:$4 sm:$0xff]   ;;  %v1742_v3 = vld [vmem:[%s2391_s1 + $0x184] ss:$8 sps:$4 sm:$0xff]  }
  0x17   :  { %346 = vmatpush1.bf16.msra.mxu1 %v1672_v21  ;;  %v2096_v4 = vld [vmem:[%s2392_s0] ss:$12 sps:$4 sm:$0xff]   ;;  %v1743_v5 = vld [vmem:[%s2391_s1 + $0x370] ss:$8 sps:$4 sm:$0xff]   ;;  %v1748_v8 = vld [vmem:[%s2391_s1 + $0x194] ss:$8 sps:$4 sm:$0xff]  }
  0x18   :  { %347 = vmatprep.subr.bf16.mxu1 %v1675_v24  ;;  %395 = vmatpush1.bf16.msra.mxu0 %v1683_v25  ;;  %v1740_v6 = vld [vmem:[%s2391_s1 + $0x180] ss:$8 sps:$4 sm:$0xff]   ;;  %v1751_v7 = vld [vmem:[%s2391_s1 + $0x384] ss:$8 sps:$4 sm:$0xff]   ;;  %v1746_v10 = vld [vmem:[%s2391_s1 + $0x190] ss:$8 sps:$4 sm:$0xff]  }
  0x19   :  { %396 = vmatprep.subr.bf16.mxu0 %v1685_v27  ;;  %v2113_v9 = vld [vmem:[%s2392_s0 + $0x20] ss:$0 sps:$4 sm:$0x33]   ;;  %v1757_v12 = vld [vmem:[%s2391_s1 + $0x394] ss:$8 sps:$4 sm:$0xff]  }
  0x1a   :  { %v1749_v11 = vld [vmem:[%s2391_s1 + $0x380] ss:$8 sps:$4 sm:$0xff]   ;;  %v1754_v13 = vld [vmem:[%s2391_s1 + $0x1a4] ss:$8 sps:$4 sm:$0xff]   ;;  %v1755_v15 = vld [vmem:[%s2391_s1 + $0x390] ss:$8 sps:$4 sm:$0xff]  }
  0x1b   :  { %348 = vmatpush1.bf16.msra.mxu1 %v1678_v26  ;;  %v1752_v14 = vld [vmem:[%s2391_s1 + $0x1a0] ss:$8 sps:$4 sm:$0xff]   ;;  %v1763_v16 = vld [vmem:[%s2391_s1 + $0x3a4] ss:$8 sps:$4 sm:$0xff]   ;;  %v1760_v17 = vld [vmem:[%s2391_s1 + $0x1b4] ss:$8 sps:$4 sm:$0xff]  }
  0x1c   :  { %349 = vmatprep.subr.bf16.mxu1 %v1681_v28  ;;  %397 = vmatpush1.bf16.msra.mxu0 %v1689_v29  ;;  %v1758_v18 = vld [vmem:[%s2391_s1 + $0x1b0] ss:$8 sps:$4 sm:$0xff]   ;;  %v1761_v19 = vld [vmem:[%s2391_s1 + $0x3a0] ss:$8 sps:$4 sm:$0xff]   ;;  %v1769_v20 = vld [vmem:[%s2391_s1 + $0x3b4] ss:$8 sps:$4 sm:$0xff]  }
  0x1d   :  { %398 = vmatprep.subr.bf16.mxu0 %v1691_v31  ;;  %v1766_v21 = vld [vmem:[%s2391_s1 + $0x1c4] ss:$8 sps:$4 sm:$0xff]   ;;  %v1764_v22 = vld [vmem:[%s2391_s1 + $0x1c0] ss:$8 sps:$4 sm:$0xff]   ;;  %v1767_v23 = vld [vmem:[%s2391_s1 + $0x3b0] ss:$8 sps:$4 sm:$0xff]  }
  0x1e   :  { %v1775_v24 = vld [vmem:[%s2391_s1 + $0x3c4] ss:$8 sps:$4 sm:$0xff]   ;;  %v1772_v25 = vld [vmem:[%s2391_s1 + $0x1d4] ss:$8 sps:$4 sm:$0xff]   ;;  %v1770_v27 = vld [vmem:[%s2391_s1 + $0x1d0] ss:$8 sps:$4 sm:$0xff]  }
  0x1f   :  { %350 = vmatpush1.bf16.msra.mxu1 %v1684_v30  ;;  %v18_v26 = vld [vmem:[%s2392_s0 + $0x18] sm:$0x33]  ;;  %v1773_v30 = vld [vmem:[%s2391_s1 + $0x3c0] ss:$8 sps:$4 sm:$0xff]  }
  0x20   :  { %351 = vmatprep.subr.bf16.mxu1 %v1687_v32  ;;  %399 = vmatpush1.bf16.msra.mxu0 %v1695_v33  ;;  %v2172_v28 = vcombine.high %v18_v26, %v18_v26  ;;  %v2174_v29 = vcombine.low %v18_v26, %v18_v26  ;;  %v1781_v31 = vld [vmem:[%s2391_s1 + $0x3d4] ss:$8 sps:$4 sm:$0xff]   ;;  %v1778_v32 = vld [vmem:[%s2391_s1 + $0x1e4] ss:$8 sps:$4 sm:$0xff]   ;;  %v1776_v33 = vld [vmem:[%s2391_s1 + $0x1e0] ss:$8 sps:$4 sm:$0xff]  }
  0x21   :  { %1113 = vmatprep.subr.bf16.mxu0 %v1699_v35  ;;  %v1787_v35 = vld [vmem:[%s2391_s1 + $0x3e4] ss:$8 sps:$4 sm:$0xff]   ;;  %v1865_v26 = vld [vmem:[%s2391_s1 + $0x2f4] ss:$8 sps:$4 sm:$0xff]  }
  0x23   :  { %352 = vmatpush1.bf16.msra.mxu1 %v1690_v34  ;;  %417 = vmatmul.mubr.bf16.vlgmr.msra.gmra.mrb[0].mxu0 %v1999_v37  ;;  %v1779_v34 = vld [vmem:[%s2391_s1 + $0x3d0] ss:$8 sps:$4 sm:$0xff]  }
  0x24   :  { %353 = vmatprep.subr.bf16.mxu1 %v1693_v36  ;;  %1114 = vmatpush1.bf16.msra.mxu0 %v1697_v38  ;;  %v1784_v36 = vld [vmem:[%s2391_s1 + $0x1f4] ss:$8 sps:$4 sm:$0xff]   ;;  %v1782_v38 = vld [vmem:[%s2391_s1 + $0x1f0] ss:$8 sps:$4 sm:$0xff]  }
  0x25   :  { %426 = vmatprep.mubr.bf16.mxu0 %v1866_v1  ;;  %1115 = vmatprep.subr.bf16.mxu0 %v1706_v40  ;;  %v1794_v40 = vld [vmem:[%s2391_s1 + $0x3f4] ss:$8 sps:$4 sm:$0xff]  }
  0x27   :  { %354 = vmatpush1.bf16.msra.mxu1 %v1696_v39  ;;  %v1785_v39 = vld [vmem:[%s2391_s1 + $0x3e0] ss:$8 sps:$4 sm:$0xff]  }
  0x28   :  { %355 = vmatprep.subr.bf16.mxu1 %v1700_v41  ;;  %1116 = vmatpush1.bf16.msra.mxu0 %v1704_v42  ;;  %v1791_v41 = vld [vmem:[%s2391_s1 + $0x204] ss:$8 sps:$4 sm:$0xff]   ;;  %v1789_v42 = vld [vmem:[%s2391_s1 + $0x200] ss:$8 sps:$4 sm:$0xff]  }
  0x29   :  { %1117 = vmatprep.subr.bf16.mxu0 %v1712_v44  ;;  %v1800_v44 = vld [vmem:[%s2391_s1 + $0x404] ss:$8 sps:$4 sm:$0xff]  }
  0x2b   :  { %356 = vmatpush1.bf16.msra.mxu1 %v1703_v43  ;;  %427 = vmatmul.mubr.bf16.gmra.mrb[4].mxu0 %v2113_v9  ;;  %v1792_v43 = vld [vmem:[%s2391_s1 + $0x3f0] ss:$8 sps:$4 sm:$0xff]  }
  0x2c   :  { %357 = vmatprep.subr.bf16.mxu1 %v1707_v45  ;;  %1118 = vmatpush1.bf16.msra.mxu0 %v1710_v47  ;;  %v1797_v45 = vld [vmem:[%s2391_s1 + $0x214] ss:$8 sps:$4 sm:$0xff]   ;;  %v1795_v47 = vld [vmem:[%s2391_s1 + $0x210] ss:$8 sps:$4 sm:$0xff]  }
  0x2d   :  { %1119 = vmatprep.subr.bf16.mxu0 %v1718_v49  ;;  %1145 = vmatprep.mubr.bf16.mxu0 %v2030_v46  ;;  %v1803_v49 = vld [vmem:[%s2391_s1 + $0x224] ss:$8 sps:$4 sm:$0xff]  }
  0x2f   :  { %358 = vmatpush1.bf16.msra.mxu1 %v1709_v48  ;;  %v1806_v48 = vld [vmem:[%s2391_s1 + $0x414] ss:$8 sps:$4 sm:$0xff]  }
  0x30   :  { %359 = vmatprep.subr.bf16.mxu1 %v1713_v50  ;;  %1120 = vmatpush1.bf16.msra.mxu0 %v1716_v51  ;;  %v1804_v50 = vld [vmem:[%s2391_s1 + $0x410] ss:$8 sps:$4 sm:$0xff]   ;;  %v1801_v51 = vld [vmem:[%s2391_s1 + $0x220] ss:$8 sps:$4 sm:$0xff]  }
  0x31   :  { %1121 = vmatprep.subr.bf16.mxu0 %v1724_v53  ;;  %v1809_v53 = vld [vmem:[%s2391_s1 + $0x234] ss:$8 sps:$4 sm:$0xff]  }
  0x33   :  { %360 = vmatpush1.bf16.msra.mxu1 %v1715_v52  ;;  %v1812_v52 = vld [vmem:[%s2391_s1 + $0x424] ss:$8 sps:$4 sm:$0xff]  }
  0x34   :  { %361 = vmatprep.subr.bf16.mxu1 %v1719_v54  ;;  %1122 = vmatpush1.bf16.msra.mxu0 %v1722_v55  ;;  %v1810_v54 = vld [vmem:[%s2391_s1 + $0x420] ss:$8 sps:$4 sm:$0xff]   ;;  %v1807_v55 = vld [vmem:[%s2391_s1 + $0x230] ss:$8 sps:$4 sm:$0xff]  }
  0x35   :  { %1123 = vmatprep.subr.bf16.mxu0 %v1730_v57  ;;  %v1815_v57 = vld [vmem:[%s2391_s1 + $0x244] ss:$8 sps:$4 sm:$0xff]  }
  0x37   :  { %362 = vmatpush1.bf16.msra.mxu1 %v1721_v56  ;;  %v1818_v56 = vld [vmem:[%s2391_s1 + $0x434] ss:$8 sps:$4 sm:$0xff]  }
  0x38   :  { %363 = vmatprep.subr.bf16.mxu1 %v1725_v58  ;;  %1124 = vmatpush1.bf16.msra.mxu0 %v1728_v59  ;;  %v1816_v58 = vld [vmem:[%s2391_s1 + $0x430] ss:$8 sps:$4 sm:$0xff]   ;;  %v1813_v59 = vld [vmem:[%s2391_s1 + $0x240] ss:$8 sps:$4 sm:$0xff]  }
  0x39   :  { %1125 = vmatprep.subr.bf16.mxu0 %v1738_v61  ;;  %v1821_v61 = vld [vmem:[%s2391_s1 + $0x254] ss:$8 sps:$4 sm:$0xff]  }
  0x3b   :  { %364 = vmatpush1.bf16.msra.mxu1 %v1727_v60  ;;  %v1826_v60 = vld [vmem:[%s2391_s1 + $0x444] ss:$8 sps:$4 sm:$0xff]  }
  0x3c   :  { %365 = vmatprep.subr.bf16.mxu1 %v1731_v62  ;;  %1126 = vmatpush1.bf16.msra.mxu0 %v1736_v63  ;;  %v1824_v62 = vld [vmem:[%s2391_s1 + $0x440] ss:$8 sps:$4 sm:$0xff]   ;;  %v1819_v63 = vld [vmem:[%s2391_s1 + $0x250] ss:$8 sps:$4 sm:$0xff]  }
  0x3d   :  { %1127 = vmatprep.subr.bf16.mxu0 %v1745_v2  ;;  %v1829_v2 = vld [vmem:[%s2391_s1 + $0x264] ss:$8 sps:$4 sm:$0xff]  }
  0x3f   :  { %366 = vmatpush1.bf16.msra.mxu1 %v1733_v0  ;;  %v1832_v0 = vld [vmem:[%s2391_s1 + $0x454] ss:$8 sps:$4 sm:$0xff]  }
  0x40   :  { %722 = vmatprep.subr.bf16.mxu1 %v1742_v3  ;;  %1128 = vmatpush1.bf16.msra.mxu0 %v1743_v5  ;;  %v1830_v3 = vld [vmem:[%s2391_s1 + $0x450] ss:$8 sps:$4 sm:$0xff]   ;;  %v1827_v5 = vld [vmem:[%s2391_s1 + $0x260] ss:$8 sps:$4 sm:$0xff]  }
  0x41   :  { %1129 = vmatprep.subr.bf16.mxu0 %v1751_v7  ;;  %v1835_v7 = vld [vmem:[%s2391_s1 + $0x274] ss:$8 sps:$4 sm:$0xff]  }
  0x42   :  { %368 = vmatmul.mubr.bf16.vlgmr.msra.gmra.mrb[0].mxu1 %v2096_v4 }
  0x43   :  { %723 = vmatpush1.bf16.msra.mxu1 %v1740_v6  ;;  %377 = vmatprep.mubr.bf16.mxu1 %v2172_v28  ;;  %v1838_v6 = vld [vmem:[%s2391_s1 + $0x464] ss:$8 sps:$4 sm:$0xff]  }
  0x44   :  { %724 = vmatprep.subr.bf16.mxu1 %v1748_v8  ;;  %1130 = vmatpush1.bf16.msra.mxu0 %v1749_v11  ;;  %v1836_v8 = vld [vmem:[%s2391_s1 + $0x460] ss:$8 sps:$4 sm:$0xff]   ;;  %v1844_v11 = vld [vmem:[%s2391_s1 + $0x474] ss:$8 sps:$4 sm:$0xff]  }
  0x45   :  { %1131 = vmatprep.subr.bf16.mxu0 %v1757_v12  ;;  %v1841_v12 = vld [vmem:[%s2391_s1 + $0x284] ss:$8 sps:$4 sm:$0xff]  }
  0x47   :  { %725 = vmatpush1.bf16.msra.mxu1 %v1746_v10  ;;  %v1833_v10 = vld [vmem:[%s2391_s1 + $0x270] ss:$8 sps:$4 sm:$0xff]  }
  0x48   :  { %726 = vmatprep.subr.bf16.mxu1 %v1754_v13  ;;  %1132 = vmatpush1.bf16.msra.mxu0 %v1755_v15  ;;  %v1842_v13 = vld [vmem:[%s2391_s1 + $0x470] ss:$8 sps:$4 sm:$0xff]   ;;  %v1847_v15 = vld [vmem:[%s2391_s1 + $0x294] ss:$8 sps:$4 sm:$0xff]  }
  0x49   :  { %1133 = vmatprep.subr.bf16.mxu0 %v1763_v16  ;;  %v1845_v16 = vld [vmem:[%s2391_s1 + $0x290] ss:$8 sps:$4 sm:$0xff]  }
  0x4a   :  { %378 = vmatmul.mubr.bf16.gmra.mrb[4].mxu1 %v2174_v29 }
  0x4b   :  { %727 = vmatpush1.bf16.msra.mxu1 %v1752_v14  ;;  %754 = vmatprep.mubr.bf16.mxu1 %v2030_v46  ;;  %v1798_v46 = vld [vmem:[%s2391_s1 + $0x400] ss:$8 sps:$4 sm:$0xff]  }
  0x4c   :  { %728 = vmatprep.subr.bf16.mxu1 %v1760_v17  ;;  %1134 = vmatpush1.bf16.msra.mxu0 %v1761_v19  ;;  %v1839_v14 = vld [vmem:[%s2391_s1 + $0x280] ss:$8 sps:$4 sm:$0xff]   ;;  %v1850_v17 = vld [vmem:[%s2391_s1 + $0x2a4] ss:$8 sps:$4 sm:$0xff]   ;;  %v1851_v19 = vld [vmem:[%s2391_s1 + $0x2b0] ss:$8 sps:$4 sm:$0xff]  }
  0x4d   :  { %1135 = vmatprep.subr.bf16.mxu0 %v1769_v20  ;;  %v1856_v20 = vld [vmem:[%s2391_s1 + $0x2c4] ss:$8 sps:$4 sm:$0xff]  }
  0x4f   :  { %729 = vmatpush1.bf16.msra.mxu1 %v1758_v18  ;;  %v1853_v18 = vld [vmem:[%s2391_s1 + $0x2b4] ss:$8 sps:$4 sm:$0xff]  }
  0x50   :  { %730 = vmatprep.subr.bf16.mxu1 %v1766_v21  ;;  %1136 = vmatpush1.bf16.msra.mxu0 %v1767_v23  ;;  %v1854_v21 = vld [vmem:[%s2391_s1 + $0x2c0] ss:$8 sps:$4 sm:$0xff]   ;;  %v1857_v23 = vld [vmem:[%s2391_s1 + $0x2d0] ss:$8 sps:$4 sm:$0xff]  }
  0x51   :  { %1137 = vmatprep.subr.bf16.mxu0 %v1775_v24  ;;  %v1862_v24 = vld [vmem:[%s2391_s1 + $0x2e4] ss:$8 sps:$4 sm:$0xff]  }
  0x53   :  { %731 = vmatpush1.bf16.msra.mxu1 %v1764_v22  ;;  %v1859_v22 = vld [vmem:[%s2391_s1 + $0x2d4] ss:$8 sps:$4 sm:$0xff]  }
  0x54   :  { %732 = vmatprep.subr.bf16.mxu1 %v1772_v25  ;;  %1138 = vmatpush1.bf16.msra.mxu0 %v1773_v30  ;;  %v1860_v25 = vld [vmem:[%s2391_s1 + $0x2e0] ss:$8 sps:$4 sm:$0xff]  }
  0x55   :  { %1139 = vmatprep.subr.bf16.mxu0 %v1781_v31 }
  0x57   :  { %733 = vmatpush1.bf16.msra.mxu1 %v1770_v27  ;;  %v1863_v27 = vld [vmem:[%s2391_s1 + $0x2f0] ss:$8 sps:$4 sm:$0xff]  }
  0x58   :  { %734 = vmatprep.subr.bf16.mxu1 %v1778_v32  ;;  %1140 = vmatpush1.bf16.msra.mxu0 %v1779_v34 }
  0x59   :  { %1141 = vmatprep.subr.bf16.mxu0 %v1787_v35 }
  0x5b   :  { %735 = vmatpush1.bf16.msra.mxu1 %v1776_v33 }
  0x5c   :  { %736 = vmatprep.subr.bf16.mxu1 %v1784_v36  ;;  %1142 = vmatpush1.bf16.msra.mxu0 %v1785_v39 }
  0x5d   :  { %1143 = vmatprep.subr.bf16.mxu0 %v1794_v40 }
  0x5f   :  { %737 = vmatpush1.bf16.msra.mxu1 %v1782_v38 }
  0x60   :  { %738 = vmatprep.subr.bf16.mxu1 %v1791_v41  ;;  %1144 = vmatpush1.bf16.msra.mxu0 %v1792_v43 }
  0x61   :  { %1162 = vmatprep.subr.bf16.mxu0 %v1800_v44 }
  0x63   :  { %739 = vmatpush1.bf16.msra.mxu1 %v1789_v42  ;;  %1146 = vmatmul.mubr.bf16.vlgmr.msra.gmra.mrb[8].mxu0 %v2096_v4 }
  0x64   :  { %740 = vmatprep.subr.bf16.mxu1 %v1797_v45  ;;  %1163 = vmatpush1.bf16.msra.mxu0 %v1798_v46 }
  0x65   :  { %1155 = vmatprep.mubr.bf16.mxu0 %v2172_v28  ;;  %1164 = vmatprep.subr.bf16.mxu0 %v1806_v48 }
  0x67   :  { %741 = vmatpush1.bf16.msra.mxu1 %v1795_v47 }
  0x68   :  { %742 = vmatprep.subr.bf16.mxu1 %v1803_v49  ;;  %1165 = vmatpush1.bf16.msra.mxu0 %v1804_v50 }
  0x69   :  { %1166 = vmatprep.subr.bf16.mxu0 %v1812_v52 }
  0x6b   :  { %743 = vmatpush1.bf16.msra.mxu1 %v1801_v51  ;;  %1156 = vmatmul.mubr.bf16.gmra.mrb[12].mxu0 %v2174_v29 }
  0x6c   :  { %744 = vmatprep.subr.bf16.mxu1 %v1809_v53  ;;  %1167 = vmatpush1.bf16.msra.mxu0 %v1810_v54 }
  0x6d   :  { %1194 = vmatprep.mubr.bf16.mxu0 %v1866_v1  ;;  %1168 = vmatprep.subr.bf16.mxu0 %v1818_v56 }
  0x6f   :  { %745 = vmatpush1.bf16.msra.mxu1 %v1807_v55 }
  0x70   :  { %746 = vmatprep.subr.bf16.mxu1 %v1815_v57  ;;  %1169 = vmatpush1.bf16.msra.mxu0 %v1816_v58 }
  0x71   :  { %1170 = vmatprep.subr.bf16.mxu0 %v1826_v60 }
  0x73   :  { %747 = vmatpush1.bf16.msra.mxu1 %v1813_v59 }
  0x74   :  { %748 = vmatprep.subr.bf16.mxu1 %v1821_v61  ;;  %1171 = vmatpush1.bf16.msra.mxu0 %v1824_v62 }
  0x75   :  { %1172 = vmatprep.subr.bf16.mxu0 %v1832_v0 }
  0x77   :  { %749 = vmatpush1.bf16.msra.mxu1 %v1819_v63 }
  0x78   :  { %750 = vmatprep.subr.bf16.mxu1 %v1829_v2  ;;  %1173 = vmatpush1.bf16.msra.mxu0 %v1830_v3 }
  0x79   :  { %1174 = vmatprep.subr.bf16.mxu0 %v1838_v6 }
  0x7b   :  { %751 = vmatpush1.bf16.msra.mxu1 %v1827_v5 }
  0x7c   :  { %752 = vmatprep.subr.bf16.mxu1 %v1835_v7  ;;  %1175 = vmatpush1.bf16.msra.mxu0 %v1836_v8 }
  0x7d   :  { %1176 = vmatprep.subr.bf16.mxu0 %v1844_v11 }
  0x7f   :  { %753 = vmatpush1.bf16.msra.mxu1 %v1833_v10 }
  0x80   :  { %773 = vmatprep.subr.bf16.mxu1 %v1841_v12  ;;  %1177 = vmatpush1.bf16.msra.mxu0 %v1842_v13 }
  0x82   :  { %755 = vmatmul.mubr.bf16.vlgmr.msra.gmra.mrb[8].mxu1 %v2096_v4  ;;  %v1848_v4 = vld [vmem:[%s2391_s1 + $0x2a0] ss:$8 sps:$4 sm:$0xff]  }
  0x83   :  { %774 = vmatpush1.bf16.msra.mxu1 %v1839_v14  ;;  %764 = vmatprep.mubr.bf16.mxu1 %v2172_v28 }
  0x84   :  { %775 = vmatprep.subr.bf16.mxu1 %v1847_v15  ;;  %1195 = vmatmul.mubr.bf16.vlgmr.msra.gmra.mrb[8].mxu0 %v1999_v37 }
  0x85   :  { %1204 = vmatprep.mubr.bf16.mxu0 %v1866_v1 }
  0x87   :  { %776 = vmatpush1.bf16.msra.mxu1 %v1845_v16 }
  0x88   :  { %777 = vmatprep.subr.bf16.mxu1 %v1850_v17 }
  0x8a   :  { %765 = vmatmul.mubr.bf16.gmra.mrb[12].mxu1 %v2174_v29 }
  0x8b   :  { %778 = vmatpush1.bf16.msra.mxu1 %v1848_v4  ;;  %805 = vmatprep.mubr.bf16.mxu1 %v1866_v1 }
  0x8c   :  { %779 = vmatprep.subr.bf16.mxu1 %v1853_v18  ;;  %1205 = vmatmul.mubr.bf16.gmra.mrb[16].mxu0 %v2113_v9 }
  0x8f   :  { %780 = vmatpush1.bf16.msra.mxu1 %v1851_v19 }
  0x90   :  { %781 = vmatprep.subr.bf16.mxu1 %v1856_v20 }
  0x93   :  { %782 = vmatpush1.bf16.msra.mxu1 %v1854_v21 }
  0x94   :  { %783 = vmatprep.subr.bf16.mxu1 %v1859_v22 }
  0x97   :  { %784 = vmatpush1.bf16.msra.mxu1 %v1857_v23 }
  0x98   :  { %785 = vmatprep.subr.bf16.mxu1 %v1862_v24 }
  0x9b   :  { %786 = vmatpush1.bf16.msra.mxu1 %v1860_v25 }
  0x9c   :  { %787 = vmatprep.subr.bf16.mxu1 %v1865_v26 }
  0x9f   :  { %788 = vmatpush1.bf16.msra.mxu1 %v1863_v27 }
  0xa2   :  { %806 = vmatmul.mubr.bf16.vlgmr.msra.gmra.mrb[8].mxu1 %v1999_v37 }
  0xa3   :  { %815 = vmatprep.mubr.bf16.mxu1 %v1866_v1 }
  0xaa   :  { %816 = vmatmul.mubr.bf16.gmra.mrb[12].mxu1 %v2113_v9 }
  0xf6   :  { %v418_v28 = vpop.f32.mrb[0].mxu0 }
  0xf7   :  { %v420_v29 = vpop.f32.mrb[1].mxu0 }
  0xf8   :  { %v422_v30 = vpop.f32.mrb[2].mxu0 }
  0xf9   :  { %v424_v31 = vpop.f32.mrb[3].mxu0 }
  0xfe   :  { %v428_v38 = vpop.f32.mrb[4].mxu0 }
  0xff   :  { %v429_v41 = vpop.f32.mrb[5].mxu0 }
 0x100   :  { %v430_v43 = vpop.f32.mrb[6].mxu0 }
 0x101   :  { %v431_v37 = vpop.f32.mrb[7].mxu0 }
 0x115   :  { %v369_v32 = vpop.f32.mrb[0].mxu1 }
 0x116   :  { %v419_v33 = vadd.f32 %v418_v28, %v369_v32  ;;  %v371_v34 = vpop.f32.mrb[1].mxu1 }
 0x117   :  { %v421_v35 = vadd.f32 %v420_v29, %v371_v34  ;;  %v373_v36 = vpop.f32.mrb[2].mxu1 }
 0x118   :  { %v423_v39 = vadd.f32 %v422_v30, %v373_v36  ;;  %v375_v40 = vpop.f32.mrb[3].mxu1 }
 0x119   :  { %v425_v42 = vadd.f32 %v424_v31, %v375_v40 }
 0x11d   :  { %v379_v44 = vpop.f32.mrb[4].mxu1 }
 0x11e   :  { %v380_v1 = vpop.f32.mrb[5].mxu1 }
 0x11f   :  { %v381_v45 = vpop.f32.mrb[6].mxu1 }
 0x120   :  { %v382_v9 = vpop.f32.mrb[7].mxu1 }
 0x13e   :  { %v1157_v46 = vpop.f32.mrb[12].mxu0 }
 0x13f   :  { %v1158_v47 = vpop.f32.mrb[13].mxu0 }
 0x140   :  { %v1159_v48 = vpop.f32.mrb[14].mxu0 }
 0x141   :  { %v1160_v49 = vpop.f32.mrb[15].mxu0 }
 0x157   :  { %v1196_v50 = vpop.f32.mrb[8].mxu0 }
 0x158   :  { %v1198_v51 = vpop.f32.mrb[9].mxu0  ;;  %v1228_v5 = vrot.slane %v1196_v50, 1 }
 0x159   :  { %v1200_v52 = vpop.f32.mrb[10].mxu0  ;;  %v1229_v8 = vrot.slane %v1198_v51, 1 }
 0x15a   :  { %v1202_v53 = vpop.f32.mrb[11].mxu0  ;;  %v1290_v27 = vrot.slane %v1200_v52, 1 }
 0x15b   :  { %v1291_v31 = vrot.slane %v1202_v53, 1 }
 0x15f   :  { %v1206_v54 = vpop.f32.mrb[16].mxu0 }
 0x160   :  { %v1207_v55 = vpop.f32.mrb[17].mxu0 }
 0x161   :  { %v1208_v56 = vpop.f32.mrb[18].mxu0 }
 0x162   :  { %v1209_v57 = vpop.f32.mrb[19].mxu0 }
 0x175   :  { %v807_v58 = vpop.f32.mrb[8].mxu1 }
 0x176   :  { %v809_v59 = vpop.f32.mrb[9].mxu1  ;;  %v1216_v61 = vrot.slane %v807_v58, 5 }
 0x177   :  { %v811_v60 = vpop.f32.mrb[10].mxu1  ;;  %v1219_v0 = vrot.slane %v809_v59, 5 }
 0x178   :  { %v1217_v62 = vrot.slane %v811_v60, 5  ;;  %v813_v63 = vpop.f32.mrb[11].mxu1 }
 0x179   :  { %v1220_v2 = vrot.slane %v813_v63, 5 }
 0x17a   :  { %v1218_v3 = vsel %vm1215_vm0, %v1216_v61, %v1217_v62 }
 0x17b   :  { %v1224_v6 = vadd.f32 %v1218_v3, %v419_v33  ;;  %v1221_v7 = vsel %vm1215_vm0, %v1219_v0, %v1220_v2 }
 0x17c   :  { %v1225_v10 = vadd.f32 %v1221_v7, %v421_v35 }
 0x17d   :  { %v1232_v11 = vadd.f32 %v1228_v5, %v1224_v6  ;;  %v817_v12 = vpop.f32.mrb[12].mxu1 }
 0x17e   :  { %v1233_v13 = vadd.f32 %v1229_v8, %v1225_v10  ;;  %v1280_v14 = vrot.slane %v817_v12, 5  ;;  %v819_v15 = vpop.f32.mrb[13].mxu1 }
 0x17f   :  { %v1244_v16 = vsel %vm1243_vm1, %v1232_v11, 0.0  ;;  %v1260_v17 = vmul.f32 %v1232_v11, %v1232_v11  ;;  %v1282_v4 = vrot.slane %v819_v15, 5  ;;  %v821_v18 = vpop.f32.mrb[14].mxu1 }
 0x180   :  { %v1245_v19 = vrot.slane %v1244_v16, 4  ;;  %v1624_v20 = vpack.c.bf16 %v1233_v13, %v1232_v11  ;;  %v1251_v21 = vsel %vm1243_vm1, %v1233_v13, 0.0  ;;  %v1261_v22 = vmul.f32 %v1233_v13, %v1233_v13  ;;  %v822_v23 = vpop.f32.mrb[15].mxu1 }
 0x181   :  { %v1262_v24 = vsel %vm1243_vm1, %v1260_v17, 0.0  ;;  %v1281_v25 = vsel %vm1215_vm0, %v1217_v62, %v1280_v14  ;;  %v1283_v26 = vsel %vm1215_vm0, %v1220_v2, %v1282_v4  ;;  %v1252_v29 = vrot.slane %v1251_v21, 4 }
 0x182   :  { %v1263_v28 = vrot.slane %v1262_v24, 4  ;;  %1242 = vst [vmem:[%s2393_s2] sm:$0x33] %v1624_v20  ;;  %v1286_v30 = vadd.f32 %v1281_v25, %v423_v39  ;;  %v1246_v32 = vadd.f32 %v1245_v19, %v1244_v16  ;;  %v1269_v33 = vsel %vm1243_vm1, %v1261_v22, 0.0 }
 0x183   :  { %v1287_v34 = vadd.f32 %v1283_v26, %v425_v42  ;;  %v1253_v40 = vadd.f32 %v1252_v29, %v1251_v21  ;;  %v1270_v41 = vrot.slane %v1269_v33, 4 }
 0x184   :  { %v1294_v35 = vadd.f32 %v1290_v27, %v1286_v30  ;;  %v1264_v36 = vadd.f32 %v1263_v28, %v1262_v24  ;;  %v1247_v44 = vrot.slane %v1246_v32, 2 }
 0x185   :  { %v1295_v38 = vadd.f32 %v1291_v31, %v1287_v34  ;;  %v1254_v49 = vrot.slane %v1253_v40, 2  ;;  %v1271_v50 = vadd.f32 %v1270_v41, %v1269_v33 }
 0x186   :  { %v1308_v43 = vrot.slane %v1294_v35, 2  ;;  %v1328_v37 = vmul.f32 %v1294_v35, %v1294_v35  ;;  %v1265_v47 = vrot.slane %v1264_v36, 2  ;;  %v1248_v52 = vadd.f32 %v1247_v44, %v1246_v32 }
 0x187   :  { %v1625_v1 = vpack.c.bf16 %v1295_v38, %v1294_v35  ;;  %v1309_v45 = vrot.slane %v1295_v38, 2  ;;  %v1329_v56 = vmul.f32 %v1295_v38, %v1295_v38  ;;  %v1255_v60 = vadd.f32 %v1254_v49, %v1253_v40 }
 0x188   :  { %v1312_v9 = vsel %vm1243_vm1, %v1308_v43, 0.0  ;;  %v1332_v46 = vrot.slane %v1328_v37, 2  ;;  %v1266_v57 = vadd.f32 %v1265_v47, %v1264_v36  ;;  %v1272_v61 = vrot.slane %v1271_v50, 2 }
 0x189   :  { %v1313_v39 = vrot.slane %v1312_v9, 4  ;;  %v1303_v48 = vrot.slane %v1625_v1, 7  ;;  %v1319_v51 = vsel %vm1243_vm1, %v1309_v45, 0.0  ;;  %v1333_v63 = vrot.slane %v1329_v56, 2 }
 0x18a   :  { %v1336_v42 = vsel %vm1243_vm1, %v1332_v46, 0.0  ;;  %v1320_v55 = vrot.slane %v1319_v51, 4  ;;  %v1249_v0 = vrot.slane %v1248_v52, 1  ;;  %v1267_v7 = vrot.slane %v1266_v57, 1 }
 0x18b   :  { %v1314_v53 = vadd.f32 %v1313_v39, %v1312_v9  ;;  %v1337_v54 = vrot.slane %v1336_v42, 4  ;;  %1305 = vst [vmem:[%s2393_s2] sm:$0xcc] %v1303_v48  ;;  %v1343_v6 = vsel %vm1243_vm1, %v1333_v63, 0.0  ;;  %v1256_v12 = vrot.slane %v1255_v60, 1 }
 0x18c   :  { %v1321_v62 = vadd.f32 %v1320_v55, %v1319_v51  ;;  %v1344_v11 = vrot.slane %v1343_v6, 4  ;;  %v1273_v13 = vadd.f32 %v1272_v61, %v1271_v50  ;;  %v1250_v15 = vadd.f32 %v1249_v0, %v1248_v52 }
 0x18d   :  { %v1315_v58 = vrot.slane %v1314_v53, 2  ;;  %v1338_v59 = vadd.f32 %v1337_v54, %v1336_v42  ;;  %v1268_v19 = vadd.f32 %v1267_v7, %v1266_v57  ;;  %v1257_v23 = vadd.f32 %v1256_v12, %v1255_v60 }
 0x18e   :  { %v1322_v5 = vrot.slane %v1321_v62, 2  ;;  %v1345_v4 = vadd.f32 %v1344_v11, %v1343_v6  ;;  %v1274_v25 = vrot.slane %v1273_v13, 1 }
 0x18f   :  { %v1316_v2 = vadd.f32 %v1315_v58, %v1314_v53  ;;  %v1339_v3 = vrot.slane %v1338_v59, 2 }
 0x190   :  { %v1323_v14 = vadd.f32 %v1322_v5, %v1321_v62  ;;  %v1346_v22 = vrot.slane %v1345_v4, 2  ;;  %v1275_v31 = vadd.f32 %v1274_v25, %v1273_v13 }
 0x191   :  { %v1317_v8 = vrot.slane %v1316_v2, 1  ;;  %v1340_v10 = vadd.f32 %v1339_v3, %v1338_v59 }
 0x192   :  { %v1324_v18 = vrot.slane %v1323_v14, 1  ;;  %v1347_v27 = vadd.f32 %v1346_v22, %v1345_v4 }
 0x193   :  { %v1318_v16 = vadd.f32 %v1317_v8, %v1316_v2  ;;  %v1341_v17 = vrot.slane %v1340_v10, 1 }
 0x194   :  { %v1325_v24 = vadd.f32 %v1324_v18, %v1323_v14  ;;  %v1348_v30 = vrot.slane %v1347_v27, 1 }
 0x195   :  { %v1326_v20 = vadd.f32 %v1318_v16, %v1250_v15  ;;  %v1342_v21 = vadd.f32 %v1341_v17, %v1340_v10 }
 0x196   :  { %v1327_v28 = vadd.f32 %v1325_v24, %v1257_v23  ;;  %v1349_v32 = vadd.f32 %v1348_v30, %v1347_v27 }
 0x197   :  { %v1350_v26 = vadd.f32 %v1342_v21, %v1268_v19 }
 0x198   :  { %v1351_v33 = vadd.f32 %v1349_v32, %v1275_v31 }
 0x199   :  { %v1353_v29 = vsel %vm1352_vm2, %v1326_v20, %v1350_v26 }
 0x19a   :  { %v1354_v34 = vsel %vm1352_vm2, %v1327_v28, %v1351_v33 }
 0x19b   :  { %v1357_v35 = vcombine.low %v1353_v29, %v1354_v34 }
 0x19d   :  { %1623 = vst.sshfl [vmem:[%s2394_s3] sm:$0x33 pattern:$0x76325410] %v1357_v35 }

// kernel: tile.123
= control target key start
LH: loop header
LB: loop body
LE: loop exit
PB: predicated region body
PF: predicated region fallthrough
CT: control target
= control target key end

     0   :  { %s22_s0 = inlined_call_operand.vmem [shape: f32[64], index: 0, kind: input, shape index: {}]   ;;  %s23_s1 = inlined_call_operand.vmem [shape: f32[4,64], index: 1, kind: output, shape index: {}]  }
   0x1   :  { %v4_v0 = vld [vmem:[%s22_s0] ss:$0 sm:$0xff] }
   0x2   :  { %5 = vst [vmem:[%s23_s1] sm:$0xf] %v4_v0 }

// kernel: tile.124
= control target key start
LH: loop header
LB: loop body
LE: loop exit
PB: predicated region body
PF: predicated region fallthrough
CT: control target
= control target key end

     0   :  { %s6_s8 = smov 3  ;;  %vm8_vm0 = vcmask 523264   ;;  %s30_s9 = smov 64   ;;  %vm15_vm1 = vcmask 1048064   ;;  %s50_s0 = inlined_call_operand.vmem [shape: f32[4,64], index: 0, kind: input, shape index: {}]   ;;  %s51_s1 = inlined_call_operand.vmem [shape: f32[1,256], index: 1, kind: output, shape index: {}]  }
   0x1   :  { %v4_v0 = vld [vmem:[%s50_s0] sm:$0xf]  ;;  %s11_s0 = smov 3 }
   0x2   :  { %5 = vst [vmem:[#allocation1] sm:$0xf] %v4_v0 }
   0x9   :  { %v12_v1 = vld [vmem:[#allocation1 + $0x1] ss:$2 sm:%s11_s0]   ;;  %v7_v2 = vld [vmem:[#allocation1] ss:$2 sm:%s6_s8]  }
   0xa   :  { %13 = vrot.lane.b32.xlu0 %v12_v1, %s30_s9  ;;  %9 = vst.msk [vmem:[#allocation0] ss:$8 sm:$0x3] %vm8_vm0, %v7_v2  }
  0x7c   :  { %v14_v3 = vpop.permute.xlu0 %13  }
  0x7d   :  { %16 = vst.msk [vmem:[#allocation0] ss:$8 sm:$0x3] %vm15_vm1, %v14_v3  }
  0x84   :  { %v20_v4 = vld [vmem:[#allocation0] sm:$0x1]  ;;  %v24_v5 = vld [vmem:[#allocation0 + $0x8] sm:$0x1] }
  0x85   :  { %22 = vst [vmem:[%s51_s1] sm:$0x1] %v20_v4  ;;  %28 = vst [vmem:[%s51_s1 + $0x1] sm:$0x1] %v24_v5 }

// kernel: _lambda_.25
= control target key start
LH: loop header
LB: loop body
LE: loop exit
PB: predicated region body
PF: predicated region fallthrough
CT: control target
= control target key end

     0   :  { %v19_v0 = vlaneseq  ;;  %s94_s0 = inlined_call_operand.vmem [shape: bf16[8,256], index: 0, kind: input, shape index: {}]   ;;  %s95_s1 = inlined_call_operand.vmem [shape: f32[1,256], index: 1, kind: input, shape index: {}]   ;;  %s96_s2 = inlined_call_operand.vmem [shape: f32[1,256], index: 2, kind: input, shape index: {}]   ;;  %s97_s3 = inlined_call_operand.vmem [shape: bf16[8,256], index: 3, kind: output, shape index: {}]  }
   0x1   :  { %v14_v1 = vld [vmem:[%s94_s0] sm:$0xff] }
   0x2   :  { %v20_v2 = vshrl.u32 %v19_v0, 7  ;;  %v17_v3 = vld [vmem:[%s95_s1] sm:$0x3]  ;;  %v15_v5 = vunpack.c.l.bf16 %v14_v1  ;;  %v16_v6 = vunpack.c.h.bf16 %v14_v1 }
   0x3   :  { %v31_v4 = vld [vmem:[%s96_s2] sm:$0x3] }
   0x4   :  { %v21_v7 = vsub.s32 0, %v20_v2  ;;  %v25_v8 = vsub.s32 1, %v20_v2 }
   0x6   :  { %v22_v9 = vrot.slane %v17_v3, %v21_v7  ;;  %v26_v10 = vrot.slane %v17_v3, %v25_v8  ;;  %v36_v11 = vrot.slane %v31_v4, %v21_v7  ;;  %v40_v12 = vrot.slane %v31_v4, %v25_v8 }
   0x8   :  { %v29_v13 = vmul.f32 %v22_v9, %v15_v5  ;;  %v30_v14 = vmul.f32 %v26_v10, %v16_v6 }
   0xa   :  { %v43_v15 = vadd.f32 %v36_v11, %v29_v13  ;;  %v44_v16 = vadd.f32 %v40_v12, %v30_v14 }
   0xc   :  { %v45_v17 = vmax.f32 %v43_v15, 0.0  ;;  %v46_v18 = vmax.f32 %v44_v16, 0.0 }
   0xe   :  { %v61_v19 = vpack.c.bf16 %v46_v18, %v45_v17 }
  0x10   :  { %55 = vst [vmem:[%s97_s3] sm:$0xff] %v61_v19 }

// kernel: _lambda_.26
= control target key start
LH: loop header
LB: loop body
LE: loop exit
PB: predicated region body
PF: predicated region fallthrough
CT: control target
= control target key end

     0   :  { %v1830_v1 = vmov 0   ;;  %vm1220_vm0 = vcmask 1046528   ;;  %vm1183_vm1 = vcmask 1043456   ;;  %vm1266_vm2 = vcmask 1041408   ;;  %s2328_s1 = inlined_call_operand.vmem [shape: bf16[3,384,256], index: 1, kind: input, shape index: {}]   ;;  %s2329_s0 = inlined_call_operand.vmem [shape: bf16[12,384], index: 0, kind: input, shape index: {}]   ;;  %s2330_s2 = inlined_call_operand.vmem [shape: bf16[8,256], index: 2, kind: output, shape index: {0}]   ;;  %s2331_s3 = inlined_call_operand.vmem [shape: f32[1,2,256], index: 3, kind: output, shape index: {1}]  }
   0x1   :  { %v1610_v0 = vld [vmem:[%s2328_s1 + $0x4] ss:$8 sps:$4 sm:$0xff]   ;;  %397 = vmatprep.mubr.bf16.mxu0 %v1830_v1  ;;  %v1612_v2 = vld [vmem:[%s2328_s1] ss:$8 sps:$4 sm:$0xff]   ;;  %v1616_v5 = vld [vmem:[%s2328_s1 + $0x14] ss:$8 sps:$4 sm:$0xff]  }
   0x2   :  { %322 = vmatprep.subr.bf16.mxu1 %v1610_v0  ;;  %v1613_v3 = vld [vmem:[%s2328_s1 + $0x104] ss:$8 sps:$4 sm:$0xff]   ;;  %v1615_v4 = vld [vmem:[%s2328_s1 + $0x100] ss:$8 sps:$4 sm:$0xff]   ;;  %v1618_v6 = vld [vmem:[%s2328_s1 + $0x10] ss:$8 sps:$4 sm:$0xff]  }
   0x3   :  { %323 = vmatpush1.bf16.msra.mxu1 %v1612_v2  ;;  %365 = vmatprep.subr.bf16.mxu0 %v1613_v3  ;;  %v1619_v7 = vld [vmem:[%s2328_s1 + $0x114] ss:$8 sps:$4 sm:$0xff]   ;;  %v1621_v8 = vld [vmem:[%s2328_s1 + $0x110] ss:$8 sps:$4 sm:$0xff]   ;;  %v1622_v9 = vld [vmem:[%s2328_s1 + $0x24] ss:$8 sps:$4 sm:$0xff]  }
   0x4   :  { %366 = vmatpush1.bf16.msra.mxu0 %v1615_v4  ;;  %324 = vmatprep.subr.bf16.mxu1 %v1616_v5  ;;  %v1624_v10 = vld [vmem:[%s2328_s1 + $0x20] ss:$8 sps:$4 sm:$0xff]   ;;  %v1625_v11 = vld [vmem:[%s2328_s1 + $0x124] ss:$8 sps:$4 sm:$0xff]   ;;  %v1628_v12 = vld [vmem:[%s2328_s1 + $0x34] ss:$8 sps:$4 sm:$0xff]  }
   0x5   :  { %367 = vmatprep.subr.bf16.mxu0 %v1619_v7  ;;  %v1627_v13 = vld [vmem:[%s2328_s1 + $0x120] ss:$8 sps:$4 sm:$0xff]   ;;  %v1631_v14 = vld [vmem:[%s2328_s1 + $0x134] ss:$8 sps:$4 sm:$0xff]   ;;  %v1630_v15 = vld [vmem:[%s2328_s1 + $0x30] ss:$8 sps:$4 sm:$0xff]  }
   0x6   :  { %v1634_v16 = vld [vmem:[%s2328_s1 + $0x44] ss:$8 sps:$4 sm:$0xff]   ;;  %v1633_v17 = vld [vmem:[%s2328_s1 + $0x130] ss:$8 sps:$4 sm:$0xff]   ;;  %v1636_v19 = vld [vmem:[%s2328_s1 + $0x40] ss:$8 sps:$4 sm:$0xff]  }
   0x7   :  { %325 = vmatpush1.bf16.msra.mxu1 %v1618_v6  ;;  %v1637_v18 = vld [vmem:[%s2328_s1 + $0x144] ss:$8 sps:$4 sm:$0xff]   ;;  %v1640_v20 = vld [vmem:[%s2328_s1 + $0x54] ss:$8 sps:$4 sm:$0xff]   ;;  %v1639_v21 = vld [vmem:[%s2328_s1 + $0x140] ss:$8 sps:$4 sm:$0xff]  }
   0x8   :  { %326 = vmatprep.subr.bf16.mxu1 %v1622_v9  ;;  %368 = vmatpush1.bf16.msra.mxu0 %v1621_v8  ;;  %v1643_v22 = vld [vmem:[%s2328_s1 + $0x154] ss:$8 sps:$4 sm:$0xff]   ;;  %v1642_v23 = vld [vmem:[%s2328_s1 + $0x50] ss:$8 sps:$4 sm:$0xff]   ;;  %v1646_v24 = vld [vmem:[%s2328_s1 + $0x64] ss:$8 sps:$4 sm:$0xff]  }
   0x9   :  { %369 = vmatprep.subr.bf16.mxu0 %v1625_v11  ;;  %v1645_v25 = vld [vmem:[%s2328_s1 + $0x150] ss:$8 sps:$4 sm:$0xff]   ;;  %v1649_v26 = vld [vmem:[%s2328_s1 + $0x164] ss:$8 sps:$4 sm:$0xff]   ;;  %v1648_v27 = vld [vmem:[%s2328_s1 + $0x60] ss:$8 sps:$4 sm:$0xff]  }
   0xa   :  { %v1652_v28 = vld [vmem:[%s2328_s1 + $0x74] ss:$8 sps:$4 sm:$0xff]   ;;  %v1651_v29 = vld [vmem:[%s2328_s1 + $0x160] ss:$8 sps:$4 sm:$0xff]   ;;  %v1654_v31 = vld [vmem:[%s2328_s1 + $0x70] ss:$8 sps:$4 sm:$0xff]  }
   0xb   :  { %327 = vmatpush1.bf16.msra.mxu1 %v1624_v10  ;;  %v1655_v30 = vld [vmem:[%s2328_s1 + $0x174] ss:$8 sps:$4 sm:$0xff]   ;;  %v1658_v32 = vld [vmem:[%s2328_s1 + $0x84] ss:$8 sps:$4 sm:$0xff]   ;;  %v1657_v33 = vld [vmem:[%s2328_s1 + $0x170] ss:$8 sps:$4 sm:$0xff]  }
   0xc   :  { %328 = vmatprep.subr.bf16.mxu1 %v1628_v12  ;;  %370 = vmatpush1.bf16.msra.mxu0 %v1627_v13  ;;  %v1663_v34 = vld [vmem:[%s2328_s1 + $0x304] ss:$8 sps:$4 sm:$0xff]   ;;  %v1660_v35 = vld [vmem:[%s2328_s1 + $0x80] ss:$8 sps:$4 sm:$0xff]   ;;  %v1665_v37 = vld [vmem:[%s2328_s1 + $0x94] ss:$8 sps:$4 sm:$0xff]  }
   0xd   :  { %371 = vmatprep.subr.bf16.mxu0 %v1631_v14  ;;  %v1960_v36 = vld [vmem:[%s2329_s0 + $0x8] ss:$12 sps:$4 sm:$0x3f]   ;;  %v1667_v40 = vld [vmem:[%s2328_s1 + $0x90] ss:$8 sps:$4 sm:$0xff]   ;;  %vm1253_vm3 = vcmask 1042432  }
   0xe   :  { %v1661_v38 = vld [vmem:[%s2328_s1 + $0x300] ss:$8 sps:$4 sm:$0xff]   ;;  %v1670_v39 = vld [vmem:[%s2328_s1 + $0x314] ss:$8 sps:$4 sm:$0xff]   ;;  %v1671_v41 = vld [vmem:[%s2328_s1 + $0xa4] ss:$8 sps:$4 sm:$0xff]  }
   0xf   :  { %329 = vmatpush1.bf16.msra.mxu1 %v1630_v15  ;;  %v1668_v42 = vld [vmem:[%s2328_s1 + $0x310] ss:$8 sps:$4 sm:$0xff]   ;;  %v1676_v43 = vld [vmem:[%s2328_s1 + $0x324] ss:$8 sps:$4 sm:$0xff]   ;;  %v1673_v44 = vld [vmem:[%s2328_s1 + $0xa0] ss:$8 sps:$4 sm:$0xff]  }
  0x10   :  { %330 = vmatprep.subr.bf16.mxu1 %v1634_v16  ;;  %372 = vmatpush1.bf16.msra.mxu0 %v1633_v17  ;;  %v1677_v45 = vld [vmem:[%s2328_s1 + $0xb4] ss:$8 sps:$4 sm:$0xff]   ;;  %v1674_v46 = vld [vmem:[%s2328_s1 + $0x320] ss:$8 sps:$4 sm:$0xff]   ;;  %v1679_v48 = vld [vmem:[%s2328_s1 + $0xb0] ss:$8 sps:$4 sm:$0xff]  }
  0x11   :  { %373 = vmatprep.subr.bf16.mxu0 %v1637_v18  ;;  %v1682_v47 = vld [vmem:[%s2328_s1 + $0x334] ss:$8 sps:$4 sm:$0xff]   ;;  %v1683_v49 = vld [vmem:[%s2328_s1 + $0xc4] ss:$8 sps:$4 sm:$0xff]   ;;  %v1680_v51 = vld [vmem:[%s2328_s1 + $0x330] ss:$8 sps:$4 sm:$0xff]  }
  0x12   :  { %v1707_v50 = vld [vmem:[%s2329_s0 + $0x4] ss:$12 sps:$4 sm:$0x3f]   ;;  %v1685_v53 = vld [vmem:[%s2328_s1 + $0xc0] ss:$8 sps:$4 sm:$0xff]   ;;  %vm1254_vm4 = vcmask 1046532  }
  0x13   :  { %331 = vmatpush1.bf16.msra.mxu1 %v1636_v19  ;;  %v1688_v52 = vld [vmem:[%s2328_s1 + $0x344] ss:$8 sps:$4 sm:$0xff]   ;;  %354 = vmatprep.mubr.bf16.mxu1 %v1707_v50  ;;  %v1689_v54 = vld [vmem:[%s2328_s1 + $0xd4] ss:$8 sps:$4 sm:$0xff]   ;;  %v1686_v55 = vld [vmem:[%s2328_s1 + $0x340] ss:$8 sps:$4 sm:$0xff]  }
  0x14   :  { %332 = vmatprep.subr.bf16.mxu1 %v1640_v20  ;;  %374 = vmatpush1.bf16.msra.mxu0 %v1639_v21  ;;  %v1694_v56 = vld [vmem:[%s2328_s1 + $0x354] ss:$8 sps:$4 sm:$0xff]   ;;  %v1691_v57 = vld [vmem:[%s2328_s1 + $0xd0] ss:$8 sps:$4 sm:$0xff]   ;;  %v1695_v58 = vld [vmem:[%s2328_s1 + $0xe4] ss:$8 sps:$4 sm:$0xff]  }
  0x15   :  { %375 = vmatprep.subr.bf16.mxu0 %v1643_v22  ;;  %v1692_v59 = vld [vmem:[%s2328_s1 + $0x350] ss:$8 sps:$4 sm:$0xff]   ;;  %v1700_v60 = vld [vmem:[%s2328_s1 + $0x364] ss:$8 sps:$4 sm:$0xff]   ;;  %v1697_v61 = vld [vmem:[%s2328_s1 + $0xe0] ss:$8 sps:$4 sm:$0xff]  }
  0x16   :  { %v1701_v62 = vld [vmem:[%s2328_s1 + $0xf4] ss:$8 sps:$4 sm:$0xff]   ;;  %v1698_v63 = vld [vmem:[%s2328_s1 + $0x360] ss:$8 sps:$4 sm:$0xff]   ;;  %v1703_v2 = vld [vmem:[%s2328_s1 + $0xf0] ss:$8 sps:$4 sm:$0xff]  }
  0x17   :  { %333 = vmatpush1.bf16.msra.mxu1 %v1642_v23  ;;  %v1706_v0 = vld [vmem:[%s2328_s1 + $0x374] ss:$8 sps:$4 sm:$0xff]   ;;  %v1704_v3 = vld [vmem:[%s2328_s1 + $0x370] ss:$8 sps:$4 sm:$0xff]   ;;  %v1712_v4 = vld [vmem:[%s2328_s1 + $0x184] ss:$8 sps:$4 sm:$0xff]  }
  0x18   :  { %334 = vmatprep.subr.bf16.mxu1 %v1646_v24  ;;  %376 = vmatpush1.bf16.msra.mxu0 %v1645_v25  ;;  %v2059_v5 = vld [vmem:[%s2329_s0] ss:$12 sps:$4 sm:$0x3f]   ;;  %v1718_v8 = vld [vmem:[%s2328_s1 + $0x194] ss:$8 sps:$4 sm:$0xff]   ;;  %vm1255_vm5 = vmor %vm1253_vm3, %vm1254_vm4  ;;  %vm1323_vm6 = vcmask 1040384  }
  0x19   :  { %377 = vmatprep.subr.bf16.mxu0 %v1649_v26  ;;  %v1715_v6 = vld [vmem:[%s2328_s1 + $0x384] ss:$8 sps:$4 sm:$0xff]   ;;  %v1710_v7 = vld [vmem:[%s2328_s1 + $0x180] ss:$8 sps:$4 sm:$0xff]   ;;  %v1721_v10 = vld [vmem:[%s2328_s1 + $0x394] ss:$8 sps:$4 sm:$0xff]  }
  0x1a   :  { %v1713_v9 = vld [vmem:[%s2328_s1 + $0x380] ss:$8 sps:$4 sm:$0xff]   ;;  %v1716_v11 = vld [vmem:[%s2328_s1 + $0x190] ss:$8 sps:$4 sm:$0xff]   ;;  %v1724_v12 = vld [vmem:[%s2328_s1 + $0x1a4] ss:$8 sps:$4 sm:$0xff]  }
  0x1b   :  { %335 = vmatpush1.bf16.msra.mxu1 %v1648_v27  ;;  %v1719_v13 = vld [vmem:[%s2328_s1 + $0x390] ss:$8 sps:$4 sm:$0xff]   ;;  %v1727_v14 = vld [vmem:[%s2328_s1 + $0x3a4] ss:$8 sps:$4 sm:$0xff]   ;;  %v1722_v15 = vld [vmem:[%s2328_s1 + $0x1a0] ss:$8 sps:$4 sm:$0xff]  }
  0x1c   :  { %336 = vmatprep.subr.bf16.mxu1 %v1652_v28  ;;  %378 = vmatpush1.bf16.msra.mxu0 %v1651_v29  ;;  %v1730_v16 = vld [vmem:[%s2328_s1 + $0x1b4] ss:$8 sps:$4 sm:$0xff]   ;;  %v1725_v17 = vld [vmem:[%s2328_s1 + $0x3a0] ss:$8 sps:$4 sm:$0xff]   ;;  %v1728_v19 = vld [vmem:[%s2328_s1 + $0x1b0] ss:$8 sps:$4 sm:$0xff]  }
  0x1d   :  { %379 = vmatprep.subr.bf16.mxu0 %v1655_v30  ;;  %v1733_v18 = vld [vmem:[%s2328_s1 + $0x3b4] ss:$8 sps:$4 sm:$0xff]   ;;  %v1736_v20 = vld [vmem:[%s2328_s1 + $0x1c4] ss:$8 sps:$4 sm:$0xff]   ;;  %v1731_v21 = vld [vmem:[%s2328_s1 + $0x3b0] ss:$8 sps:$4 sm:$0xff]  }
  0x1e   :  { %v1739_v22 = vld [vmem:[%s2328_s1 + $0x3c4] ss:$8 sps:$4 sm:$0xff]   ;;  %v1734_v23 = vld [vmem:[%s2328_s1 + $0x1c0] ss:$8 sps:$4 sm:$0xff]   ;;  %v1742_v24 = vld [vmem:[%s2328_s1 + $0x1d4] ss:$8 sps:$4 sm:$0xff]  }
  0x1f   :  { %337 = vmatpush1.bf16.msra.mxu1 %v1654_v31  ;;  %v1737_v25 = vld [vmem:[%s2328_s1 + $0x3c0] ss:$8 sps:$4 sm:$0xff]   ;;  %v1745_v26 = vld [vmem:[%s2328_s1 + $0x3d4] ss:$8 sps:$4 sm:$0xff]   ;;  %v1740_v27 = vld [vmem:[%s2328_s1 + $0x1d0] ss:$8 sps:$4 sm:$0xff]  }
  0x20   :  { %338 = vmatprep.subr.bf16.mxu1 %v1658_v32  ;;  %380 = vmatpush1.bf16.msra.mxu0 %v1657_v33  ;;  %v1748_v28 = vld [vmem:[%s2328_s1 + $0x1e4] ss:$8 sps:$4 sm:$0xff]   ;;  %v1743_v29 = vld [vmem:[%s2328_s1 + $0x3d0] ss:$8 sps:$4 sm:$0xff]   ;;  %v1746_v31 = vld [vmem:[%s2328_s1 + $0x1e0] ss:$8 sps:$4 sm:$0xff]  }
  0x21   :  { %1072 = vmatprep.subr.bf16.mxu0 %v1663_v34  ;;  %v1751_v30 = vld [vmem:[%s2328_s1 + $0x3e4] ss:$8 sps:$4 sm:$0xff]   ;;  %v1754_v32 = vld [vmem:[%s2328_s1 + $0x1f4] ss:$8 sps:$4 sm:$0xff]   ;;  %v1749_v33 = vld [vmem:[%s2328_s1 + $0x3e0] ss:$8 sps:$4 sm:$0xff]  }
  0x22   :  { %v1757_v34 = vld [vmem:[%s2328_s1 + $0x3f4] ss:$8 sps:$4 sm:$0xff]  }
  0x23   :  { %339 = vmatpush1.bf16.msra.mxu1 %v1660_v35  ;;  %398 = vmatmul.mubr.bf16.vlgmr.msra.gmra.mrb[0].mxu0 %v1960_v36  ;;  %v1752_v35 = vld [vmem:[%s2328_s1 + $0x1f0] ss:$8 sps:$4 sm:$0xff]  }
  0x24   :  { %340 = vmatprep.subr.bf16.mxu1 %v1665_v37  ;;  %1073 = vmatpush1.bf16.msra.mxu0 %v1661_v38  ;;  %v1760_v37 = vld [vmem:[%s2328_s1 + $0x204] ss:$8 sps:$4 sm:$0xff]   ;;  %v1755_v38 = vld [vmem:[%s2328_s1 + $0x3f0] ss:$8 sps:$4 sm:$0xff]  }
  0x25   :  { %1074 = vmatprep.subr.bf16.mxu0 %v1670_v39  ;;  %1104 = vmatprep.mubr.bf16.mxu0 %v1707_v50  ;;  %v1763_v39 = vld [vmem:[%s2328_s1 + $0x404] ss:$8 sps:$4 sm:$0xff]  }
  0x27   :  { %341 = vmatpush1.bf16.msra.mxu1 %v1667_v40  ;;  %v1758_v40 = vld [vmem:[%s2328_s1 + $0x200] ss:$8 sps:$4 sm:$0xff]  }
  0x28   :  { %342 = vmatprep.subr.bf16.mxu1 %v1671_v41  ;;  %1075 = vmatpush1.bf16.msra.mxu0 %v1668_v42  ;;  %v1766_v41 = vld [vmem:[%s2328_s1 + $0x214] ss:$8 sps:$4 sm:$0xff]   ;;  %v1761_v42 = vld [vmem:[%s2328_s1 + $0x400] ss:$8 sps:$4 sm:$0xff]  }
  0x29   :  { %1076 = vmatprep.subr.bf16.mxu0 %v1676_v43  ;;  %v1769_v43 = vld [vmem:[%s2328_s1 + $0x414] ss:$8 sps:$4 sm:$0xff]  }
  0x2b   :  { %343 = vmatpush1.bf16.msra.mxu1 %v1673_v44  ;;  %v1764_v44 = vld [vmem:[%s2328_s1 + $0x210] ss:$8 sps:$4 sm:$0xff]  }
  0x2c   :  { %344 = vmatprep.subr.bf16.mxu1 %v1677_v45  ;;  %1077 = vmatpush1.bf16.msra.mxu0 %v1674_v46  ;;  %v1772_v45 = vld [vmem:[%s2328_s1 + $0x224] ss:$8 sps:$4 sm:$0xff]   ;;  %v1767_v46 = vld [vmem:[%s2328_s1 + $0x410] ss:$8 sps:$4 sm:$0xff]  }
  0x2d   :  { %1078 = vmatprep.subr.bf16.mxu0 %v1682_v47  ;;  %v1775_v47 = vld [vmem:[%s2328_s1 + $0x424] ss:$8 sps:$4 sm:$0xff]  }
  0x2f   :  { %345 = vmatpush1.bf16.msra.mxu1 %v1679_v48  ;;  %v1770_v48 = vld [vmem:[%s2328_s1 + $0x220] ss:$8 sps:$4 sm:$0xff]  }
  0x30   :  { %346 = vmatprep.subr.bf16.mxu1 %v1683_v49  ;;  %1079 = vmatpush1.bf16.msra.mxu0 %v1680_v51  ;;  %v1778_v49 = vld [vmem:[%s2328_s1 + $0x234] ss:$8 sps:$4 sm:$0xff]  }
  0x31   :  { %1080 = vmatprep.subr.bf16.mxu0 %v1688_v52  ;;  %v1781_v51 = vld [vmem:[%s2328_s1 + $0x434] ss:$8 sps:$4 sm:$0xff]   ;;  %v1776_v52 = vld [vmem:[%s2328_s1 + $0x230] ss:$8 sps:$4 sm:$0xff]  }
  0x33   :  { %347 = vmatpush1.bf16.msra.mxu1 %v1685_v53  ;;  %v1784_v53 = vld [vmem:[%s2328_s1 + $0x244] ss:$8 sps:$4 sm:$0xff]  }
  0x34   :  { %348 = vmatprep.subr.bf16.mxu1 %v1689_v54  ;;  %1081 = vmatpush1.bf16.msra.mxu0 %v1686_v55  ;;  %v1779_v54 = vld [vmem:[%s2328_s1 + $0x430] ss:$8 sps:$4 sm:$0xff]   ;;  %v1787_v55 = vld [vmem:[%s2328_s1 + $0x444] ss:$8 sps:$4 sm:$0xff]  }
  0x35   :  { %1082 = vmatprep.subr.bf16.mxu0 %v1694_v56  ;;  %v1782_v56 = vld [vmem:[%s2328_s1 + $0x240] ss:$8 sps:$4 sm:$0xff]  }
  0x37   :  { %349 = vmatpush1.bf16.msra.mxu1 %v1691_v57  ;;  %v1790_v57 = vld [vmem:[%s2328_s1 + $0x254] ss:$8 sps:$4 sm:$0xff]  }
  0x38   :  { %350 = vmatprep.subr.bf16.mxu1 %v1695_v58  ;;  %1083 = vmatpush1.bf16.msra.mxu0 %v1692_v59  ;;  %v1785_v58 = vld [vmem:[%s2328_s1 + $0x440] ss:$8 sps:$4 sm:$0xff]   ;;  %v1793_v59 = vld [vmem:[%s2328_s1 + $0x454] ss:$8 sps:$4 sm:$0xff]  }
  0x39   :  { %1084 = vmatprep.subr.bf16.mxu0 %v1700_v60  ;;  %v1788_v60 = vld [vmem:[%s2328_s1 + $0x250] ss:$8 sps:$4 sm:$0xff]  }
  0x3b   :  { %351 = vmatpush1.bf16.msra.mxu1 %v1697_v61  ;;  %v1796_v61 = vld [vmem:[%s2328_s1 + $0x264] ss:$8 sps:$4 sm:$0xff]  }
  0x3c   :  { %352 = vmatprep.subr.bf16.mxu1 %v1701_v62  ;;  %1085 = vmatpush1.bf16.msra.mxu0 %v1698_v63  ;;  %v1791_v62 = vld [vmem:[%s2328_s1 + $0x450] ss:$8 sps:$4 sm:$0xff]   ;;  %v1799_v63 = vld [vmem:[%s2328_s1 + $0x464] ss:$8 sps:$4 sm:$0xff]  }
  0x3d   :  { %1086 = vmatprep.subr.bf16.mxu0 %v1706_v0  ;;  %v1794_v0 = vld [vmem:[%s2328_s1 + $0x260] ss:$8 sps:$4 sm:$0xff]  }
  0x3f   :  { %353 = vmatpush1.bf16.msra.mxu1 %v1703_v2  ;;  %v1802_v2 = vld [vmem:[%s2328_s1 + $0x274] ss:$8 sps:$4 sm:$0xff]  }
  0x40   :  { %697 = vmatprep.subr.bf16.mxu1 %v1712_v4  ;;  %1087 = vmatpush1.bf16.msra.mxu0 %v1704_v3  ;;  %v1797_v3 = vld [vmem:[%s2328_s1 + $0x460] ss:$8 sps:$4 sm:$0xff]   ;;  %v1805_v4 = vld [vmem:[%s2328_s1 + $0x474] ss:$8 sps:$4 sm:$0xff]  }
  0x41   :  { %1088 = vmatprep.subr.bf16.mxu0 %v1715_v6  ;;  %v1800_v6 = vld [vmem:[%s2328_s1 + $0x270] ss:$8 sps:$4 sm:$0xff]  }
  0x42   :  { %355 = vmatmul.mubr.bf16.vlgmr.msra.gmra.mrb[0].mxu1 %v2059_v5 }
  0x43   :  { %698 = vmatpush1.bf16.msra.mxu1 %v1710_v7  ;;  %729 = vmatprep.mubr.bf16.mxu1 %v1707_v50  ;;  %v1773_v50 = vld [vmem:[%s2328_s1 + $0x420] ss:$8 sps:$4 sm:$0xff]   ;;  %v1808_v7 = vld [vmem:[%s2328_s1 + $0x284] ss:$8 sps:$4 sm:$0xff]  }
  0x44   :  { %699 = vmatprep.subr.bf16.mxu1 %v1718_v8  ;;  %1089 = vmatpush1.bf16.msra.mxu0 %v1713_v9  ;;  %v1803_v8 = vld [vmem:[%s2328_s1 + $0x470] ss:$8 sps:$4 sm:$0xff]   ;;  %v1806_v9 = vld [vmem:[%s2328_s1 + $0x280] ss:$8 sps:$4 sm:$0xff]  }
  0x45   :  { %1090 = vmatprep.subr.bf16.mxu0 %v1721_v10  ;;  %v1811_v10 = vld [vmem:[%s2328_s1 + $0x294] ss:$8 sps:$4 sm:$0xff]  }
  0x47   :  { %700 = vmatpush1.bf16.msra.mxu1 %v1716_v11  ;;  %v1809_v11 = vld [vmem:[%s2328_s1 + $0x290] ss:$8 sps:$4 sm:$0xff]  }
  0x48   :  { %701 = vmatprep.subr.bf16.mxu1 %v1724_v12  ;;  %1091 = vmatpush1.bf16.msra.mxu0 %v1719_v13  ;;  %v1814_v12 = vld [vmem:[%s2328_s1 + $0x2a4] ss:$8 sps:$4 sm:$0xff]   ;;  %v1812_v13 = vld [vmem:[%s2328_s1 + $0x2a0] ss:$8 sps:$4 sm:$0xff]  }
  0x49   :  { %1092 = vmatprep.subr.bf16.mxu0 %v1727_v14  ;;  %v1820_v14 = vld [vmem:[%s2328_s1 + $0x2c4] ss:$8 sps:$4 sm:$0xff]  }
  0x4b   :  { %702 = vmatpush1.bf16.msra.mxu1 %v1722_v15  ;;  %v1818_v15 = vld [vmem:[%s2328_s1 + $0x2c0] ss:$8 sps:$4 sm:$0xff]  }
  0x4c   :  { %703 = vmatprep.subr.bf16.mxu1 %v1730_v16  ;;  %1093 = vmatpush1.bf16.msra.mxu0 %v1725_v17  ;;  %v1823_v16 = vld [vmem:[%s2328_s1 + $0x2d4] ss:$8 sps:$4 sm:$0xff]   ;;  %v1821_v17 = vld [vmem:[%s2328_s1 + $0x2d0] ss:$8 sps:$4 sm:$0xff]  }
  0x4d   :  { %1094 = vmatprep.subr.bf16.mxu0 %v1733_v18  ;;  %v1826_v18 = vld [vmem:[%s2328_s1 + $0x2e4] ss:$8 sps:$4 sm:$0xff]  }
  0x4f   :  { %704 = vmatpush1.bf16.msra.mxu1 %v1728_v19  ;;  %v1824_v19 = vld [vmem:[%s2328_s1 + $0x2e0] ss:$8 sps:$4 sm:$0xff]  }
  0x50   :  { %705 = vmatprep.subr.bf16.mxu1 %v1736_v20  ;;  %1095 = vmatpush1.bf16.msra.mxu0 %v1731_v21  ;;  %v1829_v20 = vld [vmem:[%s2328_s1 + $0x2f4] ss:$8 sps:$4 sm:$0xff]   ;;  %v1827_v21 = vld [vmem:[%s2328_s1 + $0x2f0] ss:$8 sps:$4 sm:$0xff]  }
  0x51   :  { %1096 = vmatprep.subr.bf16.mxu0 %v1739_v22 }
  0x53   :  { %706 = vmatpush1.bf16.msra.mxu1 %v1734_v23 }
  0x54   :  { %707 = vmatprep.subr.bf16.mxu1 %v1742_v24  ;;  %1097 = vmatpush1.bf16.msra.mxu0 %v1737_v25 }
  0x55   :  { %1098 = vmatprep.subr.bf16.mxu0 %v1745_v26 }
  0x57   :  { %708 = vmatpush1.bf16.msra.mxu1 %v1740_v27 }
  0x58   :  { %709 = vmatprep.subr.bf16.mxu1 %v1748_v28  ;;  %1099 = vmatpush1.bf16.msra.mxu0 %v1743_v29 }
  0x59   :  { %1100 = vmatprep.subr.bf16.mxu0 %v1751_v30 }
  0x5b   :  { %710 = vmatpush1.bf16.msra.mxu1 %v1746_v31 }
  0x5c   :  { %711 = vmatprep.subr.bf16.mxu1 %v1754_v32  ;;  %1101 = vmatpush1.bf16.msra.mxu0 %v1749_v33 }
  0x5d   :  { %1102 = vmatprep.subr.bf16.mxu0 %v1757_v34 }
  0x5f   :  { %712 = vmatpush1.bf16.msra.mxu1 %v1752_v35 }
  0x60   :  { %713 = vmatprep.subr.bf16.mxu1 %v1760_v37  ;;  %1103 = vmatpush1.bf16.msra.mxu0 %v1755_v38 }
  0x61   :  { %1115 = vmatprep.subr.bf16.mxu0 %v1763_v39 }
  0x63   :  { %714 = vmatpush1.bf16.msra.mxu1 %v1758_v40  ;;  %1105 = vmatmul.mubr.bf16.vlgmr.msra.gmra.mrb[4].mxu0 %v2059_v5 }
  0x64   :  { %715 = vmatprep.subr.bf16.mxu1 %v1766_v41  ;;  %1116 = vmatpush1.bf16.msra.mxu0 %v1761_v42 }
  0x65   :  { %1147 = vmatprep.mubr.bf16.mxu0 %v1830_v1  ;;  %1117 = vmatprep.subr.bf16.mxu0 %v1769_v43 }
  0x67   :  { %716 = vmatpush1.bf16.msra.mxu1 %v1764_v44 }
  0x68   :  { %717 = vmatprep.subr.bf16.mxu1 %v1772_v45  ;;  %1118 = vmatpush1.bf16.msra.mxu0 %v1767_v46 }
  0x69   :  { %1119 = vmatprep.subr.bf16.mxu0 %v1775_v47 }
  0x6b   :  { %718 = vmatpush1.bf16.msra.mxu1 %v1770_v48 }
  0x6c   :  { %719 = vmatprep.subr.bf16.mxu1 %v1778_v49  ;;  %1120 = vmatpush1.bf16.msra.mxu0 %v1773_v50 }
  0x6d   :  { %1121 = vmatprep.subr.bf16.mxu0 %v1781_v51 }
  0x6f   :  { %720 = vmatpush1.bf16.msra.mxu1 %v1776_v52 }
  0x70   :  { %721 = vmatprep.subr.bf16.mxu1 %v1784_v53  ;;  %1122 = vmatpush1.bf16.msra.mxu0 %v1779_v54 }
  0x71   :  { %1123 = vmatprep.subr.bf16.mxu0 %v1787_v55 }
  0x73   :  { %722 = vmatpush1.bf16.msra.mxu1 %v1782_v56 }
  0x74   :  { %723 = vmatprep.subr.bf16.mxu1 %v1790_v57  ;;  %1124 = vmatpush1.bf16.msra.mxu0 %v1785_v58 }
  0x75   :  { %1125 = vmatprep.subr.bf16.mxu0 %v1793_v59 }
  0x77   :  { %724 = vmatpush1.bf16.msra.mxu1 %v1788_v60 }
  0x78   :  { %725 = vmatprep.subr.bf16.mxu1 %v1796_v61  ;;  %1126 = vmatpush1.bf16.msra.mxu0 %v1791_v62 }
  0x79   :  { %1127 = vmatprep.subr.bf16.mxu0 %v1799_v63 }
  0x7b   :  { %726 = vmatpush1.bf16.msra.mxu1 %v1794_v0 }
  0x7c   :  { %727 = vmatprep.subr.bf16.mxu1 %v1802_v2  ;;  %1128 = vmatpush1.bf16.msra.mxu0 %v1797_v3 }
  0x7d   :  { %1129 = vmatprep.subr.bf16.mxu0 %v1805_v4 }
  0x7f   :  { %728 = vmatpush1.bf16.msra.mxu1 %v1800_v6 }
  0x80   :  { %740 = vmatprep.subr.bf16.mxu1 %v1808_v7  ;;  %1130 = vmatpush1.bf16.msra.mxu0 %v1803_v8 }
  0x82   :  { %730 = vmatmul.mubr.bf16.vlgmr.msra.gmra.mrb[4].mxu1 %v2059_v5  ;;  %v1817_v5 = vld [vmem:[%s2328_s1 + $0x2b4] ss:$8 sps:$4 sm:$0xff]  }
  0x83   :  { %741 = vmatpush1.bf16.msra.mxu1 %v1806_v9  ;;  %772 = vmatprep.mubr.bf16.mxu1 %v1830_v1  ;;  %v1815_v1 = vld [vmem:[%s2328_s1 + $0x2b0] ss:$8 sps:$4 sm:$0xff]  }
  0x84   :  { %1148 = vmatmul.mubr.bf16.vlgmr.msra.gmra.mrb[4].mxu0 %v1960_v36  ;;  %742 = vmatprep.subr.bf16.mxu1 %v1811_v10 }
  0x87   :  { %743 = vmatpush1.bf16.msra.mxu1 %v1809_v11 }
  0x88   :  { %744 = vmatprep.subr.bf16.mxu1 %v1814_v12 }
  0x8b   :  { %745 = vmatpush1.bf16.msra.mxu1 %v1812_v13 }
  0x8c   :  { %746 = vmatprep.subr.bf16.mxu1 %v1817_v5 }
  0x8f   :  { %747 = vmatpush1.bf16.msra.mxu1 %v1815_v1 }
  0x90   :  { %748 = vmatprep.subr.bf16.mxu1 %v1820_v14 }
  0x93   :  { %749 = vmatpush1.bf16.msra.mxu1 %v1818_v15 }
  0x94   :  { %750 = vmatprep.subr.bf16.mxu1 %v1823_v16 }
  0x97   :  { %751 = vmatpush1.bf16.msra.mxu1 %v1821_v17 }
  0x98   :  { %752 = vmatprep.subr.bf16.mxu1 %v1826_v18 }
  0x9b   :  { %753 = vmatpush1.bf16.msra.mxu1 %v1824_v19 }
  0x9c   :  { %754 = vmatprep.subr.bf16.mxu1 %v1829_v20 }
  0x9f   :  { %755 = vmatpush1.bf16.msra.mxu1 %v1827_v21 }
  0xa2   :  { %773 = vmatmul.mubr.bf16.vlgmr.msra.gmra.mrb[4].mxu1 %v1960_v36 }
  0xf6   :  { %v399_v22 = vpop.f32.mrb[0].mxu0 }
  0xf7   :  { %v401_v23 = vpop.f32.mrb[1].mxu0 }
  0xf8   :  { %v403_v24 = vpop.f32.mrb[2].mxu0 }
  0xf9   :  { %v405_v25 = vpop.f32.mrb[3].mxu0 }
 0x115   :  { %v356_v26 = vpop.f32.mrb[0].mxu1 }
 0x116   :  { %v400_v27 = vadd.f32 %v399_v22, %v356_v26  ;;  %v358_v28 = vpop.f32.mrb[1].mxu1 }
 0x117   :  { %v402_v29 = vadd.f32 %v401_v23, %v358_v28  ;;  %v360_v30 = vpop.f32.mrb[2].mxu1 }
 0x118   :  { %v404_v31 = vadd.f32 %v403_v24, %v360_v30  ;;  %v362_v32 = vpop.f32.mrb[3].mxu1 }
 0x119   :  { %v406_v33 = vadd.f32 %v405_v25, %v362_v32 }
 0x157   :  { %v1149_v34 = vpop.f32.mrb[4].mxu0 }
 0x158   :  { %v1151_v35 = vpop.f32.mrb[5].mxu0  ;;  %v1168_v43 = vrot.slane %v1149_v34, 2 }
 0x159   :  { %v1153_v37 = vpop.f32.mrb[6].mxu0  ;;  %v1169_v47 = vrot.slane %v1151_v35, 2 }
 0x15a   :  { %v1155_v38 = vpop.f32.mrb[7].mxu0  ;;  %v1235_v50 = vrot.slane %v1153_v37, 2 }
 0x15b   :  { %v1236_v7 = vrot.slane %v1155_v38, 2 }
 0x175   :  { %v774_v39 = vpop.f32.mrb[4].mxu1 }
 0x176   :  { %v1160_v40 = vrot.slane %v774_v39, 1  ;;  %v776_v41 = vpop.f32.mrb[5].mxu1 }
 0x177   :  { %v1161_v36 = vrot.slane %v776_v41, 1  ;;  %v778_v42 = vpop.f32.mrb[6].mxu1 }
 0x178   :  { %v1164_v44 = vadd.f32 %v1160_v40, %v400_v27  ;;  %v1221_v45 = vrot.slane %v778_v42, 1  ;;  %v780_v46 = vpop.f32.mrb[7].mxu1 }
 0x179   :  { %v1165_v48 = vadd.f32 %v1161_v36, %v402_v29  ;;  %v1223_v49 = vrot.slane %v780_v46, 1 }
 0x17a   :  { %v1172_v51 = vadd.f32 %v1168_v43, %v1164_v44  ;;  %v1222_v52 = vsel %vm1220_vm0, %v1160_v40, %v1221_v45  ;;  %v1231_v53 = vadd.f32 %v1221_v45, %v404_v31 }
 0x17b   :  { %v1173_v54 = vadd.f32 %v1169_v47, %v1165_v48  ;;  %v1229_v55 = vadd.f32 %v1222_v52, %v400_v27  ;;  %v1224_v56 = vsel %vm1220_vm0, %v1161_v36, %v1223_v49  ;;  %v1232_v57 = vadd.f32 %v1223_v49, %v406_v33 }
 0x17c   :  { %v1184_v58 = vsel %vm1183_vm1, %v1172_v51, 0.0  ;;  %v1200_v59 = vmul.f32 %v1172_v51, %v1172_v51  ;;  %v1241_v60 = vadd.f32 %v1235_v50, %v1231_v53  ;;  %v1230_v61 = vadd.f32 %v1224_v56, %v402_v29 }
 0x17d   :  { %v1185_v62 = vrot.slane %v1184_v58, 4  ;;  %v1594_v63 = vpack.c.bf16 %v1173_v54, %v1172_v51  ;;  %v1191_v0 = vsel %vm1183_vm1, %v1173_v54, 0.0  ;;  %v1201_v3 = vmul.f32 %v1173_v54, %v1173_v54 }
 0x17e   :  { %v1202_v2 = vsel %vm1183_vm1, %v1200_v59, 0.0  ;;  %v1239_v4 = vadd.f32 %v1235_v50, %v1229_v55  ;;  %v1268_v6 = vrot.slane %v1241_v60, 6  ;;  %v1293_v10 = vmul.f32 %v1241_v60, %v1241_v60 }
 0x17f   :  { %v1186_v8 = vadd.f32 %v1185_v62, %v1184_v58  ;;  %v1203_v9 = vrot.slane %v1202_v2, 4  ;;  %1182 = vst [vmem:[%s2330_s2] sm:$0x33] %v1594_v63  ;;  %v1192_v11 = vrot.slane %v1191_v0, 4  ;;  %v1240_v14 = vadd.f32 %v1236_v7, %v1230_v61 }
 0x180   :  { %v1267_v12 = vrot.slane %v1239_v4, 6  ;;  %v1291_v13 = vmul.f32 %v1239_v4, %v1239_v4  ;;  %v1300_v1 = vrot.slane %v1293_v10, 6  ;;  %v1209_v16 = vsel %vm1183_vm1, %v1201_v3, 0.0 }
 0x181   :  { %v1204_v5 = vadd.f32 %v1203_v9, %v1202_v2  ;;  %v1187_v15 = vrot.slane %v1186_v8, 2  ;;  %v1242_v21 = vadd.f32 %v1236_v7, %v1232_v57  ;;  %v1193_v22 = vadd.f32 %v1192_v11, %v1191_v0 }
 0x182   :  { %v1269_v17 = vsel %vm1266_vm2, %v1267_v12, %v1268_v6  ;;  %v1299_v18 = vrot.slane %v1291_v13, 6  ;;  %v1210_v25 = vrot.slane %v1209_v16, 4  ;;  %v1595_v27 = vpack.c.bf16 %v1240_v14, %v1239_v4 }
 0x183   :  { %v1205_v19 = vrot.slane %v1204_v5, 2  ;;  %v1275_v20 = vsel %vm1183_vm1, %v1269_v17, 0.0  ;;  %v1188_v28 = vadd.f32 %v1187_v15, %v1186_v8  ;;  %v1596_v32 = vpack.c.bf16 %v1242_v21, %v1241_v60 }
 0x184   :  { %v1276_v23 = vrot.slane %v1275_v20, 4  ;;  %v1301_v24 = vsel %vm1266_vm2, %v1299_v18, %v1300_v1  ;;  %v1592_v33 = vrot.slane %v1595_v27, 9  ;;  %v1194_v34 = vrot.slane %v1193_v22, 2 }
 0x185   :  { %v1307_v26 = vsel %vm1183_vm1, %v1301_v24, 0.0  ;;  %v1206_v31 = vadd.f32 %v1205_v19, %v1204_v5  ;;  %v1211_v38 = vadd.f32 %v1210_v25, %v1209_v16  ;;  %v1258_v39 = vrot.slane %v1596_v32, 5 }
 0x186   :  { %v1277_v29 = vadd.f32 %v1276_v23, %v1275_v20  ;;  %v1308_v30 = vrot.slane %v1307_v26, 4  ;;  %v1270_v40 = vrot.slane %v1240_v14, 6  ;;  %v1271_v41 = vrot.slane %v1242_v21, 6 }
 0x187   :  { %v1189_v36 = vrot.slane %v1188_v28, 1  ;;  %v1292_v44 = vmul.f32 %v1240_v14, %v1240_v14  ;;  %v1207_v45 = vrot.slane %v1206_v31, 1  ;;  %v1259_v46 = vsel %vm1255_vm5, %v1592_v33, %v1258_v39 }
 0x188   :  { %v1278_v35 = vrot.slane %v1277_v29, 2  ;;  %v1309_v37 = vadd.f32 %v1308_v30, %v1307_v26  ;;  %v1272_v47 = vsel %vm1266_vm2, %v1270_v40, %v1271_v41  ;;  %v1294_v48 = vmul.f32 %v1242_v21, %v1242_v21  ;;  %1261 = vst [vmem:[%s2330_s2] sm:$0xcc] %v1259_v46 }
 0x189   :  { %v1282_v51 = vsel %vm1183_vm1, %v1272_v47, 0.0  ;;  %v1302_v52 = vrot.slane %v1292_v44, 6  ;;  %v1190_v55 = vadd.f32 %v1189_v36, %v1188_v28  ;;  %v1195_v58 = vadd.f32 %v1194_v34, %v1193_v22 }
 0x18a   :  { %v1279_v42 = vadd.f32 %v1278_v35, %v1277_v29  ;;  %v1310_v43 = vrot.slane %v1309_v37, 2  ;;  %v1283_v53 = vrot.slane %v1282_v51, 4  ;;  %v1303_v54 = vrot.slane %v1294_v48, 6 }
 0x18b   :  { %v1212_v59 = vrot.slane %v1211_v38, 2  ;;  %v1208_v62 = vadd.f32 %v1207_v45, %v1206_v31  ;;  %v1196_v7 = vrot.slane %v1195_v58, 1 }
 0x18c   :  { %v1280_v49 = vrot.slane %v1279_v42, 1  ;;  %v1311_v50 = vadd.f32 %v1310_v43, %v1309_v37  ;;  %v1284_v60 = vadd.f32 %v1283_v53, %v1282_v51  ;;  %v1304_v61 = vsel %vm1266_vm2, %v1302_v52, %v1303_v54 }
 0x18d   :  { %v1314_v2 = vsel %vm1183_vm1, %v1304_v61, 0.0  ;;  %v1213_v8 = vadd.f32 %v1212_v59, %v1211_v38  ;;  %v1197_v5 = vadd.f32 %v1196_v7, %v1195_v58 }
 0x18e   :  { %v1281_v56 = vadd.f32 %v1280_v49, %v1279_v42  ;;  %v1312_v57 = vrot.slane %v1311_v50, 1  ;;  %v1285_v3 = vrot.slane %v1284_v60, 2  ;;  %v1315_v4 = vrot.slane %v1314_v2, 4 }
 0x18f   :  { %v1214_v1 = vrot.slane %v1213_v8, 1 }
 0x190   :  { %v1289_v63 = vadd.f32 %v1281_v56, %v1190_v55  ;;  %v1313_v0 = vadd.f32 %v1312_v57, %v1311_v50  ;;  %v1286_v9 = vadd.f32 %v1285_v3, %v1284_v60  ;;  %v1316_v10 = vadd.f32 %v1315_v4, %v1314_v2 }
 0x191   :  { %v1215_v18 = vadd.f32 %v1214_v1, %v1213_v8 }
 0x192   :  { %v1321_v6 = vadd.f32 %v1313_v0, %v1208_v62  ;;  %v1287_v12 = vrot.slane %v1286_v9, 1  ;;  %v1317_v13 = vrot.slane %v1316_v10, 2 }
 0x194   :  { %v1324_v11 = vsel %vm1323_vm6, %v1289_v63, %v1321_v6  ;;  %v1288_v14 = vadd.f32 %v1287_v12, %v1286_v9  ;;  %v1318_v15 = vadd.f32 %v1317_v13, %v1316_v10 }
 0x196   :  { %v1290_v16 = vadd.f32 %v1288_v14, %v1197_v5  ;;  %v1319_v17 = vrot.slane %v1318_v15, 1 }
 0x198   :  { %v1320_v19 = vadd.f32 %v1319_v17, %v1318_v15 }
 0x19a   :  { %v1322_v20 = vadd.f32 %v1320_v19, %v1215_v18 }
 0x19c   :  { %v1325_v21 = vsel %vm1323_vm6, %v1290_v16, %v1322_v20 }
 0x19d   :  { %v1328_v22 = vcombine.low %v1324_v11, %v1325_v21 }
 0x19f   :  { %1593 = vst.sshfl [vmem:[%s2331_s3] sm:$0x33 pattern:$0x76325410] %v1328_v22 }

// kernel: _lambda_.27
= control target key start
LH: loop header
LB: loop body
LE: loop exit
PB: predicated region body
PF: predicated region fallthrough
CT: control target
= control target key end

     0   :  { %v22_v0 = vlaneseq  ;;  %s110_s0 = inlined_call_operand.vmem [shape: bf16[8,256], index: 0, kind: input, shape index: {}]   ;;  %s111_s1 = inlined_call_operand.vmem [shape: f32[1,256], index: 1, kind: input, shape index: {}]   ;;  %s112_s2 = inlined_call_operand.vmem [shape: f32[1,256], index: 2, kind: input, shape index: {}]   ;;  %s113_s3 = inlined_call_operand.vmem [shape: bf16[8,256], index: 3, kind: input, shape index: {}]   ;;  %s114_s4 = inlined_call_operand.vmem [shape: bf16[8,256], index: 4, kind: output, shape index: {}]  }
   0x1   :  { %v17_v1 = vld [vmem:[%s110_s0] sm:$0xff] }
   0x2   :  { %v23_v2 = vshrl.u32 %v22_v0, 7  ;;  %v20_v3 = vld [vmem:[%s111_s1] sm:$0x3]  ;;  %v18_v5 = vunpack.c.l.bf16 %v17_v1  ;;  %v19_v6 = vunpack.c.h.bf16 %v17_v1 }
   0x3   :  { %v34_v4 = vld [vmem:[%s112_s2] sm:$0x3] }
   0x4   :  { %v24_v7 = vsub.s32 0, %v23_v2  ;;  %v28_v8 = vsub.s32 1, %v23_v2  ;;  %v48_v9 = vld [vmem:[%s113_s3] sm:$0xff] }
   0x5   :  { %v49_v16 = vunpack.c.l.bf16 %v48_v9  ;;  %v50_v17 = vunpack.c.h.bf16 %v48_v9 }
   0x6   :  { %v25_v10 = vrot.slane %v20_v3, %v24_v7  ;;  %v29_v11 = vrot.slane %v20_v3, %v28_v8  ;;  %v39_v12 = vrot.slane %v34_v4, %v24_v7  ;;  %v43_v13 = vrot.slane %v34_v4, %v28_v8 }
   0x8   :  { %v32_v14 = vmul.f32 %v25_v10, %v18_v5  ;;  %v33_v15 = vmul.f32 %v29_v11, %v19_v6 }
   0xa   :  { %v46_v18 = vadd.f32 %v39_v12, %v32_v14  ;;  %v47_v19 = vadd.f32 %v43_v13, %v33_v15 }
   0xc   :  { %v51_v20 = vadd.f32 %v49_v16, %v46_v18  ;;  %v52_v21 = vadd.f32 %v50_v17, %v47_v19 }
   0xe   :  { %v53_v22 = vmax.f32 %v51_v20, 0.0  ;;  %v54_v23 = vmax.f32 %v52_v21, 0.0 }
  0x10   :  { %v69_v24 = vpack.c.bf16 %v54_v23, %v53_v22 }
  0x12   :  { %63 = vst [vmem:[%s114_s4] sm:$0xff] %v69_v24 }

</bundles_post_ra>
